<compile_context>
chip_gen: v7x
topology: tpu7x:2x2x1
jax: 0.10.0
libtpu: 0.0.40
codegen_flags: <defaults>
</compile_context>

<pallas_src>
import functools
import math

import jax
import jax.numpy as jnp
from jax.experimental import pallas as pl
from jax.experimental.pallas import tpu as pltpu


# ---------------------------------------------------------------------------
# window partition helpers (bchw_to_bnc / bnc_to_bchw) — layout plumbing
# ---------------------------------------------------------------------------
def _bchw_to_bnc(x, window_size):
    b, c, h, w = x.shape
    wh, ww = window_size
    x = x.reshape(b, c, h // wh, wh, w // ww, ww)
    x = jnp.transpose(x, (0, 2, 4, 3, 5, 1))          # (B, gh, gw, wh, ww, C)
    return x.reshape(b * (h // wh) * (w // ww), wh * ww, c)


def _bnc_to_bchw(x, out_shape, window_size):
    b, c, h, w = out_shape
    wh, ww = window_size
    x = x.reshape(b, h // wh, w // ww, wh, ww, c)
    x = jnp.transpose(x, (0, 5, 1, 3, 2, 4))          # (B, C, gh, wh, gw, ww)
    return x.reshape(b, c, h, w)


# ---------------------------------------------------------------------------
# Pallas kernel: fused projections + multi-head cross attention per window block
# ---------------------------------------------------------------------------
def _wmha_kernel(x1_ref, x2_ref, wq_ref, bq_ref, wkv_ref, bkv_ref,
                 wo_ref, bo_ref, o_ref, *, num_heads):
    bt, n, c = x1_ref.shape
    d = wq_ref.shape[1]
    hd = d // num_heads
    in_dtype = x1_ref.dtype

    # Collapse windows into rows (free: last dim unchanged, n is 8-aligned here).
    x1 = x1_ref[...].reshape(bt * n, c)
    x2 = x2_ref[...].reshape(bt * n, c)

    # Fused q / kv projections: native-dtype MXU operands, f32 accumulation.
    # The 1/sqrt(hd) softmax scale is pre-folded into wq / bq wrapper-side.
    q = jnp.dot(x1, wq_ref[...], preferred_element_type=jnp.float32) + bq_ref[...]
    kv = jnp.dot(x2, wkv_ref[...], preferred_element_type=jnp.float32) + bkv_ref[...]

    q = q.astype(in_dtype).reshape(bt, n, d)
    k = kv[:, :d].astype(in_dtype).reshape(bt, n, d)   # torch .split(D, dim=-1)
    v = kv[:, d:].astype(in_dtype).reshape(bt, n, d)

    # Per-head attention.  Heads are contiguous hd-wide slices of the D axis
    # (torch view(B, N, H, hd).permute(0, 2, 1, 3)).  Statically unrolled loop;
    # each head only does the score/softmax/PV part — the output projection is
    # done once, after the loop, with K = D.
    head_outs = []
    for h in range(num_heads):
        lo = h * hd
        qh = q[:, :, lo:lo + hd]
        kh = k[:, :, lo:lo + hd]
        vh = v[:, :, lo:lo + hd]

        s = jnp.einsum('bnd,bmd->bnm', qh, kh,
                       preferred_element_type=jnp.float32)      # pre-scaled q
        s = s - jnp.max(s, axis=-1, keepdims=True)              # stable softmax
        p = jnp.exp(s)
        # EUP approximate reciprocal instead of a VALU divide.
        p = p * pl.reciprocal(jnp.sum(p, axis=-1, keepdims=True), approx=True)

        head_outs.append(jnp.einsum('bnm,bmd->bnd', p.astype(in_dtype), vh,
                                    preferred_element_type=jnp.float32))

    # Single K=D output projection (not num_heads tiny-K matmuls + adds).
    o_all = jnp.concatenate(head_outs, axis=-1)                  # (bt, n, D) f32
    o_all = o_all.reshape(bt * n, d).astype(in_dtype)
    y = jnp.dot(o_all, wo_ref[...], preferred_element_type=jnp.float32) + bo_ref[...]

    # TODO(synk): for C < 128 these stores are lane-masked; producing a
    # lane-dense (bt, n*C) output would need an in-kernel tiled reshape
    # (relayout), which is avoided here for lowering robustness.
    o_ref[...] = y.reshape(bt, n, c).astype(o_ref.dtype)


# ---------------------------------------------------------------------------
# wrapper
# ---------------------------------------------------------------------------
def _vmem_capacity_bytes():
    try:
        info = pltpu.get_tpu_info()
        cap = getattr(info, "vmem_capacity_bytes", None)
        if cap:
            return int(cap)
    except Exception:
        pass
    return 64 * 1024 * 1024            # conservative: v7x per-TensorCore VMEM


def _pick_block_windows(bw, n, c, itemsize, *, target_block_bytes, row_align,
                        min_steps):
    """Windows per grid step.

    Sized against `target_block_bytes` of input data per step, capped so there
    are at least `min_steps` grid steps, and rounded so bt*n (the MXU M dim)
    is a multiple of `row_align` when affordable.  bt does NOT have to divide
    bw — the caller pads the window axis instead.
    """
    per_window = max(1, n * c * itemsize)
    bt = max(1, target_block_bytes // per_window)
    if min_steps > 1:
        bt = min(bt, max(1, pl.cdiv(bw, min_steps)))
    bt = min(bt, max(1, bw))
    align_w = max(1, row_align // math.gcd(row_align, n))
    if bt >= align_w:
        bt = (bt // align_w) * align_w
    return int(bt)


def window_cross_mha_2d(x1, x2, params, *, num_heads, window_size):
    """x1, x2: (B, C, H, W). params use PyTorch Linear convention (out, in)."""
    assert x1.shape == x2.shape and x1.dtype == x2.dtype
    b, c, h, w = x1.shape
    wh, ww = window_size
    assert h % wh == 0 and w % ww == 0

    in_dtype = x1.dtype
    x1w = _bchw_to_bnc(x1, window_size)                # (BW, N, C)
    x2w = _bchw_to_bnc(x2, window_size)
    bw, n, _ = x1w.shape

    # Weights to (in, out) layout, kept in the input dtype; softmax scale folded
    # into Wq / bq (done in f32, then cast once).
    wq = jnp.transpose(params["q_proj_w"]).astype(jnp.float32)        # (C, D)
    bq = params["q_proj_b"].astype(jnp.float32)
    d = wq.shape[1]
    assert d % num_heads == 0
    scale = 1.0 / math.sqrt(d // num_heads)
    wq = (wq * scale).astype(in_dtype)
    bq = (bq * scale).astype(in_dtype).reshape(1, d)
    wkv = jnp.transpose(params["kv_proj_w"]).astype(in_dtype)         # (C, 2D)
    bkv = params["kv_proj_b"].astype(in_dtype).reshape(1, 2 * d)
    wo = jnp.transpose(params["head_proj_w"]).astype(in_dtype)        # (D, C)
    bo = params["head_proj_b"].astype(in_dtype).reshape(1, c)

    # ---- generation-aware block sizing -------------------------------------
    itemsize = jnp.dtype(in_dtype).itemsize
    vmem_cap = _vmem_capacity_bytes()
    two_cores = vmem_cap <= 80 * 1024 * 1024           # v7x: 64 MiB VMEM, 2 TCs
    target_block_bytes = (2 << 20) if two_cores else (4 << 20)
    bt = _pick_block_windows(bw, n, c, itemsize,
                             target_block_bytes=target_block_bytes,
                             row_align=256, min_steps=2)
    steps = pl.cdiv(bw, bt)
    if two_cores and steps > 1 and steps % 2 == 1:
        steps += 1                                      # equal work per TC
    bw_pad = steps * bt
    if bw_pad != bw:                                    # pad instead of shrinking bt
        pad = ((0, bw_pad - bw), (0, 0), (0, 0))
        x1w = jnp.pad(x1w, pad)
        x2w = jnp.pad(x2w, pad)

    # ---- VMEM budget: double-buffered I/O + weights + f32 temps, capped -----
    io_bytes = (2 + 2 + 2) * bt * n * c * itemsize                    # x1,x2,out
    weight_bytes = 2 * itemsize * (wq.size + bq.size + wkv.size + bkv.size
                                   + wo.size + bo.size)
    temp_bytes = 4 * bt * n * (7 * d + 2 * n + c)
    vmem_limit = int(min(max(2 * (io_bytes + weight_bytes + temp_bytes),
                             32 * 1024 * 1024),
                         int(vmem_cap * 0.9)))

    kernel = functools.partial(_wmha_kernel, num_heads=num_heads)

    out_w = pl.pallas_call(
        kernel,
        out_shape=jax.ShapeDtypeStruct((bw_pad, n, c), in_dtype),
        grid_spec=pltpu.PrefetchScalarGridSpec(
            num_scalar_prefetch=0,
            grid=(steps,),
            in_specs=[
                pl.BlockSpec((bt, n, c), lambda i: (i, 0, 0)),
                pl.BlockSpec((bt, n, c), lambda i: (i, 0, 0)),
                # Grid-invariant weights/biases (constant index_map -> no
                # re-DMA between consecutive steps).
                # TODO(synk): single-buffer these (pl.Buffered(1)) once
                # top-level pipeline_mode support is settled; saves a few MiB
                # at realistic C/D, mostly relevant under v7x's 64 MiB VMEM.
                pl.BlockSpec((c, d), lambda i: (0, 0)),
                pl.BlockSpec((1, d), lambda i: (0, 0)),
                pl.BlockSpec((c, 2 * d), lambda i: (0, 0)),
                pl.BlockSpec((1, 2 * d), lambda i: (0, 0)),
                pl.BlockSpec((d, c), lambda i: (0, 0)),
                pl.BlockSpec((1, c), lambda i: (0, 0)),
            ],
            out_specs=pl.BlockSpec((bt, n, c), lambda i: (i, 0, 0)),
        ),
        compiler_params=pltpu.CompilerParams(
            dimension_semantics=("parallel",),
            vmem_limit_bytes=vmem_limit,
        ),
    )(x1w, x2w, wq, bq, wkv, bkv, wo, bo)

    out_w = out_w[:bw]                                  # drop padded windows
    return _bnc_to_bchw(out_w, (b, c, h, w), window_size)


# ---------------------------------------------------------------------------
# pure-JAX reference
# ---------------------------------------------------------------------------
def _reference(x1, x2, params, *, num_heads, window_size):
    b, c, h, w = x1.shape
    x1w = _bchw_to_bnc(x1, window_size)
    x2w = _bchw_to_bnc(x2, window_size)

    wq = jnp.transpose(params["q_proj_w"])
    bq = params["q_proj_b"]
    wkv = jnp.transpose(params["kv_proj_w"])
    bkv = params["kv_proj_b"]
    wo = jnp.transpose(params["head_proj_w"])
    bo = params["head_proj_b"]
    d = wq.shape[1]
    hd = d // num_heads

    q = x1w @ wq + bq
    kv = x2w @ wkv + bkv
    k, v = kv[..., :d], kv[..., d:]

    bwn, n, _ = q.shape
    qh = q.reshape(bwn, n, num_heads, hd).transpose(0, 2, 1, 3)
    kh = k.reshape(bwn, n, num_heads, hd).transpose(0, 2, 1, 3)
    vh = v.reshape(bwn, n, num_heads, hd).transpose(0, 2, 1, 3)

    s = jnp.einsum("bhnd,bhmd->bhnm", qh, kh) * (1.0 / math.sqrt(hd))
    p = jax.nn.softmax(s, axis=-1)
    o = jnp.einsum("bhnm,bhmd->bhnd", p, vh)
    o = o.transpose(0, 2, 1, 3).reshape(bwn, n, d)
    y = o @ wo + bo
    return _bnc_to_bchw(y, (b, c, h, w), window_size)


if __name__ == "__main__":
    key = jax.random.PRNGKey(0)
    B, C, H, W = 2, 32, 16, 16
    num_heads = 4
    window_size = (4, 4)
    qkv_dim = C // num_heads            # module default
    D = qkv_dim * num_heads

    keys = jax.random.split(key, 8)
    x1 = jax.random.normal(keys[0], (B, C, H, W), dtype=jnp.float32)
    x2 = jax.random.normal(keys[1], (B, C, H, W), dtype=jnp.float32)
    params = {
        "q_proj_w": jax.random.normal(keys[2], (D, C), jnp.float32) * (1.0 / C) ** 0.5,
        "q_proj_b": jax.random.normal(keys[3], (D,), jnp.float32) * 0.02,
        "kv_proj_w": jax.random.normal(keys[4], (2 * D, C), jnp.float32) * (1.0 / C) ** 0.5,
        "kv_proj_b": jax.random.normal(keys[5], (2 * D,), jnp.float32) * 0.02,
        "head_proj_w": jax.random.normal(keys[6], (C, D), jnp.float32) * (1.0 / D) ** 0.5,
        "head_proj_b": jax.random.normal(keys[7], (C,), jnp.float32) * 0.02,
    }

    # f32 correctness check against the pure-JAX reference.
    out = window_cross_mha_2d(x1, x2, params,
                              num_heads=num_heads, window_size=window_size)
    out = jax.block_until_ready(out)
    ref = _reference(x1, x2, params, num_heads=num_heads, window_size=window_size)
    assert out.shape == (B, C, H, W)
    max_err = float(jnp.max(jnp.abs(out - ref)))
    assert bool(jnp.allclose(out, ref, atol=2e-2, rtol=2e-2)), max_err

    # bf16 smoke test (native-dtype MXU fast path).
    x1h = x1.astype(jnp.bfloat16)
    x2h = x2.astype(jnp.bfloat16)
    params_h = {k_: v_.astype(jnp.bfloat16) for k_, v_ in params.items()}
    out_h = window_cross_mha_2d(x1h, x2h, params_h,
                                num_heads=num_heads, window_size=window_size)
    out_h = jax.block_until_ready(out_h)
    assert out_h.shape == (B, C, H, W) and out_h.dtype == jnp.bfloat16
    out_h32 = out_h.astype(jnp.float32)
    assert bool(jnp.all(jnp.isfinite(out_h32)))
    assert float(jnp.max(jnp.abs(out_h32 - ref))) < 0.3

    print("KERNEL_OK")
</pallas_src>

<mosaic_0001>
module attributes {stable_mosaic.version = 11 : i64} {
  func.func @_wmha_kernel(%arg0: i32, %arg1: memref<16x16x32xf32, #tpu.memory_space<vmem>>, %arg2: memref<16x16x32xf32, #tpu.memory_space<vmem>>, %arg3: memref<32x32xf32, #tpu.memory_space<vmem>>, %arg4: memref<1x32xf32, #tpu.memory_space<vmem>>, %arg5: memref<32x64xf32, #tpu.memory_space<vmem>>, %arg6: memref<1x64xf32, #tpu.memory_space<vmem>>, %arg7: memref<32x32xf32, #tpu.memory_space<vmem>>, %arg8: memref<1x32xf32, #tpu.memory_space<vmem>>, %arg9: memref<16x16x32xf32, #tpu.memory_space<vmem>>) attributes {dimension_semantics = [#tpu.dimension_semantics<parallel>], iteration_bounds = array<i64: 2>, scalar_prefetch = 0 : i64, scratch_operands = 0 : i64, tpu.core_type = #tpu.core_type<tc>, window_params = [{transform_indices = @transform_0, window_bounds = array<i64: 16, 16, 32>}, {transform_indices = @transform_1, window_bounds = array<i64: 16, 16, 32>}, {pipeline_mode = #tpu.pipeline_mode<synchronous>, transform_indices = @transform_2, window_bounds = array<i64: 32, 32>}, {pipeline_mode = #tpu.pipeline_mode<synchronous>, transform_indices = @transform_3, window_bounds = array<i64: 1, 32>}, {pipeline_mode = #tpu.pipeline_mode<synchronous>, transform_indices = @transform_4, window_bounds = array<i64: 32, 64>}, {pipeline_mode = #tpu.pipeline_mode<synchronous>, transform_indices = @transform_5, window_bounds = array<i64: 1, 64>}, {pipeline_mode = #tpu.pipeline_mode<synchronous>, transform_indices = @transform_6, window_bounds = array<i64: 32, 32>}, {pipeline_mode = #tpu.pipeline_mode<synchronous>, transform_indices = @transform_7, window_bounds = array<i64: 1, 32>}, {transform_indices = @transform_8, window_bounds = array<i64: 16, 16, 32>}]} {
    %c0 = arith.constant 0 : index
    %c0_0 = arith.constant 0 : index
    %c0_1 = arith.constant 0 : index
    %0 = vector.load %arg1[%c0, %c0_0, %c0_1] : memref<16x16x32xf32, #tpu.memory_space<vmem>>, vector<16x16x32xf32>
    %1 = vector.shape_cast %0 : vector<16x16x32xf32> to vector<256x32xf32>
    %c0_2 = arith.constant 0 : index
    %c0_3 = arith.constant 0 : index
    %c0_4 = arith.constant 0 : index
    %2 = vector.load %arg2[%c0_2, %c0_3, %c0_4] : memref<16x16x32xf32, #tpu.memory_space<vmem>>, vector<16x16x32xf32>
    %3 = vector.shape_cast %2 : vector<16x16x32xf32> to vector<256x32xf32>
    %c0_5 = arith.constant 0 : index
    %c0_6 = arith.constant 0 : index
    %4 = vector.load %arg3[%c0_5, %c0_6] : memref<32x32xf32, #tpu.memory_space<vmem>>, vector<32x32xf32>
    %cst = arith.constant dense<0.000000e+00> : vector<256x32xf32>
    %5 = tpu.matmul %1, %4, %cst {dimension_numbers = #tpu.dot_dimension_numbers<[1], [0], [0], [1], [0, 0, 1, 1], [], []>} : vector<256x32xf32>, vector<32x32xf32>, vector<256x32xf32> -> vector<256x32xf32>
    %c0_7 = arith.constant 0 : index
    %c0_8 = arith.constant 0 : index
    %6 = vector.load %arg4[%c0_7, %c0_8] : memref<1x32xf32, #tpu.memory_space<vmem>>, vector<1x32xf32>
    %7 = vector.broadcast %6 : vector<1x32xf32> to vector<256x32xf32>
    %8 = arith.addf %5, %7 : vector<256x32xf32>
    %c0_9 = arith.constant 0 : index
    %c0_10 = arith.constant 0 : index
    %9 = vector.load %arg5[%c0_9, %c0_10] : memref<32x64xf32, #tpu.memory_space<vmem>>, vector<32x64xf32>
    %cst_11 = arith.constant dense<0.000000e+00> : vector<256x64xf32>
    %10 = tpu.matmul %3, %9, %cst_11 {dimension_numbers = #tpu.dot_dimension_numbers<[1], [0], [0], [1], [0, 0, 1, 1], [], []>} : vector<256x32xf32>, vector<32x64xf32>, vector<256x64xf32> -> vector<256x64xf32>
    %c0_12 = arith.constant 0 : index
    %c0_13 = arith.constant 0 : index
    %11 = vector.load %arg6[%c0_12, %c0_13] : memref<1x64xf32, #tpu.memory_space<vmem>>, vector<1x64xf32>
    %12 = vector.broadcast %11 : vector<1x64xf32> to vector<256x64xf32>
    %13 = arith.addf %10, %12 : vector<256x64xf32>
    %14 = vector.shape_cast %8 : vector<256x32xf32> to vector<16x16x32xf32>
    %15 = vector.extract_strided_slice %13 {offsets = [0, 0], sizes = [256, 32], strides = [1, 1]} : vector<256x64xf32> to vector<256x32xf32>
    %16 = vector.shape_cast %15 : vector<256x32xf32> to vector<16x16x32xf32>
    %17 = vector.extract_strided_slice %13 {offsets = [0, 32], sizes = [256, 32], strides = [1, 1]} : vector<256x64xf32> to vector<256x32xf32>
    %18 = vector.shape_cast %17 : vector<256x32xf32> to vector<16x16x32xf32>
    %19 = vector.extract_strided_slice %14 {offsets = [0, 0, 0], sizes = [16, 16, 8], strides = [1, 1, 1]} : vector<16x16x32xf32> to vector<16x16x8xf32>
    %20 = vector.extract_strided_slice %16 {offsets = [0, 0, 0], sizes = [16, 16, 8], strides = [1, 1, 1]} : vector<16x16x32xf32> to vector<16x16x8xf32>
    %21 = vector.extract_strided_slice %18 {offsets = [0, 0, 0], sizes = [16, 16, 8], strides = [1, 1, 1]} : vector<16x16x32xf32> to vector<16x16x8xf32>
    "tpu.trace_start"() <{level = 10 : i32, message = "bnd,bmd->bnm"}> : () -> ()
    %cst_14 = arith.constant dense<0.000000e+00> : vector<16x16x16xf32>
    %22 = tpu.matmul %19, %20, %cst_14 {dimension_numbers = #tpu.dot_dimension_numbers<[2], [2], [1], [1], [0, 0, 0, 1, 1, 1], [0], [0]>} : vector<16x16x8xf32>, vector<16x16x8xf32>, vector<16x16x16xf32> -> vector<16x16x16xf32>
    "tpu.trace_stop"() : () -> ()
    %cst_15 = arith.constant dense<0xFF800000> : vector<16x16xf32>
    %23 = vector.multi_reduction <maximumf>, %22, %cst_15 [2] : vector<16x16x16xf32> to vector<16x16xf32>
    %24 = vector.shape_cast %23 : vector<16x16xf32> to vector<16x16x1xf32>
    %25 = vector.broadcast %24 : vector<16x16x1xf32> to vector<16x16x16xf32>
    %26 = arith.subf %22, %25 : vector<16x16x16xf32>
    %27 = math.exp %26 : vector<16x16x16xf32>
    %cst_16 = arith.constant dense<0.000000e+00> : vector<16x16xf32>
    %28 = vector.multi_reduction <add>, %27, %cst_16 [2] : vector<16x16x16xf32> to vector<16x16xf32>
    %29 = vector.shape_cast %28 : vector<16x16xf32> to vector<16x16x1xf32>
    %30 = tpu.reciprocal %29 {approx = true} : vector<16x16x1xf32> -> vector<16x16x1xf32>
    %31 = vector.broadcast %30 : vector<16x16x1xf32> to vector<16x16x16xf32>
    %32 = arith.mulf %27, %31 : vector<16x16x16xf32>
    "tpu.trace_start"() <{level = 10 : i32, message = "bnm,bmd->bnd"}> : () -> ()
    %cst_17 = arith.constant dense<0.000000e+00> : vector<16x16x8xf32>
    %33 = tpu.matmul %32, %21, %cst_17 {dimension_numbers = #tpu.dot_dimension_numbers<[2], [1], [1], [2], [0, 0, 0, 1, 1, 2], [0], [0]>} : vector<16x16x16xf32>, vector<16x16x8xf32>, vector<16x16x8xf32> -> vector<16x16x8xf32>
    "tpu.trace_stop"() : () -> ()
    %34 = vector.extract_strided_slice %14 {offsets = [0, 0, 8], sizes = [16, 16, 8], strides = [1, 1, 1]} : vector<16x16x32xf32> to vector<16x16x8xf32>
    %35 = vector.extract_strided_slice %16 {offsets = [0, 0, 8], sizes = [16, 16, 8], strides = [1, 1, 1]} : vector<16x16x32xf32> to vector<16x16x8xf32>
    %36 = vector.extract_strided_slice %18 {offsets = [0, 0, 8], sizes = [16, 16, 8], strides = [1, 1, 1]} : vector<16x16x32xf32> to vector<16x16x8xf32>
    "tpu.trace_start"() <{level = 10 : i32, message = "bnd,bmd->bnm"}> : () -> ()
    %cst_18 = arith.constant dense<0.000000e+00> : vector<16x16x16xf32>
    %37 = tpu.matmul %34, %35, %cst_18 {dimension_numbers = #tpu.dot_dimension_numbers<[2], [2], [1], [1], [0, 0, 0, 1, 1, 1], [0], [0]>} : vector<16x16x8xf32>, vector<16x16x8xf32>, vector<16x16x16xf32> -> vector<16x16x16xf32>
    "tpu.trace_stop"() : () -> ()
    %cst_19 = arith.constant dense<0xFF800000> : vector<16x16xf32>
    %38 = vector.multi_reduction <maximumf>, %37, %cst_19 [2] : vector<16x16x16xf32> to vector<16x16xf32>
    %39 = vector.shape_cast %38 : vector<16x16xf32> to vector<16x16x1xf32>
    %40 = vector.broadcast %39 : vector<16x16x1xf32> to vector<16x16x16xf32>
    %41 = arith.subf %37, %40 : vector<16x16x16xf32>
    %42 = math.exp %41 : vector<16x16x16xf32>
    %cst_20 = arith.constant dense<0.000000e+00> : vector<16x16xf32>
    %43 = vector.multi_reduction <add>, %42, %cst_20 [2] : vector<16x16x16xf32> to vector<16x16xf32>
    %44 = vector.shape_cast %43 : vector<16x16xf32> to vector<16x16x1xf32>
    %45 = tpu.reciprocal %44 {approx = true} : vector<16x16x1xf32> -> vector<16x16x1xf32>
    %46 = vector.broadcast %45 : vector<16x16x1xf32> to vector<16x16x16xf32>
    %47 = arith.mulf %42, %46 : vector<16x16x16xf32>
    "tpu.trace_start"() <{level = 10 : i32, message = "bnm,bmd->bnd"}> : () -> ()
    %cst_21 = arith.constant dense<0.000000e+00> : vector<16x16x8xf32>
    %48 = tpu.matmul %47, %36, %cst_21 {dimension_numbers = #tpu.dot_dimension_numbers<[2], [1], [1], [2], [0, 0, 0, 1, 1, 2], [0], [0]>} : vector<16x16x16xf32>, vector<16x16x8xf32>, vector<16x16x8xf32> -> vector<16x16x8xf32>
    "tpu.trace_stop"() : () -> ()
    %49 = vector.extract_strided_slice %14 {offsets = [0, 0, 16], sizes = [16, 16, 8], strides = [1, 1, 1]} : vector<16x16x32xf32> to vector<16x16x8xf32>
    %50 = vector.extract_strided_slice %16 {offsets = [0, 0, 16], sizes = [16, 16, 8], strides = [1, 1, 1]} : vector<16x16x32xf32> to vector<16x16x8xf32>
    %51 = vector.extract_strided_slice %18 {offsets = [0, 0, 16], sizes = [16, 16, 8], strides = [1, 1, 1]} : vector<16x16x32xf32> to vector<16x16x8xf32>
    "tpu.trace_start"() <{level = 10 : i32, message = "bnd,bmd->bnm"}> : () -> ()
    %cst_22 = arith.constant dense<0.000000e+00> : vector<16x16x16xf32>
    %52 = tpu.matmul %49, %50, %cst_22 {dimension_numbers = #tpu.dot_dimension_numbers<[2], [2], [1], [1], [0, 0, 0, 1, 1, 1], [0], [0]>} : vector<16x16x8xf32>, vector<16x16x8xf32>, vector<16x16x16xf32> -> vector<16x16x16xf32>
    "tpu.trace_stop"() : () -> ()
    %cst_23 = arith.constant dense<0xFF800000> : vector<16x16xf32>
    %53 = vector.multi_reduction <maximumf>, %52, %cst_23 [2] : vector<16x16x16xf32> to vector<16x16xf32>
    %54 = vector.shape_cast %53 : vector<16x16xf32> to vector<16x16x1xf32>
    %55 = vector.broadcast %54 : vector<16x16x1xf32> to vector<16x16x16xf32>
    %56 = arith.subf %52, %55 : vector<16x16x16xf32>
    %57 = math.exp %56 : vector<16x16x16xf32>
    %cst_24 = arith.constant dense<0.000000e+00> : vector<16x16xf32>
    %58 = vector.multi_reduction <add>, %57, %cst_24 [2] : vector<16x16x16xf32> to vector<16x16xf32>
    %59 = vector.shape_cast %58 : vector<16x16xf32> to vector<16x16x1xf32>
    %60 = tpu.reciprocal %59 {approx = true} : vector<16x16x1xf32> -> vector<16x16x1xf32>
    %61 = vector.broadcast %60 : vector<16x16x1xf32> to vector<16x16x16xf32>
    %62 = arith.mulf %57, %61 : vector<16x16x16xf32>
    "tpu.trace_start"() <{level = 10 : i32, message = "bnm,bmd->bnd"}> : () -> ()
    %cst_25 = arith.constant dense<0.000000e+00> : vector<16x16x8xf32>
    %63 = tpu.matmul %62, %51, %cst_25 {dimension_numbers = #tpu.dot_dimension_numbers<[2], [1], [1], [2], [0, 0, 0, 1, 1, 2], [0], [0]>} : vector<16x16x16xf32>, vector<16x16x8xf32>, vector<16x16x8xf32> -> vector<16x16x8xf32>
    "tpu.trace_stop"() : () -> ()
    %64 = vector.extract_strided_slice %14 {offsets = [0, 0, 24], sizes = [16, 16, 8], strides = [1, 1, 1]} : vector<16x16x32xf32> to vector<16x16x8xf32>
    %65 = vector.extract_strided_slice %16 {offsets = [0, 0, 24], sizes = [16, 16, 8], strides = [1, 1, 1]} : vector<16x16x32xf32> to vector<16x16x8xf32>
    %66 = vector.extract_strided_slice %18 {offsets = [0, 0, 24], sizes = [16, 16, 8], strides = [1, 1, 1]} : vector<16x16x32xf32> to vector<16x16x8xf32>
    "tpu.trace_start"() <{level = 10 : i32, message = "bnd,bmd->bnm"}> : () -> ()
    %cst_26 = arith.constant dense<0.000000e+00> : vector<16x16x16xf32>
    %67 = tpu.matmul %64, %65, %cst_26 {dimension_numbers = #tpu.dot_dimension_numbers<[2], [2], [1], [1], [0, 0, 0, 1, 1, 1], [0], [0]>} : vector<16x16x8xf32>, vector<16x16x8xf32>, vector<16x16x16xf32> -> vector<16x16x16xf32>
    "tpu.trace_stop"() : () -> ()
    %cst_27 = arith.constant dense<0xFF800000> : vector<16x16xf32>
    %68 = vector.multi_reduction <maximumf>, %67, %cst_27 [2] : vector<16x16x16xf32> to vector<16x16xf32>
    %69 = vector.shape_cast %68 : vector<16x16xf32> to vector<16x16x1xf32>
    %70 = vector.broadcast %69 : vector<16x16x1xf32> to vector<16x16x16xf32>
    %71 = arith.subf %67, %70 : vector<16x16x16xf32>
    %72 = math.exp %71 : vector<16x16x16xf32>
    %cst_28 = arith.constant dense<0.000000e+00> : vector<16x16xf32>
    %73 = vector.multi_reduction <add>, %72, %cst_28 [2] : vector<16x16x16xf32> to vector<16x16xf32>
    %74 = vector.shape_cast %73 : vector<16x16xf32> to vector<16x16x1xf32>
    %75 = tpu.reciprocal %74 {approx = true} : vector<16x16x1xf32> -> vector<16x16x1xf32>
    %76 = vector.broadcast %75 : vector<16x16x1xf32> to vector<16x16x16xf32>
    %77 = arith.mulf %72, %76 : vector<16x16x16xf32>
    "tpu.trace_start"() <{level = 10 : i32, message = "bnm,bmd->bnd"}> : () -> ()
    %cst_29 = arith.constant dense<0.000000e+00> : vector<16x16x8xf32>
    %78 = tpu.matmul %77, %66, %cst_29 {dimension_numbers = #tpu.dot_dimension_numbers<[2], [1], [1], [2], [0, 0, 0, 1, 1, 2], [0], [0]>} : vector<16x16x16xf32>, vector<16x16x8xf32>, vector<16x16x8xf32> -> vector<16x16x8xf32>
    "tpu.trace_stop"() : () -> ()
    %79 = tpu.concatenate %33, %48, %63, %78 in 2 : vector<16x16x8xf32>, vector<16x16x8xf32>, vector<16x16x8xf32>, vector<16x16x8xf32> -> vector<16x16x32xf32>
    %80 = vector.shape_cast %79 : vector<16x16x32xf32> to vector<256x32xf32>
    %c0_30 = arith.constant 0 : index
    %c0_31 = arith.constant 0 : index
    %81 = vector.load %arg7[%c0_30, %c0_31] : memref<32x32xf32, #tpu.memory_space<vmem>>, vector<32x32xf32>
    %cst_32 = arith.constant dense<0.000000e+00> : vector<256x32xf32>
    %82 = tpu.matmul %80, %81, %cst_32 {dimension_numbers = #tpu.dot_dimension_numbers<[1], [0], [0], [1], [0, 0, 1, 1], [], []>} : vector<256x32xf32>, vector<32x32xf32>, vector<256x32xf32> -> vector<256x32xf32>
    %c0_33 = arith.constant 0 : index
    %c0_34 = arith.constant 0 : index
    %83 = vector.load %arg8[%c0_33, %c0_34] : memref<1x32xf32, #tpu.memory_space<vmem>>, vector<1x32xf32>
    %84 = vector.broadcast %83 : vector<1x32xf32> to vector<256x32xf32>
    %85 = arith.addf %82, %84 : vector<256x32xf32>
    %86 = vector.shape_cast %85 : vector<256x32xf32> to vector<16x16x32xf32>
    %c0_35 = arith.constant 0 : index
    %c0_36 = arith.constant 0 : index
    %c0_37 = arith.constant 0 : index
    %87 = vector.load %arg9[%c0_35, %c0_36, %c0_37] : memref<16x16x32xf32, #tpu.memory_space<vmem>>, vector<16x16x32xf32>
    tpu.vector_store %arg9[%c0_35, %c0_36, %c0_37], %86 {strides = array<i32>} : memref<16x16x32xf32, #tpu.memory_space<vmem>>, vector<16x16x32xf32>,
    return
  }
  func.func @transform_0(%arg0: i32) -> (i32, i32, i32) {
    %c0_i32 = arith.constant 0 : i32
    %c0_i32_0 = arith.constant 0 : i32
    %c0_i32_1 = arith.constant 0 : i32
    return %arg0, %c0_i32, %c0_i32_0 : i32, i32, i32
  }
  func.func @transform_1(%arg0: i32) -> (i32, i32, i32) {
    %c0_i32 = arith.constant 0 : i32
    %c0_i32_0 = arith.constant 0 : i32
    %c0_i32_1 = arith.constant 0 : i32
    return %arg0, %c0_i32, %c0_i32_0 : i32, i32, i32
  }
  func.func @transform_2(%arg0: i32) -> (i32, i32) {
    %c0_i32 = arith.constant 0 : i32
    %c0_i32_0 = arith.constant 0 : i32
    %c0_i32_1 = arith.constant 0 : i32
    return %c0_i32, %c0_i32_0 : i32, i32
  }
  func.func @transform_3(%arg0: i32) -> (i32, i32) {
    %c0_i32 = arith.constant 0 : i32
    %c0_i32_0 = arith.constant 0 : i32
    %c0_i32_1 = arith.constant 0 : i32
    return %c0_i32, %c0_i32_0 : i32, i32
  }
  func.func @transform_4(%arg0: i32) -> (i32, i32) {
    %c0_i32 = arith.constant 0 : i32
    %c0_i32_0 = arith.constant 0 : i32
    %c0_i32_1 = arith.constant 0 : i32
    return %c0_i32, %c0_i32_0 : i32, i32
  }
  func.func @transform_5(%arg0: i32) -> (i32, i32) {
    %c0_i32 = arith.constant 0 : i32
    %c0_i32_0 = arith.constant 0 : i32
    %c0_i32_1 = arith.constant 0 : i32
    return %c0_i32, %c0_i32_0 : i32, i32
  }
  func.func @transform_6(%arg0: i32) -> (i32, i32) {
    %c0_i32 = arith.constant 0 : i32
    %c0_i32_0 = arith.constant 0 : i32
    %c0_i32_1 = arith.constant 0 : i32
    return %c0_i32, %c0_i32_0 : i32, i32
  }
  func.func @transform_7(%arg0: i32) -> (i32, i32) {
    %c0_i32 = arith.constant 0 : i32
    %c0_i32_0 = arith.constant 0 : i32
    %c0_i32_1 = arith.constant 0 : i32
    return %c0_i32, %c0_i32_0 : i32, i32
  }
  func.func @transform_8(%arg0: i32) -> (i32, i32, i32) {
    %c0_i32 = arith.constant 0 : i32
    %c0_i32_0 = arith.constant 0 : i32
    %c0_i32_1 = arith.constant 0 : i32
    return %arg0, %c0_i32, %c0_i32_0 : i32, i32, i32
  }
}

</mosaic_0001>

<bundles_post_ra>
// kernel: tpu_custom_call.1
= control target key start
LH: loop header
LB: loop body
LE: loop exit
PB: predicated region body
PF: predicated region fallthrough
CT: control target
= control target key end

     0   :  { %s23253_s0 = inlined_call_operand.hbm [shape: f32[32,16,32], index: 0, kind: input, shape index: {}]   ;;  %s23254_s1 = inlined_call_operand.hbm [shape: f32[32,16,32], index: 1, kind: input, shape index: {}]   ;;  %s23255_s2 = inlined_call_operand.hbm [shape: f32[32,32], index: 2, kind: input, shape index: {}]   ;;  %s23256_s3 = inlined_call_operand.vmem [shape: f32[1,32], index: 3, kind: input, shape index: {}]   ;;  %s23257_s4 = inlined_call_operand.hbm [shape: f32[32,64], index: 4, kind: input, shape index: {}]   ;;  %s23258_s5 = inlined_call_operand.vmem [shape: f32[1,64], index: 5, kind: input, shape index: {}]   ;;  %s23259_s6 = inlined_call_operand.hbm [shape: f32[32,32], index: 6, kind: input, shape index: {}]   ;;  %s23260_s7 = inlined_call_operand.vmem [shape: f32[1,32], index: 7, kind: input, shape index: {}]   ;;  %s23261_s8 = inlined_call_operand.hbm [shape: f32[32,16,32], index: 8, kind: output, shape index: {}]  }
   0x1   :  { %23433 = sst [smem:[#allocation134_spill]] %s23253_s0 }
   0x2   :  { %23434 = sst [smem:[#allocation135_spill]] %s23255_s2 }
   0x3   :  { %23435 = sst [smem:[#allocation136_spill]] %s23257_s4 }
   0x4   :  { %23436 = sst [smem:[#allocation137_spill]] %s23259_s6 }
   0x5   :  { %13 = vsyncpa [#allocation3], 0 }
   0x6   :  { %15 = vsyncpa [#allocation3 + $0x1], 0 }
   0x7   :  { %16 = vsyncpa [#allocation6], 0 }
   0x8   :  { %18 = vsyncpa [#allocation6 + $0x1], 0 }
   0x9   :  { %19 = vsyncpa [#allocation9], 0 }
   0xa   :  { %20 = vsyncpa [#allocation4], 0 }
   0xb   :  { %22 = vsyncpa [#allocation4 + $0x1], 0  ;;  %s19186_s27 = smov 0   ;;  %s19188_s28 = smov 0  }
   0xc   :  { %s19190_s29 = smov 0   ;;  %s19192_s30 = smov 0  }
   0xd LB: > { %23437 = sst [smem:[#allocation17_spill]] %s19108_s27  ;;  %s19207_s9 = sadd.s32 4294967295, %s19120_s30   ;;  %s19120_s30 = sphi %s19192_s30, %s23937_s30   ;;  %s19116_s29 = sphi %s19190_s29, %s23936_s29   ;;  %s19112_s28 = sphi %s19188_s28, %s23935_s28   ;;  %s19108_s27 = sphi %s19186_s27, %s23934_s27  }
   0xe   : > { %s14863_s10 = sadd.s32 4294967294, %s19120_s30   ;;  %p48_p0 = scmp.ne.s32.totalorder %s19112_s28, %s19108_s27 }
   0xf   : > { %p23262_p1 = scmp.eq.s32.totalorder %s19207_s9, 0  ;;  %p230_p3 = scmp.eq.s32.totalorder %s14863_s10, 1 }
  0x10   : > { %p14864_p5 = scmp.ge.s32.totalorder %s19120_s30, 1  ;;  %p237_p7 = scmp.lt.s32.totalorder %s19120_s30, 3 }
  0x11   : > { %p19216_p4 = por %p23262_p1, %p48_p0  ;;  %p19221_p6 = por %p230_p3, %p48_p0 }
  0x12   : > { %p19226_p8 = pnand %p14864_p5, %p237_p7  ;;  %s19122_s14 = smov [#allocation7]  }
  0x13   : > { %s23438_s11 = scalar_select %p19216_p4, 1, 0 }
  0x14   : > { %s23439_s12 = scalar_select %p19221_p6, 1, 0 }
  0x15   : > { %s23441_s13 = scalar_select %p19226_p8, 1, 0 }
  0x16   : > { %23440 = sst [smem:[#allocation18_spill]] %s23439_s12  ;;  %s249_s15 = sshll.u32 %s19122_s14, 4  ;;  %s19230_s15 = int_to_ptr.vmem [resolvable:$true] %s249_s15 }
  0x17   : > { %p17749_p9 = pneg %p19226_p8  ;;  %s19123_s17 = smov [#allocation8]  }
  0x18   : > { %s265_s18 = sshll.u32 %s19123_s17, 4  ;;  %s19124_s19 = smov [#allocation10]   ;;  %s19241_s18 = int_to_ptr.vmem [resolvable:$true] %s265_s18 }
  0x19   : > { %p19237_p11 = pnand %p17749_p9, %p23262_p1  ;;  %s19243_s20 = sshll.u32 %s19124_s19, 4  ;;  %s282_s20 = int_to_ptr.vmem [resolvable:$true] %s19243_s20 }
  0x1a   : > { %s23443_s2 = sld [smem:[#allocation135_spill]] }
  0x1b   : > { %p19253_p13 = pneg %p19237_p11 }
  0x20   : > { %s18898_s23 = scalar_lea.hbm %s23443_s2, 512 }
  0x21   : > { %p18899_p12 = scmp.ne.s32.totalorder %s23443_s2, %s18898_s23  ;;  %p18905_p5 = scmp.lt.u32.totalorder %s18898_s23, %s23443_s2 }
  0x23   : > { %p18901_p0 = pnand %p19253_p13, %p18899_p12 }
  0x25   : > { %p18902_p3 = pneg %p18901_p0 }
  0x27   : > { %p18907_p7 = pnand %p18905_p5, %p18902_p3 }
  0x29   : > { %18910 = shalt.err (!%p18907_p7)
}
  0x2a   : > { %s18911_s17 = scalar_lea.vmem %s19230_s15, 512  ;;  %p18919_p2 = scmp.lt.s32.totalorder %s19230_s15, %s19230_s15 }
  0x2b   : > { %p18912_p9 = scmp.ne.s32.totalorder %s19230_s15, %s18911_s17  ;;  %p18920_p6 = scmp.lt.s32.totalorder %s18911_s17, %s18911_s17 }
  0x2d   : > { %p18914_p10 = pnand %p18912_p9, %p19253_p13  ;;  %p18921_p12 = por %p18920_p6, %p18919_p2 }
  0x2f   : > { %p18915_p1 = pneg %p18914_p10 }
  0x31   : > { %p18922_p0 = pnand %p18921_p12, %p18915_p1 }
  0x33   : > { %18925 = shalt.err (!%p18922_p0)
}
  0x34   : > { %s23267_s19 = smov 128   ;;  %s23269_s21 = smov 8  }
  0x35   : > { %17752 = dma.hbm_to_vmem [thread:$0]  (!%p19237_p11), %s23443_s2, 512, %s19230_s15, [#allocation6], %s23267_s19, %s23267_s19, %s23269_s21  }
  0x36   : > { %s23445_s4 = sld [smem:[#allocation136_spill]] }
  0x3c   : > { %s18926_s10 = scalar_lea.hbm %s23445_s4, 512 }
  0x3d   : > { %p18927_p1 = scmp.ne.s32.totalorder %s23445_s4, %s18926_s10  ;;  %p18933_p10 = scmp.lt.u32.totalorder %s18926_s10, %s23445_s4 }
  0x3f   : > { %p18929_p2 = pnand %p18927_p1, %p19253_p13 }
  0x41   : > { %p18930_p6 = pneg %p18929_p2 }
  0x43   : > { %p18935_p3 = pnand %p18933_p10, %p18930_p6 }
  0x45   : > { %18938 = shalt.err (!%p18935_p3)
}
  0x46   : > { %s18939_s15 = scalar_lea.vmem %s19241_s18, 512  ;;  %p18947_p12 = scmp.lt.s32.totalorder %s19241_s18, %s19241_s18 }
  0x47   : > { %p18940_p5 = scmp.ne.s32.totalorder %s19241_s18, %s18939_s15  ;;  %p18948_p0 = scmp.lt.s32.totalorder %s18939_s15, %s18939_s15 }
  0x49   : > { %p18942_p7 = pnand %p18940_p5, %p19253_p13  ;;  %p18949_p1 = por %p18948_p0, %p18947_p12 }
  0x4b   : > { %p18943_p9 = pneg %p18942_p7 }
  0x4d   : > { %p18950_p2 = pnand %p18949_p1, %p18943_p9 }
  0x4f   : > { %18953 = shalt.err (!%p18950_p2)
}
  0x50   : > { %17755 = dma.hbm_to_vmem [thread:$0]  (!%p19237_p11), %s23445_s4, 512, %s19241_s18, [#allocation9], %s23267_s19, %s23267_s19, %s23269_s21  }
  0x51   : > { %s23446_s6 = sld [smem:[#allocation137_spill]] }
  0x57   : > { %s18954_s24 = scalar_lea.hbm %s23446_s6, 512 }
  0x58   : > { %p18955_p6 = scmp.ne.s32.totalorder %s23446_s6, %s18954_s24  ;;  %p18961_p5 = scmp.lt.u32.totalorder %s18954_s24, %s23446_s6 }
  0x5a   : > { %p18957_p10 = pnand %p18955_p6, %p19253_p13 }
  0x5c   : > { %p18958_p3 = pneg %p18957_p10 }
  0x5e   : > { %p18963_p7 = pnand %p18961_p5, %p18958_p3 }
  0x60   : > { %18966 = shalt.err (!%p18963_p7)
}
  0x61   : > { %s18967_s15 = scalar_lea.vmem %s282_s20, 512  ;;  %p18975_p1 = scmp.lt.s32.totalorder %s282_s20, %s282_s20 }
  0x62   : > { %p18968_p9 = scmp.ne.s32.totalorder %s282_s20, %s18967_s15  ;;  %p18976_p2 = scmp.lt.s32.totalorder %s18967_s15, %s18967_s15 }
  0x64   : > { %p18970_p12 = pnand %p18968_p9, %p19253_p13  ;;  %p18977_p4 = por %p18976_p2, %p18975_p1 }
  0x66   : > { %p18971_p0 = pneg %p18970_p12 }
  0x68   : > { %p18978_p8 = pnand %p18977_p4, %p18971_p0 }
  0x6a   : > { %18981 = shalt.err (!%p18978_p8)
}
  0x6b   : > { %17758 = dma.hbm_to_vmem [thread:$0]  (!%p19237_p11), %s23446_s6, 512, %s282_s20, [#allocation9], %s23267_s19, %s23267_s19, %s23269_s21  }
  0x6c   : > { %s19326_s26 = sadd.s32 1, %s19120_s30   ;;  %s35_s12 = sadd.s32 1, %s19116_s29 }
  0x6d   : > { %s32_s16 = ssub.s32 %s19120_s30, %s19326_s26  ;;  %p42_p8 = scmp.ne.s32.totalorder %s19116_s29, %s19112_s28 }
  0x6e   : > { %p33_p4 = scmp.eq.s32.totalorder %s32_s16, 0  ;;  %p43_p13 = scmp.eq.s32.totalorder %s19120_s30, 0 }
  0x6f   : > { %p17773_p6 = scmp.lt.s32.totalorder %s19120_s30, 2  ;;  %p23448_p3 = scmp.eq.s32.totalorder %s19207_s9, 1 }
  0x70   : > { %s19336_s22 = scalar_select %p33_p4, %s19116_s29, %s35_s12  }
  0x71   : > { %p44_p10 = por %p43_p13, %p42_p8  ;;  %p19340_p5 = por %p23448_p3, %p42_p8 }
  0x72   : > { %23447 = sst [smem:[#allocation19_spill]] %s19336_s22  ;;  %s298_s24 = sand.u32 1, %s19116_s29  }
  0x73   : > { %s15374_s25 = sshll.u32 %s19120_s30, 12  ;;  %s19346_s20 = sshll.u32 %s298_s24, 8 }
  0x74   : > { %s23450_s0 = sld [smem:[#allocation134_spill]]  ;;  %s302_s15 = scalar_lea.vmem [#allocation2], %s19346_s20 }
  0x75   : > { %s310_s18 = sshll.u32 %s302_s15, 4  ;;  %p19354_p11 = pnand %p17773_p6, %p44_p10  ;;  %s19358_s18 = int_to_ptr.vmem [resolvable:$true] %s310_s18 }
  0x76   : > { %s19363_s10 = scalar_lea.hbm %s23254_s1, %s15374_s25  ;;  %s19365_s14 = scalar_lea.sflag [#allocation3], %s298_s24 }
  0x77   : > { %p18984_p9 = pneg %p19354_p11 }
  0x7a   : > { %s19351_s17 = scalar_lea.hbm %s23450_s0, %s15374_s25  ;;  %s18987_s2 = scalar_lea.hbm %s23450_s0, 8192 }
  0x7b   : > { %s18982_s19 = scalar_lea.hbm %s19351_s17, 4096  ;;  %p18988_p1 = scmp.lt.u32.totalorder %s19351_s17, %s23450_s0 }
  0x7c   : > { %p18983_p7 = scmp.ne.s32.totalorder %s19351_s17, %s18982_s19  ;;  %p18989_p2 = scmp.lt.u32.totalorder %s18987_s2, %s18982_s19 }
  0x7d   : > { %p18991_p8 = scmp.lt.u32.totalorder %s18982_s19, %s19351_s17 }
  0x7e   : > { %p18985_p12 = pnand %p18984_p9, %p18983_p7  ;;  %p18990_p4 = por %p18989_p2, %p18988_p1 }
  0x80   : > { %p18986_p0 = pneg %p18985_p12  ;;  %p18992_p13 = por %p18991_p8, %p18990_p4 }
  0x82   : > { %p18993_p6 = pnand %p18992_p13, %p18986_p0 }
  0x84   : > { %18996 = shalt.err (!%p18993_p6)
}
  0x85   : > { %s18997_s24 = scalar_lea.vmem %s19358_s18, 4096  ;;  %s19127_s21 = smov [#allocation2]  }
  0x86   : > { %p18998_p10 = scmp.ne.s32.totalorder %s19358_s18, %s18997_s24  ;;  %s19002_s25 = sshll.u32 %s19127_s21, 4  ;;  %s19003_s25 = int_to_ptr.vmem [resolvable:$false] %s19002_s25 }
  0x87   : > { %s19004_s4 = scalar_lea.vmem %s19003_s25, 8192  ;;  %p19005_p12 = scmp.lt.s32.totalorder %s19358_s18, %s19003_s25 }
  0x88   : > { %p19000_p3 = pnand %p18998_p10, %p18984_p9  ;;  %p19006_p1 = scmp.lt.s32.totalorder %s19004_s4, %s18997_s24 }
  0x8a   : > { %p19001_p7 = pneg %p19000_p3  ;;  %p19007_p2 = por %p19006_p1, %p19005_p12 }
  0x8c   : > { %p19008_p4 = pnand %p19007_p2, %p19001_p7 }
  0x8e   : > { %19011 = shalt.err (!%p19008_p4)
}
  0x8f   : > { %s23452_s2 = smov 8   ;;  %s23453_s6 = smov 128  }
  0x90   : > { %17762 = dma.hbm_to_vmem [thread:$0]  (!%p19354_p11), %s19351_s17, 4096, %s19358_s18, %s19365_s14, %s23453_s6, %s23453_s6, %s23452_s2  }
  0x91   : > { %s324_s19 = scalar_lea.vmem [#allocation5], %s19346_s20  ;;  %s320_s12 = sand.u32 1, %s19120_s30  }
  0x92   : > { %s332_s16 = sshll.u32 %s324_s19, 4  ;;  %s19400_s15 = scalar_lea.sflag [#allocation6], %s320_s12  ;;  %s19398_s16 = int_to_ptr.vmem [resolvable:$true] %s332_s16 }
  0x93   : > { %s19012_s24 = scalar_lea.hbm %s19363_s10, 4096  ;;  %s19017_s4 = scalar_lea.hbm %s23254_s1, 8192 }
  0x94   : > { %p19013_p0 = scmp.ne.s32.totalorder %s19363_s10, %s19012_s24  ;;  %p19018_p6 = scmp.lt.u32.totalorder %s19363_s10, %s23254_s1 }
  0x95   : > { %p19019_p10 = scmp.lt.u32.totalorder %s19017_s4, %s19012_s24  ;;  %p19021_p7 = scmp.lt.u32.totalorder %s19012_s24, %s19363_s10 }
  0x96   : > { %p19015_p8 = pnand %p19013_p0, %p18984_p9 }
  0x97   : > { %p19020_p3 = por %p19019_p10, %p19018_p6 }
  0x98   : > { %p19016_p13 = pneg %p19015_p8 }
  0x99   : > { %p19022_p12 = por %p19021_p7, %p19020_p3 }
  0x9b   : > { %p19023_p1 = pnand %p19022_p12, %p19016_p13 }
  0x9d   : > { %19026 = shalt.err (!%p19023_p1)
}
  0x9e   : > { %s19027_s20 = scalar_lea.vmem %s19398_s16, 4096  ;;  %s19128_s17 = smov [#allocation5]  }
  0x9f   : > { %p19028_p2 = scmp.ne.s32.totalorder %s19398_s16, %s19027_s20  ;;  %s19032_s18 = sshll.u32 %s19128_s17, 4  ;;  %s19033_s18 = int_to_ptr.vmem [resolvable:$false] %s19032_s18 }
  0xa0   : > { %s19034_s0 = scalar_lea.vmem %s19033_s18, 8192  ;;  %p19035_p8 = scmp.lt.s32.totalorder %s19398_s16, %s19033_s18 }
  0xa1   : > { %p19030_p4 = pnand %p19028_p2, %p18984_p9  ;;  %p19036_p6 = scmp.lt.s32.totalorder %s19034_s0, %s19027_s20 }
  0xa3   : > { %p19031_p0 = pneg %p19030_p4  ;;  %p19037_p10 = por %p19036_p6, %p19035_p8 }
  0xa5   : > { %p19038_p3 = pnand %p19037_p10, %p19031_p0 }
  0xa7   : > { %19041 = shalt.err (!%p19038_p3)
}
  0xa8   : > { %17765 = dma.hbm_to_vmem [thread:$0]  (!%p19354_p11), %s19363_s10, 4096, %s19398_s16, %s19400_s15, %s23453_s6, %s23453_s6, %s23452_s2  }
  0xa9   : > { %p23454_p9 = scmp.ne.s32.totalorder %s23441_s13, 0 }
  0xab   : > { %344 = sbr.rel (%p23454_p9) target bundleno = 3503 (0xdaf), region = 52 }
  0xb2   : > { %s19432_s22 = sand.u32 1, %s19112_s28   ;;  %p23455_p13 = scmp.ne.s32.totalorder %s23438_s11, 0 }
  0xb3   : > { %s19435_s14 = sshll.u32 %s19432_s22, 8  ;;  %s347_s27 = scalar_lea.sflag [#allocation3], %s19432_s22 }
  0xb4   : > { %s19439_s19 = scalar_lea.vmem [#allocation2], %s19435_s14 }
  0xb5   : > { %19087 = dma.done.wait (%p23455_p13), %s347_s27, 4096  }
  0xb6   : > { %19089 = vsyncadd (%p23455_p13), %s347_s27, 4294963200  ;;  %s355_s13 = sand.u32 1, %s19207_s9   ;;  %s19447_s2 = scalar_lea.vmem [#allocation5], %s19435_s14 }
  0xb7   : > { %s356_s10 = scalar_lea.sflag [#allocation6], %s355_s13 }
  0xb8   : > { %19091 = dma.done.wait (%p23455_p13), %s356_s10, 4096  }
  0xb9   : > { %19093 = vsyncadd (%p23455_p13), %s356_s10, 4294963200  ;;  %p23456_p11 = scmp.eq.s32.totalorder %s19207_s9, 0 }
  0xbb   : > { %19095 = dma.done.wait (%p23456_p11), [#allocation6], 512   ;;  %p23457_p7 = pmov %p23456_p11 }
  0xbd   : > { %19097 = vsyncadd (%p23457_p7), [#allocation6], 4294966784  ;;  %p23458_p12 = pmov %p23457_p7 }
  0xbe   : > { %p23459_p1 = pmov %p23457_p7 }
  0xbf   : > { %19099 = dma.done.wait (%p23458_p12), [#allocation9], 1024  }
  0xc0   : > { %19101 = vsyncadd (%p23459_p1), [#allocation9], 4294966272  ;;  %vm487_vm0 = vcmask 261120   ;;  %v476_v0 = vld [vmem:[#allocation7] sm:$0xff]  ;;  %v477_v1 = vld [vmem:[#allocation7 + $0x8] sm:$0xff]  ;;  %s19129_s16 = smov 120  }
  0xc1   : > { %v478_v2 = vld [vmem:[#allocation7 + $0x10] sm:$0xff]  ;;  %v17063_v3 = vpack.c.bf16 %v477_v1, %v476_v0  ;;  %v479_v4 = vld [vmem:[#allocation7 + $0x18] sm:$0xff]  ;;  %v428_v5 = vld [vmem:[%s19439_s19 + $0x80] sm:$0xff]  ;;  %vm1141_vm1 = vcmask 64512   ;;  %s19130_s24 = smov 96   ;;  %vm2534_vm3 = vcmask 130048  }
  0xc2   : > { %v17067_v6 = vpack.c.bf16 %v479_v4, %v478_v2  ;;  %16031 = vmatprep.mubr.msk.f32.mxu1 %vm487_vm0, %v428_v5  ;;  %v412_v7 = vld [vmem:[%s19439_s19] sm:$0xff]  ;;  %v810_v9 = vld [vmem:[#allocation8 + $0x8] sm:$0xff]  ;;  %v430_v11 = vld [vmem:[%s19439_s19 + $0x90] sm:$0xff]  ;;  %s19131_s21 = smov 88   ;;  %s19132_s25 = smov 112   ;;  %vm14327_vm4 = vcmask 195584  }
  0xc3   : > { %17727 = vmatprep.subr.bf16.mxu1 %v17063_v3  ;;  %17064 = vmatprep.subr.bf16.mxu0 %v17063_v3  ;;  %v809_v8 = vld [vmem:[#allocation8] sm:$0xff]  ;;  %v429_v10 = vld [vmem:[%s19439_s19 + $0x88] sm:$0xff]  ;;  %v414_v14 = vld [vmem:[%s19439_s19 + $0x10] sm:$0xff]  ;;  %s19133_s4 = smov 80   ;;  %s19134_s20 = smov 104  }
  0xc4   : > { %17729 = vmatpush3.bf16.msra.mxu1 %v17063_v3  ;;  %17066 = vmatpush3.bf16.msra.mxu0 %v17063_v3  ;;  %v413_v12 = vld [vmem:[%s19439_s19 + $0x8] sm:$0xff]  ;;  %v17071_v13 = vpack.c.bf16 %v810_v9, %v809_v8  ;;  %v811_v15 = vld [vmem:[#allocation8 + $0x10] sm:$0xff]  ;;  %v812_v16 = vld [vmem:[#allocation8 + $0x18] sm:$0xff]  ;;  %s19135_s17 = smov 72   ;;  %s19136_s18 = smov 8  }
  0xc5   : > { %17728 = vmatprep.subr.bf16.mxu1 %v17067_v6  ;;  %17068 = vmatprep.subr.bf16.mxu0 %v17067_v6  ;;  %v17075_v17 = vpack.c.bf16 %v812_v16, %v811_v15  ;;  %v431_v18 = vld [vmem:[%s19439_s19 + $0x98] sm:$0xff]  ;;  %v432_v20 = vld [vmem:[%s19439_s19 + $0xa0] sm:$0xff]  ;;  %v433_v22 = vld [vmem:[%s19439_s19 + $0xa8] sm:$0xff]  ;;  %s19137_s0 = smov 16   ;;  %s19138_s27 = smov 24  }
  0xc6   : > { %16007 = vmatprep.mubr.msk.f32.mxu0 %vm487_vm0, %v412_v7  ;;  %v415_v19 = vld [vmem:[%s19439_s19 + $0x18] sm:$0xff]  ;;  %v416_v21 = vld [vmem:[%s19439_s19 + $0x20] sm:$0xff]  ;;  %v417_v23 = vld [vmem:[%s19439_s19 + $0x28] sm:$0xff]  ;;  %s23105_s10 = scalar_lea.vmem [#allocation11], %s19435_s14  ;;  %s15378_s14 = sshll.u32 %s19207_s9, 12 }
  0xc7   : > { %v434_v24 = vld [vmem:[%s19439_s19 + $0xb0] sm:$0xff]  ;;  %v435_v26 = vld [vmem:[%s19439_s19 + $0xb8] sm:$0xff]  ;;  %v436_v28 = vld [vmem:[%s19439_s19 + $0xc0] sm:$0xff]  ;;  %s14725_s9 = scalar_lea.sflag [#allocation4], %s19432_s22  ;;  %s19139_s15 = smov [#allocation11]  }
  0xc8   : > { %17730 = vmatpush3.bf16.msra.mxu1 %v17067_v6  ;;  %17070 = vmatpush3.bf16.msra.mxu0 %v17067_v6  ;;  %v418_v25 = vld [vmem:[%s19439_s19 + $0x30] sm:$0xff]  ;;  %v419_v27 = vld [vmem:[%s19439_s19 + $0x38] sm:$0xff]  ;;  %v420_v29 = vld [vmem:[%s19439_s19 + $0x40] sm:$0xff] }
  0xc9   : > { %17072 = vmatprep.subr.bf16.mxu1 %v17071_v13  ;;  %v437_v30 = vld [vmem:[%s19439_s19 + $0xc8] sm:$0xff]  ;;  %v438_v32 = vld [vmem:[%s19439_s19 + $0xd0] sm:$0xff]  ;;  %v439_v34 = vld [vmem:[%s19439_s19 + $0xd8] sm:$0xff] }
  0xca   : > { %v421_v31 = vld [vmem:[%s19439_s19 + $0x48] sm:$0xff]  ;;  %v422_v33 = vld [vmem:[%s19439_s19 + $0x50] sm:$0xff]  ;;  %v423_v35 = vld [vmem:[%s19439_s19 + $0x58] sm:$0xff] }
  0xcb   : > { %16032 = vmatmul.mubr.msk.f32.vlgmr.msra.gmra.mrb[0].mxu1 %vm487_vm0, %v429_v10  ;;  %16008 = vmatmul.mubr.msk.f32.vlgmr.msra.gmra.mrb[0].mxu0 %vm487_vm0, %v413_v12  ;;  %v440_v36 = vld [vmem:[%s19439_s19 + $0xe0] sm:$0xff]  ;;  %v441_v38 = vld [vmem:[%s19439_s19 + $0xe8] sm:$0xff]  ;;  %v442_v40 = vld [vmem:[%s19439_s19 + $0xf0] sm:$0xff] }
  0xcc   : > { %16034 = vmatprep.mubr.msk.f32.mxu1 %vm487_vm0, %v430_v11  ;;  %16010 = vmatprep.mubr.msk.f32.mxu0 %vm487_vm0, %v414_v14  ;;  %v424_v37 = vld [vmem:[%s19439_s19 + $0x60] sm:$0xff]  ;;  %v425_v39 = vld [vmem:[%s19439_s19 + $0x68] sm:$0xff]  ;;  %v426_v41 = vld [vmem:[%s19439_s19 + $0x70] sm:$0xff] }
  0xcd   : > { %17074 = vmatpush3.bf16.msra.mxu1 %v17071_v13  ;;  %v443_v42 = vld [vmem:[%s19439_s19 + $0xf8] sm:$0xff]  ;;  %v444_v44 = vld [vmem:[%s19447_s2] sm:$0xff]  ;;  %v445_v45 = vld [vmem:[%s19447_s2 + $0x8] sm:$0xff] }
  0xce   : > { %17076 = vmatprep.subr.bf16.mxu1 %v17075_v17  ;;  %v427_v43 = vld [vmem:[%s19439_s19 + $0x78] sm:$0xff]  ;;  %v446_v46 = vld [vmem:[%s19447_s2 + $0x10] sm:$0xff]  ;;  %v448_v48 = vld [vmem:[%s19447_s2 + $0x20] sm:$0xff] }
  0xcf   : > { %16035 = vmatmul.mubr.msk.f32.gmra.mrb[2].mxu1 %vm487_vm0, %v431_v18  ;;  %16011 = vmatmul.mubr.msk.f32.gmra.mrb[2].mxu0 %vm487_vm0, %v415_v19  ;;  %v447_v47 = vld [vmem:[%s19447_s2 + $0x18] sm:$0xff]  ;;  %v449_v49 = vld [vmem:[%s19447_s2 + $0x28] sm:$0xff]  ;;  %v450_v50 = vld [vmem:[%s19447_s2 + $0x30] sm:$0xff] }
  0xd0   : > { %16037 = vmatprep.mubr.msk.f32.mxu1 %vm487_vm0, %v432_v20  ;;  %16013 = vmatprep.mubr.msk.f32.mxu0 %vm487_vm0, %v416_v21  ;;  %v451_v51 = vld [vmem:[%s19447_s2 + $0x38] sm:$0xff]  ;;  %v452_v52 = vld [vmem:[%s19447_s2 + $0x40] sm:$0xff]  ;;  %v453_v53 = vld [vmem:[%s19447_s2 + $0x48] sm:$0xff] }
  0xd1   : > { %17078 = vmatpush3.bf16.msra.mxu1 %v17075_v17  ;;  %v454_v54 = vld [vmem:[%s19447_s2 + $0x50] sm:$0xff]  ;;  %v455_v55 = vld [vmem:[%s19447_s2 + $0x58] sm:$0xff]  ;;  %v456_v56 = vld [vmem:[%s19447_s2 + $0x60] sm:$0xff] }
  0xd2   : > { %v457_v57 = vld [vmem:[%s19447_s2 + $0x68] sm:$0xff]  ;;  %v458_v58 = vld [vmem:[%s19447_s2 + $0x70] sm:$0xff]  ;;  %v459_v59 = vld [vmem:[%s19447_s2 + $0x78] sm:$0xff] }
  0xd3   : > { %16038 = vmatmul.mubr.msk.f32.gmra.mrb[4].mxu1 %vm487_vm0, %v433_v22  ;;  %16014 = vmatmul.mubr.msk.f32.gmra.mrb[4].mxu0 %vm487_vm0, %v417_v23  ;;  %v460_v60 = vld [vmem:[%s19447_s2 + $0x80] sm:$0xff]  ;;  %v461_v61 = vld [vmem:[%s19447_s2 + $0x88] sm:$0xff]  ;;  %v462_v62 = vld [vmem:[%s19447_s2 + $0x90] sm:$0xff] }
  0xd4   : > { %16040 = vmatprep.mubr.msk.f32.mxu1 %vm487_vm0, %v434_v24  ;;  %16016 = vmatprep.mubr.msk.f32.mxu0 %vm487_vm0, %v418_v25  ;;  %v463_v63 = vld [vmem:[%s19447_s2 + $0x98] sm:$0xff]  ;;  %v464_v0 = vld [vmem:[%s19447_s2 + $0xa0] sm:$0xff]  ;;  %v465_v1 = vld [vmem:[%s19447_s2 + $0xa8] sm:$0xff] }
  0xd5   : > { %v466_v2 = vld [vmem:[%s19447_s2 + $0xb0] sm:$0xff]  ;;  %v467_v3 = vld [vmem:[%s19447_s2 + $0xb8] sm:$0xff]  ;;  %v468_v4 = vld [vmem:[%s19447_s2 + $0xc0] sm:$0xff] }
  0xd6   : > { %v469_v5 = vld [vmem:[%s19447_s2 + $0xc8] sm:$0xff]  ;;  %v470_v6 = vld [vmem:[%s19447_s2 + $0xd0] sm:$0xff]  ;;  %v471_v7 = vld [vmem:[%s19447_s2 + $0xd8] sm:$0xff] }
  0xd7   : > { %16041 = vmatmul.mubr.msk.f32.gmra.mrb[6].mxu1 %vm487_vm0, %v435_v26  ;;  %16017 = vmatmul.mubr.msk.f32.gmra.mrb[6].mxu0 %vm487_vm0, %v419_v27  ;;  %v472_v8 = vld [vmem:[%s19447_s2 + $0xe0] sm:$0xff]  ;;  %v473_v9 = vld [vmem:[%s19447_s2 + $0xe8] sm:$0xff]  ;;  %v474_v10 = vld [vmem:[%s19447_s2 + $0xf0] sm:$0xff] }
  0xd8   : > { %16043 = vmatprep.mubr.msk.f32.mxu1 %vm487_vm0, %v436_v28  ;;  %16019 = vmatprep.mubr.msk.f32.mxu0 %vm487_vm0, %v420_v29  ;;  %v475_v11 = vld [vmem:[%s19447_s2 + $0xf8] sm:$0xff]  ;;  %v19592_v12 = vld [vmem:[%s23256_s3] ss:$0 sm:$0xff]  ;;  %vm19714_vm2 = vmpackc.low %vm1141_vm1, %vm1141_vm1  ;;  %s14739_s2 = sshll.u32 %s23105_s10, 4  ;;  %s23204_s2 = int_to_ptr.vmem [resolvable:$true] %s14739_s2 }
  0xd9   : > { %s19042_s12 = scalar_lea.vmem %s23204_s2, 4096 }
  0xda   : > { %p19043_p2 = scmp.ne.s32.totalorder %s23204_s2, %s19042_s12 }
  0xdb   : > { %16044 = vmatmul.mubr.msk.f32.gmra.mrb[8].mxu1 %vm487_vm0, %v437_v30  ;;  %16020 = vmatmul.mubr.msk.f32.gmra.mrb[8].mxu0 %vm487_vm0, %v421_v31 }
  0xdc   : > { %16046 = vmatprep.mubr.msk.f32.mxu1 %vm487_vm0, %v438_v32  ;;  %16022 = vmatprep.mubr.msk.f32.mxu0 %vm487_vm0, %v422_v33  ;;  %p19044_p4 = pnand %p19043_p2, %p19340_p5 }
  0xde   : > { %p19045_p0 = pneg %p19044_p4 }
  0xdf   : > { %16047 = vmatmul.mubr.msk.f32.gmra.mrb[10].mxu1 %vm487_vm0, %v439_v34  ;;  %16023 = vmatmul.mubr.msk.f32.gmra.mrb[10].mxu0 %vm487_vm0, %v423_v35 }
  0xe0   : > { %16049 = vmatprep.mubr.msk.f32.mxu1 %vm487_vm0, %v440_v36  ;;  %16025 = vmatprep.mubr.msk.f32.mxu0 %vm487_vm0, %v424_v37 }
  0xe3   : > { %16050 = vmatmul.mubr.msk.f32.gmra.mrb[12].mxu1 %vm487_vm0, %v441_v38  ;;  %16026 = vmatmul.mubr.msk.f32.gmra.mrb[12].mxu0 %vm487_vm0, %v425_v39 }
  0xe4   : > { %16052 = vmatprep.mubr.msk.f32.mxu1 %vm487_vm0, %v442_v40  ;;  %16028 = vmatprep.mubr.msk.f32.mxu0 %vm487_vm0, %v426_v41 }
  0xe7   : > { %16053 = vmatmul.mubr.msk.f32.gmra.mrb[14].mxu1 %vm487_vm0, %v443_v42  ;;  %16029 = vmatmul.mubr.msk.f32.gmra.mrb[14].mxu0 %vm487_vm0, %v427_v43 }
  0xe8   : > { %16063 = vmatprep.mubr.msk.f32.mxu1 %vm487_vm0, %v444_v44 }
  0xeb   : > { %16064 = vmatmul.mubr.msk.f32.vlgmr.msra.gmra.mrb[16].mxu1 %vm487_vm0, %v445_v45 }
  0xec   : > { %16066 = vmatprep.mubr.msk.f32.mxu1 %vm487_vm0, %v446_v46 }
  0xef   : > { %16067 = vmatmul.mubr.msk.f32.gmra.mrb[18].mxu1 %vm487_vm0, %v447_v47 }
  0xf0   : > { %16069 = vmatprep.mubr.msk.f32.mxu1 %vm487_vm0, %v448_v48 }
  0xf3   : > { %16070 = vmatmul.mubr.msk.f32.gmra.mrb[20].mxu1 %vm487_vm0, %v449_v49 }
  0xf4   : > { %16072 = vmatprep.mubr.msk.f32.mxu1 %vm487_vm0, %v450_v50 }
  0xf7   : > { %16073 = vmatmul.mubr.msk.f32.gmra.mrb[22].mxu1 %vm487_vm0, %v451_v51 }
  0xf8   : > { %16075 = vmatprep.mubr.msk.f32.mxu1 %vm487_vm0, %v452_v52 }
  0xfb   : > { %16076 = vmatmul.mubr.msk.f32.gmra.mrb[24].mxu1 %vm487_vm0, %v453_v53 }
  0xfc   : > { %16078 = vmatprep.mubr.msk.f32.mxu1 %vm487_vm0, %v454_v54 }
  0xff   : > { %16079 = vmatmul.mubr.msk.f32.gmra.mrb[26].mxu1 %vm487_vm0, %v455_v55 }
 0x100   : > { %16081 = vmatprep.mubr.msk.f32.mxu1 %vm487_vm0, %v456_v56 }
 0x103   : > { %16082 = vmatmul.mubr.msk.f32.gmra.mrb[28].mxu1 %vm487_vm0, %v457_v57 }
 0x104   : > { %16084 = vmatprep.mubr.msk.f32.mxu1 %vm487_vm0, %v458_v58 }
 0x107   : > { %16085 = vmatmul.mubr.msk.f32.gmra.mrb[30].mxu1 %vm487_vm0, %v459_v59 }
 0x108   : > { %16087 = vmatprep.mubr.msk.f32.mxu1 %vm487_vm0, %v460_v60 }
 0x10b   : > { %16088 = vmatmul.mubr.msk.f32.gmra.mrb[32].mxu1 %vm487_vm0, %v461_v61 }
 0x10c   : > { %16090 = vmatprep.mubr.msk.f32.mxu1 %vm487_vm0, %v462_v62 }
 0x10f   : > { %16091 = vmatmul.mubr.msk.f32.gmra.mrb[34].mxu1 %vm487_vm0, %v463_v63 }
 0x110   : > { %16093 = vmatprep.mubr.msk.f32.mxu1 %vm487_vm0, %v464_v0 }
 0x113   : > { %16094 = vmatmul.mubr.msk.f32.gmra.mrb[36].mxu1 %vm487_vm0, %v465_v1 }
 0x114   : > { %16096 = vmatprep.mubr.msk.f32.mxu1 %vm487_vm0, %v466_v2 }
 0x117   : > { %16097 = vmatmul.mubr.msk.f32.gmra.mrb[38].mxu1 %vm487_vm0, %v467_v3 }
 0x118   : > { %16099 = vmatprep.mubr.msk.f32.mxu1 %vm487_vm0, %v468_v4 }
 0x11b   : > { %16100 = vmatmul.mubr.msk.f32.gmra.mrb[40].mxu1 %vm487_vm0, %v469_v5 }
 0x11c   : > { %16102 = vmatprep.mubr.msk.f32.mxu1 %vm487_vm0, %v470_v6 }
 0x11f   : > { %16103 = vmatmul.mubr.msk.f32.gmra.mrb[42].mxu1 %vm487_vm0, %v471_v7  ;;  %v19705_v7 = vld [vmem:[%s23258_s5] ss:$0 sm:$0xff] }
 0x120   : > { %16105 = vmatprep.mubr.msk.f32.mxu1 %vm487_vm0, %v472_v8 }
 0x123   : > { %16106 = vmatmul.mubr.msk.f32.gmra.mrb[44].mxu1 %vm487_vm0, %v473_v9 }
 0x124   : > { %16108 = vmatprep.mubr.msk.f32.mxu1 %vm487_vm0, %v474_v10 }
 0x127   : > { %16109 = vmatmul.mubr.msk.f32.gmra.mrb[46].mxu1 %vm487_vm0, %v475_v11 }
 0x19e   : > { %v16033_v13 = vpop.f32.mrb[0].mxu1  ;;  %v16009_v14 = vpop.f32.mrb[0].mxu0 }
 0x19f   : > { %v19595_v15 = vadd.f32 %v16033_v13, %v19592_v12  ;;  %v730_v16 = vpop.f32.mrb[1].mxu1  ;;  %v19598_v17 = vadd.f32 %v16009_v14, %v19592_v12  ;;  %v650_v18 = vpop.f32.mrb[1].mxu0  ;;  %v23487_v14 = vmov 0 }
 0x1a0   : > { %v19601_v19 = vadd.f32 %v19592_v12, %v730_v16  ;;  %v19604_v20 = vadd.f32 %v19592_v12, %v650_v18  ;;  %v23488_v14 = vsel %vm19714_vm2, 4294967295, %v23487_v14 }
 0x1a1   : > { %23460 = vst [vmem:[#allocation20_spill] sm:$0xff] %v19595_v15  ;;  %23461 = vst [vmem:[#allocation21_spill] sm:$0xff] %v19598_v17  ;;  %4281 = vrot.lane.b32.xlu1 %v19598_v17, %s19129_s16 }
 0x1a2   : > { %23462 = vst [vmem:[#allocation22_spill] sm:$0xff] %v19601_v19  ;;  %23463 = vst [vmem:[#allocation23_spill] sm:$0xff] %v19604_v20  ;;  %v16036_v21 = vpop.f32.mrb[2].mxu1  ;;  %v16012_v22 = vpop.f32.mrb[2].mxu0  ;;  %16115 = vmatprep.mubr.msk.f32.mxu0 %vm1141_vm1, %v19604_v20 }
 0x1a3   : > { %v19611_v23 = vadd.f32 %v16036_v21, %v19592_v12  ;;  %v740_v24 = vpop.f32.mrb[3].mxu1  ;;  %v19614_v25 = vadd.f32 %v16012_v22, %v19592_v12  ;;  %v660_v26 = vpop.f32.mrb[3].mxu0  ;;  %23489 = vst [vmem:[#allocation47_spill] sm:$0xff] %v23488_v14 }
 0x1a4   : > { %v19617_v27 = vadd.f32 %v19592_v12, %v740_v24  ;;  %v19620_v28 = vadd.f32 %v19592_v12, %v660_v26 }
 0x1a5   : > { %23464 = vst [vmem:[#allocation24_spill] sm:$0xff] %v19611_v23  ;;  %23465 = vst [vmem:[#allocation25_spill] sm:$0xff] %v19614_v25  ;;  %4279 = vrot.lane.b32.xlu1 %v19604_v20, %s19129_s16  ;;  %4372 = vrot.lane.b32.xlu0 %v19614_v25, %s19129_s16 }
 0x1a6   : > { %23466 = vst [vmem:[#allocation26_spill] sm:$0xff] %v19617_v27  ;;  %23467 = vst [vmem:[#allocation27_spill] sm:$0xff] %v19620_v28  ;;  %v16039_v29 = vpop.f32.mrb[4].mxu1  ;;  %v16015_v30 = vpop.f32.mrb[4].mxu0  ;;  %16122 = vmatprep.mubr.msk.f32.mxu1 %vm1141_vm1, %v19620_v28 }
 0x1a7   : > { %v19629_v31 = vadd.f32 %v16039_v29, %v19592_v12  ;;  %v750_v32 = vpop.f32.mrb[5].mxu1  ;;  %v670_v33 = vpop.f32.mrb[5].mxu0  ;;  %v19638_v36 = vadd.f32 %v16015_v30, %v19592_v12 }
 0x1a8   : > { %v19632_v34 = vadd.f32 %v19592_v12, %v750_v32  ;;  %v19635_v35 = vadd.f32 %v19592_v12, %v670_v33 }
 0x1a9   : > { %23468 = vst [vmem:[#allocation28_spill] sm:$0xff] %v19629_v31  ;;  %23471 = vst [vmem:[#allocation31_spill] sm:$0xff] %v19638_v36  ;;  %4370 = vrot.lane.b32.xlu1 %v19620_v28, %s19129_s16 }
 0x1aa   : > { %23469 = vst [vmem:[#allocation29_spill] sm:$0xff] %v19632_v34  ;;  %23470 = vst [vmem:[#allocation30_spill] sm:$0xff] %v19635_v35  ;;  %v16042_v37 = vpop.f32.mrb[6].mxu1  ;;  %v16018_v38 = vpop.f32.mrb[6].mxu0  ;;  %4461 = vrot.lane.b32.xlu0 %v19635_v35, %s19129_s16 }
 0x1ab   : > { %v19645_v39 = vadd.f32 %v16042_v37, %v19592_v12  ;;  %v760_v40 = vpop.f32.mrb[7].mxu1  ;;  %v19648_v41 = vadd.f32 %v16018_v38, %v19592_v12  ;;  %v680_v42 = vpop.f32.mrb[7].mxu0 }
 0x1ac   : > { %v19651_v43 = vadd.f32 %v19592_v12, %v760_v40  ;;  %v19656_v44 = vadd.f32 %v19592_v12, %v680_v42 }
 0x1ad   : > { %23472 = vst [vmem:[#allocation32_spill] sm:$0xff] %v19645_v39  ;;  %23473 = vst [vmem:[#allocation33_spill] sm:$0xff] %v19648_v41  ;;  %4463 = vrot.lane.b32.xlu1 %v19638_v36, %s19129_s16 }
 0x1ae   : > { %23474 = vst [vmem:[#allocation34_spill] sm:$0xff] %v19651_v43  ;;  %23475 = vst [vmem:[#allocation35_spill] sm:$0xff] %v19656_v44  ;;  %v16045_v45 = vpop.f32.mrb[8].mxu1  ;;  %4554 = vrot.lane.b32.xlu0 %v19648_v41, %s19129_s16  ;;  %v19660_v46 = vpop.f32.mrb[8].mxu0 }
 0x1af   : > { %v19663_v47 = vadd.f32 %v16045_v45, %v19592_v12  ;;  %v770_v48 = vpop.f32.mrb[9].mxu1  ;;  %v19665_v49 = vpop.f32.mrb[9].mxu0 }
 0x1b0   : > { %v19668_v50 = vadd.f32 %v19592_v12, %v770_v48 }
 0x1b1   : > { %23476 = vst [vmem:[#allocation36_spill] sm:$0xff] %v19663_v47  ;;  %4552 = vrot.lane.b32.xlu1 %v19656_v44, %s19129_s16 }
 0x1b2   : > { %23477 = vst [vmem:[#allocation37_spill] sm:$0xff] %v19668_v50  ;;  %v16048_v51 = vpop.f32.mrb[10].mxu1  ;;  %v19672_v52 = vpop.f32.mrb[10].mxu0 }
 0x1b3   : > { %v19675_v53 = vadd.f32 %v16048_v51, %v19592_v12  ;;  %v780_v54 = vpop.f32.mrb[11].mxu1  ;;  %v19677_v55 = vpop.f32.mrb[11].mxu0 }
 0x1b4   : > { %v19680_v56 = vadd.f32 %v19592_v12, %v780_v54 }
 0x1b5   : > { %23478 = vst [vmem:[#allocation38_spill] sm:$0xff] %v19675_v53 }
 0x1b6   : > { %23479 = vst [vmem:[#allocation39_spill] sm:$0xff] %v19680_v56  ;;  %v16051_v57 = vpop.f32.mrb[12].mxu1  ;;  %v16027_v58 = vpop.f32.mrb[12].mxu0 }
 0x1b7   : > { %v19683_v59 = vadd.f32 %v16051_v57, %v19592_v12  ;;  %v790_v60 = vpop.f32.mrb[13].mxu1  ;;  %v19686_v61 = vadd.f32 %v16027_v58, %v19592_v12  ;;  %v19688_v62 = vpop.f32.mrb[13].mxu0 }
 0x1b8   : > { %v19691_v63 = vadd.f32 %v19592_v12, %v790_v60 }
 0x1b9   : > { %23480 = vst [vmem:[#allocation40_spill] sm:$0xff] %v19683_v59  ;;  %23481 = vst [vmem:[#allocation41_spill] sm:$0xff] %v19686_v61 }
 0x1ba   : > { %23482 = vst [vmem:[#allocation42_spill] sm:$0xff] %v19691_v63  ;;  %v16054_v0 = vpop.f32.mrb[14].mxu1  ;;  %v16030_v1 = vpop.f32.mrb[14].mxu0 }
 0x1bb   : > { %v19694_v2 = vadd.f32 %v16054_v0, %v19592_v12  ;;  %v800_v3 = vpop.f32.mrb[15].mxu1  ;;  %v19697_v4 = vadd.f32 %v16030_v1, %v19592_v12  ;;  %v720_v5 = vpop.f32.mrb[15].mxu0 }
 0x1bc   : > { %v19700_v6 = vadd.f32 %v19592_v12, %v800_v3  ;;  %v19708_v8 = vadd.f32 %v19592_v12, %v720_v5  ;;  %v19770_v5 = vadd.f32 %v19592_v12, %v19665_v49  ;;  %v19788_v49 = vadd.f32 %v19660_v46, %v19592_v12 }
 0x1bd   : > { %23483 = vst [vmem:[#allocation43_spill] sm:$0xff] %v19694_v2  ;;  %23484 = vst [vmem:[#allocation44_spill] sm:$0xff] %v19697_v4 }
 0x1be   : > { %23485 = vst [vmem:[#allocation45_spill] sm:$0xff] %v19700_v6  ;;  %23486 = vst [vmem:[#allocation46_spill] sm:$0xff] %v19708_v8  ;;  %v16065_v9 = vpop.f32.mrb[16].mxu1 }
 0x1bf   : > { %v988_v10 = vadd.f32 %v16065_v9, %v19705_v7  ;;  %v982_v11 = vpop.f32.mrb[17].mxu1  ;;  %23494 = vst [vmem:[#allocation52_spill] sm:$0xff] %v19770_v5  ;;  %23496 = vst [vmem:[#allocation54_spill] sm:$0xff] %v19788_v49 }
 0x1c0   : > { %v983_v13 = vadd.f32 %v19705_v7, %v982_v11 }
 0x1c2   : > { %v16068_v16 = vpop.f32.mrb[18].mxu1  ;;  %v17079_v18 = vpack.c.bf16 %v988_v10, %v983_v13  ;;  %v19718_v21 = vpack.i.bf16 %v988_v10, %v983_v13 }
 0x1c3   : > { %v998_v22 = vadd.f32 %v16068_v16, %v19705_v7  ;;  %v992_v24 = vpop.f32.mrb[19].mxu1 }
 0x1c4   : > { %23490 = vst [vmem:[#allocation48_spill] sm:$0xff] %v19718_v21  ;;  %v993_v26 = vadd.f32 %v19705_v7, %v992_v24  ;;  %17081 = vmatprep.subr.msk.bf16.mxu0 %vm19714_vm2, %v17079_v18  ;;  %17827 = vrot.lane.b32.xlu0 %v19718_v21, %s19130_s24 }
 0x1c5   : > { %17832 = vrot.lane.b32.xlu1 %v19718_v21, %s19129_s16  ;;  %17084 = vmatpush3.bf16.xpose.msk.msra.mxu0 %vm19714_vm2, %v17079_v18 }
 0x1c6   : > { %v16071_v29 = vpop.f32.mrb[20].mxu1  ;;  %v17085_v30 = vpack.c.bf16 %v998_v22, %v993_v26  ;;  %v19730_v32 = vpack.i.bf16 %v998_v22, %v993_v26  ;;  %v19792_v22 = vadd.f32 %v19592_v12, %v19677_v55  ;;  %v19812_v55 = vadd.f32 %v19672_v52, %v19592_v12 }
 0x1c7   : > { %v1008_v33 = vadd.f32 %v16071_v29, %v19705_v7  ;;  %v1002_v37 = vpop.f32.mrb[21].mxu1 }
 0x1c8   : > { %23491 = vst [vmem:[#allocation49_spill] sm:$0xff] %v19730_v32  ;;  %v1003_v38 = vadd.f32 %v19705_v7, %v1002_v37  ;;  %17087 = vmatprep.subr.msk.bf16.mxu1 %vm19714_vm2, %v17085_v30  ;;  %23497 = vst [vmem:[#allocation55_spill] sm:$0xff] %v19792_v22  ;;  %v19818_v37 = vadd.f32 %v19592_v12, %v19688_v62 }
 0x1c9   : > { %17837 = vrot.lane.b32.xlu1 %v19730_v32, %s19130_s24  ;;  %17090 = vmatpush3.bf16.xpose.msk.msra.mxu1 %vm19714_vm2, %v17085_v30  ;;  %23499 = vst [vmem:[#allocation57_spill] sm:$0xff] %v19812_v55 }
 0x1ca   : > { %v16074_v40 = vpop.f32.mrb[22].mxu1  ;;  %v17091_v42 = vpack.c.bf16 %v1008_v33, %v1003_v38  ;;  %v19740_v45 = vpack.i.bf16 %v1008_v33, %v1003_v38  ;;  %23500 = vst [vmem:[#allocation58_spill] sm:$0xff] %v19818_v37 }
 0x1cb   : > { %v1018_v48 = vadd.f32 %v16074_v40, %v19705_v7  ;;  %v1012_v51 = vpop.f32.mrb[23].mxu1 }
 0x1cc   : > { %23492 = vst [vmem:[#allocation50_spill] sm:$0xff] %v19740_v45  ;;  %v1013_v54 = vadd.f32 %v19705_v7, %v1012_v51  ;;  %17093 = vmatprep.subr.msk.bf16.mxu0 %vm19714_vm2, %v17091_v42  ;;  %16116 = vmatmul.mubr.msk.f32.vlgmr.msra.gmra.mrb[16].mxu0 %vm1141_vm1, %v19598_v17 }
 0x1cd   : > { %17842 = vrot.lane.b32.xlu1 %v19730_v32, %s19129_s16  ;;  %17096 = vmatpush3.bf16.xpose.msk.msra.mxu0 %vm19714_vm2, %v17091_v42 }
 0x1ce   : > { %v16077_v57 = vpop.f32.mrb[24].mxu1  ;;  %v17097_v58 = vpack.c.bf16 %v1018_v48, %v1013_v54  ;;  %16129 = vmatprep.mubr.msk.f32.mxu0 %vm1141_vm1, %v19635_v35  ;;  %17847 = vrot.lane.b32.xlu0 %v19740_v45, %s19130_s24  ;;  %v19756_v60 = vpack.i.bf16 %v1018_v48, %v1013_v54 }
 0x1cf   : > { %v1028_v0 = vadd.f32 %v16077_v57, %v19705_v7  ;;  %v1022_v1 = vpop.f32.mrb[25].mxu1 }
 0x1d0   : > { %23493 = vst [vmem:[#allocation51_spill] sm:$0xff] %v19756_v60  ;;  %v1023_v3 = vadd.f32 %v19705_v7, %v1022_v1  ;;  %16123 = vmatmul.mubr.msk.f32.vlgmr.msra.gmra.mrb[48].mxu1 %vm1141_vm1, %v19614_v25  ;;  %17099 = vmatprep.subr.msk.bf16.mxu1 %vm19714_vm2, %v17097_v58 }
 0x1d1   : > { %17102 = vmatpush3.bf16.xpose.msk.msra.mxu1 %vm19714_vm2, %v17097_v58  ;;  %16136 = vmatprep.mubr.msk.f32.mxu1 %vm1141_vm1, %v19656_v44 }
 0x1d2   : > { %v16080_v9 = vpop.f32.mrb[26].mxu1  ;;  %v17103_v10 = vpack.c.bf16 %v1028_v0, %v1023_v3  ;;  %17857 = vrot.lane.b32.xlu0 %v19756_v60, %s19130_s24  ;;  %17852 = vrot.lane.b32.xlu1 %v19740_v45, %s19129_s16  ;;  %v19776_v11 = vpack.i.bf16 %v1028_v0, %v1023_v3 }
 0x1d3   : > { %v1038_v13 = vadd.f32 %v16080_v9, %v19705_v7  ;;  %v1032_v16 = vpop.f32.mrb[27].mxu1 }
 0x1d4   : > { %23495 = vst [vmem:[#allocation53_spill] sm:$0xff] %v19776_v11  ;;  %v1033_v18 = vadd.f32 %v19705_v7, %v1032_v16  ;;  %17105 = vmatprep.subr.msk.bf16.mxu0 %vm19714_vm2, %v17103_v10  ;;  %16130 = vmatmul.mubr.msk.f32.vlgmr.msra.gmra.mrb[18].mxu0 %vm1141_vm1, %v19638_v36 }
 0x1d5   : > { %17108 = vmatpush3.bf16.xpose.msk.msra.mxu0 %vm19714_vm2, %v17103_v10  ;;  %16143 = vmatprep.mubr.msk.f32.mxu0 %vm1141_vm1, %v19770_v5 }
 0x1d6   : > { %v16083_v24 = vpop.f32.mrb[28].mxu1  ;;  %v17109_v26 = vpack.c.bf16 %v1038_v13, %v1033_v18  ;;  %17862 = vrot.lane.b32.xlu0 %v19756_v60, %s19129_s16  ;;  %17867 = vrot.lane.b32.xlu1 %v19776_v11, %s19130_s24  ;;  %v19800_v29 = vpack.i.bf16 %v1038_v13, %v1033_v18 }
 0x1d7   : > { %v1048_v46 = vadd.f32 %v16083_v24, %v19705_v7  ;;  %v1042_v30 = vpop.f32.mrb[29].mxu1 }
 0x1d8   : > { %23498 = vst [vmem:[#allocation56_spill] sm:$0xff] %v19800_v29  ;;  %v1043_v33 = vadd.f32 %v19705_v7, %v1042_v30  ;;  %16137 = vmatmul.mubr.msk.f32.vlgmr.msra.gmra.mrb[50].mxu1 %vm1141_vm1, %v19648_v41  ;;  %17111 = vmatprep.subr.msk.bf16.mxu1 %vm19714_vm2, %v17109_v26 }
 0x1d9   : > { %17114 = vmatpush3.bf16.xpose.msk.msra.mxu1 %vm19714_vm2, %v17109_v26  ;;  %16150 = vmatprep.mubr.msk.f32.mxu1 %vm1141_vm1, %v19792_v22 }
 0x1da   : > { %v16086_v38 = vpop.f32.mrb[30].mxu1  ;;  %v17115_v40 = vpack.c.bf16 %v1048_v46, %v1043_v33  ;;  %17872 = vrot.lane.b32.xlu1 %v19776_v11, %s19129_s16  ;;  %17882 = vrot.lane.b32.xlu0 %v19800_v29, %s19129_s16  ;;  %v19824_v42 = vpack.i.bf16 %v1048_v46, %v1043_v33 }
 0x1db   : > { %v1058_v52 = vadd.f32 %v16086_v38, %v19705_v7  ;;  %v1052_v48 = vpop.f32.mrb[31].mxu1 }
 0x1dc   : > { %23501 = vst [vmem:[#allocation59_spill] sm:$0xff] %v19824_v42  ;;  %v1053_v51 = vadd.f32 %v19705_v7, %v1052_v48  ;;  %17117 = vmatprep.subr.msk.bf16.mxu0 %vm19714_vm2, %v17115_v40  ;;  %16144 = vmatmul.mubr.msk.f32.vlgmr.msra.gmra.mrb[20].mxu0 %vm1141_vm1, %v19788_v49 }
 0x1dd   : > { %17120 = vmatpush3.bf16.xpose.msk.msra.mxu0 %vm19714_vm2, %v17115_v40  ;;  %16157 = vmatprep.mubr.msk.f32.mxu0 %vm1141_vm1, %v19818_v37 }
 0x1de   : > { %v16089_v12 = vpop.f32.mrb[32].mxu1  ;;  %v17121_v62 = vpack.c.bf16 %v1058_v52, %v1053_v51  ;;  %17877 = vrot.lane.b32.xlu1 %v19800_v29, %s19130_s24  ;;  %v19838_v54 = vpack.i.bf16 %v1058_v52, %v1053_v51 }
 0x1df   : > { %v1068_v57 = vadd.f32 %v16089_v12, %v19705_v7  ;;  %v1062_v58 = vpop.f32.mrb[33].mxu1 }
 0x1e0   : > { %v1063_v0 = vadd.f32 %v19705_v7, %v1062_v58  ;;  %16151 = vmatmul.mubr.msk.f32.vlgmr.msra.gmra.mrb[52].mxu1 %vm1141_vm1, %v19812_v55  ;;  %17123 = vmatprep.subr.msk.bf16.mxu1 %vm19714_vm2, %v17121_v62 }
 0x1e1   : > { %17126 = vmatpush3.bf16.xpose.msk.msra.mxu1 %vm19714_vm2, %v17121_v62  ;;  %16164 = vmatprep.mubr.msk.f32.mxu1 %vm1141_vm1, %v19708_v8 }
 0x1e2   : > { %v16092_v1 = vpop.f32.mrb[34].mxu1  ;;  %v17127_v3 = vpack.c.bf16 %v1068_v57, %v1063_v0  ;;  %17887 = vrot.lane.b32.xlu1 %v19824_v42, %s19130_s24  ;;  %17892 = vrot.lane.b32.xlu0 %v19838_v54, %s19130_s24  ;;  %v19854_v9 = vpack.i.bf16 %v1068_v57, %v1063_v0 }
 0x1e3   : > { %v1078_v10 = vadd.f32 %v16092_v1, %v19705_v7  ;;  %v1072_v13 = vpop.f32.mrb[35].mxu1 }
 0x1e4   : > { %v1073_v16 = vadd.f32 %v19705_v7, %v1072_v13  ;;  %16158 = vmatmul.mubr.msk.f32.vlgmr.msra.gmra.mrb[22].mxu0 %vm1141_vm1, %v19686_v61  ;;  %17129 = vmatprep.subr.msk.bf16.mxu0 %vm19714_vm2, %v17127_v3 }
 0x1e5   : > { %17132 = vmatpush3.bf16.xpose.msk.msra.mxu0 %vm19714_vm2, %v17127_v3  ;;  %16171 = vmatprep.mubr.msk.f32.mxu0 %vm1141_vm1, %v19601_v19 }
 0x1e6   : > { %v16095_v18 = vpop.f32.mrb[36].mxu1  ;;  %v17133_v24 = vpack.c.bf16 %v1078_v10, %v1073_v16  ;;  %17897 = vrot.lane.b32.xlu1 %v19854_v9, %s19130_s24  ;;  %v19868_v26 = vpack.i.bf16 %v1078_v10, %v1073_v16 }
 0x1e7   : > { %v1088_v46 = vadd.f32 %v16095_v18, %v19705_v7  ;;  %v1082_v30 = vpop.f32.mrb[37].mxu1 }
 0x1e8   : > { %23502 = vst [vmem:[#allocation60_spill] sm:$0xff] %v19868_v26  ;;  %v1083_v33 = vadd.f32 %v19705_v7, %v1082_v30  ;;  %16165 = vmatmul.mubr.msk.f32.vlgmr.msra.gmra.mrb[54].mxu1 %vm1141_vm1, %v19697_v4  ;;  %17135 = vmatprep.subr.msk.bf16.mxu1 %vm19714_vm2, %v17133_v24 }
 0x1e9   : > { %17138 = vmatpush3.bf16.xpose.msk.msra.mxu1 %vm19714_vm2, %v17133_v24  ;;  %16178 = vmatprep.mubr.msk.f32.mxu1 %vm1141_vm1, %v19617_v27 }
 0x1ea   : > { %v16098_v38 = vpop.f32.mrb[38].mxu1  ;;  %v17139_v40 = vpack.c.bf16 %v1088_v46, %v1083_v33  ;;  %17902 = vrot.lane.b32.xlu1 %v19868_v26, %s19130_s24  ;;  %v19882_v52 = vpack.i.bf16 %v1088_v46, %v1083_v33 }
 0x1eb   : > { %v1098_v48 = vadd.f32 %v16098_v38, %v19705_v7  ;;  %v1092_v51 = vpop.f32.mrb[39].mxu1 }
 0x1ec   : > { %v1093_v12 = vadd.f32 %v19705_v7, %v1092_v51  ;;  %16172 = vmatmul.mubr.msk.f32.vlgmr.msra.gmra.mrb[24].mxu0 %vm1141_vm1, %v19595_v15  ;;  %17141 = vmatprep.subr.msk.bf16.mxu0 %vm19714_vm2, %v17139_v40 }
 0x1ed   : > { %17144 = vmatpush3.bf16.xpose.msk.msra.mxu0 %vm19714_vm2, %v17139_v40  ;;  %16185 = vmatprep.mubr.msk.f32.mxu0 %vm1141_vm1, %v19632_v34 }
 0x1ee   : > { %v16101_v62 = vpop.f32.mrb[40].mxu1  ;;  %v17145_v57 = vpack.c.bf16 %v1098_v48, %v1093_v12  ;;  %17907 = vrot.lane.b32.xlu1 %v19882_v52, %s19130_s24  ;;  %v19896_v58 = vpack.i.bf16 %v1098_v48, %v1093_v12 }
 0x1ef   : > { %v1108_v0 = vadd.f32 %v16101_v62, %v19705_v7  ;;  %v1102_v1 = vpop.f32.mrb[41].mxu1 }
 0x1f0   : > { %23503 = vst [vmem:[#allocation61_spill] sm:$0xff] %v19896_v58  ;;  %v1103_v3 = vadd.f32 %v19705_v7, %v1102_v1  ;;  %16179 = vmatmul.mubr.msk.f32.vlgmr.msra.gmra.mrb[56].mxu1 %vm1141_vm1, %v19611_v23  ;;  %17147 = vmatprep.subr.msk.bf16.mxu1 %vm19714_vm2, %v17145_v57 }
 0x1f1   : > { %17150 = vmatpush3.bf16.xpose.msk.msra.mxu1 %vm19714_vm2, %v17145_v57  ;;  %16192 = vmatprep.mubr.msk.f32.mxu1 %vm1141_vm1, %v19651_v43 }
 0x1f2   : > { %v16104_v10 = vpop.f32.mrb[42].mxu1  ;;  %v17151_v13 = vpack.c.bf16 %v1108_v0, %v1103_v3  ;;  %17912 = vrot.lane.b32.xlu1 %v19896_v58, %s19130_s24  ;;  %v19910_v16 = vpack.i.bf16 %v1108_v0, %v1103_v3 }
 0x1f3   : > { %v1118_v18 = vadd.f32 %v16104_v10, %v19705_v7  ;;  %v1112_v24 = vpop.f32.mrb[43].mxu1 }
 0x1f4   : > { %v1113_v46 = vadd.f32 %v19705_v7, %v1112_v24  ;;  %16186 = vmatmul.mubr.msk.f32.vlgmr.msra.gmra.mrb[26].mxu0 %vm1141_vm1, %v19629_v31  ;;  %17153 = vmatprep.subr.msk.bf16.mxu0 %vm19714_vm2, %v17151_v13 }
 0x1f5   : > { %17156 = vmatpush3.bf16.xpose.msk.msra.mxu0 %vm19714_vm2, %v17151_v13  ;;  %16199 = vmatprep.mubr.msk.f32.mxu0 %vm1141_vm1, %v19668_v50 }
 0x1f6   : > { %v16107_v30 = vpop.f32.mrb[44].mxu1  ;;  %v17157_v33 = vpack.c.bf16 %v1118_v18, %v1113_v46  ;;  %17917 = vrot.lane.b32.xlu1 %v19910_v16, %s19130_s24  ;;  %v19924_v38 = vpack.i.bf16 %v1118_v18, %v1113_v46 }
 0x1f7   : > { %v1128_v40 = vadd.f32 %v16107_v30, %v19705_v7  ;;  %v1122_v48 = vpop.f32.mrb[45].mxu1 }
 0x1f8   : > { %23504 = vst [vmem:[#allocation62_spill] sm:$0xff] %v19924_v38  ;;  %v1123_v51 = vadd.f32 %v19705_v7, %v1122_v48  ;;  %16193 = vmatmul.mubr.msk.f32.vlgmr.msra.gmra.mrb[58].mxu1 %vm1141_vm1, %v19645_v39  ;;  %17159 = vmatprep.subr.msk.bf16.mxu1 %vm19714_vm2, %v17157_v33 }
 0x1f9   : > { %17162 = vmatpush3.bf16.xpose.msk.msra.mxu1 %vm19714_vm2, %v17157_v33  ;;  %16206 = vmatprep.mubr.msk.f32.mxu1 %vm1141_vm1, %v19680_v56 }
 0x1fa   : > { %v16110_v12 = vpop.f32.mrb[46].mxu1  ;;  %v17163_v62 = vpack.c.bf16 %v1128_v40, %v1123_v51  ;;  %17922 = vrot.lane.b32.xlu1 %v19924_v38, %s19130_s24  ;;  %v19938_v57 = vpack.i.bf16 %v1128_v40, %v1123_v51 }
 0x1fb   : > { %v1138_v0 = vadd.f32 %v16110_v12, %v19705_v7  ;;  %v1132_v1 = vpop.f32.mrb[47].mxu1 }
 0x1fc   : > { %23505 = vst [vmem:[#allocation63_spill] sm:$0xff] %v19938_v57  ;;  %v1133_v3 = vadd.f32 %v19705_v7, %v1132_v1  ;;  %16200 = vmatmul.mubr.msk.f32.vlgmr.msra.gmra.mrb[28].mxu0 %vm1141_vm1, %v19663_v47  ;;  %17165 = vmatprep.subr.msk.bf16.mxu0 %vm19714_vm2, %v17163_v62 }
 0x1fd   : > { %17168 = vmatpush3.bf16.xpose.msk.msra.mxu0 %vm19714_vm2, %v17163_v62  ;;  %16213 = vmatprep.mubr.msk.f32.mxu0 %vm1141_vm1, %v19691_v63 }
 0x1fe   : > { %v17169_v10 = vpack.c.bf16 %v1138_v0, %v1133_v3  ;;  %17927 = vrot.lane.b32.xlu0 %v19938_v57, %s19130_s24  ;;  %v19952_v13 = vpack.i.bf16 %v1138_v0, %v1133_v3 }
 0x200   : > { %16207 = vmatmul.mubr.msk.f32.vlgmr.msra.gmra.mrb[60].mxu1 %vm1141_vm1, %v19675_v53  ;;  %17171 = vmatprep.subr.msk.bf16.mxu1 %vm19714_vm2, %v17169_v10 }
 0x201   : > { %17174 = vmatpush3.bf16.xpose.msk.msra.mxu1 %vm19714_vm2, %v17169_v10  ;;  %16220 = vmatprep.mubr.msk.f32.mxu1 %vm1141_vm1, %v19700_v6 }
 0x202   : > { %17932 = vrot.lane.b32.xlu1 %v19952_v13, %s19130_s24  ;;  %s19046_s24 = sshll.u32 %s19139_s15, 4  ;;  %s19047_s24 = int_to_ptr.vmem [resolvable:$false] %s19046_s24 }
 0x203   : > { %p19049_p8 = scmp.lt.s32.totalorder %s23204_s2, %s19047_s24 }
 0x204   : > { %16214 = vmatmul.mubr.msk.f32.vlgmr.msra.gmra.mrb[30].mxu0 %vm1141_vm1, %v19683_v59 }
 0x208   : > { %16221 = vmatmul.mubr.msk.f32.vlgmr.msra.gmra.mrb[62].mxu1 %vm1141_vm1, %v19694_v2 }
 0x213   : > { %v19968_v7 = vpop.permute.xlu1 %4281 }
 0x214   : > { %23506 = vst [vmem:[#allocation64_spill] sm:$0xff] %v19968_v7 }
 0x217   : > { %v19970_v18 = vpop.permute.xlu1 %4279  ;;  %v19972_v24 = vpop.permute.xlu0 %4372 }
 0x218   : > { %23507 = vst [vmem:[#allocation65_spill] sm:$0xff] %v19970_v18  ;;  %23508 = vst [vmem:[#allocation66_spill] sm:$0xff] %v19972_v24 }
 0x21b   : > { %v19974_v46 = vpop.permute.xlu1 %4370 }
 0x21c   : > { %23509 = vst [vmem:[#allocation67_spill] sm:$0xff] %v19974_v46  ;;  %v19976_v30 = vpop.permute.xlu0 %4461 }
 0x21d   : > { %23510 = vst [vmem:[#allocation68_spill] sm:$0xff] %v19976_v30 }
 0x21f   : > { %v19978_v33 = vpop.permute.xlu1 %4463 }
 0x220   : > { %23511 = vst [vmem:[#allocation69_spill] sm:$0xff] %v19978_v33  ;;  %v19980_v40 = vpop.permute.xlu0 %4554 }
 0x221   : > { %23512 = vst [vmem:[#allocation70_spill] sm:$0xff] %v19980_v40 }
 0x223   : > { %v19982_v48 = vpop.permute.xlu1 %4552 }
 0x224   : > { %23513 = vst [vmem:[#allocation71_spill] sm:$0xff] %v19982_v48 }
 0x236   : > { %v17828_v51 = vpop.permute.xlu0 %17827 }
 0x237   : > { %v17830_v12 = vunpack.i.h.bf16 %v17828_v51  ;;  %v17829_v62 = vunpack.i.l.bf16 %v17828_v51  ;;  %v19984_v0 = vpop.permute.xlu1 %17832 }
 0x238   : > { %23514 = vst [vmem:[#allocation72_spill] sm:$0xff] %v19984_v0 }
 0x239   : > { %v17175_v1 = vpack.c.bf16 %v17830_v12, %v17829_v62 }
 0x23b   : > { %v17838_v3 = vpop.permute.xlu1 %17837  ;;  %17176 = vmatprep.subr.bf16.mxu0 %v17175_v1 }
 0x23c   : > { %v17840_v10 = vunpack.i.h.bf16 %v17838_v3  ;;  %v17839_v24 = vunpack.i.l.bf16 %v17838_v3  ;;  %17178 = vmatpush3.bf16.msra.mxu0 %v17175_v1 }
 0x23e   : > { %v17179_v46 = vpack.c.bf16 %v17840_v10, %v17839_v24 }
 0x23f   : > { %v20120_v58 = vpop.permute.xlu1 %17842 }
 0x240   : > { %17180 = vmatprep.subr.bf16.mxu1 %v17179_v46  ;;  %v17848_v30 = vpop.permute.xlu0 %17847  ;;  %23517 = vst [vmem:[#allocation75_spill] sm:$0xff] %v20120_v58 }
 0x241   : > { %17182 = vmatpush3.bf16.msra.mxu1 %v17179_v46  ;;  %v17850_v33 = vunpack.i.h.bf16 %v17848_v30  ;;  %v17849_v7 = vunpack.i.l.bf16 %v17848_v30 }
 0x243   : > { %v19986_v40 = vpack.c.bf16 %v17850_v33, %v17849_v7 }
 0x244   : > { %v17858_v48 = vpop.permute.xlu0 %17857 }
 0x245   : > { %23515 = vst [vmem:[#allocation73_spill] sm:$0xff] %v19986_v40  ;;  %v17860_v18 = vunpack.i.h.bf16 %v17858_v48  ;;  %v17859_v44 = vunpack.i.l.bf16 %v17858_v48  ;;  %17184 = vmatprep.subr.bf16.mxu0 %v19986_v40 }
 0x247   : > { %v19989_v51 = vpack.c.bf16 %v17860_v18, %v17859_v44 }
 0x249   : > { %23516 = vst [vmem:[#allocation74_spill] sm:$0xff] %v19989_v51  ;;  %17188 = vmatprep.subr.bf16.mxu1 %v19989_v51 }
 0x29f   : > { %v19992_v12 = vpop.f32.mrb[16].mxu0 }
 0x2a0   : > { %v2538_v24 = vsel %vm2534_vm3, %v19992_v12, -inf  ;;  %v19996_v46 = vpop.f32.mrb[17].mxu0 }
 0x2a1   : > { %2539 = vmax.xlane.f32.xlu0 %v2538_v24  ;;  %v2535_v33 = vsel %vm2534_vm3, %v19996_v46, -inf }
 0x2a3   : > { %v19998_v7 = vpop.f32.mrb[48].mxu1 }
 0x2a4   : > { %v20000_v30 = vpop.f32.mrb[49].mxu1  ;;  %v2544_v48 = vsel %vm2534_vm3, %v19998_v7, -inf }
 0x2a5   : > { %2536 = vmax.xlane.f32.xlu0 %v2535_v33  ;;  %v2541_v44 = vsel %vm2534_vm3, %v20000_v30, -inf }
 0x2a6   : > { %2542 = vmax.xlane.f32.xlu1 %v2541_v44 }
 0x2a7   : > { %v20006_v18 = vpop.f32.mrb[18].mxu0 }
 0x2a8   : > { %v2550_v62 = vsel %vm2534_vm3, %v20006_v18, -inf  ;;  %v20012_v1 = vpop.f32.mrb[19].mxu0 }
 0x2a9   : > { %2545 = vmax.xlane.f32.xlu0 %v2544_v48  ;;  %v2547_v33 = vsel %vm2534_vm3, %v20012_v1, -inf }
 0x2aa   : > { %2551 = vmax.xlane.f32.xlu1 %v2550_v62 }
 0x2ab   : > { %v20014_v3 = vpop.f32.mrb[50].mxu1 }
 0x2ac   : > { %v2556_v10 = vsel %vm2534_vm3, %v20014_v3, -inf  ;;  %v20018_v24 = vpop.f32.mrb[51].mxu1 }
 0x2ad   : > { %2557 = vmax.xlane.f32.xlu0 %v2556_v10  ;;  %v2553_v36 = vsel %vm2534_vm3, %v20018_v24, -inf }
 0x2ae   : > { %2548 = vmax.xlane.f32.xlu1 %v2547_v33 }
 0x2af   : > { %v20022_v44 = vpop.f32.mrb[20].mxu0 }
 0x2b0   : > { %v2562_v48 = vsel %vm2534_vm3, %v20022_v44, -inf  ;;  %v20028_v62 = vpop.f32.mrb[21].mxu0 }
 0x2b1   : > { %2554 = vmax.xlane.f32.xlu0 %v2553_v36  ;;  %v2559_v33 = vsel %vm2534_vm3, %v20028_v62, -inf }
 0x2b2   : > { %2563 = vmax.xlane.f32.xlu1 %v2562_v48 }
 0x2b3   : > { %v20030_v41 = vpop.f32.mrb[52].mxu1 }
 0x2b4   : > { %v2568_v10 = vsel %vm2534_vm3, %v20030_v41, -inf  ;;  %v20034_v28 = vpop.f32.mrb[53].mxu1 }
 0x2b5   : > { %2569 = vmax.xlane.f32.xlu0 %v2568_v10  ;;  %v2565_v35 = vsel %vm2534_vm3, %v20034_v28, -inf }
 0x2b6   : > { %2560 = vmax.xlane.f32.xlu1 %v2559_v33 }
 0x2b7   : > { %v20038_v14 = vpop.f32.mrb[22].mxu0 }
 0x2b8   : > { %v2574_v36 = vsel %vm2534_vm3, %v20038_v14, -inf  ;;  %v20044_v48 = vpop.f32.mrb[23].mxu0 }
 0x2b9   : > { %2566 = vmax.xlane.f32.xlu0 %v2565_v35  ;;  %v2571_v33 = vsel %vm2534_vm3, %v20044_v48, -inf }
 0x2ba   : > { %2575 = vmax.xlane.f32.xlu1 %v2574_v36 }
 0x2bb   : > { %v20046_v17 = vpop.f32.mrb[54].mxu1 }
 0x2bc   : > { %v2580_v10 = vsel %vm2534_vm3, %v20046_v17, -inf  ;;  %v20050_v25 = vpop.f32.mrb[55].mxu1 }
 0x2bd   : > { %2581 = vmax.xlane.f32.xlu0 %v2580_v10  ;;  %v2577_v35 = vsel %vm2534_vm3, %v20050_v25, -inf }
 0x2be   : > { %2572 = vmax.xlane.f32.xlu1 %v2571_v33 }
 0x2bf   : > { %v20054_v0 = vpop.f32.mrb[24].mxu0 }
 0x2c0   : > { %v20056_v20 = vpop.f32.mrb[25].mxu0  ;;  %v2586_v36 = vsel %vm2534_vm3, %v20054_v0, -inf }
 0x2c1   : > { %2578 = vmax.xlane.f32.xlu0 %v2577_v35  ;;  %v2583_v33 = vsel %vm2534_vm3, %v20056_v20, -inf }
 0x2c2   : > { %2587 = vmax.xlane.f32.xlu1 %v2586_v36 }
 0x2c3   : > { %v20062_v60 = vpop.f32.mrb[56].mxu1 }
 0x2c4   : > { %v20064_v45 = vpop.f32.mrb[57].mxu1  ;;  %v2592_v10 = vsel %vm2534_vm3, %v20062_v60, -inf }
 0x2c5   : > { %2593 = vmax.xlane.f32.xlu0 %v2592_v10  ;;  %v2589_v35 = vsel %vm2534_vm3, %v20064_v45, -inf }
 0x2c6   : > { %2584 = vmax.xlane.f32.xlu1 %v2583_v33 }
 0x2c7   : > { %v20070_v21 = vpop.f32.mrb[26].mxu0 }
 0x2c8   : > { %v20072_v2 = vpop.f32.mrb[27].mxu0  ;;  %v2598_v36 = vsel %vm2534_vm3, %v20070_v21, -inf }
 0x2c9   : > { %2590 = vmax.xlane.f32.xlu0 %v2589_v35  ;;  %v2595_v33 = vsel %vm2534_vm3, %v20072_v2, -inf }
 0x2ca   : > { %2599 = vmax.xlane.f32.xlu1 %v2598_v36 }
 0x2cb   : > { %v20078_v59 = vpop.f32.mrb[58].mxu1 }
 0x2cc   : > { %v20080_v53 = vpop.f32.mrb[59].mxu1  ;;  %v2604_v10 = vsel %vm2534_vm3, %v20078_v59, -inf }
 0x2cd   : > { %2605 = vmax.xlane.f32.xlu0 %v2604_v10  ;;  %v2601_v35 = vsel %vm2534_vm3, %v20080_v53, -inf }
 0x2ce   : > { %2596 = vmax.xlane.f32.xlu1 %v2595_v33 }
 0x2cf   : > { %v20086_v56 = vpop.f32.mrb[28].mxu0 }
 0x2d0   : > { %v20088_v57 = vpop.f32.mrb[29].mxu0  ;;  %v2610_v36 = vsel %vm2534_vm3, %v20086_v56, -inf }
 0x2d1   : > { %2602 = vmax.xlane.f32.xlu0 %v2601_v35  ;;  %v2607_v33 = vsel %vm2534_vm3, %v20088_v57, -inf }
 0x2d2   : > { %2611 = vmax.xlane.f32.xlu1 %v2610_v36 }
 0x2d3   : > { %v20094_v39 = vpop.f32.mrb[60].mxu1 }
 0x2d4   : > { %v20096_v51 = vpop.f32.mrb[61].mxu1  ;;  %v2616_v35 = vsel %vm2534_vm3, %v20094_v39, -inf }
 0x2d5   : > { %v2613_v10 = vsel %vm2534_vm3, %v20096_v51, -inf }
 0x2d6   : > { %2614 = vmax.xlane.f32.xlu0 %v2613_v10  ;;  %2608 = vmax.xlane.f32.xlu1 %v2607_v33 }
 0x2d7   : > { %v20102_v38 = vpop.f32.mrb[30].mxu0 }
 0x2d8   : > { %v20104_v34 = vpop.f32.mrb[31].mxu0  ;;  %v2622_v10 = vsel %vm2534_vm3, %v20102_v38, -inf }
 0x2d9   : > { %v2619_v36 = vsel %vm2534_vm3, %v20104_v34, -inf }
 0x2da   : > { %2617 = vmax.xlane.f32.xlu1 %v2616_v35  ;;  %2620 = vmax.xlane.f32.xlu0 %v2619_v36  ;;  %v20124_v35 = vpop.permute.xlu1 %17852 }
 0x2db   : > { %v20110_v40 = vpop.f32.mrb[62].mxu1  ;;  %23518 = vst [vmem:[#allocation76_spill] sm:$0xff] %v20124_v35 }
 0x2dc   : > { %v20112_v23 = vpop.f32.mrb[63].mxu1  ;;  %v2628_v29 = vsel %vm2534_vm3, %v20110_v40, -inf }
 0x2dd   : > { %v2625_v33 = vsel %vm2534_vm3, %v20112_v23, -inf }
 0x2de   : > { %2623 = vmax.xlane.f32.xlu1 %v2622_v10  ;;  %2626 = vmax.xlane.f32.xlu0 %v2625_v33  ;;  %v20126_v36 = vpop.permute.xlu1 %17867 }
 0x2df   : > { %23519 = vst [vmem:[#allocation77_spill] sm:$0xff] %v20126_v36 }
 0x2e2   : > { %2629 = vmax.xlane.f32.xlu1 %v2628_v29  ;;  %v20128_v11 = vpop.permute.xlu1 %17872  ;;  %v20138_v29 = vpop.permute.xlu0 %17862 }
 0x2e3   : > { %23520 = vst [vmem:[#allocation78_spill] sm:$0xff] %v20128_v11  ;;  %23525 = vst [vmem:[#allocation83_spill] sm:$0xff] %v20138_v29 }
 0x2e6   : > { %v20130_v19 = vpop.permute.xlu1 %17877  ;;  %v20142_v4 = vpop.permute.xlu0 %17882 }
 0x2e7   : > { %23521 = vst [vmem:[#allocation79_spill] sm:$0xff] %v20130_v19  ;;  %23527 = vst [vmem:[#allocation85_spill] sm:$0xff] %v20142_v4 }
 0x2ea   : > { %v20132_v32 = vpop.permute.xlu1 %17887  ;;  %v20146_v35 = vpop.permute.xlu0 %17892 }
 0x2eb   : > { %23522 = vst [vmem:[#allocation80_spill] sm:$0xff] %v20132_v32  ;;  %23529 = vst [vmem:[#allocation87_spill] sm:$0xff] %v20146_v35 }
 0x2ee   : > { %v20134_v10 = vpop.permute.xlu1 %17897  ;;  %v20150_v11 = vpop.permute.xlu0 %17927 }
 0x2ef   : > { %23523 = vst [vmem:[#allocation81_spill] sm:$0xff] %v20134_v10  ;;  %23531 = vst [vmem:[#allocation89_spill] sm:$0xff] %v20150_v11 }
 0x2f2   : > { %v20136_v33 = vpop.permute.xlu1 %17902 }
 0x2f3   : > { %17937 = vrot.lane.b32.xlu1 %v19824_v42, %s19129_s16  ;;  %23524 = vst [vmem:[#allocation82_spill] sm:$0xff] %v20136_v33 }
 0x2f6   : > { %v20140_v58 = vpop.permute.xlu1 %17907 }
 0x2f7   : > { %23526 = vst [vmem:[#allocation84_spill] sm:$0xff] %v20140_v58 }
 0x2fa   : > { %v20144_v42 = vpop.permute.xlu1 %17912 }
 0x2fb   : > { %23528 = vst [vmem:[#allocation86_spill] sm:$0xff] %v20144_v42 }
 0x2fe   : > { %v20148_v36 = vpop.permute.xlu1 %17917 }
 0x2ff   : > { %23530 = vst [vmem:[#allocation88_spill] sm:$0xff] %v20148_v36 }
 0x302   : > { %v20152_v19 = vpop.permute.xlu1 %17922 }
 0x303   : > { %23532 = vst [vmem:[#allocation90_spill] sm:$0xff] %v20152_v19 }
 0x306   : > { %v20154_v10 = vpop.permute.xlu1 %17932 }
 0x307   : > { %23533 = vst [vmem:[#allocation91_spill] sm:$0xff] %v20154_v10 }
 0x32e   : > { %v2540_v32 = vpop.xlane.xlu0 %2539 }
 0x32f   : > { %v2632_v33 = vsub.f32 %v19992_v12, %v2540_v32 }
 0x331   : > { %v2665_v29 = vmul.f32 1.442695, %v2632_v33 }
 0x332   : > { %v2537_v6 = vpop.xlane.xlu0 %2536 }
 0x333   : > { %18386 = vpow2.f32 %v2665_v29  ;;  %v2631_v4 = vsub.f32 %v19996_v46, %v2537_v6  ;;  %v2543_v58 = vpop.xlane.xlu1 %2542 }
 0x334   : > { %v2633_v35 = vsub.f32 %v20000_v30, %v2543_v58 }
 0x335   : > { %v2663_v42 = vmul.f32 1.442695, %v2631_v4 }
 0x336   : > { %v2546_v26 = vpop.xlane.xlu0 %2545  ;;  %v2667_v63 = vmul.f32 1.442695, %v2633_v35 }
 0x337   : > { %18388 = vpow2.f32 %v2663_v42  ;;  %v2634_v11 = vsub.f32 %v19998_v7, %v2546_v26  ;;  %v2552_v36 = vpop.xlane.xlu1 %2551 }
 0x338   : > { %v2636_v19 = vsub.f32 %v20006_v18, %v2552_v36 }
 0x339   : > { %v2669_v10 = vmul.f32 1.442695, %v2634_v11 }
 0x33a   : > { %v2673_v37 = vmul.f32 1.442695, %v2636_v19  ;;  %v2558_v32 = vpop.xlane.xlu0 %2557 }
 0x33b   : > { %18390 = vpow2.f32 %v2669_v10  ;;  %v2638_v12 = vsub.f32 %v20014_v3, %v2558_v32  ;;  %v2549_v33 = vpop.xlane.xlu1 %2548 }
 0x33c   : > { %18392 = vpow2.f32 %v2673_v37  ;;  %v2635_v4 = vsub.f32 %v20012_v1, %v2549_v33 }
 0x33d   : > { %v20163_v6 = vpop.eup %18386  ;;  %18394 = vpow2.f32 %v2667_v63  ;;  %v2677_v42 = vmul.f32 1.442695, %v2638_v12 }
 0x33e   : > { %v2671_v58 = vmul.f32 1.442695, %v2635_v4  ;;  %v2555_v26 = vpop.xlane.xlu0 %2554  ;;  %v2730_v46 = vsel %vm2534_vm3, %v20163_v6, 0.0 }
 0x33f   : > { %v2637_v11 = vsub.f32 %v20018_v24, %v2555_v26  ;;  %v2564_v19 = vpop.xlane.xlu1 %2563  ;;  %2731 = vadd.xlane.f32.xlu1 %v2730_v46 }
 0x340   : > { %18396 = vpow2.f32 %v2671_v58  ;;  %v2640_v7 = vsub.f32 %v20022_v44, %v2564_v19 }
 0x341   : > { %v20169_v30 = vpop.eup %18388  ;;  %18398 = vpow2.f32 %v2677_v42  ;;  %v2675_v37 = vmul.f32 1.442695, %v2637_v11 }
 0x342   : > { %v2681_v18 = vmul.f32 1.442695, %v2640_v7  ;;  %v2570_v1 = vpop.xlane.xlu0 %2569  ;;  %v2727_v63 = vsel %vm2534_vm3, %v20169_v30, 0.0 }
 0x343   : > { %v2642_v3 = vsub.f32 %v20030_v41, %v2570_v1  ;;  %v2561_v35 = vpop.xlane.xlu1 %2560  ;;  %2728 = vadd.xlane.f32.xlu0 %v2727_v63 }
 0x344   : > { %18400 = vpow2.f32 %v2681_v18  ;;  %v2639_v24 = vsub.f32 %v20028_v62, %v2561_v35 }
 0x345   : > { %v20175_v36 = vpop.eup %18390  ;;  %18402 = vpow2.f32 %v2675_v37  ;;  %v2685_v44 = vmul.f32 1.442695, %v2642_v3 }
 0x346   : > { %v20177_v10 = vpop.eup %18392  ;;  %v2679_v29 = vmul.f32 1.442695, %v2639_v24  ;;  %v2567_v32 = vpop.xlane.xlu0 %2566  ;;  %v2736_v12 = vsel %vm2534_vm3, %v20175_v36, 0.0 }
 0x347   : > { %v20181_v33 = vpop.eup %18394  ;;  %v2641_v41 = vsub.f32 %v20034_v28, %v2567_v32  ;;  %v2576_v4 = vpop.xlane.xlu1 %2575  ;;  %2737 = vadd.xlane.f32.xlu0 %v2736_v12  ;;  %v2742_v62 = vsel %vm2534_vm3, %v20177_v10, 0.0 }
 0x348   : > { %18404 = vpow2.f32 %v2679_v29  ;;  %v2644_v42 = vsub.f32 %v20038_v14, %v2576_v4  ;;  %2743 = vadd.xlane.f32.xlu1 %v2742_v62  ;;  %v2733_v19 = vsel %vm2534_vm3, %v20181_v33, 0.0 }
 0x349   : > { %18406 = vpow2.f32 %v2685_v44  ;;  %v2683_v58 = vmul.f32 1.442695, %v2641_v41 }
 0x34a   : > { %v20187_v26 = vpop.eup %18396  ;;  %v2689_v46 = vmul.f32 1.442695, %v2644_v42  ;;  %v2582_v11 = vpop.xlane.xlu0 %2581 }
 0x34b   : > { %v20191_v7 = vpop.eup %18398  ;;  %v2646_v28 = vsub.f32 %v20046_v17, %v2582_v11  ;;  %v2573_v37 = vpop.xlane.xlu1 %2572  ;;  %2734 = vadd.xlane.f32.xlu0 %v2733_v19  ;;  %v2739_v18 = vsel %vm2534_vm3, %v20187_v26, 0.0 }
 0x34c   : > { %18408 = vpow2.f32 %v2689_v46  ;;  %v2643_v14 = vsub.f32 %v20044_v48, %v2573_v37  ;;  %2740 = vadd.xlane.f32.xlu1 %v2739_v18  ;;  %v2748_v24 = vsel %vm2534_vm3, %v20191_v7, 0.0 }
 0x34d   : > { %18410 = vpow2.f32 %v2683_v58  ;;  %v2693_v1 = vmul.f32 1.442695, %v2646_v28 }
 0x34e   : > { %v20197_v63 = vpop.eup %18400  ;;  %v2687_v3 = vmul.f32 1.442695, %v2643_v14  ;;  %v2579_v35 = vpop.xlane.xlu0 %2578 }
 0x34f   : > { %v20201_v44 = vpop.eup %18402  ;;  %v2645_v17 = vsub.f32 %v20050_v25, %v2579_v35  ;;  %v2588_v29 = vpop.xlane.xlu1 %2587  ;;  %2749 = vadd.xlane.f32.xlu0 %v2748_v24  ;;  %v2754_v32 = vsel %vm2534_vm3, %v20197_v63, 0.0 }
 0x350   : > { %18412 = vpow2.f32 %v2687_v3  ;;  %v2648_v48 = vsub.f32 %v20054_v0, %v2588_v29  ;;  %2755 = vadd.xlane.f32.xlu1 %v2754_v32  ;;  %v2745_v42 = vsel %vm2534_vm3, %v20201_v44, 0.0 }
 0x351   : > { %18414 = vpow2.f32 %v2693_v1  ;;  %v2691_v12 = vmul.f32 1.442695, %v2645_v17 }
 0x352   : > { %v20207_v41 = vpop.eup %18404  ;;  %v2697_v4 = vmul.f32 1.442695, %v2648_v48  ;;  %v2594_v62 = vpop.xlane.xlu0 %2593 }
 0x353   : > { %v20211_v58 = vpop.eup %18406  ;;  %v2650_v25 = vsub.f32 %v20062_v60, %v2594_v62  ;;  %v2585_v46 = vpop.xlane.xlu1 %2584  ;;  %2746 = vadd.xlane.f32.xlu0 %v2745_v42  ;;  %v2751_v11 = vsel %vm2534_vm3, %v20207_v41, 0.0 }
 0x354   : > { %18416 = vpow2.f32 %v2697_v4  ;;  %v2647_v0 = vsub.f32 %v20056_v20, %v2585_v46  ;;  %2752 = vadd.xlane.f32.xlu1 %v2751_v11  ;;  %v2760_v14 = vsel %vm2534_vm3, %v20211_v58, 0.0 }
 0x355   : > { %18418 = vpow2.f32 %v2691_v12  ;;  %v2701_v19 = vmul.f32 1.442695, %v2650_v25 }
 0x356   : > { %v20217_v28 = vpop.eup %18408  ;;  %v2695_v37 = vmul.f32 1.442695, %v2647_v0  ;;  %v2591_v18 = vpop.xlane.xlu0 %2590 }
 0x357   : > { %v20221_v1 = vpop.eup %18410  ;;  %v2649_v60 = vsub.f32 %v20064_v45, %v2591_v18  ;;  %v2600_v3 = vpop.xlane.xlu1 %2599  ;;  %2761 = vadd.xlane.f32.xlu0 %v2760_v14  ;;  %v2766_v35 = vsel %vm2534_vm3, %v20217_v28, 0.0 }
 0x358   : > { %18420 = vpow2.f32 %v2695_v37  ;;  %v2652_v20 = vsub.f32 %v20070_v21, %v2600_v3  ;;  %2767 = vadd.xlane.f32.xlu1 %v2766_v35  ;;  %v2757_v48 = vsel %vm2534_vm3, %v20221_v1, 0.0 }
 0x359   : > { %18422 = vpow2.f32 %v2701_v19  ;;  %v2699_v24 = vmul.f32 1.442695, %v2649_v60 }
 0x35a   : > { %v20227_v17 = vpop.eup %18412  ;;  %v2705_v29 = vmul.f32 1.442695, %v2652_v20  ;;  %v2606_v32 = vpop.xlane.xlu0 %2605 }
 0x35b   : > { %v20231_v12 = vpop.eup %18414  ;;  %v2654_v45 = vsub.f32 %v20078_v59, %v2606_v32  ;;  %v2597_v4 = vpop.xlane.xlu1 %2596  ;;  %2758 = vadd.xlane.f32.xlu0 %v2757_v48  ;;  %v2763_v62 = vsel %vm2534_vm3, %v20227_v17, 0.0 }
 0x35c   : > { %18424 = vpow2.f32 %v2705_v29  ;;  %v2651_v21 = vsub.f32 %v20072_v2, %v2597_v4  ;;  %2764 = vadd.xlane.f32.xlu1 %v2763_v62  ;;  %v2772_v0 = vsel %vm2534_vm3, %v20231_v12, 0.0 }
 0x35d   : > { %18426 = vpow2.f32 %v2699_v24  ;;  %v2709_v25 = vmul.f32 1.442695, %v2654_v45 }
 0x35e   : > { %v20237_v42 = vpop.eup %18416  ;;  %v2703_v46 = vmul.f32 1.442695, %v2651_v21  ;;  %v2603_v11 = vpop.xlane.xlu0 %2602 }
 0x35f   : > { %v20241_v19 = vpop.eup %18418  ;;  %v2653_v59 = vsub.f32 %v20080_v53, %v2603_v11  ;;  %v2612_v37 = vpop.xlane.xlu1 %2611  ;;  %2773 = vadd.xlane.f32.xlu0 %v2772_v0  ;;  %v2778_v18 = vsel %vm2534_vm3, %v20237_v42, 0.0 }
 0x360   : > { %18428 = vpow2.f32 %v2703_v46  ;;  %2779 = vadd.xlane.f32.xlu1 %v2778_v18  ;;  %v2656_v60 = vsub.f32 %v20086_v56, %v2612_v37  ;;  %v2769_v3 = vsel %vm2534_vm3, %v20241_v19, 0.0 }
 0x361   : > { %18430 = vpow2.f32 %v2709_v25  ;;  %v2707_v14 = vmul.f32 1.442695, %v2653_v59 }
 0x362   : > { %v20246_v2 = vpop.eup %18420  ;;  %v2713_v29 = vmul.f32 1.442695, %v2656_v60 }
 0x363   : > { %v20251_v35 = vpop.eup %18422  ;;  %v2609_v20 = vpop.xlane.xlu1 %2608  ;;  %2770 = vadd.xlane.f32.xlu0 %v2769_v3  ;;  %v2775_v53 = vsel %vm2534_vm3, %v20246_v2, 0.0  ;;  %18432 = vpow2.f32 %v2707_v14 }
 0x364   : > { %2776 = vadd.xlane.f32.xlu1 %v2775_v53  ;;  %v2655_v32 = vsub.f32 %v20088_v57, %v2609_v20  ;;  %v2784_v56 = vsel %vm2534_vm3, %v20251_v35, 0.0  ;;  %18434 = vpow2.f32 %v2713_v29 }
 0x366   : > { %v20255_v24 = vpop.eup %18424  ;;  %v2711_v21 = vmul.f32 1.442695, %v2655_v32 }
 0x367   : > { %v20260_v48 = vpop.eup %18426  ;;  %v2618_v45 = vpop.xlane.xlu1 %2617  ;;  %2785 = vadd.xlane.f32.xlu0 %v2784_v56  ;;  %v2790_v4 = vsel %vm2534_vm3, %v20255_v24, 0.0 }
 0x368   : > { %2791 = vadd.xlane.f32.xlu1 %v2790_v4  ;;  %v2658_v25 = vsub.f32 %v20094_v39, %v2618_v45  ;;  %v2781_v57 = vsel %vm2534_vm3, %v20260_v48, 0.0  ;;  %18436 = vpow2.f32 %v2711_v21  ;;  %v2615_v4 = vpop.xlane.xlu0 %2614 }
 0x369   : > { %v2657_v21 = vsub.f32 %v20096_v51, %v2615_v4 }
 0x36a   : > { %v20264_v62 = vpop.eup %18428  ;;  %v2717_v59 = vmul.f32 1.442695, %v2658_v25 }
 0x36b   : > { %v2624_v46 = vpop.xlane.xlu1 %2623  ;;  %2782 = vadd.xlane.f32.xlu0 %v2781_v57  ;;  %v2787_v11 = vsel %vm2534_vm3, %v20264_v62, 0.0  ;;  %v20271_v0 = vpop.eup %18430  ;;  %v2715_v57 = vmul.f32 1.442695, %v2657_v21 }
 0x36c   : > { %2788 = vadd.xlane.f32.xlu1 %v2787_v11  ;;  %v2660_v37 = vsub.f32 %v20102_v38, %v2624_v46  ;;  %v2796_v18 = vsel %vm2534_vm3, %v20271_v0, 0.0  ;;  %18438 = vpow2.f32 %v2717_v59  ;;  %v2621_v25 = vpop.xlane.xlu0 %2620 }
 0x36d   : > { %v20276_v14 = vpop.eup %18432  ;;  %v2659_v46 = vsub.f32 %v20104_v34, %v2621_v25  ;;  %v23534_v25 = vld [vmem:[#allocation58_spill] sm:$0xff] }
 0x36e   : > { %v2721_v39 = vmul.f32 1.442695, %v2660_v37  ;;  %v2793_v60 = vsel %vm2534_vm3, %v20276_v14, 0.0  ;;  %v20280_v3 = vpop.eup %18434 }
 0x36f   : > { %v2802_v20 = vsel %vm2534_vm3, %v20280_v3, 0.0  ;;  %v2630_v11 = vpop.xlane.xlu1 %2629  ;;  %v2719_v59 = vmul.f32 1.442695, %v2659_v46  ;;  %v23535_v46 = vld [vmem:[#allocation42_spill] sm:$0xff] }
 0x370   : > { %2797 = vadd.xlane.f32.xlu1 %v2796_v18  ;;  %18440 = vpow2.f32 %v2721_v39  ;;  %v2662_v37 = vsub.f32 %v20110_v40, %v2630_v11  ;;  %v2627_v18 = vpop.xlane.xlu0 %2626  ;;  %v23536_v11 = vld [vmem:[#allocation60_spill] sm:$0xff] }
 0x371   : > { %18442 = vpow2.f32 %v2715_v57  ;;  %v2661_v39 = vsub.f32 %v20112_v23, %v2627_v18  ;;  %v23538_v18 = vld [vmem:[#allocation44_spill] sm:$0xff] }
 0x372   : > { %v20284_v53 = vpop.eup %18436  ;;  %18444 = vpow2.f32 %v2719_v59 }
 0x373   : > { %v2799_v38 = vsel %vm2534_vm3, %v20284_v53, 0.0  ;;  %v2723_v51 = vmul.f32 1.442695, %v2661_v39  ;;  %v20348_v21 = vpop.permute.xlu1 %17937 }
 0x374   : > { %2794 = vadd.xlane.f32.xlu1 %v2793_v60  ;;  %v2725_v60 = vmul.f32 1.442695, %v2662_v37  ;;  %v23537_v37 = vld [vmem:[#allocation45_spill] sm:$0xff] }
 0x376   : > { %v20288_v29 = vpop.eup %18438  ;;  %18446 = vpow2.f32 %v2725_v60  ;;  %v23539_v60 = vld [vmem:[#allocation49_spill] sm:$0xff] }
 0x377   : > { %v2808_v32 = vsel %vm2534_vm3, %v20288_v29, 0.0  ;;  %18448 = vpow2.f32 %v2723_v51 }
 0x378   : > { %2803 = vadd.xlane.f32.xlu1 %v2802_v20 }
 0x37a   : > { %v20292_v56 = vpop.eup %18440 }
 0x37b   : > { %v2814_v45 = vsel %vm2534_vm3, %v20292_v56, 0.0  ;;  %v20306_v20 = vpop.eup %18442 }
 0x37c   : > { %2800 = vadd.xlane.f32.xlu1 %v2799_v38  ;;  %v2805_v34 = vsel %vm2534_vm3, %v20306_v20, 0.0  ;;  %v20312_v40 = vpop.eup %18444 }
 0x37d   : > { %v2811_v23 = vsel %vm2534_vm3, %v20312_v40, 0.0 }
 0x380   : > { %2809 = vadd.xlane.f32.xlu1 %v2808_v32  ;;  %v20318_v38 = vpop.eup %18446 }
 0x381   : > { %4643 = vrot.lane.b32.xlu0 %v19770_v5, %s19129_s16  ;;  %v2820_v32 = vsel %vm2534_vm3, %v20318_v38, 0.0 }
 0x384   : > { %2815 = vadd.xlane.f32.xlu1 %v2814_v45  ;;  %v20324_v45 = vpop.eup %18448 }
 0x385   : > { %v2817_v4 = vsel %vm2534_vm3, %v20324_v45, 0.0 }
 0x395   : > { %4645 = vrot.lane.b32.xlu1 %v19788_v49, %s19129_s16 }
 0x399   : > { %4734 = vrot.lane.b32.xlu1 %v19792_v22, %s19129_s16 }
 0x39d   : > { %17947 = vrot.lane.b32.xlu1 %v19854_v9, %s19129_s16 }
 0x3a0   : > { %2806 = vadd.xlane.f32.xlu0 %v2805_v34  ;;  %v23540_v34 = vld [vmem:[#allocation22_spill] sm:$0xff] }
 0x3a1   : > { %4827 = vrot.lane.b32.xlu1 %v19686_v61, %s19129_s16 }
 0x3a4   : > { %2812 = vadd.xlane.f32.xlu0 %v2811_v23 }
 0x3a5   : > { %4916 = vrot.lane.b32.xlu1 %v19708_v8, %s19129_s16 }
 0x3a8   : > { %2821 = vadd.xlane.f32.xlu0 %v2820_v32  ;;  %v23541_v32 = vld [vmem:[#allocation53_spill] sm:$0xff] }
 0x3a9   : > { %17957 = vrot.lane.b32.xlu1 %v19882_v52, %s19129_s16 }
 0x3ac   : > { %2818 = vadd.xlane.f32.xlu0 %v2817_v4 }
 0x3ad   : > { %5009 = vrot.lane.b32.xlu1 %v19595_v15, %s19129_s16 }
 0x3b1   : > { %5098 = vrot.lane.b32.xlu1 %v19617_v27, %s19129_s16  ;;  %v23545_v27 = vld [vmem:[#allocation24_spill] sm:$0xff] }
 0x3b5   : > { %17967 = vrot.lane.b32.xlu1 %v19910_v16, %s19129_s16 }
 0x3b9   : > { %5191 = vrot.lane.b32.xlu1 %v19629_v31, %s19129_s16 }
 0x3bd   : > { %5280 = vrot.lane.b32.xlu1 %v19651_v43, %s19129_s16 }
 0x3c1   : > { %5371 = vrot.lane.b32.xlu1 %v19668_v50, %s19129_s16 }
 0x3c2   : > { %17942 = vrot.lane.b32.xlu0 %v19838_v54, %s19129_s16 }
 0x3c5   : > { %5373 = vrot.lane.b32.xlu1 %v19663_v47, %s19129_s16 }
 0x3c6   : > { %4736 = vrot.lane.b32.xlu0 %v19812_v55, %s19129_s16 }
 0x3c9   : > { %17982 = vrot.lane.b32.xlu1 %v19952_v13, %s19129_s16 }
 0x3ca   : > { %4825 = vrot.lane.b32.xlu0 %v23534_v25, %s19129_s16 }
 0x3cc   : > { %v2732_v57 = vpop.xlane.xlu1 %2731 }
 0x3cd   : > { %5553 = vrot.lane.b32.xlu1 %v23535_v46, %s19129_s16  ;;  %18450 = vrcp.f32 %v2732_v57  ;;  %v23543_v46 = vld [vmem:[#allocation77_spill] sm:$0xff] }
 0x3ce   : > { %17952 = vrot.lane.b32.xlu0 %v23536_v11, %s19129_s16  ;;  %v17870_v47 = vunpack.i.h.bf16 %v23543_v46  ;;  %v17869_v50 = vunpack.i.l.bf16 %v23543_v46  ;;  %v23546_v46 = vld [vmem:[#allocation73_spill] sm:$0xff] }
 0x3d0   : > { %v2729_v59 = vpop.xlane.xlu0 %2728 }
 0x3d1   : > { %18452 = vrcp.f32 %v2729_v59  ;;  %5644 = vrot.lane.b32.xlu1 %v23537_v37, %s19129_s16  ;;  %v23542_v59 = vld [vmem:[#allocation61_spill] sm:$0xff] }
 0x3d2   : > { %4918 = vrot.lane.b32.xlu0 %v23538_v18, %s19129_s16  ;;  %v23551_v18 = vld [vmem:[#allocation62_spill] sm:$0xff] }
 0x3d4   : > { %v2738_v39 = vpop.xlane.xlu0 %2737 }
 0x3d5   : > { %17992 = vrot.lane.b32.xlu1 %v23539_v60, %s19131_s21  ;;  %v2744_v51 = vpop.xlane.xlu1 %2743  ;;  %18454 = vrcp.f32 %v2738_v39 }
 0x3d6   : > { %5007 = vrot.lane.b32.xlu0 %v23540_v34, %s19129_s16  ;;  %18456 = vrcp.f32 %v2744_v51  ;;  %v23544_v51 = vld [vmem:[#allocation56_spill] sm:$0xff] }
 0x3d7   : > { %v18451_v57 = vpop.eup %18450 }
 0x3d8   : > { %v2735_v23 = vpop.xlane.xlu0 %2734  ;;  %v2856_v31 = vmul.f32 %v18451_v57, %v20163_v6 }
 0x3d9   : > { %18458 = vrcp.f32 %v2735_v23  ;;  %18007 = vrot.lane.b32.xlu1 %v23541_v32, %s19131_s21  ;;  %v2741_v4 = vpop.xlane.xlu1 %2740 }
 0x3da   : > { %18460 = vrcp.f32 %v2741_v4  ;;  %17962 = vrot.lane.b32.xlu0 %v23542_v59, %s19129_s16  ;;  %v17191_v4 = vpack.c.bf16 %v17870_v47, %v17869_v50 }
 0x3db   : > { %v18453_v37 = vpop.eup %18452 }
 0x3dc   : > { %v2750_v43 = vpop.xlane.xlu0 %2749  ;;  %v2855_v39 = vmul.f32 %v18453_v37, %v20169_v30  ;;  %v23547_v37 = vld [vmem:[#allocation59_spill] sm:$0xff] }
 0x3dd   : > { %18012 = vrot.lane.b32.xlu1 %v23544_v51, %s19131_s21  ;;  %v2756_v23 = vpop.xlane.xlu1 %2755  ;;  %18462 = vrcp.f32 %v2750_v43 }
 0x3de   : > { %5100 = vrot.lane.b32.xlu0 %v23545_v27, %s19129_s16  ;;  %16227 = vmatprep.mubr.msk.f32.mxu0 %vm2534_vm3, %v2855_v39  ;;  %18464 = vrcp.f32 %v2756_v23  ;;  %v23548_v27 = vld [vmem:[#allocation29_spill] sm:$0xff]  ;;  %v23549_v39 = vld [vmem:[#allocation79_spill] sm:$0xff]  ;;  %v23550_v23 = vld [vmem:[#allocation80_spill] sm:$0xff] }
 0x3df   : > { %16228 = vmatmul.mubr.msk.f32.vlgmr.msra.gmra.mrb[32].mxu0 %vm2534_vm3, %v2856_v31  ;;  %v18455_v30 = vpop.eup %18454  ;;  %v17880_v31 = vunpack.i.h.bf16 %v23549_v39  ;;  %v17879_v47 = vunpack.i.l.bf16 %v23549_v39  ;;  %v17889_v8 = vunpack.i.l.bf16 %v23550_v23 }
 0x3e0   : > { %17186 = vmatpush3.bf16.msra.mxu0 %v23546_v46  ;;  %v2747_v15 = vpop.xlane.xlu0 %2746  ;;  %v18457_v57 = vpop.eup %18456  ;;  %v17890_v46 = vunpack.i.h.bf16 %v23550_v23  ;;  %v2858_v61 = vmul.f32 %v18455_v30, %v20175_v36  ;;  %v23555_v23 = vld [vmem:[#allocation81_spill] sm:$0xff] }
 0x3e1   : > { %17192 = vmatprep.subr.bf16.mxu0 %v17191_v4  ;;  %18466 = vrcp.f32 %v2747_v15  ;;  %18017 = vrot.lane.b32.xlu1 %v23547_v37, %s19131_s21  ;;  %v2753_v6 = vpop.xlane.xlu1 %2752  ;;  %v2860_v39 = vmul.f32 %v18457_v57, %v20177_v10 }
 0x3e2   : > { %18468 = vrcp.f32 %v2753_v6  ;;  %5189 = vrot.lane.b32.xlu0 %v23548_v27, %s19129_s16 }
 0x3e3   : > { %v18459_v43 = vpop.eup %18458 }
 0x3e4   : > { %v18461_v50 = vpop.eup %18460  ;;  %v2762_v15 = vpop.xlane.xlu0 %2761  ;;  %v2857_v34 = vmul.f32 %v18459_v43, %v20181_v33  ;;  %v17195_v33 = vpack.c.bf16 %v17880_v31, %v17879_v47  ;;  %v23552_v43 = vld [vmem:[#allocation74_spill] sm:$0xff]  ;;  %v23554_v31 = vld [vmem:[#allocation32_spill] sm:$0xff] }
 0x3e5   : > { %18027 = vrot.lane.b32.xlu1 %v19854_v9, %s19131_s21  ;;  %v2768_v6 = vpop.xlane.xlu1 %2767  ;;  %v2859_v27 = vmul.f32 %v18461_v50, %v20187_v26  ;;  %18470 = vrcp.f32 %v2762_v15  ;;  %v17199_v26 = vpack.c.bf16 %v17890_v46, %v17889_v8  ;;  %v17900_v46 = vunpack.i.h.bf16 %v23555_v23 }
 0x3e6   : > { %17972 = vrot.lane.b32.xlu0 %v23551_v18, %s19129_s16  ;;  %16234 = vmatprep.mubr.msk.f32.mxu1 %vm2534_vm3, %v2857_v34  ;;  %18472 = vrcp.f32 %v2768_v6  ;;  %v17899_v15 = vunpack.i.l.bf16 %v23555_v23  ;;  %v23559_v23 = vld [vmem:[#allocation84_spill] sm:$0xff] }
 0x3e7   : > { %16235 = vmatmul.mubr.msk.f32.vlgmr.msra.gmra.mrb[64].mxu1 %vm2534_vm3, %v2858_v61  ;;  %16241 = vmatprep.mubr.msk.f32.mxu0 %vm2534_vm3, %v2859_v27  ;;  %v18463_v30 = vpop.eup %18462  ;;  %v23553_v61 = vld [vmem:[#allocation87_spill] sm:$0xff] }
 0x3e8   : > { %17190 = vmatpush3.bf16.msra.mxu1 %v23552_v43  ;;  %16242 = vmatmul.mubr.msk.f32.vlgmr.msra.gmra.mrb[34].mxu0 %vm2534_vm3, %v2860_v39  ;;  %v2759_v36 = vpop.xlane.xlu0 %2758  ;;  %v18465_v50 = vpop.eup %18464  ;;  %v17895_v10 = vunpack.i.h.bf16 %v23553_v61  ;;  %v17894_v57 = vunpack.i.l.bf16 %v23553_v61  ;;  %v2862_v39 = vmul.f32 %v18463_v30, %v20191_v7 }
 0x3e9   : > { %17194 = vmatpush3.bf16.msra.mxu0 %v17191_v4  ;;  %17196 = vmatprep.subr.bf16.mxu1 %v17195_v33  ;;  %18474 = vrcp.f32 %v2759_v36  ;;  %v2765_v34 = vpop.xlane.xlu1 %2764  ;;  %v23556_v36 = vld [vmem:[#allocation63_spill] sm:$0xff] }
 0x3ea   : > { %18032 = vrot.lane.b32.xlu1 %v23536_v11, %s19131_s21  ;;  %18476 = vrcp.f32 %v2765_v34  ;;  %17200 = vmatprep.subr.bf16.mxu0 %v17199_v26  ;;  %v17203_v34 = vpack.c.bf16 %v17895_v10, %v17894_v57 }
 0x3eb   : > { %v18467_v27 = vpop.eup %18466  ;;  %5282 = vrot.lane.b32.xlu0 %v23554_v31, %s19129_s16 }
 0x3ec   : > { %v18469_v8 = vpop.eup %18468  ;;  %v2774_v47 = vpop.xlane.xlu0 %2773  ;;  %v2861_v4 = vmul.f32 %v18467_v27, %v20201_v44  ;;  %v2864_v44 = vmul.f32 %v18465_v50, %v20197_v63  ;;  %v17207_v27 = vpack.c.bf16 %v17900_v46, %v17899_v15  ;;  %v23557_v50 = vld [vmem:[#allocation82_spill] sm:$0xff]  ;;  %v17910_v46 = vunpack.i.h.bf16 %v23559_v23 }
 0x3ed   : > { %v2780_v6 = vpop.xlane.xlu1 %2779  ;;  %v2863_v43 = vmul.f32 %v18469_v8, %v20207_v41  ;;  %18478 = vrcp.f32 %v2774_v47  ;;  %v17905_v10 = vunpack.i.h.bf16 %v23557_v50  ;;  %v17904_v57 = vunpack.i.l.bf16 %v23557_v50 }
 0x3ee   : > { %18037 = vrot.lane.b32.xlu1 %v19882_v52, %s19131_s21  ;;  %16248 = vmatprep.mubr.msk.f32.mxu1 %vm2534_vm3, %v2861_v4  ;;  %18480 = vrcp.f32 %v2780_v6 }
 0x3ef   : > { %17977 = vrot.lane.b32.xlu0 %v23556_v36, %s19129_s16  ;;  %16249 = vmatmul.mubr.msk.f32.vlgmr.msra.gmra.mrb[66].mxu1 %vm2534_vm3, %v2862_v39  ;;  %v18471_v41 = vpop.eup %18470 }
 0x3f0   : > { %16255 = vmatprep.mubr.msk.f32.mxu0 %vm2534_vm3, %v2863_v43  ;;  %17198 = vmatpush3.bf16.msra.mxu1 %v17195_v33  ;;  %v2771_v7 = vpop.xlane.xlu0 %2770  ;;  %v18473_v61 = vpop.eup %18472  ;;  %v23558_v33 = vld [vmem:[#allocation39_spill] sm:$0xff]  ;;  %v2866_v6 = vmul.f32 %v18471_v41, %v20211_v58  ;;  %v23560_v43 = vld [vmem:[#allocation38_spill] sm:$0xff] }
 0x3f1   : > { %16256 = vmatmul.mubr.msk.f32.vlgmr.msra.gmra.mrb[36].mxu0 %vm2534_vm3, %v2864_v44  ;;  %17204 = vmatprep.subr.bf16.mxu1 %v17203_v34  ;;  %18482 = vrcp.f32 %v2771_v7  ;;  %v2777_v30 = vpop.xlane.xlu1 %2776  ;;  %v17211_v44 = vpack.c.bf16 %v17905_v10, %v17904_v57 }
 0x3f2   : > { %17202 = vmatpush3.bf16.msra.mxu0 %v17199_v26  ;;  %18042 = vrot.lane.b32.xlu1 %v23542_v59, %s19131_s21  ;;  %18484 = vrcp.f32 %v2777_v30  ;;  %v17909_v26 = vunpack.i.l.bf16 %v23559_v23 }
 0x3f3   : > { %v18475_v63 = vpop.eup %18474  ;;  %17208 = vmatprep.subr.bf16.mxu0 %v17207_v27  ;;  %5462 = vrot.lane.b32.xlu0 %v23558_v33, %s19129_s16 }
 0x3f4   : > { %v18477_v8 = vpop.eup %18476  ;;  %v2786_v47 = vpop.xlane.xlu0 %2785  ;;  %v2865_v4 = vmul.f32 %v18475_v63, %v20221_v1  ;;  %v2868_v1 = vmul.f32 %v18473_v61, %v20217_v28  ;;  %v17215_v41 = vpack.c.bf16 %v17910_v46, %v17909_v26  ;;  %v23561_v61 = vld [vmem:[#allocation86_spill] sm:$0xff]  ;;  %v23564_v26 = vld [vmem:[#allocation43_spill] sm:$0xff] }
 0x3f5   : > { %v2792_v15 = vpop.xlane.xlu1 %2791  ;;  %v2867_v39 = vmul.f32 %v18477_v8, %v20227_v17  ;;  %18486 = vrcp.f32 %v2786_v47  ;;  %v17915_v63 = vunpack.i.h.bf16 %v23561_v61  ;;  %v17914_v50 = vunpack.i.l.bf16 %v23561_v61  ;;  %v23563_v8 = vld [vmem:[#allocation88_spill] sm:$0xff] }
 0x3f6   : > { %18047 = vrot.lane.b32.xlu1 %v19910_v16, %s19131_s21  ;;  %16262 = vmatprep.mubr.msk.f32.mxu1 %vm2534_vm3, %v2865_v4  ;;  %18488 = vrcp.f32 %v2792_v15  ;;  %v17920_v47 = vunpack.i.h.bf16 %v23563_v8 }
 0x3f7   : > { %5464 = vrot.lane.b32.xlu0 %v23560_v43, %s19129_s16  ;;  %16263 = vmatmul.mubr.msk.f32.vlgmr.msra.gmra.mrb[68].mxu1 %vm2534_vm3, %v2866_v6  ;;  %v18479_v17 = vpop.eup %18478  ;;  %v17219_v15 = vpack.c.bf16 %v17915_v63, %v17914_v50 }
 0x3f8   : > { %16269 = vmatprep.mubr.msk.f32.mxu0 %vm2534_vm3, %v2867_v39  ;;  %17206 = vmatpush3.bf16.msra.mxu1 %v17203_v34  ;;  %v2783_v58 = vpop.xlane.xlu0 %2782  ;;  %v18481_v30 = vpop.eup %18480  ;;  %v23562_v34 = vld [vmem:[#allocation40_spill] sm:$0xff]  ;;  %v2870_v23 = vmul.f32 %v18479_v17, %v20231_v12 }
 0x3f9   : > { %16270 = vmatmul.mubr.msk.f32.vlgmr.msra.gmra.mrb[38].mxu0 %vm2534_vm3, %v2868_v1  ;;  %17212 = vmatprep.subr.bf16.mxu1 %v17211_v44  ;;  %18490 = vrcp.f32 %v2783_v58  ;;  %v2789_v7 = vpop.xlane.xlu1 %2788  ;;  %v23565_v1 = vld [vmem:[#allocation48_spill] sm:$0xff] }
 0x3fa   : > { %17210 = vmatpush3.bf16.msra.mxu0 %v17207_v27  ;;  %18052 = vrot.lane.b32.xlu1 %v23551_v18, %s19131_s21  ;;  %18492 = vrcp.f32 %v2789_v7  ;;  %v17919_v27 = vunpack.i.l.bf16 %v23563_v8 }
 0x3fb   : > { %v18483_v28 = vpop.eup %18482  ;;  %17216 = vmatprep.subr.bf16.mxu0 %v17215_v41  ;;  %5555 = vrot.lane.b32.xlu0 %v23562_v34, %s19129_s16 }
 0x3fc   : > { %v18485_v10 = vpop.eup %18484  ;;  %v2869_v57 = vmul.f32 %v18483_v28, %v20241_v19  ;;  %v2872_v19 = vmul.f32 %v18481_v30, %v20237_v42  ;;  %v23566_v42 = vld [vmem:[#allocation90_spill] sm:$0xff]  ;;  %v23567_v28 = vld [vmem:[#allocation89_spill] sm:$0xff] }
 0x3fd   : > { %v2798_v4 = vpop.xlane.xlu1 %2797  ;;  %v2871_v46 = vmul.f32 %v18485_v10, %v20246_v2  ;;  %v17223_v2 = vpack.c.bf16 %v17920_v47, %v17919_v27  ;;  %v17925_v17 = vunpack.i.h.bf16 %v23566_v42  ;;  %v17924_v7 = vunpack.i.l.bf16 %v23566_v42  ;;  %v23569_v27 = vld [vmem:[#allocation51_spill] sm:$0xff] }
 0x3fe   : > { %18062 = vrot.lane.b32.xlu1 %v19952_v13, %s19131_s21  ;;  %16276 = vmatprep.mubr.msk.f32.mxu1 %vm2534_vm3, %v2869_v57  ;;  %18494 = vrcp.f32 %v2798_v4  ;;  %v17930_v61 = vunpack.i.h.bf16 %v23567_v28  ;;  %v23568_v57 = vld [vmem:[#allocation50_spill] sm:$0xff]  ;;  %v23570_v4 = vld [vmem:[#allocation91_spill] sm:$0xff] }
 0x3ff   : > { %5646 = vrot.lane.b32.xlu0 %v23564_v26, %s19129_s16  ;;  %16277 = vmatmul.mubr.msk.f32.vlgmr.msra.gmra.mrb[70].mxu1 %vm2534_vm3, %v2870_v23  ;;  %v18487_v6 = vpop.eup %18486  ;;  %v17227_v8 = vpack.c.bf16 %v17925_v17, %v17924_v7  ;;  %v17935_v23 = vunpack.i.h.bf16 %v23570_v4  ;;  %s23201_s16 = scalar_lea.hbm %s23261_s8, %s15378_s14 }
 0x400   : > { %16283 = vmatprep.mubr.msk.f32.mxu0 %vm2534_vm3, %v2871_v46  ;;  %17214 = vmatpush3.bf16.msra.mxu1 %v17211_v44  ;;  %v18489_v39 = vpop.eup %18488  ;;  %v2874_v50 = vmul.f32 %v18487_v6, %v20251_v35  ;;  %v17934_v46 = vunpack.i.l.bf16 %v23570_v4  ;;  %v23571_v6 = vld [vmem:[#allocation23_spill] sm:$0xff] }
 0x401   : > { %16284 = vmatmul.mubr.msk.f32.vlgmr.msra.gmra.mrb[40].mxu0 %vm2534_vm3, %v2872_v19  ;;  %17220 = vmatprep.subr.bf16.mxu1 %v17219_v15  ;;  %v2795_v12 = vpop.xlane.xlu1 %2794 }
 0x402   : > { %17218 = vmatpush3.bf16.msra.mxu0 %v17215_v41  ;;  %18067 = vrot.lane.b32.xlu1 %v23565_v1, %s19132_s25  ;;  %18496 = vrcp.f32 %v2795_v12  ;;  %v17929_v41 = vunpack.i.l.bf16 %v23567_v28  ;;  %v23574_v28 = vld [vmem:[#allocation21_spill] sm:$0xff] }
 0x403   : > { %v18491_v58 = vpop.eup %18490  ;;  %17224 = vmatprep.subr.bf16.mxu0 %v17223_v2  ;;  %17987 = vrot.lane.b32.xlu0 %v23565_v1, %s19131_s21 }
 0x404   : > { %v18493_v44 = vpop.eup %18492  ;;  %v2873_v30 = vmul.f32 %v18491_v58, %v20260_v48  ;;  %v2876_v48 = vmul.f32 %v18489_v39, %v20255_v24 }
 0x405   : > { %v2804_v63 = vpop.xlane.xlu1 %2803  ;;  %v2875_v10 = vmul.f32 %v18493_v44, %v20264_v62  ;;  %v17231_v62 = vpack.c.bf16 %v17930_v61, %v17929_v41  ;;  %v23573_v44 = vld [vmem:[#allocation25_spill] sm:$0xff] }
 0x406   : > { %18072 = vrot.lane.b32.xlu1 %v23539_v60, %s19132_s25  ;;  %16290 = vmatprep.mubr.msk.f32.mxu1 %vm2534_vm3, %v2873_v30  ;;  %18498 = vrcp.f32 %v2804_v63  ;;  %v23575_v63 = vld [vmem:[#allocation30_spill] sm:$0xff] }
 0x407   : > { %17997 = vrot.lane.b32.xlu0 %v23568_v57, %s19131_s21  ;;  %16291 = vmatmul.mubr.msk.f32.vlgmr.msra.gmra.mrb[72].mxu1 %vm2534_vm3, %v2874_v50  ;;  %v23577_v50 = vld [vmem:[#allocation27_spill] sm:$0xff] }
 0x408   : > { %16297 = vmatprep.mubr.msk.f32.mxu0 %vm2534_vm3, %v2875_v10  ;;  %17222 = vmatpush3.bf16.msra.mxu1 %v17219_v15  ;;  %v18495_v47 = vpop.eup %18494  ;;  %v23578_v10 = vld [vmem:[#allocation33_spill] sm:$0xff] }
 0x409   : > { %16298 = vmatmul.mubr.msk.f32.vlgmr.msra.gmra.mrb[42].mxu0 %vm2534_vm3, %v2876_v48  ;;  %17228 = vmatprep.subr.bf16.mxu1 %v17227_v8  ;;  %v2801_v35 = vpop.xlane.xlu1 %2800  ;;  %v2878_v12 = vmul.f32 %v18495_v47, %v20271_v0  ;;  %v23572_v0 = vld [vmem:[#allocation72_spill] sm:$0xff]  ;;  %v23579_v48 = vld [vmem:[#allocation31_spill] sm:$0xff] }
 0x40a   : > { %17226 = vmatpush3.bf16.msra.mxu0 %v17223_v2  ;;  %18077 = vrot.lane.b32.xlu1 %v23568_v57, %s19132_s25  ;;  %18500 = vrcp.f32 %v2801_v35  ;;  %v17235_v2 = vpack.c.bf16 %v17935_v23, %v17934_v46  ;;  %v17835_v42 = vunpack.i.h.bf16 %v23572_v0  ;;  %v17834_v17 = vunpack.i.l.bf16 %v23572_v0  ;;  %v23580_v35 = vld [vmem:[#allocation35_spill] sm:$0xff] }
 0x40b   : > { %17232 = vmatprep.subr.bf16.mxu0 %v17231_v62  ;;  %18002 = vrot.lane.b32.xlu0 %v23569_v27, %s19131_s21 }
 0x40c   : > { %v18497_v24 = vpop.eup %18496  ;;  %v17239_v61 = vpack.c.bf16 %v17835_v42, %v17834_v17 }
 0x40d   : > { %v2810_v19 = vpop.xlane.xlu1 %2809  ;;  %v2877_v15 = vmul.f32 %v18497_v24, %v20276_v14 }
 0x40e   : > { %7479 = vrot.lane.b32.xlu1 %v23571_v6, %s19132_s25  ;;  %18502 = vrcp.f32 %v2810_v19 }
 0x40f   : > { %18022 = vrot.lane.b32.xlu0 %v19838_v54, %s19131_s21  ;;  %16304 = vmatprep.mubr.msk.f32.mxu1 %vm2534_vm3, %v2877_v15 }
 0x410   : > { %16305 = vmatmul.mubr.msk.f32.vlgmr.msra.gmra.mrb[74].mxu1 %vm2534_vm3, %v2878_v12  ;;  %v18499_v39 = vpop.eup %18498 }
 0x411   : > { %17230 = vmatpush3.bf16.msra.mxu1 %v17227_v8  ;;  %v2816_v14 = vpop.xlane.xlu1 %2815  ;;  %v2880_v30 = vmul.f32 %v18499_v39, %v20280_v3 }
 0x412   : > { %18082 = vrot.lane.b32.xlu1 %v23569_v27, %s19132_s25  ;;  %17236 = vmatprep.subr.bf16.mxu1 %v17235_v2 }
 0x413   : > { %18057 = vrot.lane.b32.xlu0 %v23556_v36, %s19131_s21  ;;  %s19048_s21 = scalar_lea.vmem %s19047_s24, 8192 }
 0x414   : > { %v18501_v58 = vpop.eup %18500  ;;  %p19050_p6 = scmp.lt.s32.totalorder %s19048_s21, %s19042_s12 }
 0x415   : > { %v2879_v7 = vmul.f32 %v18501_v58, %v20284_v53  ;;  %v20510_v41 = vpop.permute.xlu1 %4645  ;;  %v23581_v58 = vld [vmem:[#allocation75_spill] sm:$0xff] }
 0x416   : > { %7572 = vrot.lane.b32.xlu1 %v23573_v44, %s19132_s25  ;;  %v17845_v0 = vunpack.i.h.bf16 %v23581_v58  ;;  %v17844_v42 = vunpack.i.l.bf16 %v23581_v58  ;;  %p19051_p10 = por %p19050_p6, %p19049_p8 }
 0x417   : > { %7481 = vrot.lane.b32.xlu0 %v23574_v28, %s19132_s25  ;;  %16311 = vmatprep.mubr.msk.f32.mxu0 %vm2534_vm3, %v2879_v7 }
 0x418   : > { %16312 = vmatmul.mubr.msk.f32.vlgmr.msra.gmra.mrb[44].mxu0 %vm2534_vm3, %v2880_v30  ;;  %v18503_v15 = vpop.eup %18502  ;;  %p19052_p3 = pnand %p19051_p10, %p19045_p0 }
 0x419   : > { %17234 = vmatpush3.bf16.msra.mxu0 %v17231_v62  ;;  %v20520_v3 = vpop.permute.xlu1 %4734  ;;  %v20532_v62 = vpop.permute.xlu0 %4643 }
 0x41a   : > { %7661 = vrot.lane.b32.xlu1 %v23575_v63, %s19132_s25  ;;  %17241 = vmatprep.subr.msk.bf16.mxu0 %vm19714_vm2, %v17239_v61 }
 0x41b   : > { %7570 = vrot.lane.b32.xlu0 %v23577_v50, %s19132_s25 }
 0x41d   : > { %v20528_v8 = vpop.permute.xlu1 %17947 }
 0x41e   : > { %18092 = vrot.lane.b32.xlu1 %v23544_v51, %s19132_s25 }
 0x41f   : > { %18087 = vrot.lane.b32.xlu0 %v23541_v32, %s19132_s25 }
 0x421   : > { %v20534_v47 = vpop.permute.xlu1 %4827 }
 0x422   : > { %7754 = vrot.lane.b32.xlu1 %v23578_v10, %s19132_s25 }
 0x423   : > { %7663 = vrot.lane.b32.xlu0 %v23579_v48, %s19132_s25 }
 0x425   : > { %v20536_v4 = vpop.permute.xlu1 %4916 }
 0x427   : > { %7752 = vrot.lane.b32.xlu0 %v23580_v35, %s19132_s25 }
 0x429   : > { %v20538_v12 = vpop.permute.xlu1 %17957 }
 0x42d   : > { %v2807_v24 = vpop.xlane.xlu0 %2806  ;;  %v20548_v44 = vpop.permute.xlu1 %5009 }
 0x42e   : > { %18504 = vrcp.f32 %v2807_v24  ;;  %v17245_v24 = vpack.c.bf16 %v17845_v0, %v17844_v42  ;;  %v23584_v0 = vld [vmem:[#allocation83_spill] sm:$0xff] }
 0x42f   : > { %18506 = vrcp.f32 %v2816_v14  ;;  %v2882_v14 = vmul.f32 %v18503_v15, %v20288_v29  ;;  %v17865_v42 = vunpack.i.h.bf16 %v23584_v0 }
 0x431   : > { %v2813_v23 = vpop.xlane.xlu0 %2812  ;;  %v20566_v58 = vpop.permute.xlu1 %5098 }
 0x432   : > { %18508 = vrcp.f32 %v2813_v23  ;;  %v23582_v23 = vld [vmem:[#allocation76_spill] sm:$0xff] }
 0x433   : > { %v17855_v10 = vunpack.i.h.bf16 %v23582_v23  ;;  %v17854_v63 = vunpack.i.l.bf16 %v23582_v23 }
 0x435   : > { %v2822_v46 = vpop.xlane.xlu0 %2821  ;;  %v17251_v15 = vpack.c.bf16 %v17855_v10, %v17854_v63  ;;  %v17864_v63 = vunpack.i.l.bf16 %v23584_v0  ;;  %v23585_v10 = vld [vmem:[#allocation78_spill] sm:$0xff]  ;;  %v17940_v0 = vunpack.i.h.bf16 %v20348_v21 }
 0x436   : > { %18510 = vrcp.f32 %v2822_v46 }
 0x437   : > { %v17257_v23 = vpack.c.bf16 %v17865_v42, %v17864_v63 }
 0x438   : > { %v18505_v39 = vpop.eup %18504 }
 0x439   : > { %v2819_v17 = vpop.xlane.xlu0 %2818  ;;  %v2881_v19 = vmul.f32 %v18505_v39, %v20306_v20  ;;  %v18507_v7 = vpop.eup %18506  ;;  %v23583_v39 = vld [vmem:[#allocation65_spill] sm:$0xff] }
 0x43a   : > { %18512 = vrcp.f32 %v2819_v17  ;;  %v2884_v29 = vmul.f32 %v18507_v7, %v20292_v56  ;;  %v17875_v17 = vunpack.i.h.bf16 %v23585_v10 }
 0x43b   : > { %16318 = vmatprep.mubr.msk.f32.mxu1 %vm2534_vm3, %v2881_v19 }
 0x43c   : > { %v18509_v30 = vpop.eup %18508  ;;  %16319 = vmatmul.mubr.msk.f32.vlgmr.msra.gmra.mrb[76].mxu1 %vm2534_vm3, %v2882_v14 }
 0x43d   : > { %17238 = vmatpush3.bf16.msra.mxu1 %v17235_v2  ;;  %v20550_v46 = vpop.permute.xlu0 %17942  ;;  %v2883_v20 = vmul.f32 %v18509_v30, %v20312_v40  ;;  %v23586_v30 = vld [vmem:[#allocation64_spill] sm:$0xff] }
 0x43e   : > { %17247 = vmatprep.subr.msk.bf16.mxu1 %vm19714_vm2, %v17245_v24 }
 0x43f   : > { %16325 = vmatprep.mubr.msk.f32.mxu0 %vm2534_vm3, %v2883_v20 }
 0x440   : > { %16326 = vmatmul.mubr.msk.f32.vlgmr.msra.gmra.mrb[46].mxu0 %vm2534_vm3, %v2884_v29  ;;  %v18511_v40 = vpop.eup %18510  ;;  %v20578_v29 = vpop.permute.xlu1 %17967 }
 0x441   : > { %17244 = vmatpush3.bf16.xpose.msk.msra.mxu0 %vm19714_vm2, %v17239_v61  ;;  %16339 = vmatprep.mubr.msk.f32.mxu0 %vm1141_vm1, %v23583_v39  ;;  %v20562_v2 = vpop.permute.xlu0 %4736  ;;  %v17874_v61 = vunpack.i.l.bf16 %v23585_v10  ;;  %v2886_v7 = vmul.f32 %v18511_v40, %v20318_v38  ;;  %v23587_v39 = vld [vmem:[#allocation68_spill] sm:$0xff]  ;;  %v23588_v38 = vld [vmem:[#allocation67_spill] sm:$0xff]  ;;  %v23589_v40 = vld [vmem:[#allocation85_spill] sm:$0xff] }
 0x442   : > { %17253 = vmatprep.subr.msk.bf16.mxu0 %vm19714_vm2, %v17251_v15  ;;  %v23590_v10 = vld [vmem:[#allocation66_spill] sm:$0xff] }
 0x443   : > { %v17263_v20 = vpack.c.bf16 %v17875_v17, %v17874_v61  ;;  %v23591_v17 = vld [vmem:[#allocation69_spill] sm:$0xff] }
 0x444   : > { %v18513_v56 = vpop.eup %18512  ;;  %v20596_v63 = vpop.permute.xlu1 %5191 }
 0x445   : > { %v4826_v19 = vpop.permute.xlu0 %4825  ;;  %v2885_v14 = vmul.f32 %v18513_v56, %v20324_v45  ;;  %v17885_v56 = vunpack.i.h.bf16 %v23589_v40 }
 0x447   : > { %16332 = vmatprep.mubr.msk.f32.mxu1 %vm2534_vm3, %v2885_v14 }
 0x448   : > { %16340 = vmatmul.mubr.msk.f32.vlgmr.msra.gmra.mrb[48].mxu0 %vm1141_vm1, %v23586_v30  ;;  %16333 = vmatmul.mubr.msk.f32.vlgmr.msra.gmra.mrb[78].mxu1 %vm2534_vm3, %v2886_v7  ;;  %v23592_v7 = vld [vmem:[#allocation71_spill] sm:$0xff] }
 0x449   : > { %17250 = vmatpush3.bf16.xpose.msk.msra.mxu1 %vm19714_vm2, %v17245_v24  ;;  %17256 = vmatpush3.bf16.xpose.msk.msra.mxu0 %vm19714_vm2, %v17251_v15  ;;  %v17953_v45 = vpop.permute.xlu0 %17952  ;;  %v17884_v24 = vunpack.i.l.bf16 %v23589_v40  ;;  %v17939_v15 = vunpack.i.l.bf16 %v20348_v21  ;;  %v17950_v21 = vunpack.i.h.bf16 %v20528_v8  ;;  %v17945_v40 = vunpack.i.h.bf16 %v20550_v46 }
 0x44a   : > { %16353 = vmatprep.mubr.msk.f32.mxu0 %vm1141_vm1, %v23587_v39  ;;  %16346 = vmatprep.mubr.msk.f32.mxu1 %vm1141_vm1, %v23588_v38  ;;  %v5281_v39 = vpop.permute.xlu1 %5280 }
 0x44b   : > { %17259 = vmatprep.subr.msk.bf16.mxu1 %vm19714_vm2, %v17257_v23  ;;  %17265 = vmatprep.subr.msk.bf16.mxu0 %vm19714_vm2, %v17263_v20  ;;  %v17269_v61 = vpack.c.bf16 %v17885_v56, %v17884_v24  ;;  %v17275_v14 = vpack.c.bf16 %v17940_v0, %v17939_v15  ;;  %v17944_v56 = vunpack.i.l.bf16 %v20550_v46  ;;  %v17959_v46 = vunpack.i.l.bf16 %v20538_v12 }
 0x44d   : > { %v4919_v42 = vpop.permute.xlu0 %4918  ;;  %v17281_v0 = vpack.c.bf16 %v17945_v40, %v17944_v56 }
 0x450   : > { %16347 = vmatmul.mubr.msk.f32.vlgmr.msra.gmra.mrb[80].mxu1 %vm1141_vm1, %v23590_v10  ;;  %16354 = vmatmul.mubr.msk.f32.vlgmr.msra.gmra.mrb[50].mxu0 %vm1141_vm1, %v23591_v17  ;;  %v17955_v10 = vunpack.i.h.bf16 %v17953_v45  ;;  %v17954_v17 = vunpack.i.l.bf16 %v17953_v45 }
 0x451   : > { %17262 = vmatpush3.bf16.xpose.msk.msra.mxu1 %vm19714_vm2, %v17257_v23  ;;  %16360 = vmatprep.mubr.msk.f32.mxu1 %vm1141_vm1, %v23592_v7  ;;  %v5008_v30 = vpop.permute.xlu0 %5007  ;;  %v17949_v23 = vunpack.i.l.bf16 %v20528_v8  ;;  %v5372_v8 = vpop.permute.xlu1 %5371 }
 0x452   : > { %17268 = vmatpush3.bf16.xpose.msk.msra.mxu0 %vm19714_vm2, %v17263_v20  ;;  %16367 = vmatprep.mubr.msk.f32.mxu0 %vm1141_vm1, %v20532_v62  ;;  %v23593_v20 = vld [vmem:[#allocation70_spill] sm:$0xff] }
 0x453   : > { %17271 = vmatprep.subr.msk.bf16.mxu1 %vm19714_vm2, %v17269_v61  ;;  %17277 = vmatprep.subr.msk.bf16.mxu0 %vm19714_vm2, %v17275_v14  ;;  %v17287_v62 = vpack.c.bf16 %v17950_v21, %v17949_v23 }
 0x455   : > { %v17963_v38 = vpop.permute.xlu0 %17962 }
 0x456   : > { %v17965_v45 = vunpack.i.h.bf16 %v17963_v38  ;;  %v17964_v7 = vunpack.i.l.bf16 %v17963_v38 }
 0x458   : > { %16361 = vmatmul.mubr.msk.f32.vlgmr.msra.gmra.mrb[82].mxu1 %vm1141_vm1, %v23593_v20  ;;  %v17305_v23 = vpack.c.bf16 %v17965_v45, %v17964_v7 }
 0x459   : > { %16368 = vmatmul.mubr.msk.f32.vlgmr.msra.gmra.mrb[52].mxu0 %vm1141_vm1, %v20510_v41  ;;  %17274 = vmatpush3.bf16.xpose.msk.msra.mxu1 %vm19714_vm2, %v17269_v61  ;;  %v5101_v24 = vpop.permute.xlu0 %5100  ;;  %v17960_v41 = vunpack.i.h.bf16 %v20538_v12  ;;  %v5374_v61 = vpop.permute.xlu1 %5373  ;;  %v17969_v12 = vunpack.i.l.bf16 %v20578_v29 }
 0x45a   : > { %16374 = vmatprep.mubr.msk.f32.mxu1 %vm1141_vm1, %v20520_v3  ;;  %17280 = vmatpush3.bf16.xpose.msk.msra.mxu0 %vm19714_vm2, %v17275_v14  ;;  %v17293_v14 = vpack.c.bf16 %v17955_v10, %v17954_v17 }
 0x45b   : > { %16381 = vmatprep.mubr.msk.f32.mxu0 %vm1141_vm1, %v4826_v19  ;;  %17289 = vmatprep.subr.msk.bf16.mxu0 %vm19714_vm2, %v17287_v62  ;;  %v17299_v3 = vpack.c.bf16 %v17960_v41, %v17959_v46 }
 0x45c   : > { %17283 = vmatprep.subr.msk.bf16.mxu1 %vm19714_vm2, %v17281_v0 }
 0x45d   : > { %v5190_v15 = vpop.permute.xlu0 %5189  ;;  %v17983_v21 = vpop.permute.xlu1 %17982 }
 0x460   : > { %16375 = vmatmul.mubr.msk.f32.vlgmr.msra.gmra.mrb[84].mxu1 %vm1141_vm1, %v20562_v2 }
 0x461   : > { %16382 = vmatmul.mubr.msk.f32.vlgmr.msra.gmra.mrb[54].mxu0 %vm1141_vm1, %v20534_v47  ;;  %17286 = vmatpush3.bf16.xpose.msk.msra.mxu1 %vm19714_vm2, %v17281_v0  ;;  %v17973_v19 = vpop.permute.xlu0 %17972  ;;  %v17970_v47 = vunpack.i.h.bf16 %v20578_v29 }
 0x462   : > { %16388 = vmatprep.mubr.msk.f32.mxu1 %vm1141_vm1, %v20536_v4  ;;  %17292 = vmatpush3.bf16.xpose.msk.msra.mxu0 %vm19714_vm2, %v17287_v62  ;;  %v17975_v29 = vunpack.i.h.bf16 %v17973_v19 }
 0x463   : > { %16395 = vmatprep.mubr.msk.f32.mxu0 %vm1141_vm1, %v5008_v30  ;;  %17301 = vmatprep.subr.msk.bf16.mxu0 %vm19714_vm2, %v17299_v3  ;;  %v17311_v4 = vpack.c.bf16 %v17970_v47, %v17969_v12 }
 0x464   : > { %17295 = vmatprep.subr.msk.bf16.mxu1 %vm19714_vm2, %v17293_v14 }
 0x465   : > { %v5283_v2 = vpop.permute.xlu0 %5282 }
 0x468   : > { %16389 = vmatmul.mubr.msk.f32.vlgmr.msra.gmra.mrb[86].mxu1 %vm1141_vm1, %v4919_v42  ;;  %v17974_v42 = vunpack.i.l.bf16 %v17973_v19 }
 0x469   : > { %16396 = vmatmul.mubr.msk.f32.vlgmr.msra.gmra.mrb[56].mxu0 %vm1141_vm1, %v20548_v44  ;;  %17298 = vmatpush3.bf16.xpose.msk.msra.mxu1 %vm19714_vm2, %v17293_v14  ;;  %v17978_v30 = vpop.permute.xlu0 %17977  ;;  %v5554_v44 = vpop.permute.xlu1 %5553 }
 0x46a   : > { %16402 = vmatprep.mubr.msk.f32.mxu1 %vm1141_vm1, %v20566_v58  ;;  %17304 = vmatpush3.bf16.xpose.msk.msra.mxu0 %vm19714_vm2, %v17299_v3  ;;  %v17980_v40 = vunpack.i.h.bf16 %v17978_v30  ;;  %v17979_v56 = vunpack.i.l.bf16 %v17978_v30  ;;  %v17317_v58 = vpack.c.bf16 %v17975_v29, %v17974_v42 }
 0x46b   : > { %16409 = vmatprep.mubr.msk.f32.mxu0 %vm1141_vm1, %v5190_v15  ;;  %17313 = vmatprep.subr.msk.bf16.mxu0 %vm19714_vm2, %v17311_v4 }
 0x46c   : > { %17307 = vmatprep.subr.msk.bf16.mxu1 %vm19714_vm2, %v17305_v23  ;;  %v17323_v62 = vpack.c.bf16 %v17980_v40, %v17979_v56 }
 0x46d   : > { %v5463_v38 = vpop.permute.xlu0 %5462  ;;  %v5645_v0 = vpop.permute.xlu1 %5644 }
 0x470   : > { %16403 = vmatmul.mubr.msk.f32.vlgmr.msra.gmra.mrb[88].mxu1 %vm1141_vm1, %v5101_v24  ;;  %v17984_v24 = vunpack.i.l.bf16 %v17983_v21 }
 0x471   : > { %16410 = vmatmul.mubr.msk.f32.vlgmr.msra.gmra.mrb[58].mxu0 %vm1141_vm1, %v20596_v63  ;;  %17310 = vmatpush3.bf16.xpose.msk.msra.mxu1 %vm19714_vm2, %v17305_v23  ;;  %v5465_v20 = vpop.permute.xlu0 %5464  ;;  %v17985_v63 = vunpack.i.h.bf16 %v17983_v21  ;;  %v17993_v15 = vpop.permute.xlu1 %17992 }
 0x472   : > { %16416 = vmatprep.mubr.msk.f32.mxu1 %vm1141_vm1, %v5281_v39  ;;  %17316 = vmatpush3.bf16.xpose.msk.msra.mxu0 %vm19714_vm2, %v17311_v4  ;;  %v17994_v10 = vunpack.i.l.bf16 %v17993_v15 }
 0x473   : > { %16423 = vmatprep.mubr.msk.f32.mxu0 %vm1141_vm1, %v5372_v8  ;;  %17319 = vmatprep.subr.msk.bf16.mxu1 %vm19714_vm2, %v17317_v58  ;;  %v17329_v46 = vpack.c.bf16 %v17985_v63, %v17984_v24  ;;  %v17995_v8 = vunpack.i.h.bf16 %v17993_v15 }
 0x474   : > { %17325 = vmatprep.subr.msk.bf16.mxu0 %vm19714_vm2, %v17323_v62 }
 0x475   : > { %v5556_v41 = vpop.permute.xlu0 %5555 }
 0x478   : > { %16417 = vmatmul.mubr.msk.f32.vlgmr.msra.gmra.mrb[90].mxu1 %vm1141_vm1, %v5283_v2 }
 0x479   : > { %16424 = vmatmul.mubr.msk.f32.vlgmr.msra.gmra.mrb[60].mxu0 %vm1141_vm1, %v5374_v61  ;;  %17322 = vmatpush3.bf16.xpose.msk.msra.mxu1 %vm19714_vm2, %v17317_v58  ;;  %v5647_v39 = vpop.permute.xlu0 %5646  ;;  %v17339_v61 = vpack.c.bf16 %v17995_v8, %v17994_v10 }
 0x47a   : > { %16430 = vmatprep.mubr.msk.f32.mxu1 %vm1141_vm1, %v5463_v38  ;;  %17328 = vmatpush3.bf16.xpose.msk.msra.mxu0 %vm19714_vm2, %v17323_v62 }
 0x47b   : > { %16437 = vmatprep.mubr.msk.f32.mxu0 %vm1141_vm1, %v5554_v44  ;;  %17331 = vmatprep.subr.msk.bf16.mxu1 %vm19714_vm2, %v17329_v46 }
 0x47d   : > { %v17988_v17 = vpop.permute.xlu0 %17987 }
 0x47e   : > { %v17990_v3 = vunpack.i.h.bf16 %v17988_v17  ;;  %v17989_v19 = vunpack.i.l.bf16 %v17988_v17 }
 0x480   : > { %16431 = vmatmul.mubr.msk.f32.vlgmr.msra.gmra.mrb[92].mxu1 %vm1141_vm1, %v5465_v20  ;;  %v17335_v14 = vpack.c.bf16 %v17990_v3, %v17989_v19 }
 0x481   : > { %16438 = vmatmul.mubr.msk.f32.vlgmr.msra.gmra.mrb[62].mxu0 %vm1141_vm1, %v5556_v41  ;;  %17334 = vmatpush3.bf16.xpose.msk.msra.mxu1 %vm19714_vm2, %v17329_v46  ;;  %v17998_v47 = vpop.permute.xlu0 %17997 }
 0x482   : > { %16444 = vmatprep.mubr.msk.f32.mxu1 %vm1141_vm1, %v5645_v0  ;;  %v18000_v12 = vunpack.i.h.bf16 %v17998_v47  ;;  %v17999_v2 = vunpack.i.l.bf16 %v17998_v47  ;;  %17340 = vmatprep.subr.bf16.mxu1 %v17339_v61 }
 0x483   : > { %17336 = vmatprep.subr.bf16.mxu0 %v17335_v14 }
 0x484   : > { %17338 = vmatpush3.bf16.msra.mxu0 %v17335_v14  ;;  %v20694_v45 = vpack.c.bf16 %v18000_v12, %v17999_v2 }
 0x485   : > { %v18003_v7 = vpop.permute.xlu0 %18002 }
 0x486   : > { %23594 = vst [vmem:[#allocation60_spill] sm:$0xff] %v20694_v45  ;;  %v18005_v21 = vunpack.i.h.bf16 %v18003_v7  ;;  %v18004_v4 = vunpack.i.l.bf16 %v18003_v7  ;;  %17344 = vmatprep.subr.bf16.mxu0 %v20694_v45 }
 0x488   : > { %16445 = vmatmul.mubr.msk.f32.vlgmr.msra.gmra.mrb[94].mxu1 %vm1141_vm1, %v5647_v39  ;;  %v20698_v30 = vpack.c.bf16 %v18005_v21, %v18004_v4 }
 0x489   : > { %17342 = vmatpush3.bf16.msra.mxu1 %v17339_v61 }
 0x48a   : > { %23595 = vst [vmem:[#allocation61_spill] sm:$0xff] %v20698_v30  ;;  %17348 = vmatprep.subr.bf16.mxu1 %v20698_v30 }
 0x4b2   : > { %v20701_v23 = vpop.f32.mrb[32].mxu0 }
 0x4b3   : > { %23596 = vst [vmem:[#allocation77_spill] sm:$0xff] %v20701_v23  ;;  %v20703_v44 = vpop.f32.mrb[33].mxu0 }
 0x4b4   : > { %23597 = vst [vmem:[#allocation73_spill] sm:$0xff] %v20703_v44 }
 0x4ba   : > { %v20705_v29 = vpop.f32.mrb[64].mxu1 }
 0x4bb   : > { %23598 = vst [vmem:[#allocation79_spill] sm:$0xff] %v20705_v29  ;;  %v20707_v42 = vpop.f32.mrb[65].mxu1  ;;  %v20709_v38 = vpop.f32.mrb[34].mxu0 }
 0x4bc   : > { %23599 = vst [vmem:[#allocation80_spill] sm:$0xff] %v20707_v42  ;;  %23600 = vst [vmem:[#allocation62_spill] sm:$0xff] %v20709_v38  ;;  %v20711_v40 = vpop.f32.mrb[35].mxu0 }
 0x4bd   : > { %23601 = vst [vmem:[#allocation74_spill] sm:$0xff] %v20711_v40 }
 0x4c2   : > { %v20713_v56 = vpop.f32.mrb[66].mxu1 }
 0x4c3   : > { %23602 = vst [vmem:[#allocation87_spill] sm:$0xff] %v20713_v56  ;;  %v20715_v58 = vpop.f32.mrb[67].mxu1 }
 0x4c4   : > { %23603 = vst [vmem:[#allocation81_spill] sm:$0xff] %v20715_v58  ;;  %v20717_v20 = vpop.f32.mrb[36].mxu0 }
 0x4c5   : > { %23604 = vst [vmem:[#allocation63_spill] sm:$0xff] %v20717_v20  ;;  %v20719_v62 = vpop.f32.mrb[37].mxu0 }
 0x4c6   : > { %23605 = vst [vmem:[#allocation82_spill] sm:$0xff] %v20719_v62 }
 0x4ca   : > { %v20721_v0 = vpop.f32.mrb[68].mxu1 }
 0x4cb   : > { %23606 = vst [vmem:[#allocation84_spill] sm:$0xff] %v20721_v0  ;;  %v20723_v63 = vpop.f32.mrb[69].mxu1 }
 0x4cc   : > { %23607 = vst [vmem:[#allocation86_spill] sm:$0xff] %v20723_v63  ;;  %v20725_v24 = vpop.f32.mrb[38].mxu0 }
 0x4cd   : > { %23608 = vst [vmem:[#allocation88_spill] sm:$0xff] %v20725_v24  ;;  %v20727_v41 = vpop.f32.mrb[39].mxu0 }
 0x4ce   : > { %23609 = vst [vmem:[#allocation90_spill] sm:$0xff] %v20727_v41 }
 0x4d2   : > { %v20729_v46 = vpop.f32.mrb[70].mxu1 }
 0x4d3   : > { %23610 = vst [vmem:[#allocation89_spill] sm:$0xff] %v20729_v46  ;;  %v20731_v15 = vpop.f32.mrb[71].mxu1 }
 0x4d4   : > { %23611 = vst [vmem:[#allocation91_spill] sm:$0xff] %v20731_v15  ;;  %v20733_v39 = vpop.f32.mrb[40].mxu0 }
 0x4d5   : > { %23612 = vst [vmem:[#allocation72_spill] sm:$0xff] %v20733_v39  ;;  %v20735_v8 = vpop.f32.mrb[41].mxu0 }
 0x4d6   : > { %23613 = vst [vmem:[#allocation75_spill] sm:$0xff] %v20735_v8 }
 0x4da   : > { %v20737_v10 = vpop.f32.mrb[72].mxu1 }
 0x4db   : > { %23614 = vst [vmem:[#allocation76_spill] sm:$0xff] %v20737_v10  ;;  %v20739_v17 = vpop.f32.mrb[73].mxu1 }
 0x4dc   : > { %23615 = vst [vmem:[#allocation65_spill] sm:$0xff] %v20739_v17  ;;  %v20741_v3 = vpop.f32.mrb[42].mxu0 }
 0x4dd   : > { %23616 = vst [vmem:[#allocation83_spill] sm:$0xff] %v20741_v3  ;;  %v20743_v19 = vpop.f32.mrb[43].mxu0 }
 0x4de   : > { %23617 = vst [vmem:[#allocation78_spill] sm:$0xff] %v20743_v19 }
 0x4e3   : > { %v20745_v61 = vpop.f32.mrb[74].mxu1 }
 0x4e4   : > { %23618 = vst [vmem:[#allocation64_spill] sm:$0xff] %v20745_v61  ;;  %v20747_v14 = vpop.f32.mrb[75].mxu1 }
 0x4e5   : > { %23619 = vst [vmem:[#allocation68_spill] sm:$0xff] %v20747_v14 }
 0x4eb   : > { %v20749_v47 = vpop.f32.mrb[44].mxu0 }
 0x4ec   : > { %23620 = vst [vmem:[#allocation67_spill] sm:$0xff] %v20749_v47  ;;  %v20751_v12 = vpop.f32.mrb[45].mxu0 }
 0x4ed   : > { %23621 = vst [vmem:[#allocation85_spill] sm:$0xff] %v20751_v12 }
 0x50f   : > { %v20753_v2 = vpop.f32.mrb[76].mxu1 }
 0x510   : > { %23622 = vst [vmem:[#allocation66_spill] sm:$0xff] %v20753_v2  ;;  %v20755_v7 = vpop.f32.mrb[77].mxu1 }
 0x511   : > { %23623 = vst [vmem:[#allocation69_spill] sm:$0xff] %v20755_v7 }
 0x513   : > { %v20757_v21 = vpop.f32.mrb[46].mxu0 }
 0x514   : > { %23624 = vst [vmem:[#allocation71_spill] sm:$0xff] %v20757_v21  ;;  %v20759_v4 = vpop.f32.mrb[47].mxu0 }
 0x515   : > { %23625 = vst [vmem:[#allocation70_spill] sm:$0xff] %v20759_v4 }
 0x51b   : > { %v20761_v10 = vpop.f32.mrb[48].mxu0  ;;  %v20763_v3 = vpop.f32.mrb[78].mxu1 }
 0x51c   : > { %23626 = vst [vmem:[#allocation92_spill] sm:$0xff] %v20763_v3  ;;  %v20765_v39 = vpop.f32.mrb[49].mxu0  ;;  %v5738_v61 = vsel %vm2534_vm3, %v20761_v10, -inf  ;;  %v20769_v47 = vpop.f32.mrb[79].mxu1 }
 0x51d   : > { %23627 = vst [vmem:[#allocation93_spill] sm:$0xff] %v20769_v47  ;;  %5739 = vmax.xlane.f32.xlu0 %v5738_v61  ;;  %v5735_v2 = vsel %vm2534_vm3, %v20765_v39, -inf }
 0x51e   : > { %5736 = vmax.xlane.f32.xlu1 %v5735_v2 }
 0x523   : > { %v20773_v7 = vpop.f32.mrb[80].mxu1  ;;  %v20775_v21 = vpop.f32.mrb[50].mxu0 }
 0x524   : > { %v20777_v4 = vpop.f32.mrb[81].mxu1  ;;  %v20779_v12 = vpop.f32.mrb[51].mxu0  ;;  %v5750_v3 = vsel %vm2534_vm3, %v20775_v21, -inf  ;;  %v5744_v14 = vsel %vm2534_vm3, %v20773_v7, -inf }
 0x525   : > { %5751 = vmax.xlane.f32.xlu1 %v5750_v3  ;;  %5745 = vmax.xlane.f32.xlu0 %v5744_v14  ;;  %v5747_v61 = vsel %vm2534_vm3, %v20779_v12, -inf  ;;  %v5741_v2 = vsel %vm2534_vm3, %v20777_v4, -inf }
 0x529   : > { %5748 = vmax.xlane.f32.xlu1 %v5747_v61  ;;  %5742 = vmax.xlane.f32.xlu0 %v5741_v2 }
 0x52b   : > { %v20789_v47 = vpop.f32.mrb[82].mxu1 }
 0x52c   : > { %v20791_v19 = vpop.f32.mrb[52].mxu0  ;;  %v20793_v46 = vpop.f32.mrb[83].mxu1  ;;  %v5756_v17 = vsel %vm2534_vm3, %v20789_v47, -inf }
 0x52d   : > { %v20797_v24 = vpop.f32.mrb[53].mxu0  ;;  %v5762_v3 = vsel %vm2534_vm3, %v20791_v19, -inf  ;;  %5757 = vmax.xlane.f32.xlu0 %v5756_v17  ;;  %v5753_v14 = vsel %vm2534_vm3, %v20793_v46, -inf }
 0x52e   : > { %5763 = vmax.xlane.f32.xlu1 %v5762_v3  ;;  %v5759_v61 = vsel %vm2534_vm3, %v20797_v24, -inf }
 0x531   : > { %5754 = vmax.xlane.f32.xlu0 %v5753_v14 }
 0x532   : > { %5760 = vmax.xlane.f32.xlu1 %v5759_v61  ;;  %v20821_v61 = vpop.permute.xlu1 %18007 }
 0x533   : > { %v20805_v2 = vpop.f32.mrb[84].mxu1  ;;  %23628 = vst [vmem:[#allocation94_spill] sm:$0xff] %v20821_v61 }
 0x534   : > { %v20807_v8 = vpop.f32.mrb[54].mxu0  ;;  %v20809_v0 = vpop.f32.mrb[85].mxu1  ;;  %v5768_v15 = vsel %vm2534_vm3, %v20805_v2, -inf }
 0x535   : > { %v20813_v20 = vpop.f32.mrb[55].mxu0  ;;  %5769 = vmax.xlane.f32.xlu0 %v5768_v15  ;;  %v5774_v17 = vsel %vm2534_vm3, %v20807_v8, -inf  ;;  %v5765_v3 = vsel %vm2534_vm3, %v20809_v0, -inf }
 0x536   : > { %5775 = vmax.xlane.f32.xlu1 %v5774_v17  ;;  %v5771_v14 = vsel %vm2534_vm3, %v20813_v20, -inf  ;;  %v20837_v38 = vpop.permute.xlu1 %18012 }
 0x537   : > { %23629 = vst [vmem:[#allocation95_spill] sm:$0xff] %v20837_v38 }
 0x539   : > { %5766 = vmax.xlane.f32.xlu0 %v5765_v3 }
 0x53a   : > { %5772 = vmax.xlane.f32.xlu1 %v5771_v14  ;;  %v20853_v40 = vpop.permute.xlu1 %18017 }
 0x53b   : > { %v20823_v41 = vpop.f32.mrb[86].mxu1  ;;  %23630 = vst [vmem:[#allocation96_spill] sm:$0xff] %v20853_v40 }
 0x53c   : > { %v20825_v56 = vpop.f32.mrb[56].mxu0  ;;  %v20827_v63 = vpop.f32.mrb[87].mxu1  ;;  %v5780_v15 = vsel %vm2534_vm3, %v20823_v41, -inf }
 0x53d   : > { %v20831_v17 = vpop.f32.mrb[57].mxu0  ;;  %v5786_v3 = vsel %vm2534_vm3, %v20825_v56, -inf  ;;  %5781 = vmax.xlane.f32.xlu0 %v5780_v15  ;;  %v5777_v14 = vsel %vm2534_vm3, %v20827_v63, -inf }
 0x53e   : > { %5787 = vmax.xlane.f32.xlu1 %v5786_v3  ;;  %v5783_v62 = vsel %vm2534_vm3, %v20831_v17, -inf }
 0x541   : > { %5778 = vmax.xlane.f32.xlu0 %v5777_v14 }
 0x542   : > { %5784 = vmax.xlane.f32.xlu1 %v5783_v62 }
 0x543   : > { %v20841_v29 = vpop.f32.mrb[88].mxu1 }
 0x544   : > { %v20843_v58 = vpop.f32.mrb[58].mxu0  ;;  %v20845_v44 = vpop.f32.mrb[89].mxu1  ;;  %v5792_v15 = vsel %vm2534_vm3, %v20841_v29, -inf }
 0x545   : > { %v20849_v3 = vpop.f32.mrb[59].mxu0  ;;  %v5798_v23 = vsel %vm2534_vm3, %v20843_v58, -inf  ;;  %5793 = vmax.xlane.f32.xlu0 %v5792_v15  ;;  %v5789_v62 = vsel %vm2534_vm3, %v20845_v44, -inf }
 0x546   : > { %5799 = vmax.xlane.f32.xlu1 %v5798_v23  ;;  %v5795_v14 = vsel %vm2534_vm3, %v20849_v3, -inf  ;;  %v20867_v23 = vpop.permute.xlu1 %18027 }
 0x547   : > { %23631 = vst [vmem:[#allocation97_spill] sm:$0xff] %v20867_v23 }
 0x549   : > { %5790 = vmax.xlane.f32.xlu0 %v5789_v62 }
 0x54a   : > { %5796 = vmax.xlane.f32.xlu1 %v5795_v14  ;;  %v20877_v50 = vpop.permute.xlu1 %18032 }
 0x54b   : > { %v20859_v42 = vpop.f32.mrb[90].mxu1  ;;  %23632 = vst [vmem:[#allocation98_spill] sm:$0xff] %v20877_v50 }
 0x54c   : > { %v20861_v53 = vpop.f32.mrb[60].mxu0  ;;  %v20863_v35 = vpop.f32.mrb[91].mxu1  ;;  %v5804_v15 = vsel %vm2534_vm3, %v20859_v42, -inf }
 0x54d   : > { %v20869_v6 = vpop.f32.mrb[61].mxu0  ;;  %v5810_v48 = vsel %vm2534_vm3, %v20861_v53, -inf  ;;  %5805 = vmax.xlane.f32.xlu0 %v5804_v15  ;;  %v5801_v62 = vsel %vm2534_vm3, %v20863_v35, -inf }
 0x54e   : > { %5811 = vmax.xlane.f32.xlu1 %v5810_v48  ;;  %v5807_v14 = vsel %vm2534_vm3, %v20869_v6, -inf }
 0x551   : > { %5802 = vmax.xlane.f32.xlu0 %v5801_v62  ;;  %v20891_v62 = vpop.permute.xlu1 %18037 }
 0x552   : > { %5808 = vmax.xlane.f32.xlu1 %v5807_v14  ;;  %23633 = vst [vmem:[#allocation99_spill] sm:$0xff] %v20891_v62 }
 0x553   : > { %v20879_v28 = vpop.f32.mrb[92].mxu1 }
 0x554   : > { %v20881_v23 = vpop.f32.mrb[62].mxu0  ;;  %v20883_v30 = vpop.f32.mrb[93].mxu1  ;;  %v5816_v15 = vsel %vm2534_vm3, %v20879_v28, -inf }
 0x555   : > { %v20887_v48 = vpop.f32.mrb[63].mxu0  ;;  %v5813_v40 = vsel %vm2534_vm3, %v20883_v30, -inf  ;;  %v5822_v14 = vsel %vm2534_vm3, %v20881_v23, -inf }
 0x556   : > { %5817 = vmax.xlane.f32.xlu1 %v5816_v15  ;;  %5814 = vmax.xlane.f32.xlu0 %v5813_v40  ;;  %v5819_v50 = vsel %vm2534_vm3, %v20887_v48, -inf  ;;  %v20905_v15 = vpop.permute.xlu1 %18042 }
 0x557   : > { %23634 = vst [vmem:[#allocation100_spill] sm:$0xff] %v20905_v15 }
 0x55a   : > { %5823 = vmax.xlane.f32.xlu1 %v5822_v14  ;;  %5820 = vmax.xlane.f32.xlu0 %v5819_v50  ;;  %v20907_v62 = vpop.permute.xlu1 %18047 }
 0x55b   : > { %v20897_v38 = vpop.f32.mrb[94].mxu1  ;;  %23635 = vst [vmem:[#allocation101_spill] sm:$0xff] %v20907_v62 }
 0x55c   : > { %v20899_v51 = vpop.f32.mrb[95].mxu1  ;;  %v5828_v32 = vsel %vm2534_vm3, %v20897_v38, -inf }
 0x55d   : > { %v5825_v40 = vsel %vm2534_vm3, %v20899_v51, -inf }
 0x55e   : > { %5829 = vmax.xlane.f32.xlu1 %v5828_v32  ;;  %5826 = vmax.xlane.f32.xlu0 %v5825_v40  ;;  %v20909_v45 = vpop.permute.xlu1 %18052  ;;  %v20921_v32 = vpop.permute.xlu0 %18022 }
 0x55f   : > { %23636 = vst [vmem:[#allocation102_spill] sm:$0xff] %v20909_v45  ;;  %23640 = vst [vmem:[#allocation106_spill] sm:$0xff] %v20921_v32 }
 0x562   : > { %v20913_v50 = vpop.permute.xlu1 %18062  ;;  %v20925_v15 = vpop.permute.xlu0 %18057 }
 0x563   : > { %23637 = vst [vmem:[#allocation103_spill] sm:$0xff] %v20913_v50  ;;  %23642 = vst [vmem:[#allocation108_spill] sm:$0xff] %v20925_v15 }
 0x566   : > { %v20917_v14 = vpop.permute.xlu1 %18067  ;;  %v20929_v45 = vpop.permute.xlu0 %7481 }
 0x567   : > { %23638 = vst [vmem:[#allocation104_spill] sm:$0xff] %v20917_v14  ;;  %23644 = vst [vmem:[#allocation110_spill] sm:$0xff] %v20929_v45 }
 0x56a   : > { %v20919_v27 = vpop.permute.xlu1 %18072  ;;  %v20933_v50 = vpop.permute.xlu0 %7570 }
 0x56b   : > { %23639 = vst [vmem:[#allocation105_spill] sm:$0xff] %v20919_v27  ;;  %23646 = vst [vmem:[#allocation112_spill] sm:$0xff] %v20933_v50 }
 0x56e   : > { %v20923_v40 = vpop.permute.xlu1 %18077 }
 0x56f   : > { %7843 = vrot.lane.b32.xlu1 %v19770_v5, %s19132_s25  ;;  %23641 = vst [vmem:[#allocation107_spill] sm:$0xff] %v20923_v40 }
 0x572   : > { %v20927_v62 = vpop.permute.xlu1 %7479 }
 0x573   : > { %23643 = vst [vmem:[#allocation109_spill] sm:$0xff] %v20927_v62 }
 0x574   : > { %18097 = vrot.lane.b32.xlu0 %v23547_v37, %s19132_s25  ;;  %v20937_v37 = vpop.permute.xlu0 %18087 }
 0x575   : > { %23648 = vst [vmem:[#allocation114_spill] sm:$0xff] %v20937_v37 }
 0x576   : > { %v20931_v5 = vpop.permute.xlu1 %18082 }
 0x577   : > { %23645 = vst [vmem:[#allocation111_spill] sm:$0xff] %v20931_v5 }
 0x578   : > { %v20941_v27 = vpop.permute.xlu0 %7663 }
 0x579   : > { %23650 = vst [vmem:[#allocation116_spill] sm:$0xff] %v20941_v27 }
 0x57a   : > { %v20935_v57 = vpop.permute.xlu1 %7572 }
 0x57b   : > { %23647 = vst [vmem:[#allocation113_spill] sm:$0xff] %v20935_v57 }
 0x57c   : > { %v20945_v40 = vpop.permute.xlu0 %7752 }
 0x57d   : > { %23652 = vst [vmem:[#allocation118_spill] sm:$0xff] %v20945_v40 }
 0x57e   : > { %v20939_v14 = vpop.permute.xlu1 %7661 }
 0x57f   : > { %23649 = vst [vmem:[#allocation115_spill] sm:$0xff] %v20939_v14 }
 0x582   : > { %v20943_v32 = vpop.permute.xlu1 %18092 }
 0x583   : > { %23651 = vst [vmem:[#allocation117_spill] sm:$0xff] %v20943_v32 }
 0x586   : > { %v20947_v15 = vpop.permute.xlu1 %7754 }
 0x587   : > { %23653 = vst [vmem:[#allocation119_spill] sm:$0xff] %v20947_v15 }
 0x5aa   : > { %v5740_v62 = vpop.xlane.xlu0 %5739 }
 0x5ab   : > { %v5832_v45 = vsub.f32 %v20761_v10, %v5740_v62  ;;  %v5737_v5 = vpop.xlane.xlu1 %5736 }
 0x5ac   : > { %v5831_v50 = vsub.f32 %v20765_v39, %v5737_v5 }
 0x5ad   : > { %v5865_v60 = vmul.f32 1.442695, %v5832_v45 }
 0x5ae   : > { %v5863_v57 = vmul.f32 1.442695, %v5831_v50 }
 0x5af   : > { %18514 = vpow2.f32 %v5865_v60 }
 0x5b0   : > { %18516 = vpow2.f32 %v5863_v57 }
 0x5b2   : > { %v5752_v37 = vpop.xlane.xlu1 %5751  ;;  %v5746_v14 = vpop.xlane.xlu0 %5745 }
 0x5b3   : > { %v5836_v27 = vsub.f32 %v20775_v21, %v5752_v37  ;;  %v5834_v32 = vsub.f32 %v20773_v7, %v5746_v14 }
 0x5b5   : > { %v5873_v61 = vmul.f32 1.442695, %v5836_v27  ;;  %v5869_v40 = vmul.f32 1.442695, %v5834_v32 }
 0x5b6   : > { %v5749_v1 = vpop.xlane.xlu1 %5748  ;;  %v5743_v15 = vpop.xlane.xlu0 %5742 }
 0x5b7   : > { %18518 = vpow2.f32 %v5873_v61  ;;  %v5835_v10 = vsub.f32 %v20779_v12, %v5749_v1  ;;  %v5833_v62 = vsub.f32 %v20777_v4, %v5743_v15 }
 0x5b8   : > { %18520 = vpow2.f32 %v5869_v40 }
 0x5b9   : > { %v20955_v5 = vpop.eup %18514  ;;  %v5871_v60 = vmul.f32 1.442695, %v5835_v10  ;;  %v5867_v57 = vmul.f32 1.442695, %v5833_v62 }
 0x5ba   : > { %v20957_v45 = vpop.eup %18516  ;;  %v5758_v39 = vpop.xlane.xlu0 %5757  ;;  %v5930_v37 = vsel %vm2534_vm3, %v20955_v5, 0.0 }
 0x5bb   : > { %18522 = vpow2.f32 %v5871_v60  ;;  %v5764_v27 = vpop.xlane.xlu1 %5763  ;;  %v5838_v7 = vsub.f32 %v20789_v47, %v5758_v39  ;;  %5931 = vadd.xlane.f32.xlu1 %v5930_v37  ;;  %v5927_v1 = vsel %vm2534_vm3, %v20957_v45, 0.0 }
 0x5bc   : > { %18524 = vpow2.f32 %v5867_v57  ;;  %v5840_v12 = vsub.f32 %v20791_v19, %v5764_v27  ;;  %5928 = vadd.xlane.f32.xlu0 %v5927_v1 }
 0x5bd   : > { %v5877_v21 = vmul.f32 1.442695, %v5838_v7 }
 0x5be   : > { %v5881_v4 = vmul.f32 1.442695, %v5840_v12  ;;  %v5755_v61 = vpop.xlane.xlu0 %5754 }
 0x5bf   : > { %18526 = vpow2.f32 %v5877_v21  ;;  %v5761_v15 = vpop.xlane.xlu1 %5760  ;;  %v5837_v50 = vsub.f32 %v20793_v46, %v5755_v61 }
 0x5c0   : > { %18528 = vpow2.f32 %v5881_v4  ;;  %v5839_v14 = vsub.f32 %v20797_v24, %v5761_v15 }
 0x5c1   : > { %v20967_v32 = vpop.eup %18518  ;;  %v5875_v47 = vmul.f32 1.442695, %v5837_v50 }
 0x5c2   : > { %v20969_v40 = vpop.eup %18520  ;;  %v5879_v10 = vmul.f32 1.442695, %v5839_v14  ;;  %v5770_v62 = vpop.xlane.xlu0 %5769  ;;  %v5942_v19 = vsel %vm2534_vm3, %v20967_v32, 0.0 }
 0x5c3   : > { %18530 = vpow2.f32 %v5875_v47  ;;  %v5776_v60 = vpop.xlane.xlu1 %5775  ;;  %v5842_v57 = vsub.f32 %v20805_v2, %v5770_v62  ;;  %5943 = vadd.xlane.f32.xlu1 %v5942_v19  ;;  %v5936_v46 = vsel %vm2534_vm3, %v20969_v40, 0.0 }
 0x5c4   : > { %18532 = vpow2.f32 %v5879_v10  ;;  %v5844_v24 = vsub.f32 %v20807_v8, %v5776_v60  ;;  %5937 = vadd.xlane.f32.xlu0 %v5936_v46 }
 0x5c5   : > { %v20977_v39 = vpop.eup %18522  ;;  %v5885_v37 = vmul.f32 1.442695, %v5842_v57 }
 0x5c6   : > { %v20979_v27 = vpop.eup %18524  ;;  %v5889_v7 = vmul.f32 1.442695, %v5844_v24  ;;  %v5767_v1 = vpop.xlane.xlu0 %5766  ;;  %v5939_v12 = vsel %vm2534_vm3, %v20977_v39, 0.0 }
 0x5c7   : > { %18534 = vpow2.f32 %v5885_v37  ;;  %v5773_v2 = vpop.xlane.xlu1 %5772  ;;  %v5841_v21 = vsub.f32 %v20809_v0, %v5767_v1  ;;  %5940 = vadd.xlane.f32.xlu1 %v5939_v12  ;;  %v5933_v4 = vsel %vm2534_vm3, %v20979_v27, 0.0 }
 0x5c8   : > { %18536 = vpow2.f32 %v5889_v7  ;;  %v5843_v8 = vsub.f32 %v20813_v20, %v5773_v2  ;;  %5934 = vadd.xlane.f32.xlu0 %v5933_v4 }
 0x5c9   : > { %v20987_v61 = vpop.eup %18526  ;;  %v5883_v15 = vmul.f32 1.442695, %v5841_v21 }
 0x5ca   : > { %v20989_v50 = vpop.eup %18528  ;;  %v5887_v14 = vmul.f32 1.442695, %v5843_v8  ;;  %v5782_v47 = vpop.xlane.xlu0 %5781  ;;  %v5948_v10 = vsel %vm2534_vm3, %v20987_v61, 0.0 }
 0x5cb   : > { %18538 = vpow2.f32 %v5883_v15  ;;  %v5788_v0 = vpop.xlane.xlu1 %5787  ;;  %v5846_v62 = vsub.f32 %v20823_v41, %v5782_v47  ;;  %v5954_v19 = vsel %vm2534_vm3, %v20989_v50, 0.0 }
 0x5cc   : > { %18540 = vpow2.f32 %v5887_v14  ;;  %v5848_v20 = vsub.f32 %v20825_v56, %v5788_v0  ;;  %5955 = vadd.xlane.f32.xlu1 %v5954_v19  ;;  %5949 = vadd.xlane.f32.xlu0 %v5948_v10 }
 0x5cd   : > { %v20997_v60 = vpop.eup %18530  ;;  %v5893_v57 = vmul.f32 1.442695, %v5846_v62 }
 0x5ce   : > { %v20999_v46 = vpop.eup %18532  ;;  %v5897_v24 = vmul.f32 1.442695, %v5848_v20  ;;  %v5779_v37 = vpop.xlane.xlu0 %5778  ;;  %v5945_v7 = vsel %vm2534_vm3, %v20997_v60, 0.0 }
 0x5cf   : > { %18542 = vpow2.f32 %v5893_v57  ;;  %v5785_v41 = vpop.xlane.xlu1 %5784  ;;  %v5845_v1 = vsub.f32 %v20827_v63, %v5779_v37  ;;  %v5951_v12 = vsel %vm2534_vm3, %v20999_v46, 0.0 }
 0x5d0   : > { %18544 = vpow2.f32 %v5897_v24  ;;  %v5847_v56 = vsub.f32 %v20831_v17, %v5785_v41  ;;  %5952 = vadd.xlane.f32.xlu1 %v5951_v12  ;;  %5946 = vadd.xlane.f32.xlu0 %v5945_v7 }
 0x5d1   : > { %v21007_v2 = vpop.eup %18534  ;;  %v5891_v21 = vmul.f32 1.442695, %v5845_v1 }
 0x5d2   : > { %v21009_v4 = vpop.eup %18536  ;;  %v5895_v8 = vmul.f32 1.442695, %v5847_v56  ;;  %v5794_v15 = vpop.xlane.xlu0 %5793  ;;  %v5960_v14 = vsel %vm2534_vm3, %v21007_v2, 0.0 }
 0x5d3   : > { %18546 = vpow2.f32 %v5891_v21  ;;  %v5800_v63 = vpop.xlane.xlu1 %5799  ;;  %v5850_v47 = vsub.f32 %v20841_v29, %v5794_v15  ;;  %v5966_v10 = vsel %vm2534_vm3, %v21009_v4, 0.0 }
 0x5d4   : > { %18548 = vpow2.f32 %v5895_v8  ;;  %v5852_v17 = vsub.f32 %v20843_v58, %v5800_v63  ;;  %5967 = vadd.xlane.f32.xlu1 %v5966_v10  ;;  %5961 = vadd.xlane.f32.xlu0 %v5960_v14 }
 0x5d5   : > { %v21017_v0 = vpop.eup %18538  ;;  %v5901_v62 = vmul.f32 1.442695, %v5850_v47 }
 0x5d6   : > { %v21019_v19 = vpop.eup %18540  ;;  %v5905_v20 = vmul.f32 1.442695, %v5852_v17  ;;  %v5791_v57 = vpop.xlane.xlu0 %5790  ;;  %v5957_v24 = vsel %vm2534_vm3, %v21017_v0, 0.0 }
 0x5d7   : > { %18550 = vpow2.f32 %v5901_v62  ;;  %v5797_v29 = vpop.xlane.xlu1 %5796  ;;  %v5849_v37 = vsub.f32 %v20845_v44, %v5791_v57  ;;  %v5963_v7 = vsel %vm2534_vm3, %v21019_v19, 0.0 }
 0x5d8   : > { %18552 = vpow2.f32 %v5905_v20  ;;  %v5851_v58 = vsub.f32 %v20849_v3, %v5797_v29  ;;  %5964 = vadd.xlane.f32.xlu1 %v5963_v7  ;;  %5958 = vadd.xlane.f32.xlu0 %v5957_v24 }
 0x5d9   : > { %v21027_v41 = vpop.eup %18542  ;;  %v5899_v1 = vmul.f32 1.442695, %v5849_v37 }
 0x5da   : > { %v21029_v12 = vpop.eup %18544  ;;  %v5903_v56 = vmul.f32 1.442695, %v5851_v58  ;;  %v5806_v21 = vpop.xlane.xlu0 %5805  ;;  %v5972_v8 = vsel %vm2534_vm3, %v21027_v41, 0.0 }
 0x5db   : > { %18554 = vpow2.f32 %v5899_v1  ;;  %v5812_v44 = vpop.xlane.xlu1 %5811  ;;  %v5854_v15 = vsub.f32 %v20859_v42, %v5806_v21  ;;  %v5978_v14 = vsel %vm2534_vm3, %v21029_v12, 0.0 }
 0x5dc   : > { %18556 = vpow2.f32 %v5903_v56  ;;  %5979 = vadd.xlane.f32.xlu1 %v5978_v14  ;;  %5973 = vadd.xlane.f32.xlu0 %v5972_v8  ;;  %v5856_v10 = vsub.f32 %v20861_v53, %v5812_v44 }
 0x5dd   : > { %v21036_v3 = vpop.eup %18546  ;;  %v5909_v63 = vmul.f32 1.442695, %v5854_v15 }
 0x5de   : > { %v21038_v47 = vpop.eup %18548  ;;  %v5803_v17 = vpop.xlane.xlu0 %5802  ;;  %v5969_v62 = vsel %vm2534_vm3, %v21036_v3, 0.0  ;;  %v5913_v53 = vmul.f32 1.442695, %v5856_v10 }
 0x5df   : > { %18558 = vpow2.f32 %v5909_v63  ;;  %v5809_v20 = vpop.xlane.xlu1 %5808  ;;  %v5853_v42 = vsub.f32 %v20863_v35, %v5803_v17  ;;  %v5975_v57 = vsel %vm2534_vm3, %v21038_v47, 0.0 }
 0x5e0   : > { %v5855_v24 = vsub.f32 %v20869_v6, %v5809_v20  ;;  %5976 = vadd.xlane.f32.xlu1 %v5975_v57  ;;  %5970 = vadd.xlane.f32.xlu0 %v5969_v62 }
 0x5e1   : > { %v21047_v29 = vpop.eup %18550  ;;  %v5907_v37 = vmul.f32 1.442695, %v5853_v42 }
 0x5e2   : > { %v21049_v7 = vpop.eup %18552  ;;  %v5984_v58 = vsel %vm2534_vm3, %v21047_v29, 0.0  ;;  %v5911_v21 = vmul.f32 1.442695, %v5855_v24 }
 0x5e3   : > { %18560 = vpow2.f32 %v5907_v37  ;;  %v5818_v1 = vpop.xlane.xlu1 %5817  ;;  %v5815_v56 = vpop.xlane.xlu0 %5814  ;;  %v5990_v35 = vsel %vm2534_vm3, %v21049_v7, 0.0 }
 0x5e4   : > { %v5857_v6 = vsub.f32 %v20883_v30, %v5815_v56  ;;  %5991 = vadd.xlane.f32.xlu1 %v5990_v35  ;;  %5985 = vadd.xlane.f32.xlu0 %v5984_v58  ;;  %18562 = vpow2.f32 %v5913_v53  ;;  %v5858_v15 = vsub.f32 %v20879_v28, %v5818_v1 }
 0x5e5   : > { %v21056_v8 = vpop.eup %18554  ;;  %18564 = vpow2.f32 %v5911_v21 }
 0x5e6   : > { %v21058_v44 = vpop.eup %18556  ;;  %v5915_v14 = vmul.f32 1.442695, %v5857_v6  ;;  %v5981_v63 = vsel %vm2534_vm3, %v21056_v8, 0.0  ;;  %v5917_v42 = vmul.f32 1.442695, %v5858_v15 }
 0x5e7   : > { %v5824_v10 = vpop.xlane.xlu1 %5823  ;;  %v5821_v17 = vpop.xlane.xlu0 %5820  ;;  %v5987_v62 = vsel %vm2534_vm3, %v21058_v44, 0.0 }
 0x5e8   : > { %v5859_v30 = vsub.f32 %v20887_v48, %v5821_v17  ;;  %5988 = vadd.xlane.f32.xlu1 %v5987_v62  ;;  %5982 = vadd.xlane.f32.xlu0 %v5981_v63  ;;  %18566 = vpow2.f32 %v5915_v14  ;;  %v5860_v28 = vsub.f32 %v20881_v23, %v5824_v10 }
 0x5e9   : > { %v21066_v20 = vpop.eup %18558 }
 0x5ea   : > { %v5919_v57 = vmul.f32 1.442695, %v5859_v30  ;;  %v5996_v24 = vsel %vm2534_vm3, %v21066_v20, 0.0  ;;  %v5921_v56 = vmul.f32 1.442695, %v5860_v28 }
 0x5eb   : > { %v5830_v37 = vpop.xlane.xlu1 %5829  ;;  %v5827_v53 = vpop.xlane.xlu0 %5826 }
 0x5ec   : > { %v5862_v58 = vsub.f32 %v20897_v38, %v5830_v37  ;;  %5997 = vadd.xlane.f32.xlu1 %v5996_v24  ;;  %v5861_v1 = vsub.f32 %v20899_v51, %v5827_v53  ;;  %18568 = vpow2.f32 %v5919_v57 }
 0x5ed   : > { %v21073_v48 = vpop.eup %18560  ;;  %18570 = vpow2.f32 %v5917_v42 }
 0x5ee   : > { %v5925_v35 = vmul.f32 1.442695, %v5862_v58  ;;  %v5993_v23 = vsel %vm2534_vm3, %v21073_v48, 0.0  ;;  %v5923_v21 = vmul.f32 1.442695, %v5861_v1  ;;  %v21077_v6 = vpop.eup %18562  ;;  %v23654_v58 = vld [vmem:[#allocation44_spill] sm:$0xff] }
 0x5ef   : > { %v21079_v15 = vpop.eup %18564  ;;  %v6002_v51 = vsel %vm2534_vm3, %v21077_v6, 0.0  ;;  %v23655_v1 = vld [vmem:[#allocation41_spill] sm:$0xff] }
 0x5f0   : > { %18572 = vpow2.f32 %v5925_v35  ;;  %5994 = vadd.xlane.f32.xlu1 %v5993_v23  ;;  %v5999_v10 = vsel %vm2534_vm3, %v21079_v15, 0.0  ;;  %v23657_v35 = vld [vmem:[#allocation46_spill] sm:$0xff]  ;;  %v23658_v23 = vld [vmem:[#allocation24_spill] sm:$0xff] }
 0x5f1   : > { %18574 = vpow2.f32 %v5921_v56  ;;  %v23656_v56 = vld [vmem:[#allocation22_spill] sm:$0xff] }
 0x5f2   : > { %v21081_v38 = vpop.eup %18566  ;;  %18576 = vpow2.f32 %v5923_v21  ;;  %v23659_v21 = vld [vmem:[#allocation20_spill] sm:$0xff] }
 0x5f3   : > { %v6005_v14 = vsel %vm2534_vm3, %v21081_v38, 0.0 }
 0x5f4   : > { %6003 = vadd.xlane.f32.xlu1 %v6002_v51  ;;  %6006 = vadd.xlane.f32.xlu0 %v6005_v14  ;;  %v23660_v51 = vld [vmem:[#allocation29_spill] sm:$0xff]  ;;  %v23661_v14 = vld [vmem:[#allocation26_spill] sm:$0xff] }
 0x5f6   : > { %v21087_v63 = vpop.eup %18568 }
 0x5f7   : > { %v21091_v17 = vpop.eup %18570  ;;  %v6011_v62 = vsel %vm2534_vm3, %v21087_v63, 0.0 }
 0x5f8   : > { %6000 = vadd.xlane.f32.xlu1 %v5999_v10  ;;  %6012 = vadd.xlane.f32.xlu0 %v6011_v62  ;;  %v6008_v42 = vsel %vm2534_vm3, %v21091_v17, 0.0  ;;  %v23662_v10 = vld [vmem:[#allocation28_spill] sm:$0xff]  ;;  %v23663_v62 = vld [vmem:[#allocation34_spill] sm:$0xff] }
 0x5fa   : > { %v21095_v30 = vpop.eup %18572 }
 0x5fb   : > { %v6020_v28 = vsel %vm2534_vm3, %v21095_v30, 0.0  ;;  %v21101_v57 = vpop.eup %18574 }
 0x5fc   : > { %6009 = vadd.xlane.f32.xlu1 %v6008_v42  ;;  %v21103_v24 = vpop.eup %18576  ;;  %6021 = vadd.xlane.f32.xlu0 %v6020_v28  ;;  %v6014_v37 = vsel %vm2534_vm3, %v21101_v57, 0.0  ;;  %v23664_v42 = vld [vmem:[#allocation37_spill] sm:$0xff]  ;;  %v21159_v28 = vpop.permute.xlu1 %7843 }
 0x5fd   : > { %v6017_v53 = vsel %vm2534_vm3, %v21103_v24, 0.0 }
 0x600   : > { %6015 = vadd.xlane.f32.xlu1 %v6014_v37  ;;  %6018 = vadd.xlane.f32.xlu0 %v6017_v53  ;;  %v21161_v37 = vpop.permute.xlu0 %18097  ;;  %v23665_v53 = vld [vmem:[#allocation36_spill] sm:$0xff] }
 0x611   : > { %18102 = vrot.lane.b32.xlu1 %v19838_v54, %s19132_s25 }
 0x615   : > { %7936 = vrot.lane.b32.xlu1 %v19812_v55, %s19132_s25  ;;  %v23673_v55 = vld [vmem:[#allocation60_spill] sm:$0xff] }
 0x616   : > { %7845 = vrot.lane.b32.xlu0 %v19788_v49, %s19132_s25 }
 0x619   : > { %8025 = vrot.lane.b32.xlu1 %v23534_v25, %s19132_s25 }
 0x61a   : > { %7934 = vrot.lane.b32.xlu0 %v19792_v22, %s19132_s25 }
 0x61d   : > { %18112 = vrot.lane.b32.xlu1 %v23536_v11, %s19132_s25 }
 0x61e   : > { %18107 = vrot.lane.b32.xlu0 %v19854_v9, %s19132_s25 }
 0x621   : > { %8118 = vrot.lane.b32.xlu1 %v23654_v58, %s19132_s25 }
 0x622   : > { %8027 = vrot.lane.b32.xlu0 %v23655_v1, %s19132_s25 }
 0x625   : > { %8207 = vrot.lane.b32.xlu1 %v23656_v56, %s19132_s25 }
 0x626   : > { %8116 = vrot.lane.b32.xlu0 %v23657_v35, %s19132_s25 }
 0x629   : > { %18122 = vrot.lane.b32.xlu1 %v23542_v59, %s19132_s25 }
 0x62a   : > { %18117 = vrot.lane.b32.xlu0 %v19882_v52, %s19132_s25 }
 0x62d   : > { %8300 = vrot.lane.b32.xlu1 %v23658_v23, %s19132_s25  ;;  %v23667_v23 = vld [vmem:[#allocation48_spill] sm:$0xff] }
 0x62e   : > { %8209 = vrot.lane.b32.xlu0 %v23659_v21, %s19132_s25 }
 0x631   : > { %8389 = vrot.lane.b32.xlu1 %v23660_v51, %s19132_s25 }
 0x632   : > { %8298 = vrot.lane.b32.xlu0 %v23661_v14, %s19132_s25 }
 0x635   : > { %18132 = vrot.lane.b32.xlu1 %v23551_v18, %s19132_s25 }
 0x636   : > { %18127 = vrot.lane.b32.xlu0 %v19910_v16, %s19132_s25 }
 0x639   : > { %8482 = vrot.lane.b32.xlu1 %v23554_v31, %s19132_s25 }
 0x63a   : > { %8391 = vrot.lane.b32.xlu0 %v23662_v10, %s19132_s25  ;;  %v23671_v10 = vld [vmem:[#allocation50_spill] sm:$0xff] }
 0x63d   : > { %18137 = vrot.lane.b32.xlu1 %v23556_v36, %s19132_s25 }
 0x63e   : > { %8480 = vrot.lane.b32.xlu0 %v23663_v62, %s19132_s25 }
 0x641   : > { %8662 = vrot.lane.b32.xlu1 %v23558_v33, %s19132_s25 }
 0x642   : > { %8571 = vrot.lane.b32.xlu0 %v23664_v42, %s19132_s25  ;;  %v23666_v42 = vld [vmem:[#allocation42_spill] sm:$0xff] }
 0x645   : > { %8664 = vrot.lane.b32.xlu1 %v23560_v43, %s19132_s25 }
 0x646   : > { %8573 = vrot.lane.b32.xlu0 %v23665_v53, %s19132_s25 }
 0x648   : > { %v5932_v31 = vpop.xlane.xlu1 %5931 }
 0x649   : > { %8755 = vrot.lane.b32.xlu1 %v23562_v34, %s19132_s25  ;;  %18578 = vrcp.f32 %v5932_v31  ;;  %v5929_v51 = vpop.xlane.xlu0 %5928  ;;  %v23668_v31 = vld [vmem:[#allocation45_spill] sm:$0xff]  ;;  %v23669_v34 = vld [vmem:[#allocation94_spill] sm:$0xff] }
 0x64a   : > { %18580 = vrcp.f32 %v5929_v51  ;;  %18142 = vrot.lane.b32.xlu0 %v19952_v13, %s19132_s25  ;;  %v18010_v53 = vunpack.i.h.bf16 %v23669_v34  ;;  %v18009_v58 = vunpack.i.l.bf16 %v23669_v34 }
 0x64c   : > { %v17351_v34 = vpack.c.bf16 %v18010_v53, %v18009_v58  ;;  %v23675_v53 = vld [vmem:[#allocation56_spill] sm:$0xff] }
 0x64d   : > { %8846 = vrot.lane.b32.xlu1 %v23564_v26, %s19132_s25 }
 0x64e   : > { %8753 = vrot.lane.b32.xlu0 %v23666_v42, %s19132_s25  ;;  %v23670_v42 = vld [vmem:[#allocation49_spill] sm:$0xff] }
 0x650   : > { %v5944_v43 = vpop.xlane.xlu1 %5943 }
 0x651   : > { %18147 = vrot.lane.b32.xlu1 %v23667_v23, %s19133_s4  ;;  %v5938_v33 = vpop.xlane.xlu0 %5937  ;;  %18582 = vrcp.f32 %v5944_v43 }
 0x652   : > { %8844 = vrot.lane.b32.xlu0 %v23668_v31, %s19132_s25  ;;  %18584 = vrcp.f32 %v5938_v33  ;;  %v23672_v33 = vld [vmem:[#allocation51_spill] sm:$0xff] }
 0x653   : > { %v18579_v56 = vpop.eup %18578 }
 0x654   : > { %v18581_v51 = vpop.eup %18580  ;;  %v5941_v26 = vpop.xlane.xlu1 %5940  ;;  %v6056_v43 = vmul.f32 %v18579_v56, %v20955_v5 }
 0x655   : > { %18152 = vrot.lane.b32.xlu1 %v23670_v42, %s19133_s4  ;;  %18586 = vrcp.f32 %v5941_v26  ;;  %v5935_v62 = vpop.xlane.xlu0 %5934  ;;  %v6055_v25 = vmul.f32 %v18581_v51, %v20957_v45  ;;  %v23674_v45 = vld [vmem:[#allocation53_spill] sm:$0xff]  ;;  %v23676_v51 = vld [vmem:[#allocation95_spill] sm:$0xff] }
 0x656   : > { %18588 = vrcp.f32 %v5935_v62  ;;  %18157 = vrot.lane.b32.xlu0 %v23671_v10, %s19133_s4  ;;  %v18014_v14 = vunpack.i.l.bf16 %v23676_v51 }
 0x657   : > { %16451 = vmatprep.mubr.msk.f32.mxu0 %vm2534_vm3, %v6055_v25 }
 0x658   : > { %16452 = vmatmul.mubr.msk.f32.vlgmr.msra.gmra.mrb[64].mxu0 %vm2534_vm3, %v6056_v43  ;;  %v18015_v43 = vunpack.i.h.bf16 %v23676_v51  ;;  %v23678_v51 = vld [vmem:[#allocation59_spill] sm:$0xff] }
 0x659   : > { %18162 = vrot.lane.b32.xlu1 %v23672_v33, %s19133_s4  ;;  %v5956_v31 = vpop.xlane.xlu1 %5955  ;;  %17346 = vmatpush3.bf16.msra.mxu0 %v23673_v55  ;;  %v5950_v26 = vpop.xlane.xlu0 %5949 }
 0x65a   : > { %17352 = vmatprep.subr.bf16.mxu0 %v17351_v34  ;;  %18167 = vrot.lane.b32.xlu0 %v23674_v45, %s19133_s4  ;;  %18590 = vrcp.f32 %v5956_v31 }
 0x65b   : > { %v18583_v5 = vpop.eup %18582  ;;  %18592 = vrcp.f32 %v5950_v26  ;;  %v23677_v26 = vld [vmem:[#allocation96_spill] sm:$0xff] }
 0x65c   : > { %v18585_v58 = vpop.eup %18584  ;;  %v18020_v21 = vunpack.i.h.bf16 %v23677_v26  ;;  %v18019_v35 = vunpack.i.l.bf16 %v23677_v26  ;;  %v6060_v49 = vmul.f32 %v18583_v5, %v20967_v32 }
 0x65d   : > { %18182 = vrot.lane.b32.xlu1 %v19838_v54, %s19133_s4  ;;  %v5953_v25 = vpop.xlane.xlu1 %5952  ;;  %v5947_v56 = vpop.xlane.xlu0 %5946  ;;  %v6058_v22 = vmul.f32 %v18585_v58, %v20969_v40 }
 0x65e   : > { %18594 = vrcp.f32 %v5953_v25  ;;  %18172 = vrot.lane.b32.xlu0 %v23675_v53, %s19133_s4 }
 0x65f   : > { %v18587_v62 = vpop.eup %18586  ;;  %18596 = vrcp.f32 %v5947_v56 }
 0x660   : > { %v18589_v55 = vpop.eup %18588  ;;  %v6059_v31 = vmul.f32 %v18587_v62, %v20977_v39  ;;  %v17355_v39 = vpack.c.bf16 %v18015_v43, %v18014_v14  ;;  %v23679_v62 = vld [vmem:[#allocation61_spill] sm:$0xff] }
 0x661   : > { %18187 = vrot.lane.b32.xlu1 %v19854_v9, %s19133_s4  ;;  %v5968_v25 = vpop.xlane.xlu1 %5967  ;;  %v5962_v1 = vpop.xlane.xlu0 %5961  ;;  %v6057_v56 = vmul.f32 %v18589_v55, %v20979_v27  ;;  %v17359_v55 = vpack.c.bf16 %v18020_v21, %v18019_v35  ;;  %v23681_v35 = vld [vmem:[#allocation106_spill] sm:$0xff] }
 0x662   : > { %16465 = vmatprep.mubr.msk.f32.mxu0 %vm2534_vm3, %v6059_v31  ;;  %18177 = vrot.lane.b32.xlu0 %v23678_v51, %s19133_s4  ;;  %18598 = vrcp.f32 %v5968_v25  ;;  %v18025_v21 = vunpack.i.h.bf16 %v23681_v35  ;;  %v18024_v5 = vunpack.i.l.bf16 %v23681_v35 }
 0x663   : > { %16458 = vmatprep.mubr.msk.f32.mxu1 %vm2534_vm3, %v6057_v56  ;;  %16466 = vmatmul.mubr.msk.f32.vlgmr.msra.gmra.mrb[66].mxu0 %vm2534_vm3, %v6060_v49  ;;  %18600 = vrcp.f32 %v5962_v1 }
 0x664   : > { %16459 = vmatmul.mubr.msk.f32.vlgmr.msra.gmra.mrb[96].mxu1 %vm2534_vm3, %v6058_v22  ;;  %17354 = vmatpush3.bf16.msra.mxu0 %v17351_v34  ;;  %v18591_v58 = vpop.eup %18590  ;;  %v23680_v22 = vld [vmem:[#allocation97_spill] sm:$0xff] }
 0x665   : > { %17350 = vmatpush3.bf16.msra.mxu1 %v23679_v62  ;;  %v5965_v27 = vpop.xlane.xlu1 %5964  ;;  %v5959_v40 = vpop.xlane.xlu0 %5958  ;;  %18192 = vrot.lane.b32.xlu1 %v23536_v11, %s19133_s4  ;;  %v18030_v1 = vunpack.i.h.bf16 %v23680_v22  ;;  %v18029_v34 = vunpack.i.l.bf16 %v23680_v22  ;;  %v6064_v56 = vmul.f32 %v18591_v58, %v20989_v50 }
 0x666   : > { %18602 = vrcp.f32 %v5965_v27  ;;  %17356 = vmatprep.subr.bf16.mxu1 %v17355_v39  ;;  %v18593_v32 = vpop.eup %18592  ;;  %17360 = vmatprep.subr.bf16.mxu0 %v17359_v55 }
 0x667   : > { %18604 = vrcp.f32 %v5959_v40  ;;  %18197 = vrot.lane.b32.xlu0 %v19882_v52, %s19133_s4  ;;  %v6062_v62 = vmul.f32 %v18593_v32, %v20987_v61  ;;  %v17367_v50 = vpack.c.bf16 %v18030_v1, %v18029_v34  ;;  %v23683_v34 = vld [vmem:[#allocation99_spill] sm:$0xff] }
 0x668   : > { %v18595_v49 = vpop.eup %18594  ;;  %v18040_v35 = vunpack.i.h.bf16 %v23683_v34 }
 0x669   : > { %v18597_v14 = vpop.eup %18596  ;;  %v5980_v43 = vpop.xlane.xlu1 %5979  ;;  %v6063_v26 = vmul.f32 %v18595_v49, %v20999_v46  ;;  %18202 = vrot.lane.b32.xlu1 %v23542_v59, %s19133_s4  ;;  %v17363_v46 = vpack.c.bf16 %v18025_v21, %v18024_v5  ;;  %v18039_v21 = vunpack.i.l.bf16 %v23683_v34 }
 0x66a   : > { %v5974_v31 = vpop.xlane.xlu0 %5973  ;;  %v6061_v25 = vmul.f32 %v18597_v14, %v20997_v60  ;;  %18606 = vrcp.f32 %v5980_v43 }
 0x66b   : > { %18227 = vrot.lane.b32.xlu0 %v23667_v23, %s19134_s20  ;;  %16479 = vmatprep.mubr.msk.f32.mxu0 %vm2534_vm3, %v6063_v26  ;;  %18608 = vrcp.f32 %v5974_v31  ;;  %v23684_v26 = vld [vmem:[#allocation21_spill] sm:$0xff] }
 0x66c   : > { %16472 = vmatprep.mubr.msk.f32.mxu1 %vm2534_vm3, %v6061_v25  ;;  %16480 = vmatmul.mubr.msk.f32.vlgmr.msra.gmra.mrb[68].mxu0 %vm2534_vm3, %v6064_v56  ;;  %v18599_v40 = vpop.eup %18598 }
 0x66d   : > { %16473 = vmatmul.mubr.msk.f32.vlgmr.msra.gmra.mrb[98].mxu1 %vm2534_vm3, %v6062_v62  ;;  %17362 = vmatpush3.bf16.msra.mxu0 %v17359_v55  ;;  %v5977_v60 = vpop.xlane.xlu1 %5976  ;;  %v18601_v61 = vpop.eup %18600  ;;  %v23682_v55 = vld [vmem:[#allocation98_spill] sm:$0xff]  ;;  %v6068_v31 = vmul.f32 %v18599_v40, %v21009_v4  ;;  %v23686_v40 = vld [vmem:[#allocation100_spill] sm:$0xff] }
 0x66e   : > { %v5971_v27 = vpop.xlane.xlu0 %5970  ;;  %17358 = vmatpush3.bf16.msra.mxu1 %v17355_v39  ;;  %18207 = vrot.lane.b32.xlu1 %v19910_v16, %s19133_s4  ;;  %18610 = vrcp.f32 %v5977_v60  ;;  %v18035_v49 = vunpack.i.h.bf16 %v23682_v55  ;;  %v18034_v22 = vunpack.i.l.bf16 %v23682_v55  ;;  %v6066_v43 = vmul.f32 %v18601_v61, %v21007_v2  ;;  %v23685_v60 = vld [vmem:[#allocation27_spill] sm:$0xff] }
 0x66f   : > { %17364 = vmatprep.subr.bf16.mxu1 %v17363_v46  ;;  %17368 = vmatprep.subr.bf16.mxu0 %v17367_v50  ;;  %18612 = vrcp.f32 %v5971_v27  ;;  %v17375_v2 = vpack.c.bf16 %v18040_v35, %v18039_v21  ;;  %v18045_v61 = vunpack.i.h.bf16 %v23686_v40  ;;  %v23688_v35 = vld [vmem:[#allocation31_spill] sm:$0xff] }
 0x670   : > { %v18603_v58 = vpop.eup %18602  ;;  %18237 = vrot.lane.b32.xlu0 %v23671_v10, %s19134_s20  ;;  %v17371_v25 = vpack.c.bf16 %v18035_v49, %v18034_v22 }
 0x671   : > { %v18605_v32 = vpop.eup %18604  ;;  %v5992_v1 = vpop.xlane.xlu1 %5991  ;;  %v6067_v39 = vmul.f32 %v18603_v58, %v21019_v19  ;;  %v18044_v58 = vunpack.i.l.bf16 %v23686_v40  ;;  %v23692_v40 = vld [vmem:[#allocation35_spill] sm:$0xff] }
 0x672   : > { %v5986_v14 = vpop.xlane.xlu0 %5985  ;;  %18212 = vrot.lane.b32.xlu1 %v23551_v18, %s19133_s4  ;;  %v6065_v5 = vmul.f32 %v18605_v32, %v21017_v0  ;;  %18614 = vrcp.f32 %v5992_v1  ;;  %v23687_v32 = vld [vmem:[#allocation101_spill] sm:$0xff] }
 0x673   : > { %16493 = vmatprep.mubr.msk.f32.mxu0 %vm2534_vm3, %v6067_v39  ;;  %18616 = vrcp.f32 %v5986_v14  ;;  %v18050_v55 = vunpack.i.h.bf16 %v23687_v32  ;;  %v18049_v49 = vunpack.i.l.bf16 %v23687_v32 }
 0x674   : > { %10681 = vrot.lane.b32.xlu0 %v23684_v26, %s19134_s20  ;;  %16486 = vmatprep.mubr.msk.f32.mxu1 %vm2534_vm3, %v6065_v5  ;;  %v18607_v56 = vpop.eup %18606  ;;  %v23689_v5 = vld [vmem:[#allocation102_spill] sm:$0xff] }
 0x675   : > { %16487 = vmatmul.mubr.msk.f32.vlgmr.msra.gmra.mrb[100].mxu1 %vm2534_vm3, %v6066_v43  ;;  %16494 = vmatmul.mubr.msk.f32.vlgmr.msra.gmra.mrb[70].mxu0 %vm2534_vm3, %v6068_v31  ;;  %v5989_v19 = vpop.xlane.xlu1 %5988  ;;  %v18609_v4 = vpop.eup %18608  ;;  %v6072_v14 = vmul.f32 %v18607_v56, %v21029_v12  ;;  %v17383_v34 = vpack.c.bf16 %v18050_v55, %v18049_v49  ;;  %v18055_v43 = vunpack.i.h.bf16 %v23689_v5  ;;  %v18054_v31 = vunpack.i.l.bf16 %v23689_v5 }
 0x676   : > { %v5983_v0 = vpop.xlane.xlu0 %5982  ;;  %17366 = vmatpush3.bf16.msra.mxu1 %v17363_v46  ;;  %17370 = vmatpush3.bf16.msra.mxu0 %v17367_v50  ;;  %18618 = vrcp.f32 %v5989_v19  ;;  %v6070_v1 = vmul.f32 %v18609_v4, %v21027_v41 }
 0x677   : > { %18217 = vrot.lane.b32.xlu1 %v23556_v36, %s19133_s4  ;;  %17372 = vmatprep.subr.bf16.mxu1 %v17371_v25  ;;  %18620 = vrcp.f32 %v5983_v0 }
 0x678   : > { %v18611_v62 = vpop.eup %18610  ;;  %17376 = vmatprep.subr.bf16.mxu0 %v17375_v2  ;;  %10770 = vrot.lane.b32.xlu0 %v23685_v60, %s19134_s20 }
 0x679   : > { %v18613_v27 = vpop.eup %18612  ;;  %v5998_v46 = vpop.xlane.xlu1 %5997  ;;  %v6071_v50 = vmul.f32 %v18611_v62, %v21038_v47  ;;  %v17379_v47 = vpack.c.bf16 %v18045_v61, %v18044_v58  ;;  %v23691_v62 = vld [vmem:[#allocation23_spill] sm:$0xff] }
 0x67a   : > { %v6069_v22 = vmul.f32 %v18613_v27, %v21036_v3  ;;  %18622 = vrcp.f32 %v5998_v46  ;;  %v23693_v46 = vld [vmem:[#allocation103_spill] sm:$0xff] }
 0x67b   : > { %18222 = vrot.lane.b32.xlu1 %v19952_v13, %s19133_s4  ;;  %16507 = vmatprep.mubr.msk.f32.mxu0 %vm2534_vm3, %v6071_v50  ;;  %v18065_v50 = vunpack.i.h.bf16 %v23693_v46  ;;  %v18064_v32 = vunpack.i.l.bf16 %v23693_v46 }
 0x67c   : > { %18247 = vrot.lane.b32.xlu0 %v23674_v45, %s19134_s20  ;;  %16500 = vmatprep.mubr.msk.f32.mxu1 %vm2534_vm3, %v6069_v22  ;;  %v18615_v39 = vpop.eup %18614 }
 0x67d   : > { %16501 = vmatmul.mubr.msk.f32.vlgmr.msra.gmra.mrb[102].mxu1 %vm2534_vm3, %v6070_v1  ;;  %16508 = vmatmul.mubr.msk.f32.vlgmr.msra.gmra.mrb[72].mxu0 %vm2534_vm3, %v6072_v14  ;;  %v5995_v3 = vpop.xlane.xlu1 %5994  ;;  %v18617_v41 = vpop.eup %18616  ;;  %v6076_v27 = vmul.f32 %v18615_v39, %v21049_v7  ;;  %v23694_v14 = vld [vmem:[#allocation25_spill] sm:$0xff] }
 0x67e   : > { %17374 = vmatpush3.bf16.msra.mxu1 %v17371_v25  ;;  %17378 = vmatpush3.bf16.msra.mxu0 %v17375_v2  ;;  %18624 = vrcp.f32 %v5995_v3  ;;  %v23690_v25 = vld [vmem:[#allocation108_spill] sm:$0xff]  ;;  %v6074_v60 = vmul.f32 %v18617_v41, %v21047_v29  ;;  %v17395_v3 = vpack.c.bf16 %v18065_v50, %v18064_v32 }
 0x67f   : > { %18232 = vrot.lane.b32.xlu1 %v23670_v42, %s19134_s20  ;;  %17380 = vmatprep.subr.bf16.mxu1 %v17379_v47  ;;  %v18060_v0 = vunpack.i.h.bf16 %v23690_v25  ;;  %v18059_v56 = vunpack.i.l.bf16 %v23690_v25 }
 0x680   : > { %v18619_v12 = vpop.eup %18618  ;;  %17384 = vmatprep.subr.bf16.mxu0 %v17383_v34  ;;  %10863 = vrot.lane.b32.xlu0 %v23688_v35, %s19134_s20  ;;  %v23696_v35 = vld [vmem:[#allocation104_spill] sm:$0xff] }
 0x681   : > { %v18621_v21 = vpop.eup %18620  ;;  %v6004_v26 = vpop.xlane.xlu1 %6003  ;;  %v6075_v19 = vmul.f32 %v18619_v12, %v21058_v44  ;;  %v17387_v44 = vpack.c.bf16 %v18055_v43, %v18054_v31  ;;  %v17391_v61 = vpack.c.bf16 %v18060_v0, %v18059_v56  ;;  %v18069_v5 = vunpack.i.l.bf16 %v23696_v35  ;;  %v23697_v0 = vld [vmem:[#allocation105_spill] sm:$0xff] }
 0x682   : > { %v6007_v2 = vpop.xlane.xlu0 %6006  ;;  %v6073_v4 = vmul.f32 %v18621_v21, %v21056_v8  ;;  %v18070_v21 = vunpack.i.h.bf16 %v23696_v35  ;;  %v18075_v56 = vunpack.i.h.bf16 %v23697_v0 }
 0x683   : > { %10679 = vrot.lane.b32.xlu1 %v23691_v62, %s19134_s20  ;;  %18626 = vrcp.f32 %v6007_v2  ;;  %16521 = vmatprep.mubr.msk.f32.mxu0 %vm2534_vm3, %v6075_v19  ;;  %v18074_v2 = vunpack.i.l.bf16 %v23697_v0 }
 0x684   : > { %10952 = vrot.lane.b32.xlu0 %v23692_v40, %s19134_s20  ;;  %16514 = vmatprep.mubr.msk.f32.mxu1 %vm2534_vm3, %v6073_v4  ;;  %18628 = vrcp.f32 %v6004_v26  ;;  %v18623_v29 = vpop.eup %18622  ;;  %v17399_v62 = vpack.c.bf16 %v18070_v21, %v18069_v5 }
 0x685   : > { %16515 = vmatmul.mubr.msk.f32.vlgmr.msra.gmra.mrb[104].mxu1 %vm2534_vm3, %v6074_v60  ;;  %16522 = vmatmul.mubr.msk.f32.vlgmr.msra.gmra.mrb[74].mxu0 %vm2534_vm3, %v6076_v27  ;;  %v6001_v8 = vpop.xlane.xlu1 %6000  ;;  %v6078_v1 = vmul.f32 %v18623_v29, %v21066_v20  ;;  %v23695_v20 = vld [vmem:[#allocation30_spill] sm:$0xff]  ;;  %v17405_v40 = vpack.c.bf16 %v18075_v56, %v18074_v2  ;;  %v23708_v56 = vld [vmem:[#allocation113_spill] sm:$0xff]  ;;  %v18100_v2 = vunpack.i.h.bf16 %v21161_v37 }
 0x686   : > { %17382 = vmatpush3.bf16.msra.mxu1 %v17379_v47  ;;  %17386 = vmatpush3.bf16.msra.mxu0 %v17383_v34  ;;  %18630 = vrcp.f32 %v6001_v8  ;;  %v6013_v58 = vpop.xlane.xlu0 %6012  ;;  %v23699_v8 = vld [vmem:[#allocation33_spill] sm:$0xff] }
 0x687   : > { %18242 = vrot.lane.b32.xlu1 %v23672_v33, %s19134_s20  ;;  %17388 = vmatprep.subr.bf16.mxu1 %v17387_v44  ;;  %18632 = vrcp.f32 %v6013_v58  ;;  %v23700_v58 = vld [vmem:[#allocation107_spill] sm:$0xff] }
 0x688   : > { %v18625_v7 = vpop.eup %18624  ;;  %17392 = vmatprep.subr.bf16.mxu0 %v17391_v61  ;;  %v18080_v29 = vunpack.i.h.bf16 %v23700_v58 }
 0x689   : > { %v6010_v55 = vpop.xlane.xlu1 %6009  ;;  %v6077_v49 = vmul.f32 %v18625_v7, %v21073_v48  ;;  %v18079_v7 = vunpack.i.l.bf16 %v23700_v58 }
 0x68a   : > { %18634 = vrcp.f32 %v6010_v55  ;;  %v6022_v22 = vpop.xlane.xlu0 %6021 }
 0x68b   : > { %10772 = vrot.lane.b32.xlu1 %v23694_v14, %s19134_s20  ;;  %16528 = vmatprep.mubr.msk.f32.mxu1 %vm2534_vm3, %v6077_v49  ;;  %18636 = vrcp.f32 %v6022_v22  ;;  %v23701_v49 = vld [vmem:[#allocation111_spill] sm:$0xff]  ;;  %v23702_v14 = vld [vmem:[#allocation109_spill] sm:$0xff] }
 0x68c   : > { %16529 = vmatmul.mubr.msk.f32.vlgmr.msra.gmra.mrb[106].mxu1 %vm2534_vm3, %v6078_v1  ;;  %v18085_v22 = vunpack.i.h.bf16 %v23701_v49  ;;  %v18084_v1 = vunpack.i.l.bf16 %v23701_v49 }
 0x68d   : > { %v18627_v47 = vpop.eup %18626  ;;  %17390 = vmatpush3.bf16.msra.mxu1 %v17387_v44  ;;  %v6016_v39 = vpop.xlane.xlu1 %6015 }
 0x68e   : > { %18638 = vrcp.f32 %v6016_v39  ;;  %17396 = vmatprep.subr.bf16.mxu1 %v17395_v3  ;;  %v6019_v34 = vpop.xlane.xlu0 %6018  ;;  %v6081_v48 = vmul.f32 %v18627_v47, %v21081_v38  ;;  %v18629_v41 = vpop.eup %18628  ;;  %v23704_v39 = vld [vmem:[#allocation114_spill] sm:$0xff] }
 0x68f   : > { %10861 = vrot.lane.b32.xlu1 %v23695_v20, %s19134_s20  ;;  %18640 = vrcp.f32 %v6019_v34  ;;  %v6080_v38 = vmul.f32 %v18629_v41, %v21077_v6  ;;  %v18090_v34 = vunpack.i.h.bf16 %v23704_v39 }
 0x690   : > { %v18631_v12 = vpop.eup %18630  ;;  %16542 = vmatprep.mubr.msk.f32.mxu1 %vm2534_vm3, %v6081_v48  ;;  %v18089_v48 = vunpack.i.l.bf16 %v23704_v39 }
 0x691   : > { %v18633_v43 = vpop.eup %18632  ;;  %v21311_v31 = vpop.permute.xlu1 %18102  ;;  %v6079_v26 = vmul.f32 %v18631_v12, %v21079_v15  ;;  %v23705_v12 = vld [vmem:[#allocation117_spill] sm:$0xff] }
 0x692   : > { %v21314_v19 = vpop.permute.xlu0 %7845  ;;  %v6083_v25 = vmul.f32 %v18633_v43, %v21087_v63  ;;  %v18095_v35 = vunpack.i.h.bf16 %v23705_v12  ;;  %v18094_v21 = vunpack.i.l.bf16 %v23705_v12  ;;  %v17423_v5 = vpack.c.bf16 %v18090_v34, %v18089_v48  ;;  %v23706_v43 = vld [vmem:[#allocation110_spill] sm:$0xff] }
 0x693   : > { %18252 = vrot.lane.b32.xlu1 %v23675_v53, %s19134_s20  ;;  %16535 = vmatprep.mubr.msk.f32.mxu0 %vm2534_vm3, %v6079_v26 }
 0x694   : > { %v18635_v4 = vpop.eup %18634  ;;  %16536 = vmatmul.mubr.msk.f32.vlgmr.msra.gmra.mrb[76].mxu0 %vm2534_vm3, %v6080_v38  ;;  %v23707_v38 = vld [vmem:[#allocation115_spill] sm:$0xff]  ;;  %v17429_v0 = vpack.c.bf16 %v18095_v35, %v18094_v21 }
 0x695   : > { %17394 = vmatpush3.bf16.msra.mxu0 %v17391_v61  ;;  %v21324_v15 = vpop.permute.xlu1 %7936  ;;  %16549 = vmatprep.mubr.msk.f32.mxu0 %vm2534_vm3, %v6083_v25  ;;  %v6082_v6 = vmul.f32 %v18635_v4, %v21091_v17  ;;  %v18637_v27 = vpop.eup %18636  ;;  %v18099_v4 = vunpack.i.l.bf16 %v21161_v37 }
 0x696   : > { %17401 = vmatprep.subr.msk.bf16.mxu0 %vm19714_vm2, %v17399_v62  ;;  %v21330_v60 = vpop.permute.xlu0 %7934  ;;  %v6086_v55 = vmul.f32 %v18637_v27, %v21095_v30 }
 0x697   : > { %10954 = vrot.lane.b32.xlu1 %v23699_v8, %s19134_s20  ;;  %16543 = vmatmul.mubr.msk.f32.vlgmr.msra.gmra.mrb[108].mxu1 %vm2534_vm3, %v6082_v6  ;;  %v18104_v8 = vunpack.i.l.bf16 %v21311_v31 }
 0x698   : > { %v18639_v44 = vpop.eup %18638  ;;  %17398 = vmatpush3.bf16.msra.mxu1 %v17395_v3  ;;  %v17411_v3 = vpack.c.bf16 %v18080_v29, %v18079_v7  ;;  %v23711_v7 = vld [vmem:[#allocation119_spill] sm:$0xff] }
 0x699   : > { %v18641_v61 = vpop.eup %18640  ;;  %17407 = vmatprep.subr.msk.bf16.mxu1 %vm19714_vm2, %v17405_v40  ;;  %v21339_v17 = vpop.permute.xlu1 %8025  ;;  %v6084_v46 = vmul.f32 %v18639_v44, %v21101_v57  ;;  %v23703_v57 = vld [vmem:[#allocation112_spill] sm:$0xff]  ;;  %v17435_v44 = vpack.c.bf16 %v18100_v2, %v18099_v4 }
 0x69a   : > { %v18108_v50 = vpop.permute.xlu0 %18107  ;;  %v6085_v32 = vmul.f32 %v18641_v61, %v21103_v24  ;;  %v17417_v24 = vpack.c.bf16 %v18085_v22, %v18084_v1  ;;  %v23710_v61 = vld [vmem:[#allocation116_spill] sm:$0xff] }
 0x69b   : > { %16550 = vmatmul.mubr.msk.f32.vlgmr.msra.gmra.mrb[78].mxu0 %vm2534_vm3, %v6084_v46  ;;  %v18109_v46 = vunpack.i.l.bf16 %v18108_v50 }
 0x69c   : > { %16556 = vmatprep.mubr.msk.f32.mxu1 %vm2534_vm3, %v6085_v32  ;;  %16563 = vmatprep.mubr.msk.f32.mxu0 %vm1141_vm1, %v23702_v14 }
 0x69d   : > { %v18113_v47 = vpop.permute.xlu1 %18112  ;;  %16557 = vmatmul.mubr.msk.f32.vlgmr.msra.gmra.mrb[110].mxu1 %vm2534_vm3, %v6086_v55 }
 0x69e   : > { %17404 = vmatpush3.bf16.xpose.msk.msra.mxu0 %vm19714_vm2, %v17399_v62  ;;  %16570 = vmatprep.mubr.msk.f32.mxu1 %vm1141_vm1, %v23703_v57  ;;  %v21355_v30 = vpop.permute.xlu0 %8027  ;;  %v23709_v62 = vld [vmem:[#allocation118_spill] sm:$0xff]  ;;  %v18115_v55 = vunpack.i.h.bf16 %v18113_v47  ;;  %v18114_v49 = vunpack.i.l.bf16 %v18113_v47 }
 0x69f   : > { %17413 = vmatprep.subr.msk.bf16.mxu0 %vm19714_vm2, %v17411_v3 }
 0x6a1   : > { %17410 = vmatpush3.bf16.xpose.msk.msra.mxu1 %vm19714_vm2, %v17405_v40  ;;  %v21363_v41 = vpop.permute.xlu1 %8118  ;;  %v18105_v40 = vunpack.i.h.bf16 %v21311_v31  ;;  %v18110_v31 = vunpack.i.h.bf16 %v18108_v50 }
 0x6a2   : > { %17419 = vmatprep.subr.msk.bf16.mxu1 %vm19714_vm2, %v17417_v24  ;;  %v8117_v20 = vpop.permute.xlu0 %8116 }
 0x6a3   : > { %v17441_v29 = vpack.c.bf16 %v18105_v40, %v18104_v8  ;;  %v17447_v22 = vpack.c.bf16 %v18110_v31, %v18109_v46 }
 0x6a5   : > { %16564 = vmatmul.mubr.msk.f32.vlgmr.msra.gmra.mrb[80].mxu0 %vm1141_vm1, %v23706_v43  ;;  %v8208_v26 = vpop.permute.xlu1 %8207 }
 0x6a6   : > { %17416 = vmatpush3.bf16.xpose.msk.msra.mxu0 %vm19714_vm2, %v17411_v3  ;;  %16577 = vmatprep.mubr.msk.f32.mxu0 %vm1141_vm1, %v23707_v38  ;;  %v18118_v25 = vpop.permute.xlu0 %18117 }
 0x6a7   : > { %17425 = vmatprep.subr.msk.bf16.mxu0 %vm19714_vm2, %v17423_v5  ;;  %v18120_v14 = vunpack.i.h.bf16 %v18118_v25  ;;  %v18119_v3 = vunpack.i.l.bf16 %v18118_v25 }
 0x6a8   : > { %16571 = vmatmul.mubr.msk.f32.vlgmr.msra.gmra.mrb[112].mxu1 %vm1141_vm1, %v23708_v56 }
 0x6a9   : > { %17422 = vmatpush3.bf16.xpose.msk.msra.mxu1 %vm19714_vm2, %v17417_v24  ;;  %16584 = vmatprep.mubr.msk.f32.mxu1 %vm1141_vm1, %v23709_v62  ;;  %v18123_v6 = vpop.permute.xlu1 %18122  ;;  %v17459_v24 = vpack.c.bf16 %v18120_v14, %v18119_v3 }
 0x6aa   : > { %17431 = vmatprep.subr.msk.bf16.mxu1 %vm19714_vm2, %v17429_v0  ;;  %v8210_v27 = vpop.permute.xlu0 %8209  ;;  %v18125_v47 = vunpack.i.h.bf16 %v18123_v6  ;;  %v18124_v57 = vunpack.i.l.bf16 %v18123_v6 }
 0x6ac   : > { %v17465_v34 = vpack.c.bf16 %v18125_v47, %v18124_v57 }
 0x6ad   : > { %16578 = vmatmul.mubr.msk.f32.vlgmr.msra.gmra.mrb[82].mxu0 %vm1141_vm1, %v23710_v61  ;;  %v8301_v37 = vpop.permute.xlu1 %8300 }
 0x6ae   : > { %17428 = vmatpush3.bf16.xpose.msk.msra.mxu0 %vm19714_vm2, %v17423_v5  ;;  %16591 = vmatprep.mubr.msk.f32.mxu0 %vm1141_vm1, %v21159_v28  ;;  %v8299_v58 = vpop.permute.xlu0 %8298 }
 0x6af   : > { %17437 = vmatprep.subr.msk.bf16.mxu0 %vm19714_vm2, %v17435_v44 }
 0x6b0   : > { %16585 = vmatmul.mubr.msk.f32.vlgmr.msra.gmra.mrb[114].mxu1 %vm1141_vm1, %v23711_v7 }
 0x6b1   : > { %17434 = vmatpush3.bf16.xpose.msk.msra.mxu1 %vm19714_vm2, %v17429_v0  ;;  %16598 = vmatprep.mubr.msk.f32.mxu1 %vm1141_vm1, %v21330_v60  ;;  %v8390_v32 = vpop.permute.xlu1 %8389  ;;  %v17453_v60 = vpack.c.bf16 %v18115_v55, %v18114_v49 }
 0x6b2   : > { %17443 = vmatprep.subr.msk.bf16.mxu1 %vm19714_vm2, %v17441_v29  ;;  %v18128_v28 = vpop.permute.xlu0 %18127 }
 0x6b3   : > { %v18130_v48 = vunpack.i.h.bf16 %v18128_v28 }
 0x6b5   : > { %16592 = vmatmul.mubr.msk.f32.vlgmr.msra.gmra.mrb[84].mxu0 %vm1141_vm1, %v21314_v19  ;;  %v18133_v1 = vpop.permute.xlu1 %18132 }
 0x6b6   : > { %17440 = vmatpush3.bf16.xpose.msk.msra.mxu0 %vm19714_vm2, %v17435_v44  ;;  %16605 = vmatprep.mubr.msk.f32.mxu0 %vm1141_vm1, %v21339_v17  ;;  %v8392_v50 = vpop.permute.xlu0 %8391  ;;  %v18135_v35 = vunpack.i.h.bf16 %v18133_v1  ;;  %v18134_v21 = vunpack.i.l.bf16 %v18133_v1 }
 0x6b7   : > { %17449 = vmatprep.subr.msk.bf16.mxu0 %vm19714_vm2, %v17447_v22 }
 0x6b8   : > { %16599 = vmatmul.mubr.msk.f32.vlgmr.msra.gmra.mrb[116].mxu1 %vm1141_vm1, %v21324_v15 }
 0x6b9   : > { %17446 = vmatpush3.bf16.xpose.msk.msra.mxu1 %vm19714_vm2, %v17441_v29  ;;  %16612 = vmatprep.mubr.msk.f32.mxu1 %vm1141_vm1, %v8117_v20  ;;  %v8483_v19 = vpop.permute.xlu1 %8482  ;;  %v18129_v20 = vunpack.i.l.bf16 %v18128_v28 }
 0x6ba   : > { %17455 = vmatprep.subr.msk.bf16.mxu1 %vm19714_vm2, %v17453_v60  ;;  %v8481_v17 = vpop.permute.xlu0 %8480 }
 0x6bb   : > { %v17471_v5 = vpack.c.bf16 %v18130_v48, %v18129_v20 }
 0x6bd   : > { %16606 = vmatmul.mubr.msk.f32.vlgmr.msra.gmra.mrb[86].mxu0 %vm1141_vm1, %v21355_v30  ;;  %v18138_v39 = vpop.permute.xlu1 %18137 }
 0x6be   : > { %17452 = vmatpush3.bf16.xpose.msk.msra.mxu0 %vm19714_vm2, %v17447_v22  ;;  %16619 = vmatprep.mubr.msk.f32.mxu0 %vm1141_vm1, %v8208_v26  ;;  %v8572_v15 = vpop.permute.xlu0 %8571  ;;  %v17477_v26 = vpack.c.bf16 %v18135_v35, %v18134_v21  ;;  %v18140_v38 = vunpack.i.h.bf16 %v18138_v39  ;;  %v18139_v25 = vunpack.i.l.bf16 %v18138_v39 }
 0x6bf   : > { %17461 = vmatprep.subr.msk.bf16.mxu0 %vm19714_vm2, %v17459_v24 }
 0x6c0   : > { %16613 = vmatmul.mubr.msk.f32.vlgmr.msra.gmra.mrb[118].mxu1 %vm1141_vm1, %v21363_v41  ;;  %v17483_v62 = vpack.c.bf16 %v18140_v38, %v18139_v25 }
 0x6c1   : > { %17458 = vmatpush3.bf16.xpose.msk.msra.mxu1 %vm19714_vm2, %v17453_v60  ;;  %16626 = vmatprep.mubr.msk.f32.mxu1 %vm1141_vm1, %v8299_v58  ;;  %v8663_v30 = vpop.permute.xlu1 %8662 }
 0x6c2   : > { %17467 = vmatprep.subr.msk.bf16.mxu1 %vm19714_vm2, %v17465_v34  ;;  %v8574_v12 = vpop.permute.xlu0 %8573 }
 0x6c5   : > { %16620 = vmatmul.mubr.msk.f32.vlgmr.msra.gmra.mrb[88].mxu0 %vm1141_vm1, %v8210_v27  ;;  %v8665_v43 = vpop.permute.xlu1 %8664 }
 0x6c6   : > { %17464 = vmatpush3.bf16.xpose.msk.msra.mxu0 %vm19714_vm2, %v17459_v24  ;;  %16633 = vmatprep.mubr.msk.f32.mxu0 %vm1141_vm1, %v8390_v32  ;;  %v18143_v41 = vpop.permute.xlu0 %18142 }
 0x6c7   : > { %17473 = vmatprep.subr.msk.bf16.mxu0 %vm19714_vm2, %v17471_v5  ;;  %v18145_v2 = vunpack.i.h.bf16 %v18143_v41  ;;  %v18144_v4 = vunpack.i.l.bf16 %v18143_v41 }
 0x6c8   : > { %16627 = vmatmul.mubr.msk.f32.vlgmr.msra.gmra.mrb[120].mxu1 %vm1141_vm1, %v8301_v37 }
 0x6c9   : > { %17470 = vmatpush3.bf16.xpose.msk.msra.mxu1 %vm19714_vm2, %v17465_v34  ;;  %16640 = vmatprep.mubr.msk.f32.mxu1 %vm1141_vm1, %v8481_v17  ;;  %v8756_v0 = vpop.permute.xlu1 %8755  ;;  %v17489_v27 = vpack.c.bf16 %v18145_v2, %v18144_v4 }
 0x6ca   : > { %17479 = vmatprep.subr.msk.bf16.mxu1 %vm19714_vm2, %v17477_v26  ;;  %v8754_v56 = vpop.permute.xlu0 %8753 }
 0x6cd   : > { %16634 = vmatmul.mubr.msk.f32.vlgmr.msra.gmra.mrb[90].mxu0 %vm1141_vm1, %v8392_v50  ;;  %v8847_v6 = vpop.permute.xlu1 %8846 }
 0x6ce   : > { %17476 = vmatpush3.bf16.xpose.msk.msra.mxu0 %vm19714_vm2, %v17471_v5  ;;  %16647 = vmatprep.mubr.msk.f32.mxu0 %vm1141_vm1, %v8572_v15  ;;  %v8845_v40 = vpop.permute.xlu0 %8844 }
 0x6cf   : > { %17485 = vmatprep.subr.msk.bf16.mxu0 %vm19714_vm2, %v17483_v62 }
 0x6d0   : > { %16641 = vmatmul.mubr.msk.f32.vlgmr.msra.gmra.mrb[122].mxu1 %vm1141_vm1, %v8483_v19 }
 0x6d1   : > { %17482 = vmatpush3.bf16.xpose.msk.msra.mxu1 %vm19714_vm2, %v17477_v26  ;;  %16654 = vmatprep.mubr.msk.f32.mxu1 %vm1141_vm1, %v8663_v30  ;;  %v18148_v8 = vpop.permute.xlu1 %18147 }
 0x6d2   : > { %v18150_v44 = vunpack.i.h.bf16 %v18148_v8  ;;  %v18149_v61 = vunpack.i.l.bf16 %v18148_v8  ;;  %17491 = vmatprep.subr.msk.bf16.mxu1 %vm19714_vm2, %v17489_v27  ;;  %v18158_v29 = vpop.permute.xlu0 %18157 }
 0x6d3   : > { %v18160_v32 = vunpack.i.h.bf16 %v18158_v29  ;;  %v18159_v28 = vunpack.i.l.bf16 %v18158_v29 }
 0x6d4   : > { %v17495_v37 = vpack.c.bf16 %v18150_v44, %v18149_v61 }
 0x6d5   : > { %16648 = vmatmul.mubr.msk.f32.vlgmr.msra.gmra.mrb[92].mxu0 %vm1141_vm1, %v8574_v12  ;;  %v18153_v58 = vpop.permute.xlu1 %18152  ;;  %v21467_v1 = vpack.c.bf16 %v18160_v32, %v18159_v28 }
 0x6d6   : > { %v18155_v7 = vunpack.i.h.bf16 %v18153_v58  ;;  %v18154_v31 = vunpack.i.l.bf16 %v18153_v58  ;;  %17488 = vmatpush3.bf16.xpose.msk.msra.mxu0 %vm19714_vm2, %v17483_v62  ;;  %16661 = vmatprep.mubr.msk.f32.mxu0 %vm1141_vm1, %v8754_v56 }
 0x6d7   : > { %17496 = vmatprep.subr.bf16.mxu0 %v17495_v37 }
 0x6d8   : > { %16655 = vmatmul.mubr.msk.f32.vlgmr.msra.gmra.mrb[124].mxu1 %vm1141_vm1, %v8665_v43  ;;  %v17499_v46 = vpack.c.bf16 %v18155_v7, %v18154_v31 }
 0x6d9   : > { %17494 = vmatpush3.bf16.xpose.msk.msra.mxu1 %vm19714_vm2, %v17489_v27  ;;  %16668 = vmatprep.mubr.msk.f32.mxu1 %vm1141_vm1, %v8845_v40  ;;  %v18163_v55 = vpop.permute.xlu1 %18162 }
 0x6da   : > { %17500 = vmatprep.subr.bf16.mxu1 %v17499_v46  ;;  %v18165_v49 = vunpack.i.h.bf16 %v18163_v55  ;;  %v18164_v22 = vunpack.i.l.bf16 %v18163_v55 }
 0x6dc   : > { %v21471_v50 = vpack.c.bf16 %v18165_v49, %v18164_v22 }
 0x6dd   : > { %16662 = vmatmul.mubr.msk.f32.vlgmr.msra.gmra.mrb[94].mxu0 %vm1141_vm1, %v8756_v0 }
 0x6de   : > { %17498 = vmatpush3.bf16.msra.mxu0 %v17495_v37 }
 0x6df   : > { %17504 = vmatprep.subr.bf16.mxu0 %v21467_v1 }
 0x6e0   : > { %16669 = vmatmul.mubr.msk.f32.vlgmr.msra.gmra.mrb[126].mxu1 %vm1141_vm1, %v8847_v6 }
 0x6e1   : > { %17502 = vmatpush3.bf16.msra.mxu1 %v17499_v46 }
 0x6e2   : > { %17508 = vmatprep.subr.bf16.mxu1 %v21471_v50 }
 0x72b   : > { %v21474_v60 = vpop.f32.mrb[64].mxu0 }
 0x72c   : > { %23712 = vst [vmem:[#allocation94_spill] sm:$0xff] %v21474_v60  ;;  %v21476_v14 = vpop.f32.mrb[65].mxu0  ;;  %v23747_v60 = vld [vmem:[#allocation52_spill] sm:$0xff] }
 0x72d   : > { %23713 = vst [vmem:[#allocation49_spill] sm:$0xff] %v21476_v14 }
 0x736   : > { %v21480_v19 = vpop.f32.mrb[66].mxu0 }
 0x737   : > { %v21478_v3 = vpop.f32.mrb[96].mxu1  ;;  %23715 = vst [vmem:[#allocation53_spill] sm:$0xff] %v21480_v19  ;;  %v21484_v47 = vpop.f32.mrb[67].mxu0 }
 0x738   : > { %23714 = vst [vmem:[#allocation60_spill] sm:$0xff] %v21478_v3  ;;  %v21482_v17 = vpop.f32.mrb[97].mxu1  ;;  %23717 = vst [vmem:[#allocation96_spill] sm:$0xff] %v21484_v47 }
 0x739   : > { %23716 = vst [vmem:[#allocation95_spill] sm:$0xff] %v21482_v17 }
 0x73f   : > { %v21486_v57 = vpop.f32.mrb[68].mxu0 }
 0x740   : > { %23718 = vst [vmem:[#allocation59_spill] sm:$0xff] %v21486_v57  ;;  %v21488_v24 = vpop.f32.mrb[98].mxu1  ;;  %v21490_v39 = vpop.f32.mrb[69].mxu0 }
 0x741   : > { %23719 = vst [vmem:[#allocation61_spill] sm:$0xff] %v21488_v24  ;;  %23720 = vst [vmem:[#allocation97_spill] sm:$0xff] %v21490_v39  ;;  %v21492_v15 = vpop.f32.mrb[99].mxu1  ;;  %v21648_v57 = vpop.permute.xlu1 %18182 }
 0x742   : > { %23721 = vst [vmem:[#allocation106_spill] sm:$0xff] %v21492_v15 }
 0x745   : > { %v21662_v19 = vpop.permute.xlu1 %18187 }
 0x746   : > { %23744 = vst [vmem:[#allocation117_spill] sm:$0xff] %v21662_v19 }
 0x748   : > { %v21494_v34 = vpop.f32.mrb[100].mxu1  ;;  %v21496_v48 = vpop.f32.mrb[70].mxu0 }
 0x749   : > { %23722 = vst [vmem:[#allocation98_spill] sm:$0xff] %v21494_v34  ;;  %23723 = vst [vmem:[#allocation99_spill] sm:$0xff] %v21496_v48  ;;  %v21498_v20 = vpop.f32.mrb[101].mxu1  ;;  %v21500_v30 = vpop.f32.mrb[71].mxu0 }
 0x74a   : > { %23724 = vst [vmem:[#allocation21_spill] sm:$0xff] %v21498_v20  ;;  %23725 = vst [vmem:[#allocation27_spill] sm:$0xff] %v21500_v30  ;;  %v21668_v3 = vpop.permute.xlu1 %18192 }
 0x74b   : > { %23745 = vst [vmem:[#allocation110_spill] sm:$0xff] %v21668_v3 }
 0x74e   : > { %v21670_v39 = vpop.permute.xlu1 %18202 }
 0x74f   : > { %23746 = vst [vmem:[#allocation115_spill] sm:$0xff] %v21670_v39 }
 0x750   : > { %v21502_v12 = vpop.f32.mrb[102].mxu1  ;;  %v21504_v35 = vpop.f32.mrb[72].mxu0 }
 0x751   : > { %23726 = vst [vmem:[#allocation100_spill] sm:$0xff] %v21502_v12  ;;  %23727 = vst [vmem:[#allocation101_spill] sm:$0xff] %v21504_v35  ;;  %v21506_v21 = vpop.f32.mrb[103].mxu1  ;;  %v21508_v5 = vpop.f32.mrb[73].mxu0 }
 0x752   : > { %23728 = vst [vmem:[#allocation31_spill] sm:$0xff] %v21506_v21  ;;  %23729 = vst [vmem:[#allocation102_spill] sm:$0xff] %v21508_v5 }
 0x758   : > { %v21510_v43 = vpop.f32.mrb[104].mxu1  ;;  %v21512_v41 = vpop.f32.mrb[74].mxu0 }
 0x759   : > { %23730 = vst [vmem:[#allocation108_spill] sm:$0xff] %v21510_v43  ;;  %23731 = vst [vmem:[#allocation23_spill] sm:$0xff] %v21512_v41  ;;  %v21514_v26 = vpop.f32.mrb[105].mxu1  ;;  %v21516_v38 = vpop.f32.mrb[75].mxu0 }
 0x75a   : > { %23732 = vst [vmem:[#allocation35_spill] sm:$0xff] %v21514_v26  ;;  %23733 = vst [vmem:[#allocation103_spill] sm:$0xff] %v21516_v38 }
 0x75f   : > { %v21518_v25 = vpop.f32.mrb[106].mxu1 }
 0x760   : > { %23734 = vst [vmem:[#allocation25_spill] sm:$0xff] %v21518_v25  ;;  %v21520_v0 = vpop.f32.mrb[107].mxu1 }
 0x761   : > { %23735 = vst [vmem:[#allocation30_spill] sm:$0xff] %v21520_v0 }
 0x767   : > { %v21522_v56 = vpop.f32.mrb[76].mxu0 }
 0x768   : > { %23736 = vst [vmem:[#allocation104_spill] sm:$0xff] %v21522_v56  ;;  %v21524_v2 = vpop.f32.mrb[77].mxu0 }
 0x769   : > { %23737 = vst [vmem:[#allocation105_spill] sm:$0xff] %v21524_v2 }
 0x76a   : > { %v21526_v4 = vpop.f32.mrb[108].mxu1 }
 0x76b   : > { %23738 = vst [vmem:[#allocation33_spill] sm:$0xff] %v21526_v4  ;;  %v21528_v62 = vpop.f32.mrb[109].mxu1 }
 0x76c   : > { %23739 = vst [vmem:[#allocation107_spill] sm:$0xff] %v21528_v62 }
 0x76e   : > { %v21530_v6 = vpop.f32.mrb[78].mxu0 }
 0x76f   : > { %23740 = vst [vmem:[#allocation111_spill] sm:$0xff] %v21530_v6  ;;  %v21532_v27 = vpop.f32.mrb[79].mxu0 }
 0x770   : > { %23741 = vst [vmem:[#allocation109_spill] sm:$0xff] %v21532_v27  ;;  %v21534_v40 = vpop.f32.mrb[110].mxu1 }
 0x771   : > { %23742 = vst [vmem:[#allocation112_spill] sm:$0xff] %v21534_v40  ;;  %v21536_v8 = vpop.f32.mrb[111].mxu1 }
 0x772   : > { %23743 = vst [vmem:[#allocation114_spill] sm:$0xff] %v21536_v8 }
 0x778   : > { %v21538_v44 = vpop.f32.mrb[80].mxu0 }
 0x779   : > { %v21540_v61 = vpop.f32.mrb[81].mxu0  ;;  %v8938_v37 = vsel %vm2534_vm3, %v21538_v44, -inf }
 0x77a   : > { %8939 = vmax.xlane.f32.xlu1 %v8938_v37  ;;  %v8935_v58 = vsel %vm2534_vm3, %v21540_v61, -inf }
 0x77b   : > { %8936 = vmax.xlane.f32.xlu0 %v8935_v58  ;;  %v21546_v29 = vpop.f32.mrb[112].mxu1 }
 0x77c   : > { %v21548_v7 = vpop.f32.mrb[113].mxu1  ;;  %v8944_v31 = vsel %vm2534_vm3, %v21546_v29, -inf }
 0x77d   : > { %v8941_v46 = vsel %vm2534_vm3, %v21548_v7, -inf }
 0x77e   : > { %8945 = vmax.xlane.f32.xlu1 %v8944_v31 }
 0x77f   : > { %8942 = vmax.xlane.f32.xlu0 %v8941_v46 }
 0x780   : > { %v21554_v32 = vpop.f32.mrb[82].mxu0 }
 0x781   : > { %v21556_v28 = vpop.f32.mrb[83].mxu0  ;;  %v8950_v55 = vsel %vm2534_vm3, %v21554_v32, -inf }
 0x782   : > { %v8947_v58 = vsel %vm2534_vm3, %v21556_v28, -inf }
 0x783   : > { %8951 = vmax.xlane.f32.xlu0 %v8950_v55  ;;  %v21560_v49 = vpop.f32.mrb[114].mxu1 }
 0x784   : > { %v21562_v22 = vpop.f32.mrb[115].mxu1  ;;  %v8956_v37 = vsel %vm2534_vm3, %v21560_v49, -inf }
 0x785   : > { %8957 = vmax.xlane.f32.xlu1 %v8956_v37  ;;  %v8953_v46 = vsel %vm2534_vm3, %v21562_v22, -inf }
 0x787   : > { %8948 = vmax.xlane.f32.xlu0 %v8947_v58 }
 0x788   : > { %v21568_v31 = vpop.f32.mrb[84].mxu0 }
 0x789   : > { %8954 = vmax.xlane.f32.xlu1 %v8953_v46  ;;  %v21572_v40 = vpop.f32.mrb[85].mxu0  ;;  %v8962_v55 = vsel %vm2534_vm3, %v21568_v31, -inf }
 0x78a   : > { %v8959_v58 = vsel %vm2534_vm3, %v21572_v40, -inf }
 0x78b   : > { %8963 = vmax.xlane.f32.xlu0 %v8962_v55  ;;  %v21576_v6 = vpop.f32.mrb[116].mxu1 }
 0x78c   : > { %v21578_v4 = vpop.f32.mrb[117].mxu1  ;;  %v8968_v37 = vsel %vm2534_vm3, %v21576_v6, -inf }
 0x78d   : > { %8969 = vmax.xlane.f32.xlu1 %v8968_v37  ;;  %v8965_v46 = vsel %vm2534_vm3, %v21578_v4, -inf }
 0x78f   : > { %8960 = vmax.xlane.f32.xlu0 %v8959_v58 }
 0x790   : > { %v21584_v56 = vpop.f32.mrb[86].mxu0 }
 0x791   : > { %8966 = vmax.xlane.f32.xlu1 %v8965_v46  ;;  %v21588_v8 = vpop.f32.mrb[87].mxu0  ;;  %v8974_v55 = vsel %vm2534_vm3, %v21584_v56, -inf }
 0x792   : > { %v8971_v58 = vsel %vm2534_vm3, %v21588_v8, -inf }
 0x793   : > { %v21592_v25 = vpop.f32.mrb[118].mxu1  ;;  %8975 = vmax.xlane.f32.xlu0 %v8974_v55 }
 0x794   : > { %v21594_v27 = vpop.f32.mrb[119].mxu1  ;;  %v8980_v37 = vsel %vm2534_vm3, %v21592_v25, -inf }
 0x795   : > { %8981 = vmax.xlane.f32.xlu1 %v8980_v37  ;;  %v8977_v46 = vsel %vm2534_vm3, %v21594_v27, -inf }
 0x797   : > { %8972 = vmax.xlane.f32.xlu0 %v8971_v58 }
 0x798   : > { %v21600_v41 = vpop.f32.mrb[88].mxu0 }
 0x799   : > { %8978 = vmax.xlane.f32.xlu1 %v8977_v46  ;;  %v21604_v62 = vpop.f32.mrb[89].mxu0  ;;  %v8986_v55 = vsel %vm2534_vm3, %v21600_v41, -inf }
 0x79a   : > { %v8983_v58 = vsel %vm2534_vm3, %v21604_v62, -inf }
 0x79b   : > { %v21608_v43 = vpop.f32.mrb[120].mxu1  ;;  %8987 = vmax.xlane.f32.xlu0 %v8986_v55 }
 0x79c   : > { %v21610_v2 = vpop.f32.mrb[121].mxu1  ;;  %v8992_v37 = vsel %vm2534_vm3, %v21608_v43, -inf }
 0x79d   : > { %8993 = vmax.xlane.f32.xlu1 %v8992_v37  ;;  %v8989_v46 = vsel %vm2534_vm3, %v21610_v2, -inf }
 0x79f   : > { %8984 = vmax.xlane.f32.xlu0 %v8983_v58 }
 0x7a0   : > { %v21616_v35 = vpop.f32.mrb[90].mxu0 }
 0x7a1   : > { %8990 = vmax.xlane.f32.xlu1 %v8989_v46  ;;  %v21620_v0 = vpop.f32.mrb[91].mxu0  ;;  %v8998_v55 = vsel %vm2534_vm3, %v21616_v35, -inf }
 0x7a2   : > { %v8995_v58 = vsel %vm2534_vm3, %v21620_v0, -inf }
 0x7a3   : > { %v21624_v12 = vpop.f32.mrb[122].mxu1  ;;  %8999 = vmax.xlane.f32.xlu0 %v8998_v55 }
 0x7a4   : > { %v21626_v38 = vpop.f32.mrb[123].mxu1  ;;  %v9004_v37 = vsel %vm2534_vm3, %v21624_v12, -inf }
 0x7a5   : > { %9005 = vmax.xlane.f32.xlu1 %v9004_v37  ;;  %v9001_v46 = vsel %vm2534_vm3, %v21626_v38, -inf }
 0x7a7   : > { %8996 = vmax.xlane.f32.xlu0 %v8995_v58 }
 0x7a8   : > { %v21632_v48 = vpop.f32.mrb[92].mxu0 }
 0x7a9   : > { %9002 = vmax.xlane.f32.xlu1 %v9001_v46  ;;  %v21636_v26 = vpop.f32.mrb[93].mxu0  ;;  %v9010_v55 = vsel %vm2534_vm3, %v21632_v48, -inf }
 0x7aa   : > { %v9007_v58 = vsel %vm2534_vm3, %v21636_v26, -inf }
 0x7ab   : > { %v21640_v34 = vpop.f32.mrb[124].mxu1  ;;  %9011 = vmax.xlane.f32.xlu0 %v9010_v55 }
 0x7ac   : > { %v21642_v5 = vpop.f32.mrb[125].mxu1  ;;  %v9016_v24 = vsel %vm2534_vm3, %v21640_v34, -inf }
 0x7ad   : > { %v9013_v37 = vsel %vm2534_vm3, %v21642_v5, -inf }
 0x7ae   : > { %9014 = vmax.xlane.f32.xlu1 %v9013_v37 }
 0x7af   : > { %9008 = vmax.xlane.f32.xlu0 %v9007_v58 }
 0x7b0   : > { %v21650_v46 = vpop.f32.mrb[94].mxu0 }
 0x7b1   : > { %v21652_v21 = vpop.f32.mrb[95].mxu0  ;;  %v9022_v58 = vsel %vm2534_vm3, %v21650_v46, -inf }
 0x7b2   : > { %v9019_v55 = vsel %vm2534_vm3, %v21652_v21, -inf }
 0x7b3   : > { %v21658_v30 = vpop.f32.mrb[126].mxu1  ;;  %9017 = vmax.xlane.f32.xlu0 %v9016_v24  ;;  %9020 = vmax.xlane.f32.xlu1 %v9019_v55  ;;  %v21674_v24 = vpop.permute.xlu1 %18207 }
 0x7b4   : > { %v21660_v37 = vpop.f32.mrb[127].mxu1  ;;  %v9028_v20 = vsel %vm2534_vm3, %v21658_v30, -inf  ;;  %23748 = vst [vmem:[#allocation113_spill] sm:$0xff] %v21674_v24  ;;  %v21676_v55 = vpop.permute.xlu0 %18167 }
 0x7b7   : > { %9023 = vmax.xlane.f32.xlu0 %v9022_v58  ;;  %v21678_v15 = vpop.permute.xlu1 %18212 }
 0x7b8   : > { %23749 = vst [vmem:[#allocation118_spill] sm:$0xff] %v21678_v15  ;;  %v21680_v14 = vpop.permute.xlu0 %18172  ;;  %v9025_v15 = vsel %vm2534_vm3, %v21660_v37, -inf }
 0x7bb   : > { %9029 = vmax.xlane.f32.xlu0 %v9028_v20  ;;  %v21684_v58 = vpop.permute.xlu1 %18217 }
 0x7bc   : > { %23750 = vst [vmem:[#allocation116_spill] sm:$0xff] %v21684_v58  ;;  %v21686_v47 = vpop.permute.xlu0 %18177 }
 0x7bf   : > { %v21688_v20 = vpop.permute.xlu1 %18222 }
 0x7c0   : > { %23751 = vst [vmem:[#allocation119_spill] sm:$0xff] %v21688_v20  ;;  %v21690_v17 = vpop.permute.xlu0 %18197 }
 0x7c1   : > { %23752 = vst [vmem:[#allocation52_spill] sm:$0xff] %v21690_v17 }
 0x7c4   : > { %11043 = vrot.lane.b32.xlu1 %v23747_v60, %s19134_s20  ;;  %v21692_v60 = vpop.permute.xlu1 %18232  ;;  %v21694_v63 = vpop.permute.xlu0 %18227 }
 0x7c5   : > { %23753 = vst [vmem:[#allocation120_spill] sm:$0xff] %v21692_v60  ;;  %23754 = vst [vmem:[#allocation121_spill] sm:$0xff] %v21694_v63 }
 0x7c8   : > { %v21696_v53 = vpop.permute.xlu1 %10679  ;;  %v21698_v33 = vpop.permute.xlu0 %18237 }
 0x7c9   : > { %23755 = vst [vmem:[#allocation122_spill] sm:$0xff] %v21696_v53  ;;  %23756 = vst [vmem:[#allocation123_spill] sm:$0xff] %v21698_v33 }
 0x7cc   : > { %v21702_v10 = vpop.permute.xlu1 %18242  ;;  %v21704_v58 = vpop.permute.xlu0 %10681 }
 0x7cd   : > { %23757 = vst [vmem:[#allocation124_spill] sm:$0xff] %v21702_v10  ;;  %23758 = vst [vmem:[#allocation125_spill] sm:$0xff] %v21704_v58 }
 0x7d0   : > { %v21706_v24 = vpop.permute.xlu1 %10772  ;;  %v21708_v20 = vpop.permute.xlu0 %10770 }
 0x7d1   : > { %18257 = vrot.lane.b32.xlu0 %v23678_v51, %s19134_s20  ;;  %23759 = vst [vmem:[#allocation126_spill] sm:$0xff] %v21706_v24  ;;  %23760 = vst [vmem:[#allocation127_spill] sm:$0xff] %v21708_v20 }
 0x7d4   : > { %v21710_v23 = vpop.permute.xlu1 %10861  ;;  %v21712_v60 = vpop.permute.xlu0 %18247 }
 0x7d5   : > { %23761 = vst [vmem:[#allocation128_spill] sm:$0xff] %v21710_v23  ;;  %23762 = vst [vmem:[#allocation129_spill] sm:$0xff] %v21712_v60 }
 0x7d8   : > { %v21714_v63 = vpop.permute.xlu1 %18252  ;;  %v21716_v53 = vpop.permute.xlu0 %10863 }
 0x7d9   : > { %23763 = vst [vmem:[#allocation130_spill] sm:$0xff] %v21714_v63  ;;  %23764 = vst [vmem:[#allocation131_spill] sm:$0xff] %v21716_v53 }
 0x7dc   : > { %v21718_v33 = vpop.permute.xlu1 %10954  ;;  %v21720_v39 = vpop.permute.xlu0 %10952 }
 0x7dd   : > { %23765 = vst [vmem:[#allocation132_spill] sm:$0xff] %v21718_v33  ;;  %23766 = vst [vmem:[#allocation133_spill] sm:$0xff] %v21720_v39 }
 0x7e8   : > { %9026 = vmax.xlane.f32.xlu1 %v9025_v15 }
 0x807   : > { %v8940_v15 = vpop.xlane.xlu1 %8939 }
 0x808   : > { %v9032_v10 = vsub.f32 %v21538_v44, %v8940_v15  ;;  %v8937_v58 = vpop.xlane.xlu0 %8936 }
 0x809   : > { %v9031_v24 = vsub.f32 %v21540_v61, %v8937_v58 }
 0x80a   : > { %v9065_v17 = vmul.f32 1.442695, %v9032_v10 }
 0x80b   : > { %v9063_v20 = vmul.f32 1.442695, %v9031_v24  ;;  %v8946_v3 = vpop.xlane.xlu1 %8945 }
 0x80c   : > { %18642 = vpow2.f32 %v9065_v17  ;;  %v9034_v23 = vsub.f32 %v21546_v29, %v8946_v3  ;;  %v8943_v60 = vpop.xlane.xlu0 %8942 }
 0x80d   : > { %18644 = vpow2.f32 %v9063_v20  ;;  %v9033_v63 = vsub.f32 %v21548_v7, %v8943_v60 }
 0x80e   : > { %v9069_v53 = vmul.f32 1.442695, %v9034_v23 }
 0x80f   : > { %v9067_v33 = vmul.f32 1.442695, %v9033_v63 }
 0x810   : > { %18646 = vpow2.f32 %v9069_v53  ;;  %v8952_v39 = vpop.xlane.xlu0 %8951 }
 0x811   : > { %v9036_v19 = vsub.f32 %v21554_v32, %v8952_v39  ;;  %18648 = vpow2.f32 %v9067_v33 }
 0x812   : > { %v8958_v44 = vpop.xlane.xlu1 %8957 }
 0x813   : > { %v9073_v15 = vmul.f32 1.442695, %v9036_v19  ;;  %v9038_v10 = vsub.f32 %v21560_v49, %v8958_v44 }
 0x814   : > { %v8949_v61 = vpop.xlane.xlu0 %8948 }
 0x815   : > { %18650 = vpow2.f32 %v9073_v15  ;;  %v9077_v17 = vmul.f32 1.442695, %v9038_v10  ;;  %v9035_v3 = vsub.f32 %v21556_v28, %v8949_v61 }
 0x816   : > { %v21729_v29 = vpop.eup %18642  ;;  %v8955_v24 = vpop.xlane.xlu1 %8954 }
 0x817   : > { %v21731_v7 = vpop.eup %18644  ;;  %18652 = vpow2.f32 %v9077_v17  ;;  %v9071_v23 = vmul.f32 1.442695, %v9035_v3  ;;  %v9037_v53 = vsub.f32 %v21562_v22, %v8955_v24  ;;  %v9130_v33 = vsel %vm2534_vm3, %v21729_v29, 0.0 }
 0x818   : > { %v8964_v63 = vpop.xlane.xlu0 %8963  ;;  %9131 = vadd.xlane.f32.xlu0 %v9130_v33  ;;  %v9127_v19 = vsel %vm2534_vm3, %v21731_v7, 0.0 }
 0x819   : > { %18654 = vpow2.f32 %v9071_v23  ;;  %v9075_v39 = vmul.f32 1.442695, %v9037_v53  ;;  %v9040_v32 = vsub.f32 %v21568_v31, %v8964_v63  ;;  %9128 = vadd.xlane.f32.xlu1 %v9127_v19 }
 0x81a   : > { %v21739_v28 = vpop.eup %18646  ;;  %v8970_v49 = vpop.xlane.xlu1 %8969 }
 0x81b   : > { %18656 = vpow2.f32 %v9075_v39  ;;  %v9081_v58 = vmul.f32 1.442695, %v9040_v32  ;;  %v9042_v22 = vsub.f32 %v21576_v6, %v8970_v49  ;;  %v9136_v20 = vsel %vm2534_vm3, %v21739_v28, 0.0  ;;  %v21744_v44 = vpop.eup %18648 }
 0x81c   : > { %v8961_v60 = vpop.xlane.xlu0 %8960  ;;  %v9133_v23 = vsel %vm2534_vm3, %v21744_v44, 0.0 }
 0x81d   : > { %18658 = vpow2.f32 %v9081_v58  ;;  %v9085_v15 = vmul.f32 1.442695, %v9042_v22  ;;  %v9039_v10 = vsub.f32 %v21572_v40, %v8961_v60  ;;  %9137 = vadd.xlane.f32.xlu1 %v9136_v20 }
 0x81e   : > { %v8967_v31 = vpop.xlane.xlu1 %8966 }
 0x81f   : > { %v21747_v61 = vpop.eup %18650  ;;  %18660 = vpow2.f32 %v9085_v15  ;;  %v9079_v17 = vmul.f32 1.442695, %v9039_v10  ;;  %v9041_v3 = vsub.f32 %v21578_v4, %v8967_v31 }
 0x820   : > { %v8976_v24 = vpop.xlane.xlu0 %8975  ;;  %v9142_v6 = vsel %vm2534_vm3, %v21747_v61, 0.0 }
 0x821   : > { %v21754_v53 = vpop.eup %18652  ;;  %18662 = vpow2.f32 %v9079_v17  ;;  %v9083_v33 = vmul.f32 1.442695, %v9041_v3  ;;  %v9044_v40 = vsub.f32 %v21584_v56, %v8976_v24  ;;  %9143 = vadd.xlane.f32.xlu0 %v9142_v6  ;;  %9134 = vadd.xlane.f32.xlu1 %v9133_v23 }
 0x822   : > { %v8982_v63 = vpop.xlane.xlu1 %8981  ;;  %v9148_v58 = vsel %vm2534_vm3, %v21754_v53, 0.0 }
 0x823   : > { %v21757_v19 = vpop.eup %18654  ;;  %18664 = vpow2.f32 %v9083_v33  ;;  %v9089_v4 = vmul.f32 1.442695, %v9044_v40  ;;  %v9046_v39 = vsub.f32 %v21592_v25, %v8982_v63 }
 0x824   : > { %v8973_v32 = vpop.xlane.xlu0 %8972  ;;  %v9139_v49 = vsel %vm2534_vm3, %v21757_v19, 0.0 }
 0x825   : > { %v21764_v22 = vpop.eup %18656  ;;  %18666 = vpow2.f32 %v9089_v4  ;;  %v9093_v56 = vmul.f32 1.442695, %v9046_v39  ;;  %v9043_v20 = vsub.f32 %v21588_v8, %v8973_v32  ;;  %9140 = vadd.xlane.f32.xlu0 %v9139_v49  ;;  %9149 = vadd.xlane.f32.xlu1 %v9148_v58 }
 0x826   : > { %v8979_v60 = vpop.xlane.xlu1 %8978  ;;  %v9145_v3 = vsel %vm2534_vm3, %v21764_v22, 0.0 }
 0x827   : > { %v21767_v15 = vpop.eup %18658  ;;  %18668 = vpow2.f32 %v9093_v56  ;;  %v9087_v25 = vmul.f32 1.442695, %v9043_v20  ;;  %v9045_v10 = vsub.f32 %v21594_v27, %v8979_v60 }
 0x828   : > { %v8988_v31 = vpop.xlane.xlu0 %8987  ;;  %v9154_v17 = vsel %vm2534_vm3, %v21767_v15, 0.0 }
 0x829   : > { %v21774_v24 = vpop.eup %18660  ;;  %18670 = vpow2.f32 %v9087_v25  ;;  %v9091_v8 = vmul.f32 1.442695, %v9045_v10  ;;  %v9048_v6 = vsub.f32 %v21600_v41, %v8988_v31  ;;  %9155 = vadd.xlane.f32.xlu0 %v9154_v17  ;;  %9146 = vadd.xlane.f32.xlu1 %v9145_v3 }
 0x82a   : > { %v8994_v23 = vpop.xlane.xlu1 %8993  ;;  %v9160_v39 = vsel %vm2534_vm3, %v21774_v24, 0.0 }
 0x82b   : > { %v21777_v33 = vpop.eup %18662  ;;  %18672 = vpow2.f32 %v9091_v8  ;;  %v9097_v27 = vmul.f32 1.442695, %v9048_v6  ;;  %v9050_v40 = vsub.f32 %v21608_v43, %v8994_v23 }
 0x82c   : > { %v8985_v63 = vpop.xlane.xlu0 %8984  ;;  %v9151_v4 = vsel %vm2534_vm3, %v21777_v33, 0.0 }
 0x82d   : > { %v21784_v32 = vpop.eup %18664  ;;  %18674 = vpow2.f32 %v9097_v27  ;;  %v9101_v41 = vmul.f32 1.442695, %v9050_v40  ;;  %v9047_v49 = vsub.f32 %v21604_v62, %v8985_v63  ;;  %9152 = vadd.xlane.f32.xlu0 %v9151_v4  ;;  %9161 = vadd.xlane.f32.xlu1 %v9160_v39 }
 0x82e   : > { %v8991_v58 = vpop.xlane.xlu1 %8990  ;;  %v9157_v10 = vsel %vm2534_vm3, %v21784_v32, 0.0 }
 0x82f   : > { %v21787_v56 = vpop.eup %18666  ;;  %18676 = vpow2.f32 %v9101_v41  ;;  %v9095_v43 = vmul.f32 1.442695, %v9047_v49  ;;  %v9049_v20 = vsub.f32 %v21610_v2, %v8991_v58 }
 0x830   : > { %v9000_v60 = vpop.xlane.xlu0 %8999  ;;  %v9166_v25 = vsel %vm2534_vm3, %v21787_v56, 0.0 }
 0x831   : > { %v21794_v31 = vpop.eup %18668  ;;  %18678 = vpow2.f32 %v9095_v43  ;;  %v9099_v62 = vmul.f32 1.442695, %v9049_v20  ;;  %v9052_v17 = vsub.f32 %v21616_v35, %v9000_v60  ;;  %9167 = vadd.xlane.f32.xlu0 %v9166_v25  ;;  %9158 = vadd.xlane.f32.xlu1 %v9157_v10 }
 0x832   : > { %v9006_v3 = vpop.xlane.xlu1 %9005  ;;  %v9172_v40 = vsel %vm2534_vm3, %v21794_v31, 0.0 }
 0x833   : > { %v21797_v8 = vpop.eup %18670  ;;  %18680 = vpow2.f32 %v9099_v62  ;;  %v9105_v2 = vmul.f32 1.442695, %v9052_v17  ;;  %v9054_v6 = vsub.f32 %v21624_v12, %v9006_v3 }
 0x834   : > { %v8997_v23 = vpop.xlane.xlu0 %8996  ;;  %v9163_v27 = vsel %vm2534_vm3, %v21797_v8, 0.0 }
 0x835   : > { %v21804_v63 = vpop.eup %18672  ;;  %18682 = vpow2.f32 %v9105_v2  ;;  %v9051_v35 = vsub.f32 %v21620_v0, %v8997_v23  ;;  %9164 = vadd.xlane.f32.xlu0 %v9163_v27  ;;  %9173 = vadd.xlane.f32.xlu1 %v9172_v40  ;;  %v9109_v41 = vmul.f32 1.442695, %v9054_v6 }
 0x836   : > { %v9003_v4 = vpop.xlane.xlu1 %9002  ;;  %v9169_v20 = vsel %vm2534_vm3, %v21804_v63, 0.0 }
 0x837   : > { %v21807_v39 = vpop.eup %18674  ;;  %v9103_v49 = vmul.f32 1.442695, %v9051_v35  ;;  %v9053_v12 = vsub.f32 %v21626_v38, %v9003_v4 }
 0x838   : > { %v9012_v58 = vpop.xlane.xlu0 %9011  ;;  %v9178_v43 = vsel %vm2534_vm3, %v21807_v39, 0.0 }
 0x839   : > { %v21814_v60 = vpop.eup %18676  ;;  %18684 = vpow2.f32 %v9103_v49  ;;  %9179 = vadd.xlane.f32.xlu0 %v9178_v43  ;;  %9170 = vadd.xlane.f32.xlu1 %v9169_v20  ;;  %v9107_v25 = vmul.f32 1.442695, %v9053_v12  ;;  %v9056_v10 = vsub.f32 %v21632_v48, %v9012_v58 }
 0x83a   : > { %18686 = vpow2.f32 %v9109_v41  ;;  %v9184_v2 = vsel %vm2534_vm3, %v21814_v60, 0.0 }
 0x83b   : > { %v21816_v0 = vpop.eup %18678  ;;  %v9015_v62 = vpop.xlane.xlu1 %9014  ;;  %18688 = vpow2.f32 %v9107_v25  ;;  %v9113_v40 = vmul.f32 1.442695, %v9056_v10 }
 0x83c   : > { %v9057_v38 = vsub.f32 %v21642_v5, %v9015_v62  ;;  %v9009_v17 = vpop.xlane.xlu0 %9008  ;;  %v9175_v3 = vsel %vm2534_vm3, %v21816_v0, 0.0 }
 0x83d   : > { %v21824_v6 = vpop.eup %18680  ;;  %9176 = vadd.xlane.f32.xlu0 %v9175_v3  ;;  %9185 = vadd.xlane.f32.xlu1 %v9184_v2  ;;  %v9055_v48 = vsub.f32 %v21636_v26, %v9009_v17 }
 0x83e   : > { %v9115_v23 = vmul.f32 1.442695, %v9057_v38  ;;  %v9181_v41 = vsel %vm2534_vm3, %v21824_v6, 0.0 }
 0x83f   : > { %v21826_v27 = vpop.eup %18682  ;;  %v9111_v58 = vmul.f32 1.442695, %v9055_v48 }
 0x840   : > { %18690 = vpow2.f32 %v9115_v23  ;;  %v9018_v5 = vpop.xlane.xlu0 %9017  ;;  %v9021_v35 = vpop.xlane.xlu1 %9020  ;;  %v9190_v4 = vsel %vm2534_vm3, %v21826_v27, 0.0 }
 0x841   : > { %v9059_v49 = vsub.f32 %v21652_v21, %v9021_v35  ;;  %9191 = vadd.xlane.f32.xlu0 %v9190_v4  ;;  %9182 = vadd.xlane.f32.xlu1 %v9181_v41  ;;  %18692 = vpow2.f32 %v9113_v40  ;;  %v9058_v43 = vsub.f32 %v21640_v34, %v9018_v5 }
 0x843   : > { %v21834_v12 = vpop.eup %18684  ;;  %v9119_v26 = vmul.f32 1.442695, %v9059_v49  ;;  %v9117_v62 = vmul.f32 1.442695, %v9058_v43 }
 0x844   : > { %v9024_v20 = vpop.xlane.xlu0 %9023  ;;  %v9187_v25 = vsel %vm2534_vm3, %v21834_v12, 0.0  ;;  %v21839_v10 = vpop.eup %18686 }
 0x845   : > { %9188 = vadd.xlane.f32.xlu0 %v9187_v25  ;;  %18694 = vpow2.f32 %v9119_v26  ;;  %v9060_v21 = vsub.f32 %v21650_v46, %v9024_v20  ;;  %v9196_v17 = vsel %vm2534_vm3, %v21839_v10, 0.0  ;;  %v21844_v3 = vpop.eup %18688 }
 0x846   : > { %18696 = vpow2.f32 %v9111_v58  ;;  %v9193_v46 = vsel %vm2534_vm3, %v21844_v3, 0.0 }
 0x847   : > { %18698 = vpow2.f32 %v9117_v62  ;;  %v9121_v2 = vmul.f32 1.442695, %v9060_v21  ;;  %v21879_v21 = vpop.permute.xlu1 %11043 }
 0x848   : > { %v9030_v38 = vpop.xlane.xlu0 %9029 }
 0x849   : > { %9197 = vadd.xlane.f32.xlu0 %v9196_v17  ;;  %v9062_v23 = vsub.f32 %v21658_v30, %v9030_v38  ;;  %18700 = vpow2.f32 %v9121_v2  ;;  %v23767_v2 = vld [vmem:[#allocation54_spill] sm:$0xff] }
 0x84a   : > { %v21846_v34 = vpop.eup %18690 }
 0x84b   : > { %v9205_v40 = vsel %vm2534_vm3, %v21846_v34, 0.0  ;;  %v21853_v48 = vpop.eup %18692  ;;  %v9125_v5 = vmul.f32 1.442695, %v9062_v23 }
 0x84c   : > { %9206 = vadd.xlane.f32.xlu1 %v9205_v40  ;;  %v9202_v4 = vsel %vm2534_vm3, %v21853_v48, 0.0  ;;  %v23768_v40 = vld [vmem:[#allocation55_spill] sm:$0xff] }
 0x84d   : > { %9194 = vadd.xlane.f32.xlu0 %v9193_v46  ;;  %18702 = vpow2.f32 %v9125_v5  ;;  %v23769_v46 = vld [vmem:[#allocation41_spill] sm:$0xff] }
 0x84f   : > { %v21855_v35 = vpop.eup %18694 }
 0x850   : > { %v21859_v41 = vpop.eup %18696  ;;  %v9211_v30 = vsel %vm2534_vm3, %v21855_v35, 0.0 }
 0x851   : > { %9203 = vadd.xlane.f32.xlu0 %v9202_v4  ;;  %9212 = vadd.xlane.f32.xlu1 %v9211_v30  ;;  %v9199_v49 = vsel %vm2534_vm3, %v21859_v41, 0.0  ;;  %v21865_v58 = vpop.eup %18698  ;;  %v23771_v30 = vld [vmem:[#allocation20_spill] sm:$0xff] }
 0x852   : > { %v9208_v43 = vsel %vm2534_vm3, %v21865_v58, 0.0 }
 0x853   : > { %v21869_v26 = vpop.eup %18700 }
 0x854   : > { %v9214_v20 = vsel %vm2534_vm3, %v21869_v26, 0.0 }
 0x855   : > { %9200 = vadd.xlane.f32.xlu0 %v9199_v49  ;;  %v23772_v49 = vld [vmem:[#allocation26_spill] sm:$0xff] }
 0x857   : > { %v21873_v25 = vpop.eup %18702 }
 0x858   : > { %v9220_v62 = vsel %vm2534_vm3, %v21873_v25, 0.0 }
 0x859   : > { %9209 = vadd.xlane.f32.xlu0 %v9208_v43  ;;  %v23773_v43 = vld [vmem:[#allocation57_spill] sm:$0xff] }
 0x85d   : > { %9215 = vadd.xlane.f32.xlu0 %v9214_v20  ;;  %v23774_v20 = vld [vmem:[#allocation28_spill] sm:$0xff] }
 0x861   : > { %9221 = vadd.xlane.f32.xlu0 %v9220_v62  ;;  %v23775_v62 = vld [vmem:[#allocation58_spill] sm:$0xff] }
 0x862   : > { %18262 = vrot.lane.b32.xlu1 %v19838_v54, %s19134_s20 }
 0x875   : > { %v9027_v38 = vpop.xlane.xlu1 %9026 }
 0x876   : > { %v9061_v17 = vsub.f32 %v21660_v37, %v9027_v38  ;;  %v23770_v37 = vld [vmem:[#allocation46_spill] sm:$0xff] }
 0x877   : > { %11045 = vrot.lane.b32.xlu0 %v23767_v2, %s19134_s20  ;;  %v23776_v38 = vld [vmem:[#allocation34_spill] sm:$0xff]  ;;  %v23777_v2 = vld [vmem:[#allocation44_spill] sm:$0xff] }
 0x878   : > { %v9123_v23 = vmul.f32 1.442695, %v9061_v17  ;;  %v21914_v17 = vpop.permute.xlu0 %18257 }
 0x87a   : > { %18704 = vpow2.f32 %v9123_v23 }
 0x87b   : > { %11134 = vrot.lane.b32.xlu0 %v23768_v40, %s19134_s20 }
 0x87f   : > { %18267 = vrot.lane.b32.xlu0 %v19854_v9, %s19134_s20 }
 0x883   : > { %11227 = vrot.lane.b32.xlu0 %v23769_v46, %s19134_s20  ;;  %v23778_v46 = vld [vmem:[#allocation36_spill] sm:$0xff] }
 0x884   : > { %v21890_v5 = vpop.eup %18704 }
 0x885   : > { %v9217_v4 = vsel %vm2534_vm3, %v21890_v5, 0.0 }
 0x886   : > { %9218 = vadd.xlane.f32.xlu1 %v9217_v4  ;;  %v23779_v4 = vld [vmem:[#allocation22_spill] sm:$0xff] }
 0x887   : > { %11316 = vrot.lane.b32.xlu0 %v23770_v37, %s19134_s20 }
 0x88b   : > { %18277 = vrot.lane.b32.xlu0 %v19882_v52, %s19134_s20 }
 0x88f   : > { %11409 = vrot.lane.b32.xlu0 %v23771_v30, %s19134_s20  ;;  %v23780_v30 = vld [vmem:[#allocation39_spill] sm:$0xff] }
 0x893   : > { %11498 = vrot.lane.b32.xlu0 %v23772_v49, %s19134_s20 }
 0x897   : > { %18287 = vrot.lane.b32.xlu0 %v19910_v16, %s19134_s20  ;;  %11136 = vrot.lane.b32.xlu1 %v23773_v43, %s19134_s20 }
 0x89b   : > { %11591 = vrot.lane.b32.xlu0 %v23774_v20, %s19134_s20  ;;  %11225 = vrot.lane.b32.xlu1 %v23775_v62, %s19134_s20  ;;  %v23781_v20 = vld [vmem:[#allocation42_spill] sm:$0xff] }
 0x89f   : > { %11680 = vrot.lane.b32.xlu0 %v23776_v38, %s19134_s20  ;;  %18272 = vrot.lane.b32.xlu1 %v23536_v11, %s19134_s20  ;;  %v23782_v38 = vld [vmem:[#allocation24_spill] sm:$0xff] }
 0x8a3   : > { %18297 = vrot.lane.b32.xlu0 %v23556_v36, %s19134_s20  ;;  %11318 = vrot.lane.b32.xlu1 %v23777_v2, %s19134_s20 }
 0x8a5   : > { %v9132_v23 = vpop.xlane.xlu0 %9131 }
 0x8a6   : > { %18706 = vrcp.f32 %v9132_v23  ;;  %v9129_v40 = vpop.xlane.xlu1 %9128  ;;  %v18170_v23 = vunpack.i.h.bf16 %v21676_v55 }
 0x8a7   : > { %18708 = vrcp.f32 %v9129_v40  ;;  %11773 = vrot.lane.b32.xlu0 %v23778_v46, %s19134_s20  ;;  %11407 = vrot.lane.b32.xlu1 %v23779_v4, %s19134_s20  ;;  %v18169_v40 = vunpack.i.l.bf16 %v21676_v55 }
 0x8aa   : > { %v9138_v37 = vpop.xlane.xlu1 %9137 }
 0x8ab   : > { %11862 = vrot.lane.b32.xlu0 %v23780_v30, %s19134_s20  ;;  %18282 = vrot.lane.b32.xlu1 %v23542_v59, %s19134_s20  ;;  %18710 = vrcp.f32 %v9138_v37  ;;  %v23783_v37 = vld [vmem:[#allocation45_spill] sm:$0xff] }
 0x8ae   : > { %v9144_v49 = vpop.xlane.xlu0 %9143  ;;  %v9135_v43 = vpop.xlane.xlu1 %9134 }
 0x8af   : > { %11953 = vrot.lane.b32.xlu0 %v23781_v20, %s19134_s20  ;;  %18712 = vrcp.f32 %v9135_v43  ;;  %11500 = vrot.lane.b32.xlu1 %v23782_v38, %s19134_s20  ;;  %v23784_v43 = vld [vmem:[#allocation29_spill] sm:$0xff]  ;;  %v17511_v38 = vpack.c.bf16 %v18170_v23, %v18169_v40 }
 0x8b0   : > { %v18707_v62 = vpop.eup %18706  ;;  %18714 = vrcp.f32 %v9144_v49 }
 0x8b1   : > { %v18709_v2 = vpop.eup %18708  ;;  %v9256_v20 = vmul.f32 %v18707_v62, %v21729_v29  ;;  %v18175_v62 = vunpack.i.h.bf16 %v21680_v14 }
 0x8b2   : > { %v9141_v46 = vpop.xlane.xlu0 %9140  ;;  %v9150_v4 = vpop.xlane.xlu1 %9149  ;;  %v9255_v30 = vmul.f32 %v18709_v2, %v21731_v7  ;;  %v18174_v2 = vunpack.i.l.bf16 %v21680_v14  ;;  %v18180_v14 = vunpack.i.h.bf16 %v21686_v47 }
 0x8b3   : > { %18716 = vrcp.f32 %v9141_v46  ;;  %12044 = vrot.lane.b32.xlu0 %v23783_v37, %s19134_s20  ;;  %11589 = vrot.lane.b32.xlu1 %v23784_v43, %s19134_s20  ;;  %v23785_v46 = vld [vmem:[#allocation32_spill] sm:$0xff]  ;;  %v18179_v37 = vunpack.i.l.bf16 %v21686_v47 }
 0x8b4   : > { %16675 = vmatprep.mubr.msk.f32.mxu0 %vm2534_vm3, %v9255_v30  ;;  %18718 = vrcp.f32 %v9150_v4  ;;  %v17515_v43 = vpack.c.bf16 %v18175_v62, %v18174_v2 }
 0x8b5   : > { %16676 = vmatmul.mubr.msk.f32.vlgmr.msra.gmra.mrb[96].mxu0 %vm2534_vm3, %v9256_v20  ;;  %v18711_v29 = vpop.eup %18710 }
 0x8b6   : > { %17506 = vmatpush3.bf16.msra.mxu0 %v21467_v1  ;;  %v9156_v55 = vpop.xlane.xlu0 %9155  ;;  %v9147_v49 = vpop.xlane.xlu1 %9146  ;;  %v9258_v4 = vmul.f32 %v18711_v29, %v21739_v28  ;;  %v23786_v28 = vld [vmem:[#allocation37_spill] sm:$0xff]  ;;  %v18185_v29 = vunpack.i.h.bf16 %v21648_v57 }
 0x8b7   : > { %17512 = vmatprep.subr.bf16.mxu0 %v17511_v38  ;;  %18312 = vrot.lane.b32.xlu0 %v23670_v42, %s19135_s17  ;;  %18720 = vrcp.f32 %v9147_v49 }
 0x8b8   : > { %18292 = vrot.lane.b32.xlu1 %v23551_v18, %s19134_s20  ;;  %18722 = vrcp.f32 %v9156_v55 }
 0x8b9   : > { %v18713_v7 = vpop.eup %18712 }
 0x8ba   : > { %v9153_v1 = vpop.xlane.xlu0 %9152  ;;  %v9162_v23 = vpop.xlane.xlu1 %9161  ;;  %v9257_v40 = vmul.f32 %v18713_v7, %v21744_v44 }
 0x8bb   : > { %18724 = vrcp.f32 %v9153_v1  ;;  %18327 = vrot.lane.b32.xlu0 %v23674_v45, %s19135_s17  ;;  %v18715_v42 = vpop.eup %18714  ;;  %v23787_v1 = vld [vmem:[#allocation117_spill] sm:$0xff] }
 0x8bc   : > { %11682 = vrot.lane.b32.xlu1 %v23785_v46, %s19134_s20  ;;  %16682 = vmatprep.mubr.msk.f32.mxu1 %vm2534_vm3, %v9257_v40  ;;  %18726 = vrcp.f32 %v9162_v23  ;;  %v9260_v47 = vmul.f32 %v18715_v42, %v21747_v61  ;;  %v18190_v23 = vunpack.i.h.bf16 %v23787_v1 }
 0x8bd   : > { %v18717_v30 = vpop.eup %18716  ;;  %16683 = vmatmul.mubr.msk.f32.vlgmr.msra.gmra.mrb[128].mxu1 %vm2534_vm3, %v9258_v4 }
 0x8be   : > { %v9168_v20 = vpop.xlane.xlu0 %9167  ;;  %v9159_v45 = vpop.xlane.xlu1 %9158  ;;  %v9259_v44 = vmul.f32 %v18717_v30, %v21757_v19  ;;  %17510 = vmatpush3.bf16.msra.mxu1 %v21471_v50  ;;  %v18184_v19 = vunpack.i.l.bf16 %v21648_v57 }
 0x8bf   : > { %18337 = vrot.lane.b32.xlu0 %v23678_v51, %s19135_s17  ;;  %17516 = vmatprep.subr.bf16.mxu1 %v17515_v43  ;;  %18728 = vrcp.f32 %v9159_v45  ;;  %v18719_v55 = vpop.eup %18718  ;;  %v17519_v51 = vpack.c.bf16 %v18180_v14, %v18179_v37  ;;  %v23789_v14 = vld [vmem:[#allocation110_spill] sm:$0xff] }
 0x8c0   : > { %11771 = vrot.lane.b32.xlu1 %v23786_v28, %s19134_s20  ;;  %16689 = vmatprep.mubr.msk.f32.mxu0 %vm2534_vm3, %v9259_v44  ;;  %18730 = vrcp.f32 %v9168_v20  ;;  %v9262_v57 = vmul.f32 %v18719_v55, %v21754_v53  ;;  %v23788_v53 = vld [vmem:[#allocation38_spill] sm:$0xff]  ;;  %v18195_v37 = vunpack.i.h.bf16 %v23789_v14  ;;  %v18194_v20 = vunpack.i.l.bf16 %v23789_v14 }
 0x8c1   : > { %v18721_v49 = vpop.eup %18720  ;;  %16690 = vmatmul.mubr.msk.f32.vlgmr.msra.gmra.mrb[98].mxu0 %vm2534_vm3, %v9260_v47 }
 0x8c2   : > { %v9165_v50 = vpop.xlane.xlu0 %9164  ;;  %v9174_v7 = vpop.xlane.xlu1 %9173  ;;  %17514 = vmatpush3.bf16.msra.mxu0 %v17511_v38  ;;  %v9261_v61 = vmul.f32 %v18721_v49, %v21764_v22  ;;  %v18189_v38 = vunpack.i.l.bf16 %v23787_v1  ;;  %v23791_v49 = vld [vmem:[#allocation52_spill] sm:$0xff] }
 0x8c3   : > { %18732 = vrcp.f32 %v9165_v50  ;;  %18347 = vrot.lane.b32.xlu0 %v19854_v9, %s19135_s17  ;;  %v18723_v62 = vpop.eup %18722  ;;  %17520 = vmatprep.subr.bf16.mxu0 %v17519_v51  ;;  %v17523_v9 = vpack.c.bf16 %v18185_v29, %v18184_v19  ;;  %v18200_v29 = vunpack.i.h.bf16 %v23791_v49  ;;  %v18199_v19 = vunpack.i.l.bf16 %v23791_v49 }
 0x8c4   : > { %18302 = vrot.lane.b32.xlu1 %v19952_v13, %s19134_s20  ;;  %16696 = vmatprep.mubr.msk.f32.mxu1 %vm2534_vm3, %v9261_v61  ;;  %18734 = vrcp.f32 %v9174_v7  ;;  %v9264_v46 = vmul.f32 %v18723_v62, %v21767_v15  ;;  %v23790_v15 = vld [vmem:[#allocation40_spill] sm:$0xff] }
 0x8c5   : > { %v18725_v2 = vpop.eup %18724  ;;  %16697 = vmatmul.mubr.msk.f32.vlgmr.msra.gmra.mrb[130].mxu1 %vm2534_vm3, %v9262_v57 }
 0x8c6   : > { %v9180_v40 = vpop.xlane.xlu0 %9179  ;;  %v9171_v42 = vpop.xlane.xlu1 %9170  ;;  %v9263_v22 = vmul.f32 %v18725_v2, %v21777_v33  ;;  %17518 = vmatpush3.bf16.msra.mxu1 %v17515_v43  ;;  %v17527_v43 = vpack.c.bf16 %v18190_v23, %v18189_v38  ;;  %v23793_v2 = vld [vmem:[#allocation115_spill] sm:$0xff]  ;;  %v17535_v38 = vpack.c.bf16 %v18200_v29, %v18199_v19  ;;  %v23799_v19 = vld [vmem:[#allocation116_spill] sm:$0xff] }
 0x8c7   : > { %17524 = vmatprep.subr.bf16.mxu1 %v17523_v9  ;;  %18736 = vrcp.f32 %v9171_v42  ;;  %v18727_v4 = vpop.eup %18726  ;;  %v18205_v1 = vunpack.i.h.bf16 %v23793_v2  ;;  %v18204_v23 = vunpack.i.l.bf16 %v23793_v2 }
 0x8c8   : > { %11864 = vrot.lane.b32.xlu1 %v23788_v53, %s19134_s20  ;;  %16703 = vmatprep.mubr.msk.f32.mxu0 %vm2534_vm3, %v9263_v22  ;;  %18738 = vrcp.f32 %v9180_v40  ;;  %v9266_v47 = vmul.f32 %v18727_v4, %v21774_v24  ;;  %v23792_v24 = vld [vmem:[#allocation43_spill] sm:$0xff]  ;;  %v23795_v53 = vld [vmem:[#allocation113_spill] sm:$0xff] }
 0x8c9   : > { %v18729_v30 = vpop.eup %18728  ;;  %16704 = vmatmul.mubr.msk.f32.vlgmr.msra.gmra.mrb[100].mxu0 %vm2534_vm3, %v9264_v46  ;;  %v18210_v46 = vunpack.i.h.bf16 %v23795_v53  ;;  %v18209_v4 = vunpack.i.l.bf16 %v23795_v53  ;;  %v17539_v14 = vpack.c.bf16 %v18205_v1, %v18204_v23  ;;  %v23801_v23 = vld [vmem:[#allocation119_spill] sm:$0xff] }
 0x8ca   : > { %v9177_v33 = vpop.xlane.xlu0 %9176  ;;  %v9186_v45 = vpop.xlane.xlu1 %9185  ;;  %17522 = vmatpush3.bf16.msra.mxu0 %v17519_v51  ;;  %v9265_v44 = vmul.f32 %v18729_v30, %v21784_v32  ;;  %v17531_v51 = vpack.c.bf16 %v18195_v37, %v18194_v20  ;;  %v23796_v37 = vld [vmem:[#allocation50_spill] sm:$0xff] }
 0x8cb   : > { %18740 = vrcp.f32 %v9177_v33  ;;  %v18731_v28 = vpop.eup %18730  ;;  %17528 = vmatprep.subr.bf16.mxu0 %v17527_v43 }
 0x8cc   : > { %11955 = vrot.lane.b32.xlu1 %v23790_v15, %s19134_s20  ;;  %16710 = vmatprep.mubr.msk.f32.mxu1 %vm2534_vm3, %v9265_v44  ;;  %18742 = vrcp.f32 %v9186_v45  ;;  %v9268_v61 = vmul.f32 %v18731_v28, %v21787_v56  ;;  %v23794_v56 = vld [vmem:[#allocation48_spill] sm:$0xff]  ;;  %v23797_v45 = vld [vmem:[#allocation118_spill] sm:$0xff]  ;;  %v17543_v15 = vpack.c.bf16 %v18210_v46, %v18209_v4 }
 0x8cd   : > { %v18733_v55 = vpop.eup %18732  ;;  %16711 = vmatmul.mubr.msk.f32.vlgmr.msra.gmra.mrb[132].mxu1 %vm2534_vm3, %v9266_v47  ;;  %v18215_v44 = vunpack.i.h.bf16 %v23797_v45  ;;  %v18214_v28 = vunpack.i.l.bf16 %v23797_v45 }
 0x8ce   : > { %v9192_v50 = vpop.xlane.xlu0 %9191  ;;  %v9183_v7 = vpop.xlane.xlu1 %9182  ;;  %v9267_v32 = vmul.f32 %v18733_v55, %v21797_v8  ;;  %17526 = vmatpush3.bf16.msra.mxu1 %v17523_v9  ;;  %v23798_v55 = vld [vmem:[#allocation51_spill] sm:$0xff] }
 0x8cf   : > { %17532 = vmatprep.subr.bf16.mxu1 %v17531_v51  ;;  %18744 = vrcp.f32 %v9183_v7  ;;  %v18735_v62 = vpop.eup %18734 }
 0x8d0   : > { %12046 = vrot.lane.b32.xlu1 %v23792_v24, %s19134_s20  ;;  %16717 = vmatprep.mubr.msk.f32.mxu0 %vm2534_vm3, %v9267_v32  ;;  %18746 = vrcp.f32 %v9192_v50  ;;  %v9270_v42 = vmul.f32 %v18735_v62, %v21794_v31  ;;  %v18220_v50 = vunpack.i.h.bf16 %v23799_v19  ;;  %v17547_v32 = vpack.c.bf16 %v18215_v44, %v18214_v28 }
 0x8d1   : > { %v18737_v57 = vpop.eup %18736  ;;  %16718 = vmatmul.mubr.msk.f32.vlgmr.msra.gmra.mrb[102].mxu0 %vm2534_vm3, %v9268_v61  ;;  %v23800_v61 = vld [vmem:[#allocation56_spill] sm:$0xff] }
 0x8d2   : > { %v9189_v8 = vpop.xlane.xlu0 %9188  ;;  %17530 = vmatpush3.bf16.msra.mxu0 %v17527_v43  ;;  %v9269_v40 = vmul.f32 %v18737_v57, %v21804_v63  ;;  %v18739_v9 = vpop.eup %18738 }
 0x8d3   : > { %18748 = vrcp.f32 %v9189_v8  ;;  %17536 = vmatprep.subr.bf16.mxu0 %v17535_v38  ;;  %v9272_v31 = vmul.f32 %v18739_v9, %v21807_v39  ;;  %v18225_v8 = vunpack.i.h.bf16 %v23801_v23 }
 0x8d4   : > { %18307 = vrot.lane.b32.xlu1 %v23794_v56, %s19135_s17  ;;  %16724 = vmatprep.mubr.msk.f32.mxu1 %vm2534_vm3, %v9269_v40 }
 0x8d5   : > { %v18741_v22 = vpop.eup %18740  ;;  %16725 = vmatmul.mubr.msk.f32.vlgmr.msra.gmra.mrb[134].mxu1 %vm2534_vm3, %v9270_v42 }
 0x8d6   : > { %v9198_v30 = vpop.xlane.xlu0 %9197  ;;  %v9271_v63 = vmul.f32 %v18741_v22, %v21816_v0  ;;  %17534 = vmatpush3.bf16.msra.mxu1 %v17531_v51  ;;  %v18743_v20 = vpop.eup %18742  ;;  %v18219_v51 = vunpack.i.l.bf16 %v23799_v19 }
 0x8d7   : > { %17540 = vmatprep.subr.bf16.mxu1 %v17539_v14  ;;  %18750 = vrcp.f32 %v9198_v30  ;;  %v9274_v49 = vmul.f32 %v18743_v20, %v21814_v60 }
 0x8d8   : > { %18317 = vrot.lane.b32.xlu1 %v23796_v37, %s19135_s17  ;;  %16731 = vmatprep.mubr.msk.f32.mxu0 %vm2534_vm3, %v9271_v63  ;;  %v17551_v57 = vpack.c.bf16 %v18220_v50, %v18219_v51  ;;  %v23803_v63 = vld [vmem:[#allocation120_spill] sm:$0xff] }
 0x8d9   : > { %v9207_v33 = vpop.xlane.xlu1 %9206  ;;  %v18745_v43 = vpop.eup %18744  ;;  %16732 = vmatmul.mubr.msk.f32.vlgmr.msra.gmra.mrb[104].mxu0 %vm2534_vm3, %v9272_v31  ;;  %v18235_v37 = vunpack.i.h.bf16 %v23803_v63  ;;  %v18234_v31 = vunpack.i.l.bf16 %v23803_v63  ;;  %v23812_v63 = vld [vmem:[#allocation127_spill] sm:$0xff] }
 0x8da   : > { %18752 = vrcp.f32 %v9207_v33  ;;  %v9195_v0 = vpop.xlane.xlu0 %9194  ;;  %17538 = vmatpush3.bf16.msra.mxu0 %v17535_v38  ;;  %v9273_v47 = vmul.f32 %v18745_v43, %v21824_v6  ;;  %v18747_v39 = vpop.eup %18746 }
 0x8db   : > { %18754 = vrcp.f32 %v9195_v0  ;;  %17544 = vmatprep.subr.bf16.mxu0 %v17543_v15  ;;  %v9276_v60 = vmul.f32 %v18747_v39, %v21826_v27  ;;  %v18224_v27 = vunpack.i.l.bf16 %v23801_v23  ;;  %v23806_v39 = vld [vmem:[#allocation122_spill] sm:$0xff] }
 0x8dc   : > { %18322 = vrot.lane.b32.xlu1 %v23798_v55, %s19135_s17  ;;  %16738 = vmatprep.mubr.msk.f32.mxu1 %vm2534_vm3, %v9273_v47 }
 0x8dd   : > { %v18749_v29 = vpop.eup %18748  ;;  %16739 = vmatmul.mubr.msk.f32.vlgmr.msra.gmra.mrb[136].mxu1 %vm2534_vm3, %v9274_v49  ;;  %v17555_v42 = vpack.c.bf16 %v18225_v8, %v18224_v27 }
 0x8de   : > { %v9204_v7 = vpop.xlane.xlu0 %9203  ;;  %v9275_v6 = vmul.f32 %v18749_v29, %v21834_v12  ;;  %17542 = vmatpush3.bf16.msra.mxu1 %v17539_v14  ;;  %v9213_v24 = vpop.xlane.xlu1 %9212  ;;  %v23807_v29 = vld [vmem:[#allocation129_spill] sm:$0xff] }
 0x8df   : > { %17548 = vmatprep.subr.bf16.mxu1 %v17547_v32  ;;  %18756 = vrcp.f32 %v9204_v7  ;;  %v18250_v19 = vunpack.i.h.bf16 %v23807_v29  ;;  %v18249_v50 = vunpack.i.l.bf16 %v23807_v29 }
 0x8e0   : > { %18332 = vrot.lane.b32.xlu1 %v23800_v61, %s19135_s17  ;;  %16745 = vmatprep.mubr.msk.f32.mxu0 %vm2534_vm3, %v9275_v6  ;;  %18758 = vrcp.f32 %v9213_v24  ;;  %v18260_v24 = vunpack.i.h.bf16 %v21914_v17  ;;  %v18259_v61 = vunpack.i.l.bf16 %v21914_v17 }
 0x8e1   : > { %16746 = vmatmul.mubr.msk.f32.vlgmr.msra.gmra.mrb[106].mxu0 %vm2534_vm3, %v9276_v60  ;;  %v18751_v2 = vpop.eup %18750  ;;  %v17583_v7 = vpack.c.bf16 %v18250_v19, %v18249_v50  ;;  %v23816_v50 = vld [vmem:[#allocation132_spill] sm:$0xff] }
 0x8e2   : > { %v9201_v62 = vpop.xlane.xlu0 %9200  ;;  %17546 = vmatpush3.bf16.msra.mxu0 %v17543_v15  ;;  %v9278_v9 = vmul.f32 %v18751_v2, %v21839_v10  ;;  %v17595_v60 = vpack.c.bf16 %v18260_v24, %v18259_v61 }
 0x8e3   : > { %18760 = vrcp.f32 %v9201_v62  ;;  %17552 = vmatprep.subr.bf16.mxu0 %v17551_v57  ;;  %v23810_v62 = vld [vmem:[#allocation131_spill] sm:$0xff] }
 0x8e4   : > { %v18753_v12 = vpop.eup %18752  ;;  %18342 = vrot.lane.b32.xlu1 %v19838_v54, %s19135_s17 }
 0x8e5   : > { %v18755_v1 = vpop.eup %18754  ;;  %v9281_v56 = vmul.f32 %v18753_v12, %v21846_v34 }
 0x8e6   : > { %v9210_v38 = vpop.xlane.xlu0 %9209  ;;  %v9277_v40 = vmul.f32 %v18755_v1, %v21844_v3  ;;  %v23802_v3 = vld [vmem:[#allocation121_spill] sm:$0xff]  ;;  %v18263_v1 = vpop.permute.xlu1 %18262 }
 0x8e7   : > { %18762 = vrcp.f32 %v9210_v38  ;;  %v18230_v4 = vunpack.i.h.bf16 %v23802_v3  ;;  %v18229_v10 = vunpack.i.l.bf16 %v23802_v3 }
 0x8e8   : > { %16752 = vmatprep.mubr.msk.f32.mxu1 %vm2534_vm3, %v9277_v40 }
 0x8e9   : > { %16753 = vmatmul.mubr.msk.f32.vlgmr.msra.gmra.mrb[138].mxu1 %vm2534_vm3, %v9278_v9  ;;  %v18757_v22 = vpop.eup %18756  ;;  %v17559_v43 = vpack.c.bf16 %v18230_v4, %v18229_v10 }
 0x8ea   : > { %17550 = vmatpush3.bf16.msra.mxu1 %v17547_v32  ;;  %v9216_v54 = vpop.xlane.xlu0 %9215  ;;  %16766 = vmatprep.mubr.msk.f32.mxu1 %vm2534_vm3, %v9281_v56  ;;  %v18759_v53 = vpop.eup %18758  ;;  %v9280_v34 = vmul.f32 %v18757_v22, %v21853_v48  ;;  %v22057_v48 = vpack.c.bf16 %v18235_v37, %v18234_v31  ;;  %v23809_v32 = vld [vmem:[#allocation128_spill] sm:$0xff] }
 0x8eb   : > { %18764 = vrcp.f32 %v9216_v54  ;;  %17556 = vmatprep.subr.bf16.mxu1 %v17555_v42  ;;  %v9283_v20 = vmul.f32 %v18759_v53, %v21855_v35  ;;  %v23805_v35 = vld [vmem:[#allocation123_spill] sm:$0xff]  ;;  %v23811_v53 = vld [vmem:[#allocation124_spill] sm:$0xff] }
 0x8ec   : > { %v18240_v0 = vunpack.i.h.bf16 %v23805_v35  ;;  %v18239_v15 = vunpack.i.l.bf16 %v23805_v35  ;;  %v18244_v3 = vunpack.i.l.bf16 %v23811_v53  ;;  %v23815_v35 = vld [vmem:[#allocation133_spill] sm:$0xff] }
 0x8ed   : > { %v18761_v46 = vpop.eup %18760 }
 0x8ee   : > { %v9222_v30 = vpop.xlane.xlu0 %9221  ;;  %v9279_v14 = vmul.f32 %v18761_v46, %v21859_v41  ;;  %v17571_v55 = vpack.c.bf16 %v18240_v0, %v18239_v15  ;;  %v18245_v46 = vunpack.i.h.bf16 %v23811_v53  ;;  %v18265_v15 = vunpack.i.h.bf16 %v18263_v1 }
 0x8ef   : > { %18766 = vrcp.f32 %v9222_v30 }
 0x8f0   : > { %16759 = vmatprep.mubr.msk.f32.mxu0 %vm2534_vm3, %v9279_v14  ;;  %v17577_v14 = vpack.c.bf16 %v18245_v46, %v18244_v3 }
 0x8f1   : > { %v18763_v33 = vpop.eup %18762  ;;  %16760 = vmatmul.mubr.msk.f32.vlgmr.msra.gmra.mrb[108].mxu0 %vm2534_vm3, %v9280_v34 }
 0x8f2   : > { %17554 = vmatpush3.bf16.msra.mxu0 %v17551_v57  ;;  %v11046_v45 = vpop.permute.xlu0 %11045  ;;  %16773 = vmatprep.mubr.msk.f32.mxu0 %vm2534_vm3, %v9283_v20  ;;  %v9282_v41 = vmul.f32 %v18763_v33, %v21865_v58 }
 0x8f3   : > { %17561 = vmatprep.subr.msk.bf16.mxu0 %vm19714_vm2, %v17559_v43 }
 0x8f4   : > { %16767 = vmatmul.mubr.msk.f32.vlgmr.msra.gmra.mrb[140].mxu1 %vm2534_vm3, %v9282_v41 }
 0x8f5   : > { %v18765_v28 = vpop.eup %18764  ;;  %17558 = vmatpush3.bf16.msra.mxu1 %v17555_v42 }
 0x8f6   : > { %17567 = vmatprep.subr.msk.bf16.mxu1 %vm19714_vm2, %v22057_v48  ;;  %v22065_v47 = vpop.permute.xlu0 %11134  ;;  %v9284_v58 = vmul.f32 %v18765_v28, %v21869_v26  ;;  %v23808_v26 = vld [vmem:[#allocation125_spill] sm:$0xff]  ;;  %v23814_v28 = vld [vmem:[#allocation126_spill] sm:$0xff] }
 0x8f8   : > { %16774 = vmatmul.mubr.msk.f32.vlgmr.msra.gmra.mrb[110].mxu0 %vm2534_vm3, %v9284_v58  ;;  %v18264_v58 = vunpack.i.l.bf16 %v18263_v1 }
 0x8f9   : > { %16787 = vmatprep.mubr.msk.f32.mxu0 %vm1141_vm1, %v23806_v39  ;;  %v18767_v42 = vpop.eup %18766 }
 0x8fa   : > { %v18268_v49 = vpop.permute.xlu0 %18267  ;;  %v9286_v30 = vmul.f32 %v18767_v42, %v21873_v25  ;;  %v17601_v19 = vpack.c.bf16 %v18265_v15, %v18264_v58 }
 0x8fb   : > { %17564 = vmatpush3.bf16.xpose.msk.msra.mxu0 %vm19714_vm2, %v17559_v43  ;;  %v18270_v2 = vunpack.i.h.bf16 %v18268_v49  ;;  %v18269_v12 = vunpack.i.l.bf16 %v18268_v49 }
 0x8fc   : > { %17573 = vmatprep.subr.msk.bf16.mxu0 %vm19714_vm2, %v17571_v55 }
 0x8fd   : > { %v17607_v8 = vpack.c.bf16 %v18270_v2, %v18269_v12 }
 0x8fe   : > { %v11228_v51 = vpop.permute.xlu0 %11227 }
 0x902   : > { %16788 = vmatmul.mubr.msk.f32.vlgmr.msra.gmra.mrb[112].mxu0 %vm1141_vm1, %v23808_v26  ;;  %v22085_v6 = vpop.permute.xlu0 %11316 }
 0x903   : > { %17576 = vmatpush3.bf16.xpose.msk.msra.mxu0 %vm19714_vm2, %v17571_v55  ;;  %16801 = vmatprep.mubr.msk.f32.mxu0 %vm1141_vm1, %v23809_v32 }
 0x904   : > { %17585 = vmatprep.subr.msk.bf16.mxu0 %vm19714_vm2, %v17583_v7 }
 0x906   : > { %v18278_v57 = vpop.permute.xlu0 %18277 }
 0x907   : > { %v18280_v38 = vunpack.i.h.bf16 %v18278_v57  ;;  %v18279_v40 = vunpack.i.l.bf16 %v18278_v57 }
 0x909   : > { %v17619_v54 = vpack.c.bf16 %v18280_v38, %v18279_v40 }
 0x90a   : > { %16802 = vmatmul.mubr.msk.f32.vlgmr.msra.gmra.mrb[114].mxu0 %vm1141_vm1, %v23810_v62  ;;  %v11410_v23 = vpop.permute.xlu0 %11409 }
 0x90b   : > { %17588 = vmatpush3.bf16.xpose.msk.msra.mxu0 %vm19714_vm2, %v17583_v7  ;;  %16815 = vmatprep.mubr.msk.f32.mxu0 %vm1141_vm1, %v21879_v21 }
 0x90c   : > { %17597 = vmatprep.subr.msk.bf16.mxu0 %vm19714_vm2, %v17595_v60 }
 0x90e   : > { %v22102_v21 = vpop.permute.xlu0 %11498 }
 0x912   : > { %16816 = vmatmul.mubr.msk.f32.vlgmr.msra.gmra.mrb[116].mxu0 %vm1141_vm1, %v11046_v45  ;;  %v18288_v56 = vpop.permute.xlu0 %18287 }
 0x913   : > { %17600 = vmatpush3.bf16.xpose.msk.msra.mxu0 %vm19714_vm2, %v17595_v60  ;;  %v9219_v17 = vpop.xlane.xlu1 %9218  ;;  %v18290_v20 = vunpack.i.h.bf16 %v18288_v56  ;;  %v18289_v33 = vunpack.i.l.bf16 %v18288_v56 }
 0x914   : > { %17609 = vmatprep.subr.msk.bf16.mxu0 %vm19714_vm2, %v17607_v8  ;;  %18768 = vrcp.f32 %v9219_v17 }
 0x916   : > { %v11592_v34 = vpop.permute.xlu0 %11591 }
 0x917   : > { %v22104_v27 = vpop.permute.xlu1 %11136 }
 0x91a   : > { %v11681_v45 = vpop.permute.xlu0 %11680 }
 0x91b   : > { %v11226_v9 = vpop.permute.xlu1 %11225 }
 0x91c   : > { %16829 = vmatprep.mubr.msk.f32.mxu0 %vm1141_vm1, %v11226_v9 }
 0x91d   : > { %16830 = vmatmul.mubr.msk.f32.vlgmr.msra.gmra.mrb[118].mxu0 %vm1141_vm1, %v11228_v51 }
 0x91e   : > { %v18769_v22 = vpop.eup %18768  ;;  %17612 = vmatpush3.bf16.xpose.msk.msra.mxu0 %vm19714_vm2, %v17607_v8  ;;  %v18298_v39 = vpop.permute.xlu0 %18297 }
 0x91f   : > { %17621 = vmatprep.subr.msk.bf16.mxu0 %vm19714_vm2, %v17619_v54  ;;  %v18273_v4 = vpop.permute.xlu1 %18272  ;;  %v9285_v10 = vmul.f32 %v18769_v22, %v21890_v5  ;;  %v23813_v5 = vld [vmem:[#allocation130_spill] sm:$0xff]  ;;  %v18300_v49 = vunpack.i.h.bf16 %v18298_v39  ;;  %v18299_v29 = vunpack.i.l.bf16 %v18298_v39 }
 0x920   : > { %v18255_v31 = vunpack.i.h.bf16 %v23813_v5  ;;  %v18254_v25 = vunpack.i.l.bf16 %v23813_v5  ;;  %v18275_v26 = vunpack.i.h.bf16 %v18273_v4  ;;  %v18274_v32 = vunpack.i.l.bf16 %v18273_v4 }
 0x921   : > { %16780 = vmatprep.mubr.msk.f32.mxu1 %vm2534_vm3, %v9285_v10  ;;  %v17643_v7 = vpack.c.bf16 %v18300_v49, %v18299_v29 }
 0x922   : > { %16781 = vmatmul.mubr.msk.f32.vlgmr.msra.gmra.mrb[142].mxu1 %vm2534_vm3, %v9286_v30  ;;  %v17589_v41 = vpack.c.bf16 %v18255_v31, %v18254_v25  ;;  %v11774_v24 = vpop.permute.xlu0 %11773 }
 0x923   : > { %17570 = vmatpush3.bf16.xpose.msk.msra.mxu1 %vm19714_vm2, %v22057_v48  ;;  %16794 = vmatprep.mubr.msk.f32.mxu1 %vm1141_vm1, %v23812_v63  ;;  %v11319_v37 = vpop.permute.xlu1 %11318  ;;  %v17631_v48 = vpack.c.bf16 %v18290_v20, %v18289_v33 }
 0x924   : > { %17579 = vmatprep.subr.msk.bf16.mxu1 %vm19714_vm2, %v17577_v14 }
 0x926   : > { %v11863_v62 = vpop.permute.xlu0 %11862 }
 0x927   : > { %v11408_v43 = vpop.permute.xlu1 %11407 }
 0x928   : > { %16843 = vmatprep.mubr.msk.f32.mxu0 %vm1141_vm1, %v11408_v43 }
 0x929   : > { %16844 = vmatmul.mubr.msk.f32.vlgmr.msra.gmra.mrb[120].mxu0 %vm1141_vm1, %v11410_v23 }
 0x92a   : > { %16795 = vmatmul.mubr.msk.f32.vlgmr.msra.gmra.mrb[144].mxu1 %vm1141_vm1, %v23814_v28  ;;  %17624 = vmatpush3.bf16.xpose.msk.msra.mxu0 %vm19714_vm2, %v17619_v54  ;;  %v11954_v23 = vpop.permute.xlu0 %11953 }
 0x92b   : > { %17582 = vmatpush3.bf16.xpose.msk.msra.mxu1 %vm19714_vm2, %v17577_v14  ;;  %16808 = vmatprep.mubr.msk.f32.mxu1 %vm1141_vm1, %v23815_v35  ;;  %v18283_v0 = vpop.permute.xlu1 %18282 }
 0x92c   : > { %17633 = vmatprep.subr.msk.bf16.mxu0 %vm19714_vm2, %v17631_v48  ;;  %17591 = vmatprep.subr.msk.bf16.mxu1 %vm19714_vm2, %v17589_v41  ;;  %v18285_v57 = vunpack.i.h.bf16 %v18283_v0  ;;  %v18284_v2 = vunpack.i.l.bf16 %v18283_v0 }
 0x92e   : > { %v17625_v1 = vpack.c.bf16 %v18285_v57, %v18284_v2 }
 0x92f   : > { %v11501_v55 = vpop.permute.xlu1 %11500 }
 0x932   : > { %16809 = vmatmul.mubr.msk.f32.vlgmr.msra.gmra.mrb[146].mxu1 %vm1141_vm1, %v23816_v50 }
 0x933   : > { %17594 = vmatpush3.bf16.xpose.msk.msra.mxu1 %vm19714_vm2, %v17589_v41  ;;  %16822 = vmatprep.mubr.msk.f32.mxu1 %vm1141_vm1, %v22065_v47  ;;  %v11590_v51 = vpop.permute.xlu1 %11589  ;;  %v17613_v47 = vpack.c.bf16 %v18275_v26, %v18274_v32 }
 0x934   : > { %17603 = vmatprep.subr.msk.bf16.mxu1 %vm19714_vm2, %v17601_v19  ;;  %16857 = vmatprep.mubr.msk.f32.mxu0 %vm1141_vm1, %v11590_v51 }
 0x935   : > { %16858 = vmatmul.mubr.msk.f32.vlgmr.msra.gmra.mrb[122].mxu0 %vm1141_vm1, %v11592_v34 }
 0x936   : > { %17636 = vmatpush3.bf16.xpose.msk.msra.mxu0 %vm19714_vm2, %v17631_v48 }
 0x937   : > { %17645 = vmatprep.subr.msk.bf16.mxu0 %vm19714_vm2, %v17643_v7  ;;  %v18293_v61 = vpop.permute.xlu1 %18292 }
 0x938   : > { %v18295_v8 = vunpack.i.h.bf16 %v18293_v61  ;;  %v18294_v17 = vunpack.i.l.bf16 %v18293_v61 }
 0x93a   : > { %16823 = vmatmul.mubr.msk.f32.vlgmr.msra.gmra.mrb[148].mxu1 %vm1141_vm1, %v22104_v27  ;;  %v17637_v38 = vpack.c.bf16 %v18295_v8, %v18294_v17 }
 0x93b   : > { %17606 = vmatpush3.bf16.xpose.msk.msra.mxu1 %vm19714_vm2, %v17601_v19  ;;  %16836 = vmatprep.mubr.msk.f32.mxu1 %vm1141_vm1, %v22085_v6  ;;  %v11683_v60 = vpop.permute.xlu1 %11682 }
 0x93c   : > { %17615 = vmatprep.subr.msk.bf16.mxu1 %vm19714_vm2, %v17613_v47 }
 0x93f   : > { %v11772_v12 = vpop.permute.xlu1 %11771 }
 0x940   : > { %16871 = vmatprep.mubr.msk.f32.mxu0 %vm1141_vm1, %v11772_v12 }
 0x941   : > { %16872 = vmatmul.mubr.msk.f32.vlgmr.msra.gmra.mrb[124].mxu0 %vm1141_vm1, %v11774_v24 }
 0x942   : > { %16837 = vmatmul.mubr.msk.f32.vlgmr.msra.gmra.mrb[150].mxu1 %vm1141_vm1, %v11319_v37  ;;  %17648 = vmatpush3.bf16.xpose.msk.msra.mxu0 %vm19714_vm2, %v17643_v7 }
 0x943   : > { %17618 = vmatpush3.bf16.xpose.msk.msra.mxu1 %vm19714_vm2, %v17613_v47  ;;  %16850 = vmatprep.mubr.msk.f32.mxu1 %vm1141_vm1, %v22102_v21  ;;  %v18303_v6 = vpop.permute.xlu1 %18302  ;;  %v12045_v21 = vpop.permute.xlu0 %12044 }
 0x944   : > { %16885 = vmatprep.mubr.msk.f32.mxu0 %vm1141_vm1, %v11954_v23  ;;  %17627 = vmatprep.subr.msk.bf16.mxu1 %vm19714_vm2, %v17625_v1  ;;  %v18305_v9 = vunpack.i.h.bf16 %v18303_v6  ;;  %v18304_v56 = vunpack.i.l.bf16 %v18303_v6 }
 0x946   : > { %v17649_v54 = vpack.c.bf16 %v18305_v9, %v18304_v56 }
 0x947   : > { %v11865_v27 = vpop.permute.xlu1 %11864  ;;  %v18313_v22 = vpop.permute.xlu0 %18312 }
 0x948   : > { %v18315_v4 = vunpack.i.h.bf16 %v18313_v22  ;;  %v18314_v10 = vunpack.i.l.bf16 %v18313_v22 }
 0x94a   : > { %16851 = vmatmul.mubr.msk.f32.vlgmr.msra.gmra.mrb[152].mxu1 %vm1141_vm1, %v11501_v55  ;;  %v17659_v37 = vpack.c.bf16 %v18315_v4, %v18314_v10 }
 0x94b   : > { %17630 = vmatpush3.bf16.xpose.msk.msra.mxu1 %vm19714_vm2, %v17625_v1  ;;  %16864 = vmatprep.mubr.msk.f32.mxu1 %vm1141_vm1, %v11681_v45  ;;  %v11956_v40 = vpop.permute.xlu1 %11955 }
 0x94c   : > { %17639 = vmatprep.subr.msk.bf16.mxu1 %vm19714_vm2, %v17637_v38  ;;  %16886 = vmatmul.mubr.msk.f32.vlgmr.msra.gmra.mrb[126].mxu0 %vm1141_vm1, %v11956_v40 }
 0x94f   : > { %v12047_v42 = vpop.permute.xlu1 %12046 }
 0x952   : > { %16865 = vmatmul.mubr.msk.f32.vlgmr.msra.gmra.mrb[154].mxu1 %vm1141_vm1, %v11683_v60 }
 0x953   : > { %17642 = vmatpush3.bf16.xpose.msk.msra.mxu1 %vm19714_vm2, %v17637_v38  ;;  %16878 = vmatprep.mubr.msk.f32.mxu1 %vm1141_vm1, %v11863_v62  ;;  %v18308_v53 = vpop.permute.xlu1 %18307 }
 0x954   : > { %v18310_v46 = vunpack.i.h.bf16 %v18308_v53  ;;  %v18309_v3 = vunpack.i.l.bf16 %v18308_v53  ;;  %17651 = vmatprep.subr.msk.bf16.mxu1 %vm19714_vm2, %v17649_v54 }
 0x956   : > { %v17655_v30 = vpack.c.bf16 %v18310_v46, %v18309_v3 }
 0x957   : > { %v18318_v14 = vpop.permute.xlu1 %18317 }
 0x958   : > { %v18320_v34 = vunpack.i.h.bf16 %v18318_v14  ;;  %v18319_v63 = vunpack.i.l.bf16 %v18318_v14  ;;  %17656 = vmatprep.subr.bf16.mxu0 %v17655_v30 }
 0x959   : > { %17658 = vmatpush3.bf16.msra.mxu0 %v17655_v30 }
 0x95a   : > { %16879 = vmatmul.mubr.msk.f32.vlgmr.msra.gmra.mrb[156].mxu1 %vm1141_vm1, %v11865_v27  ;;  %v22189_v5 = vpack.c.bf16 %v18320_v34, %v18319_v63 }
 0x95b   : > { %17654 = vmatpush3.bf16.xpose.msk.msra.mxu1 %vm19714_vm2, %v17649_v54  ;;  %16892 = vmatprep.mubr.msk.f32.mxu1 %vm1141_vm1, %v12045_v21  ;;  %v18323_v31 = vpop.permute.xlu1 %18322 }
 0x95c   : > { %17660 = vmatprep.subr.bf16.mxu1 %v17659_v37  ;;  %17664 = vmatprep.subr.bf16.mxu0 %v22189_v5  ;;  %v18325_v25 = vunpack.i.h.bf16 %v18323_v31  ;;  %v18324_v20 = vunpack.i.l.bf16 %v18323_v31 }
 0x95e   : > { %v22196_v33 = vpack.c.bf16 %v18325_v25, %v18324_v20 }
 0x960   : > { %23817 = vst [vmem:[#allocation54_spill] sm:$0xff] %v22196_v33 }
 0x962   : > { %16893 = vmatmul.mubr.msk.f32.vlgmr.msra.gmra.mrb[158].mxu1 %vm1141_vm1, %v12047_v42 }
 0x963   : > { %17662 = vmatpush3.bf16.msra.mxu1 %v17659_v37 }
 0x964   : > { %17668 = vmatprep.subr.bf16.mxu1 %v22196_v33 }
 0x988   : > { %v22199_v43 = vpop.f32.mrb[96].mxu0 }
 0x989   : > { %v22201_v45 = vpop.f32.mrb[97].mxu0 }
 0x990   : > { %v22203_v44 = vpop.f32.mrb[128].mxu1 }
 0x991   : > { %v22205_v41 = vpop.f32.mrb[129].mxu1 }
 0x994   : > { %v22207_v48 = vpop.f32.mrb[98].mxu0 }
 0x995   : > { %v22209_v28 = vpop.f32.mrb[99].mxu0 }
 0x998   : > { %v22211_v35 = vpop.f32.mrb[130].mxu1 }
 0x999   : > { %v22213_v0 = vpop.f32.mrb[131].mxu1 }
 0x99c   : > { %v22215_v15 = vpop.f32.mrb[100].mxu0 }
 0x99d   : > { %v22217_v58 = vpop.f32.mrb[101].mxu0 }
 0x9a0   : > { %v22219_v39 = vpop.f32.mrb[132].mxu1 }
 0x9a1   : > { %23818 = vst [vmem:[#allocation55_spill] sm:$0xff] %v22219_v39  ;;  %v22221_v55 = vpop.f32.mrb[133].mxu1 }
 0x9a4   : > { %v22223_v49 = vpop.f32.mrb[102].mxu0 }
 0x9a5   : > { %23819 = vst [vmem:[#allocation41_spill] sm:$0xff] %v22223_v49  ;;  %v22225_v29 = vpop.f32.mrb[103].mxu0 }
 0x9a8   : > { %v22227_v19 = vpop.f32.mrb[134].mxu1 }
 0x9a9   : > { %23820 = vst [vmem:[#allocation46_spill] sm:$0xff] %v22227_v19  ;;  %v22229_v50 = vpop.f32.mrb[135].mxu1 }
 0x9ac   : > { %v22231_v51 = vpop.f32.mrb[104].mxu0 }
 0x9ad   : > { %23821 = vst [vmem:[#allocation20_spill] sm:$0xff] %v22231_v51  ;;  %v22233_v7 = vpop.f32.mrb[105].mxu0 }
 0x9ae   : > { %23822 = vst [vmem:[#allocation26_spill] sm:$0xff] %v22233_v7 }
 0x9b0   : > { %v22235_v26 = vpop.f32.mrb[136].mxu1 }
 0x9b1   : > { %23823 = vst [vmem:[#allocation57_spill] sm:$0xff] %v22235_v26  ;;  %v22237_v32 = vpop.f32.mrb[137].mxu1 }
 0x9b2   : > { %23824 = vst [vmem:[#allocation28_spill] sm:$0xff] %v22237_v32 }
 0x9b4   : > { %v22239_v24 = vpop.f32.mrb[106].mxu0 }
 0x9b5   : > { %23825 = vst [vmem:[#allocation58_spill] sm:$0xff] %v22239_v24  ;;  %v22241_v61 = vpop.f32.mrb[107].mxu0 }
 0x9b6   : > { %23826 = vst [vmem:[#allocation34_spill] sm:$0xff] %v22241_v61 }
 0x9bc   : > { %v22243_v47 = vpop.f32.mrb[138].mxu1 }
 0x9bd   : > { %23827 = vst [vmem:[#allocation44_spill] sm:$0xff] %v22243_v47  ;;  %v22245_v60 = vpop.f32.mrb[139].mxu1 }
 0x9be   : > { %23828 = vst [vmem:[#allocation36_spill] sm:$0xff] %v22245_v60 }
 0x9c4   : > { %v22247_v62 = vpop.f32.mrb[108].mxu0 }
 0x9c5   : > { %23829 = vst [vmem:[#allocation22_spill] sm:$0xff] %v22247_v62  ;;  %v22249_v57 = vpop.f32.mrb[109].mxu0 }
 0x9c6   : > { %23830 = vst [vmem:[#allocation39_spill] sm:$0xff] %v22249_v57 }
 0x9c7   : > { %v22251_v2 = vpop.f32.mrb[140].mxu1 }
 0x9c8   : > { %23831 = vst [vmem:[#allocation42_spill] sm:$0xff] %v22251_v2  ;;  %v22253_v12 = vpop.f32.mrb[141].mxu1 }
 0x9c9   : > { %23832 = vst [vmem:[#allocation24_spill] sm:$0xff] %v22253_v12 }
 0x9cb   : > { %v22255_v1 = vpop.f32.mrb[110].mxu0 }
 0x9cc   : > { %23833 = vst [vmem:[#allocation45_spill] sm:$0xff] %v22255_v1  ;;  %v22257_v23 = vpop.f32.mrb[111].mxu0 }
 0x9cd   : > { %23834 = vst [vmem:[#allocation29_spill] sm:$0xff] %v22257_v23 }
 0x9d5   : > { %v22259_v6 = vpop.f32.mrb[112].mxu0 }
 0x9d6   : > { %v22261_v8 = vpop.f32.mrb[113].mxu0  ;;  %v12138_v17 = vsel %vm2534_vm3, %v22259_v6, -inf }
 0x9d7   : > { %12139 = vmax.xlane.f32.xlu1 %v12138_v17  ;;  %v12135_v27 = vsel %vm2534_vm3, %v22261_v8, -inf }
 0x9d8   : > { %12136 = vmax.xlane.f32.xlu0 %v12135_v27 }
 0x9dd   : > { %v22267_v38 = vpop.f32.mrb[114].mxu0 }
 0x9de   : > { %v22269_v40 = vpop.f32.mrb[115].mxu0  ;;  %v12150_v37 = vsel %vm2534_vm3, %v22267_v38, -inf }
 0x9df   : > { %v12147_v21 = vsel %vm2534_vm3, %v22269_v40, -inf }
 0x9e0   : > { %12148 = vmax.xlane.f32.xlu1 %v12147_v21 }
 0x9e5   : > { %v22273_v9 = vpop.f32.mrb[116].mxu0 }
 0x9e6   : > { %v22275_v56 = vpop.f32.mrb[117].mxu0 }
 0x9e7   : > { %v12159_v27 = vsel %vm2534_vm3, %v22275_v56, -inf }
 0x9f0   : > { %v22277_v42 = vpop.f32.mrb[118].mxu0 }
 0x9f1   : > { %v22279_v54 = vpop.f32.mrb[119].mxu0 }
 0x9f5   : > { %v22281_v22 = vpop.f32.mrb[142].mxu1 }
 0x9f6   : > { %23835 = vst [vmem:[#allocation32_spill] sm:$0xff] %v22281_v22  ;;  %v22283_v53 = vpop.f32.mrb[143].mxu1 }
 0x9f7   : > { %23836 = vst [vmem:[#allocation37_spill] sm:$0xff] %v22283_v53 }
 0x9fc   : > { %v22285_v46 = vpop.f32.mrb[120].mxu0 }
 0x9fd   : > { %v22287_v3 = vpop.f32.mrb[144].mxu1  ;;  %v22289_v4 = vpop.f32.mrb[121].mxu0  ;;  %v12186_v47 = vsel %vm2534_vm3, %v22285_v46, -inf }
 0x9fe   : > { %v22291_v10 = vpop.f32.mrb[145].mxu1  ;;  %v12144_v30 = vsel %vm2534_vm3, %v22287_v3, -inf }
 0x9ff   : > { %12145 = vmax.xlane.f32.xlu0 %v12144_v30  ;;  %v12141_v14 = vsel %vm2534_vm3, %v22291_v10, -inf }
 0xa03   : > { %12142 = vmax.xlane.f32.xlu0 %v12141_v14  ;;  %v12162_v14 = vsel %vm2534_vm3, %v22273_v9, -inf }
 0xa05   : > { %v22297_v34 = vpop.f32.mrb[146].mxu1 }
 0xa06   : > { %v22299_v63 = vpop.f32.mrb[147].mxu1  ;;  %v12156_v17 = vsel %vm2534_vm3, %v22297_v34, -inf }
 0xa07   : > { %12151 = vmax.xlane.f32.xlu0 %v12150_v37  ;;  %v12153_v31 = vsel %vm2534_vm3, %v22299_v63, -inf }
 0xa08   : > { %12154 = vmax.xlane.f32.xlu1 %v12153_v31  ;;  %v22305_v25 = vpop.f32.mrb[122].mxu0 }
 0xa09   : > { %v22307_v20 = vpop.f32.mrb[123].mxu0 }
 0xa0b   : > { %12157 = vmax.xlane.f32.xlu0 %v12156_v17  ;;  %v12171_v17 = vsel %vm2534_vm3, %v22279_v54, -inf }
 0xa0c   : > { %12160 = vmax.xlane.f32.xlu1 %v12159_v27 }
 0xa0d   : > { %v22313_v21 = vpop.f32.mrb[148].mxu1 }
 0xa0e   : > { %v22315_v30 = vpop.f32.mrb[149].mxu1  ;;  %v12168_v31 = vsel %vm2534_vm3, %v22313_v21, -inf }
 0xa0f   : > { %12163 = vmax.xlane.f32.xlu0 %v12162_v14  ;;  %v12165_v37 = vsel %vm2534_vm3, %v22315_v30, -inf  ;;  %v12174_v14 = vsel %vm2534_vm3, %v22277_v42, -inf }
 0xa10   : > { %12166 = vmax.xlane.f32.xlu1 %v12165_v37 }
 0xa13   : > { %12169 = vmax.xlane.f32.xlu0 %v12168_v31 }
 0xa14   : > { %12172 = vmax.xlane.f32.xlu1 %v12171_v17  ;;  %v22325_v27 = vpop.f32.mrb[124].mxu0  ;;  %v12183_v17 = vsel %vm2534_vm3, %v22289_v4, -inf }
 0xa15   : > { %v22327_v22 = vpop.f32.mrb[150].mxu1  ;;  %v22329_v1 = vpop.f32.mrb[125].mxu0  ;;  %v12210_v51 = vsel %vm2534_vm3, %v22325_v27, -inf }
 0xa16   : > { %v22331_v2 = vpop.f32.mrb[151].mxu1  ;;  %v12180_v31 = vsel %vm2534_vm3, %v22327_v22, -inf }
 0xa17   : > { %12175 = vmax.xlane.f32.xlu0 %v12174_v14  ;;  %v12177_v37 = vsel %vm2534_vm3, %v22331_v2, -inf }
 0xa18   : > { %12178 = vmax.xlane.f32.xlu1 %v12177_v37 }
 0xa1b   : > { %12181 = vmax.xlane.f32.xlu0 %v12180_v31 }
 0xa1c   : > { %12184 = vmax.xlane.f32.xlu1 %v12183_v17  ;;  %v12195_v17 = vsel %vm2534_vm3, %v22307_v20, -inf }
 0xa1d   : > { %v22341_v62 = vpop.f32.mrb[152].mxu1 }
 0xa1e   : > { %v22343_v53 = vpop.f32.mrb[153].mxu1  ;;  %v12192_v31 = vsel %vm2534_vm3, %v22341_v62, -inf }
 0xa1f   : > { %12187 = vmax.xlane.f32.xlu0 %v12186_v47  ;;  %v22347_v14 = vpop.f32.mrb[126].mxu0  ;;  %v12189_v37 = vsel %vm2534_vm3, %v22343_v53, -inf  ;;  %v12198_v47 = vsel %vm2534_vm3, %v22305_v25, -inf }
 0xa20   : > { %12190 = vmax.xlane.f32.xlu1 %v12189_v37  ;;  %v22351_v23 = vpop.f32.mrb[127].mxu0  ;;  %v12222_v19 = vsel %vm2534_vm3, %v22347_v14, -inf }
 0xa23   : > { %12193 = vmax.xlane.f32.xlu0 %v12192_v31  ;;  %v12207_v31 = vsel %vm2534_vm3, %v22329_v1, -inf }
 0xa24   : > { %12196 = vmax.xlane.f32.xlu1 %v12195_v17 }
 0xa25   : > { %v22357_v24 = vpop.f32.mrb[154].mxu1 }
 0xa26   : > { %v22359_v12 = vpop.f32.mrb[155].mxu1  ;;  %v12204_v26 = vsel %vm2534_vm3, %v22357_v24, -inf }
 0xa27   : > { %12199 = vmax.xlane.f32.xlu0 %v12198_v47  ;;  %v12201_v37 = vsel %vm2534_vm3, %v22359_v12, -inf }
 0xa28   : > { %12202 = vmax.xlane.f32.xlu1 %v12201_v37 }
 0xa2b   : > { %12205 = vmax.xlane.f32.xlu0 %v12204_v26  ;;  %v12219_v26 = vsel %vm2534_vm3, %v22351_v23, -inf }
 0xa2c   : > { %12208 = vmax.xlane.f32.xlu1 %v12207_v31 }
 0xa2d   : > { %v22369_v17 = vpop.f32.mrb[156].mxu1 }
 0xa2e   : > { %v22371_v57 = vpop.f32.mrb[157].mxu1  ;;  %v12216_v37 = vsel %vm2534_vm3, %v22369_v17, -inf }
 0xa2f   : > { %12211 = vmax.xlane.f32.xlu0 %v12210_v51  ;;  %v12213_v47 = vsel %vm2534_vm3, %v22371_v57, -inf }
 0xa30   : > { %12214 = vmax.xlane.f32.xlu1 %v12213_v47 }
 0xa33   : > { %12217 = vmax.xlane.f32.xlu0 %v12216_v37  ;;  %v22395_v37 = vpop.permute.xlu0 %18327 }
 0xa34   : > { %12220 = vmax.xlane.f32.xlu1 %v12219_v26 }
 0xa35   : > { %v22381_v31 = vpop.f32.mrb[158].mxu1 }
 0xa36   : > { %v22383_v60 = vpop.f32.mrb[159].mxu1  ;;  %v12228_v47 = vsel %vm2534_vm3, %v22381_v31, -inf }
 0xa37   : > { %12223 = vmax.xlane.f32.xlu0 %v12222_v19  ;;  %v12225_v51 = vsel %vm2534_vm3, %v22383_v60, -inf  ;;  %v22399_v19 = vpop.permute.xlu1 %18332  ;;  %v22403_v26 = vpop.permute.xlu0 %18337 }
 0xa38   : > { %12226 = vmax.xlane.f32.xlu1 %v12225_v51  ;;  %23837 = vst [vmem:[#allocation117_spill] sm:$0xff] %v22399_v19  ;;  %23838 = vst [vmem:[#allocation38_spill] sm:$0xff] %v22403_v26 }
 0xa3b   : > { %12229 = vmax.xlane.f32.xlu0 %v12228_v47  ;;  %v22407_v51 = vpop.permute.xlu1 %18342 }
 0xa3c   : > { %23839 = vst [vmem:[#allocation110_spill] sm:$0xff] %v22407_v51 }
 0xa49   : > { %18352 = vrot.lane.b32.xlu1 %v23536_v11, %s19135_s17  ;;  %v22409_v11 = vpop.permute.xlu0 %18347 }
 0xa4a   : > { %23840 = vst [vmem:[#allocation40_spill] sm:$0xff] %v22409_v11 }
 0xa51   : > { %18357 = vrot.lane.b32.xlu0 %v19882_v52, %s19135_s17 }
 0xa55   : > { %18362 = vrot.lane.b32.xlu0 %v23542_v59, %s19135_s17 }
 0xa59   : > { %18367 = vrot.lane.b32.xlu0 %v19910_v16, %s19135_s17 }
 0xa5d   : > { %18372 = vrot.lane.b32.xlu0 %v23551_v18, %s19135_s17 }
 0xa64   : > { %v12140_v52 = vpop.xlane.xlu1 %12139 }
 0xa65   : > { %v12137_v47 = vpop.xlane.xlu0 %12136  ;;  %v12232_v59 = vsub.f32 %v22259_v6, %v12140_v52 }
 0xa66   : > { %v12231_v33 = vsub.f32 %v22261_v8, %v12137_v47 }
 0xa67   : > { %v12265_v19 = vmul.f32 1.442695, %v12232_v59 }
 0xa68   : > { %v12263_v61 = vmul.f32 1.442695, %v12231_v33 }
 0xa6a   : > { %18770 = vpow2.f32 %v12263_v61 }
 0xa6b   : > { %18772 = vpow2.f32 %v12265_v19 }
 0xa6d   : > { %v12149_v51 = vpop.xlane.xlu1 %12148 }
 0xa6e   : > { %v12235_v33 = vsub.f32 %v22269_v40, %v12149_v51 }
 0xa70   : > { %v12271_v47 = vmul.f32 1.442695, %v12235_v33 }
 0xa74   : > { %v22413_v16 = vpop.eup %18770 }
 0xa75   : > { %v12327_v26 = vsel %vm2534_vm3, %v22413_v16, 0.0  ;;  %v22417_v18 = vpop.eup %18772 }
 0xa76   : > { %12328 = vadd.xlane.f32.xlu1 %v12327_v26  ;;  %v12330_v11 = vsel %vm2534_vm3, %v22417_v18, 0.0 }
 0xa7c   : > { %12331 = vadd.xlane.f32.xlu0 %v12330_v11 }
 0xa8c   : > { %v12146_v8 = vpop.xlane.xlu0 %12145 }
 0xa8d   : > { %v12234_v6 = vsub.f32 %v22287_v3, %v12146_v8 }
 0xa8f   : > { %v12269_v61 = vmul.f32 1.442695, %v12234_v6 }
 0xa90   : > { %v12143_v19 = vpop.xlane.xlu0 %12142 }
 0xa91   : > { %18774 = vpow2.f32 %v12269_v61  ;;  %v12233_v52 = vsub.f32 %v22291_v10, %v12143_v19 }
 0xa93   : > { %v12267_v59 = vmul.f32 1.442695, %v12233_v52 }
 0xa94   : > { %v12152_v26 = vpop.xlane.xlu0 %12151 }
 0xa95   : > { %18776 = vpow2.f32 %v12267_v59  ;;  %v12236_v49 = vsub.f32 %v22267_v38, %v12152_v26  ;;  %v12155_v32 = vpop.xlane.xlu1 %12154 }
 0xa96   : > { %v12237_v11 = vsub.f32 %v22299_v63, %v12155_v32  ;;  %18778 = vpow2.f32 %v12271_v47 }
 0xa97   : > { %v12273_v39 = vmul.f32 1.442695, %v12236_v49 }
 0xa98   : > { %v12275_v7 = vmul.f32 1.442695, %v12237_v11  ;;  %v12158_v3 = vpop.xlane.xlu0 %12157 }
 0xa99   : > { %18780 = vpow2.f32 %v12273_v39  ;;  %v12238_v40 = vsub.f32 %v22297_v34, %v12158_v3  ;;  %v12161_v51 = vpop.xlane.xlu1 %12160 }
 0xa9a   : > { %v12239_v8 = vsub.f32 %v22275_v56, %v12161_v51  ;;  %18782 = vpow2.f32 %v12275_v7 }
 0xa9b   : > { %v22428_v10 = vpop.eup %18774  ;;  %v12277_v6 = vmul.f32 1.442695, %v12238_v40 }
 0xa9c   : > { %v12279_v33 = vmul.f32 1.442695, %v12239_v8  ;;  %v12164_v61 = vpop.xlane.xlu0 %12163  ;;  %v12336_v38 = vsel %vm2534_vm3, %v22428_v10, 0.0 }
 0xa9d   : > { %18784 = vpow2.f32 %v12277_v6  ;;  %v12240_v49 = vsub.f32 %v22273_v9, %v12164_v61  ;;  %v12167_v32 = vpop.xlane.xlu1 %12166  ;;  %12337 = vadd.xlane.f32.xlu0 %v12336_v38 }
 0xa9e   : > { %v12241_v39 = vsub.f32 %v22315_v30, %v12167_v32  ;;  %18786 = vpow2.f32 %v12279_v33 }
 0xa9f   : > { %v22434_v34 = vpop.eup %18776  ;;  %v12281_v56 = vmul.f32 1.442695, %v12240_v49 }
 0xaa0   : > { %v12283_v63 = vmul.f32 1.442695, %v12241_v39  ;;  %v12170_v19 = vpop.xlane.xlu0 %12169  ;;  %v12333_v7 = vsel %vm2534_vm3, %v22434_v34, 0.0  ;;  %v22438_v52 = vpop.eup %18778 }
 0xaa1   : > { %18788 = vpow2.f32 %v12281_v56  ;;  %v12242_v47 = vsub.f32 %v22313_v21, %v12170_v19  ;;  %v12173_v59 = vpop.xlane.xlu1 %12172  ;;  %12334 = vadd.xlane.f32.xlu1 %v12333_v7  ;;  %v12339_v40 = vsel %vm2534_vm3, %v22438_v52, 0.0 }
 0xaa2   : > { %18790 = vpow2.f32 %v12283_v63  ;;  %v12243_v26 = vsub.f32 %v22279_v54, %v12173_v59 }
 0xaa3   : > { %v22441_v9 = vpop.eup %18780  ;;  %v12285_v30 = vmul.f32 1.442695, %v12242_v47 }
 0xaa4   : > { %v12176_v11 = vpop.xlane.xlu0 %12175  ;;  %v12342_v3 = vsel %vm2534_vm3, %v22441_v9, 0.0  ;;  %v22448_v51 = vpop.eup %18782  ;;  %v12287_v54 = vmul.f32 1.442695, %v12243_v26 }
 0xaa5   : > { %18792 = vpow2.f32 %v12285_v30  ;;  %v12244_v21 = vsub.f32 %v22277_v42, %v12176_v11  ;;  %v12179_v8 = vpop.xlane.xlu1 %12178  ;;  %12343 = vadd.xlane.f32.xlu0 %v12342_v3  ;;  %12340 = vadd.xlane.f32.xlu1 %v12339_v40  ;;  %v12345_v39 = vsel %vm2534_vm3, %v22448_v51, 0.0 }
 0xaa6   : > { %v12245_v6 = vsub.f32 %v22331_v2, %v12179_v8 }
 0xaa7   : > { %v22452_v33 = vpop.eup %18784  ;;  %v12289_v61 = vmul.f32 1.442695, %v12244_v21 }
 0xaa8   : > { %v12291_v38 = vmul.f32 1.442695, %v12245_v6  ;;  %v12182_v49 = vpop.xlane.xlu0 %12181  ;;  %v12348_v32 = vsel %vm2534_vm3, %v22452_v33, 0.0  ;;  %v22458_v56 = vpop.eup %18786 }
 0xaa9   : > { %18794 = vpow2.f32 %v12289_v61  ;;  %v12246_v42 = vsub.f32 %v22327_v22, %v12182_v49  ;;  %v12185_v63 = vpop.xlane.xlu1 %12184  ;;  %12349 = vadd.xlane.f32.xlu0 %v12348_v32  ;;  %12346 = vadd.xlane.f32.xlu1 %v12345_v39  ;;  %v12351_v59 = vsel %vm2534_vm3, %v22458_v56, 0.0 }
 0xaaa   : > { %18796 = vpow2.f32 %v12291_v38  ;;  %v12247_v3 = vsub.f32 %v22289_v4, %v12185_v63 }
 0xaab   : > { %v22461_v2 = vpop.eup %18788  ;;  %18798 = vpow2.f32 %v12287_v54  ;;  %v12293_v19 = vmul.f32 1.442695, %v12246_v42 }
 0xaac   : > { %v12188_v7 = vpop.xlane.xlu0 %12187  ;;  %v12354_v47 = vsel %vm2534_vm3, %v22461_v2, 0.0  ;;  %v22467_v30 = vpop.eup %18790  ;;  %v12295_v38 = vmul.f32 1.442695, %v12247_v3 }
 0xaad   : > { %v12248_v26 = vsub.f32 %v22285_v46, %v12188_v7  ;;  %v12191_v22 = vpop.xlane.xlu1 %12190  ;;  %12355 = vadd.xlane.f32.xlu0 %v12354_v47  ;;  %12352 = vadd.xlane.f32.xlu1 %v12351_v59  ;;  %18800 = vpow2.f32 %v12293_v19  ;;  %v12357_v6 = vsel %vm2534_vm3, %v22467_v30, 0.0 }
 0xaae   : > { %v12249_v49 = vsub.f32 %v22343_v53, %v12191_v22 }
 0xaaf   : > { %v22470_v11 = vpop.eup %18792  ;;  %v12297_v40 = vmul.f32 1.442695, %v12248_v26 }
 0xab0   : > { %v12194_v21 = vpop.xlane.xlu0 %12193  ;;  %v12360_v8 = vsel %vm2534_vm3, %v22470_v11, 0.0  ;;  %v12299_v53 = vmul.f32 1.442695, %v12249_v49 }
 0xab1   : > { %v12250_v54 = vsub.f32 %v22341_v62, %v12194_v21  ;;  %v12197_v61 = vpop.xlane.xlu1 %12196  ;;  %12361 = vadd.xlane.f32.xlu0 %v12360_v8  ;;  %12358 = vadd.xlane.f32.xlu1 %v12357_v6  ;;  %18802 = vpow2.f32 %v12297_v40 }
 0xab2   : > { %v12251_v47 = vsub.f32 %v22307_v20, %v12197_v61 }
 0xab3   : > { %v22478_v46 = vpop.eup %18794  ;;  %v12301_v4 = vmul.f32 1.442695, %v12250_v54 }
 0xab4   : > { %v22481_v32 = vpop.eup %18796  ;;  %v12200_v39 = vpop.xlane.xlu0 %12199  ;;  %v12366_v42 = vsel %vm2534_vm3, %v22478_v46, 0.0  ;;  %v12303_v21 = vmul.f32 1.442695, %v12251_v47 }
 0xab5   : > { %v22485_v63 = vpop.eup %18798  ;;  %18804 = vpow2.f32 %v12301_v4  ;;  %v12252_v62 = vsub.f32 %v22305_v25, %v12200_v39  ;;  %v12203_v19 = vpop.xlane.xlu1 %12202  ;;  %12367 = vadd.xlane.f32.xlu0 %v12366_v42  ;;  %v12369_v7 = vsel %vm2534_vm3, %v22481_v32, 0.0 }
 0xab6   : > { %12370 = vadd.xlane.f32.xlu1 %v12369_v7  ;;  %18806 = vpow2.f32 %v12295_v38  ;;  %v12363_v22 = vsel %vm2534_vm3, %v22485_v63, 0.0  ;;  %v12253_v8 = vsub.f32 %v22359_v12, %v12203_v19 }
 0xab7   : > { %v12305_v59 = vmul.f32 1.442695, %v12252_v62  ;;  %v22493_v3 = vpop.eup %18800 }
 0xab8   : > { %v12206_v26 = vpop.xlane.xlu0 %12205  ;;  %v12372_v20 = vsel %vm2534_vm3, %v22493_v3, 0.0 }
 0xab9   : > { %18808 = vpow2.f32 %v12305_v59  ;;  %v12254_v25 = vsub.f32 %v22357_v24, %v12206_v26  ;;  %v12209_v40 = vpop.xlane.xlu1 %12208  ;;  %12364 = vadd.xlane.f32.xlu0 %v12363_v22  ;;  %v12307_v24 = vmul.f32 1.442695, %v12253_v8 }
 0xaba   : > { %18810 = vpow2.f32 %v12299_v53  ;;  %v12255_v39 = vsub.f32 %v22329_v1, %v12209_v40 }
 0xabb   : > { %v12309_v6 = vmul.f32 1.442695, %v12254_v25  ;;  %v22499_v61 = vpop.eup %18802 }
 0xabc   : > { %v12212_v54 = vpop.xlane.xlu0 %12211  ;;  %v12378_v62 = vsel %vm2534_vm3, %v22499_v61, 0.0  ;;  %v12311_v1 = vmul.f32 1.442695, %v12255_v39 }
 0xabd   : > { %18812 = vpow2.f32 %v12309_v6  ;;  %v12256_v38 = vsub.f32 %v22325_v27, %v12212_v54  ;;  %v12215_v49 = vpop.xlane.xlu1 %12214  ;;  %12373 = vadd.xlane.f32.xlu0 %v12372_v20 }
 0xabe   : > { %18814 = vpow2.f32 %v12303_v21  ;;  %v12257_v59 = vsub.f32 %v22371_v57, %v12215_v49 }
 0xabf   : > { %v22502_v4 = vpop.eup %18804  ;;  %v12313_v42 = vmul.f32 1.442695, %v12256_v38 }
 0xac0   : > { %v12218_v12 = vpop.xlane.xlu0 %12217  ;;  %v12384_v19 = vsel %vm2534_vm3, %v22502_v4, 0.0  ;;  %v22509_v7 = vpop.eup %18806  ;;  %v12315_v6 = vmul.f32 1.442695, %v12257_v59 }
 0xac1   : > { %18816 = vpow2.f32 %v12313_v42  ;;  %v12258_v27 = vsub.f32 %v22369_v17, %v12218_v12  ;;  %12379 = vadd.xlane.f32.xlu0 %v12378_v62  ;;  %12385 = vadd.xlane.f32.xlu1 %v12384_v19  ;;  %v12221_v53 = vpop.xlane.xlu1 %12220  ;;  %v12375_v25 = vsel %vm2534_vm3, %v22509_v7, 0.0 }
 0xac2   : > { %18818 = vpow2.f32 %v12307_v24  ;;  %v12259_v57 = vsub.f32 %v22351_v23, %v12221_v53 }
 0xac3   : > { %v22512_v47 = vpop.eup %18808  ;;  %v12317_v26 = vmul.f32 1.442695, %v12258_v27 }
 0xac4   : > { %v12224_v22 = vpop.xlane.xlu0 %12223  ;;  %v12390_v40 = vsel %vm2534_vm3, %v22512_v47, 0.0  ;;  %v22519_v21 = vpop.eup %18810  ;;  %v12319_v23 = vmul.f32 1.442695, %v12259_v57 }
 0xac5   : > { %18820 = vpow2.f32 %v12317_v26  ;;  %v12260_v17 = vsub.f32 %v22347_v14, %v12224_v22  ;;  %12376 = vadd.xlane.f32.xlu0 %v12375_v25  ;;  %12391 = vadd.xlane.f32.xlu1 %v12390_v40  ;;  %v12227_v20 = vpop.xlane.xlu1 %12226  ;;  %v12381_v49 = vsel %vm2534_vm3, %v22519_v21, 0.0 }
 0xac6   : > { %18822 = vpow2.f32 %v12311_v1  ;;  %v12261_v12 = vsub.f32 %v22383_v60, %v12227_v20 }
 0xac7   : > { %v22522_v8 = vpop.eup %18812  ;;  %v12321_v54 = vmul.f32 1.442695, %v12260_v17 }
 0xac8   : > { %v12230_v38 = vpop.xlane.xlu0 %12229  ;;  %v12396_v24 = vsel %vm2534_vm3, %v22522_v8, 0.0  ;;  %v22529_v39 = vpop.eup %18814  ;;  %v12323_v1 = vmul.f32 1.442695, %v12261_v12  ;;  %v23842_v12 = vld [vmem:[#allocation96_spill] sm:$0xff] }
 0xac9   : > { %18824 = vpow2.f32 %v12321_v54  ;;  %v12262_v14 = vsub.f32 %v22381_v31, %v12230_v38  ;;  %12382 = vadd.xlane.f32.xlu0 %v12381_v49  ;;  %12397 = vadd.xlane.f32.xlu1 %v12396_v24  ;;  %v12387_v19 = vsel %vm2534_vm3, %v22529_v39, 0.0 }
 0xaca   : > { %18826 = vpow2.f32 %v12315_v6 }
 0xacb   : > { %v22532_v42 = vpop.eup %18816  ;;  %v12325_v62 = vmul.f32 1.442695, %v12262_v14  ;;  %v23841_v14 = vld [vmem:[#allocation95_spill] sm:$0xff] }
 0xacc   : > { %v12402_v27 = vsel %vm2534_vm3, %v22532_v42, 0.0  ;;  %v22539_v53 = vpop.eup %18818 }
 0xacd   : > { %18828 = vpow2.f32 %v12325_v62  ;;  %12388 = vadd.xlane.f32.xlu0 %v12387_v19  ;;  %12403 = vadd.xlane.f32.xlu1 %v12402_v27  ;;  %v12393_v59 = vsel %vm2534_vm3, %v22539_v53, 0.0  ;;  %v22589_v19 = vpop.permute.xlu1 %18352 }
 0xace   : > { %18830 = vpow2.f32 %v12319_v23  ;;  %v22577_v23 = vpop.permute.xlu0 %18357 }
 0xacf   : > { %v22541_v31 = vpop.eup %18820  ;;  %18832 = vpow2.f32 %v12323_v1  ;;  %v23845_v1 = vld [vmem:[#allocation94_spill] sm:$0xff] }
 0xad0   : > { %v12408_v60 = vsel %vm2534_vm3, %v22541_v31, 0.0  ;;  %v22547_v26 = vpop.eup %18822 }
 0xad1   : > { %12394 = vadd.xlane.f32.xlu0 %v12393_v59  ;;  %12409 = vadd.xlane.f32.xlu1 %v12408_v60  ;;  %v12399_v25 = vsel %vm2534_vm3, %v22547_v26, 0.0  ;;  %v23846_v59 = vld [vmem:[#allocation97_spill] sm:$0xff] }
 0xad2   : > { %v22583_v62 = vpop.permute.xlu0 %18362 }
 0xad3   : > { %v22549_v22 = vpop.eup %18824 }
 0xad4   : > { %v12414_v40 = vsel %vm2534_vm3, %v22549_v22, 0.0  ;;  %v22555_v17 = vpop.eup %18826 }
 0xad5   : > { %12400 = vadd.xlane.f32.xlu0 %v12399_v25  ;;  %12415 = vadd.xlane.f32.xlu1 %v12414_v40  ;;  %v12405_v57 = vsel %vm2534_vm3, %v22555_v17, 0.0 }
 0xad6   : > { %v22593_v27 = vpop.permute.xlu0 %18367 }
 0xad7   : > { %v22557_v6 = vpop.eup %18828 }
 0xad8   : > { %v12420_v54 = vsel %vm2534_vm3, %v22557_v6, 0.0  ;;  %v22563_v20 = vpop.eup %18830 }
 0xad9   : > { %12406 = vadd.xlane.f32.xlu0 %v12405_v57  ;;  %12421 = vadd.xlane.f32.xlu1 %v12420_v54  ;;  %v12411_v38 = vsel %vm2534_vm3, %v22563_v20, 0.0  ;;  %v22567_v49 = vpop.eup %18832  ;;  %v23849_v57 = vld [vmem:[#allocation53_spill] sm:$0xff] }
 0xada   : > { %v12417_v24 = vsel %vm2534_vm3, %v22567_v49, 0.0 }
 0xadd   : > { %12412 = vadd.xlane.f32.xlu0 %v12411_v38 }
 0xae1   : > { %12418 = vadd.xlane.f32.xlu0 %v12417_v24  ;;  %v23856_v24 = vld [vmem:[#allocation98_spill] sm:$0xff] }
 0xaea   : > { %18382 = vrot.lane.b32.xlu1 %v19952_v13, %s19135_s17  ;;  %v23843_v13 = vld [vmem:[#allocation49_spill] sm:$0xff] }
 0xaee   : > { %13915 = vrot.lane.b32.xlu1 %v23841_v14, %s19136_s18  ;;  %v23858_v14 = vld [vmem:[#allocation55_spill] sm:$0xff] }
 0xaf2   : > { %14043 = vrot.lane.b32.xlu1 %v22205_v41, %s19137_s0  ;;  %v23844_v41 = vld [vmem:[#allocation106_spill] sm:$0xff] }
 0xaf6   : > { %13919 = vrot.lane.b32.xlu1 %v23842_v12, %s19136_s18 }
 0xaf7   : > { %18377 = vrot.lane.b32.xlu0 %v23556_v36, %s19135_s17 }
 0xafa   : > { %14047 = vrot.lane.b32.xlu1 %v22209_v28, %s19137_s0  ;;  %v22601_v28 = vpop.permute.xlu0 %18372 }
 0xafb   : > { %13911 = vrot.lane.b32.xlu0 %v23843_v13, %s19136_s18  ;;  %v23859_v13 = vld [vmem:[#allocation28_spill] sm:$0xff] }
 0xafe   : > { %13923 = vrot.lane.b32.xlu1 %v23844_v41, %s19136_s18  ;;  %v23860_v41 = vld [vmem:[#allocation99_spill] sm:$0xff] }
 0xaff   : > { %13913 = vrot.lane.b32.xlu0 %v23845_v1, %s19136_s18 }
 0xb02   : > { %14051 = vrot.lane.b32.xlu1 %v22213_v0, %s19137_s0  ;;  %v23847_v0 = vld [vmem:[#allocation60_spill] sm:$0xff] }
 0xb03   : > { %v12329_v36 = vpop.xlane.xlu1 %12328  ;;  %14039 = vrot.lane.b32.xlu0 %v22201_v45, %s19137_s0  ;;  %v23848_v45 = vld [vmem:[#allocation21_spill] sm:$0xff] }
 0xb04   : > { %18834 = vrcp.f32 %v12329_v36  ;;  %v23861_v36 = vld [vmem:[#allocation103_spill] sm:$0xff] }
 0xb06   : > { %13927 = vrot.lane.b32.xlu1 %v23846_v59, %s19136_s18 }
 0xb07   : > { %14041 = vrot.lane.b32.xlu0 %v22199_v43, %s19137_s0  ;;  %v18330_v43 = vunpack.i.h.bf16 %v22395_v37 }
 0xb09   : > { %v12332_v60 = vpop.xlane.xlu0 %12331 }
 0xb0a   : > { %18836 = vrcp.f32 %v12332_v60  ;;  %14055 = vrot.lane.b32.xlu1 %v22217_v58, %s19137_s0  ;;  %v18329_v58 = vunpack.i.l.bf16 %v22395_v37  ;;  %v23852_v37 = vld [vmem:[#allocation31_spill] sm:$0xff]  ;;  %v23862_v60 = vld [vmem:[#allocation41_spill] sm:$0xff] }
 0xb0b   : > { %13917 = vrot.lane.b32.xlu0 %v23847_v0, %s19136_s18 }
 0xb0e   : > { %v18835_v25 = vpop.eup %18834  ;;  %13931 = vrot.lane.b32.xlu1 %v23848_v45, %s19136_s18  ;;  %v23863_v45 = vld [vmem:[#allocation117_spill] sm:$0xff] }
 0xb0f   : > { %v12455_v40 = vmul.f32 %v18835_v25, %v22413_v16  ;;  %14045 = vrot.lane.b32.xlu0 %v22203_v44, %s19137_s0  ;;  %v23850_v16 = vld [vmem:[#allocation27_spill] sm:$0xff]  ;;  %v22629_v44 = vpack.c.bf16 %v18330_v43, %v18329_v58  ;;  %v18334_v43 = vunpack.i.l.bf16 %v23863_v45 }
 0xb11   : > { %16899 = vmatprep.mubr.msk.f32.mxu0 %vm2534_vm3, %v12455_v40  ;;  %v18335_v40 = vunpack.i.h.bf16 %v23863_v45 }
 0xb12   : > { %14059 = vrot.lane.b32.xlu1 %v22221_v55, %s19137_s0  ;;  %v23851_v55 = vld [vmem:[#allocation61_spill] sm:$0xff] }
 0xb13   : > { %13921 = vrot.lane.b32.xlu0 %v23849_v57, %s19136_s18  ;;  %v23864_v57 = vld [vmem:[#allocation34_spill] sm:$0xff] }
 0xb14   : > { %v18837_v54 = vpop.eup %18836 }
 0xb15   : > { %v12456_v38 = vmul.f32 %v18837_v54, %v22417_v18 }
 0xb16   : > { %13935 = vrot.lane.b32.xlu1 %v23850_v16, %s19136_s18  ;;  %v23865_v16 = vld [vmem:[#allocation100_spill] sm:$0xff] }
 0xb17   : > { %14049 = vrot.lane.b32.xlu0 %v22207_v48, %s19137_s0  ;;  %16900 = vmatmul.mubr.msk.f32.vlgmr.msra.gmra.mrb[128].mxu0 %vm2534_vm3, %v12456_v38  ;;  %v23853_v48 = vld [vmem:[#allocation59_spill] sm:$0xff] }
 0xb18   : > { %17666 = vmatpush3.bf16.msra.mxu0 %v22189_v5  ;;  %v23854_v5 = vld [vmem:[#allocation102_spill] sm:$0xff] }
 0xb19   : > { %17672 = vmatprep.subr.bf16.mxu0 %v22629_v44 }
 0xb1a   : > { %14063 = vrot.lane.b32.xlu1 %v22225_v29, %s19137_s0  ;;  %v23855_v29 = vld [vmem:[#allocation26_spill] sm:$0xff] }
 0xb1b   : > { %13925 = vrot.lane.b32.xlu0 %v23851_v55, %s19136_s18 }
 0xb1e   : > { %13939 = vrot.lane.b32.xlu1 %v23852_v37, %s19136_s18 }
 0xb1f   : > { %14053 = vrot.lane.b32.xlu0 %v22211_v35, %s19137_s0  ;;  %v23857_v35 = vld [vmem:[#allocation35_spill] sm:$0xff] }
 0xb22   : > { %14067 = vrot.lane.b32.xlu1 %v22229_v50, %s19137_s0 }
 0xb23   : > { %13929 = vrot.lane.b32.xlu0 %v23853_v48, %s19136_s18  ;;  %v17675_v48 = vpack.c.bf16 %v18335_v40, %v18334_v43 }
 0xb26   : > { %13943 = vrot.lane.b32.xlu1 %v23854_v5, %s19136_s18 }
 0xb27   : > { %14057 = vrot.lane.b32.xlu0 %v22215_v15, %s19137_s0 }
 0xb2a   : > { %14071 = vrot.lane.b32.xlu1 %v23855_v29, %s19137_s0  ;;  %v12338_v18 = vpop.xlane.xlu0 %12337  ;;  %v23866_v29 = vld [vmem:[#allocation38_spill] sm:$0xff] }
 0xb2b   : > { %13933 = vrot.lane.b32.xlu0 %v23856_v24, %s19136_s18  ;;  %18838 = vrcp.f32 %v12338_v18  ;;  %v18340_v18 = vunpack.i.h.bf16 %v23866_v29  ;;  %v18339_v24 = vunpack.i.l.bf16 %v23866_v29 }
 0xb2e   : > { %13947 = vrot.lane.b32.xlu1 %v23857_v35, %s19136_s18  ;;  %v12335_v50 = vpop.xlane.xlu1 %12334  ;;  %v23867_v35 = vld [vmem:[#allocation54_spill] sm:$0xff] }
 0xb2f   : > { %18840 = vrcp.f32 %v12335_v50  ;;  %14061 = vrot.lane.b32.xlu0 %v23858_v14, %s19137_s0  ;;  %v23868_v50 = vld [vmem:[#allocation30_spill] sm:$0xff] }
 0xb32   : > { %v12344_v12 = vpop.xlane.xlu0 %12343  ;;  %14075 = vrot.lane.b32.xlu1 %v23859_v13, %s19137_s0  ;;  %v12341_v15 = vpop.xlane.xlu1 %12340 }
 0xb33   : > { %18842 = vrcp.f32 %v12344_v12  ;;  %13937 = vrot.lane.b32.xlu0 %v23860_v41, %s19136_s18  ;;  %v23869_v12 = vld [vmem:[#allocation46_spill] sm:$0xff] }
 0xb34   : > { %18844 = vrcp.f32 %v12341_v15 }
 0xb35   : > { %v18839_v0 = vpop.eup %18838 }
 0xb36   : > { %v12350_v1 = vpop.xlane.xlu0 %12349  ;;  %13951 = vrot.lane.b32.xlu1 %v23861_v36, %s19136_s18  ;;  %v12347_v59 = vpop.xlane.xlu1 %12346  ;;  %v12458_v55 = vmul.f32 %v18839_v0, %v22428_v10  ;;  %v17679_v0 = vpack.c.bf16 %v18340_v18, %v18339_v24  ;;  %v18355_v18 = vunpack.i.h.bf16 %v22589_v19  ;;  %v18354_v24 = vunpack.i.l.bf16 %v22589_v19 }
 0xb37   : > { %18846 = vrcp.f32 %v12350_v1  ;;  %14065 = vrot.lane.b32.xlu0 %v23862_v60, %s19137_s0  ;;  %v23870_v1 = vld [vmem:[#allocation110_spill] sm:$0xff] }
 0xb38   : > { %18848 = vrcp.f32 %v12347_v59  ;;  %v18345_v36 = vunpack.i.h.bf16 %v23870_v1  ;;  %v18344_v59 = vunpack.i.l.bf16 %v23870_v1  ;;  %v18360_v1 = vunpack.i.h.bf16 %v22577_v23 }
 0xb39   : > { %v18841_v25 = vpop.eup %18840 }
 0xb3a   : > { %v12356_v58 = vpop.xlane.xlu0 %12355  ;;  %14079 = vrot.lane.b32.xlu1 %v23864_v57, %s19137_s0  ;;  %v12353_v54 = vpop.xlane.xlu1 %12352  ;;  %v12457_v38 = vmul.f32 %v18841_v25, %v22434_v34 }
 0xb3b   : > { %18850 = vrcp.f32 %v12356_v58  ;;  %13941 = vrot.lane.b32.xlu0 %v23865_v16, %s19136_s18  ;;  %v23873_v58 = vld [vmem:[#allocation40_spill] sm:$0xff]  ;;  %v17683_v16 = vpack.c.bf16 %v18345_v36, %v18344_v59  ;;  %v18359_v36 = vunpack.i.l.bf16 %v22577_v23  ;;  %v18364_v23 = vunpack.i.l.bf16 %v22583_v62 }
 0xb3c   : > { %18852 = vrcp.f32 %v12353_v54  ;;  %16906 = vmatprep.mubr.msk.f32.mxu1 %vm2534_vm3, %v12457_v38  ;;  %v18350_v57 = vunpack.i.h.bf16 %v23873_v58  ;;  %v18349_v38 = vunpack.i.l.bf16 %v23873_v58 }
 0xb3d   : > { %v18843_v37 = vpop.eup %18842  ;;  %16907 = vmatmul.mubr.msk.f32.vlgmr.msra.gmra.mrb[160].mxu1 %vm2534_vm3, %v12458_v55  ;;  %v23875_v55 = vld [vmem:[#allocation20_spill] sm:$0xff] }
 0xb3e   : > { %v18845_v5 = vpop.eup %18844  ;;  %17670 = vmatpush3.bf16.msra.mxu1 %v23867_v35  ;;  %v12362_v34 = vpop.xlane.xlu0 %12361  ;;  %13955 = vrot.lane.b32.xlu1 %v23868_v50, %s19136_s18  ;;  %v12460_v10 = vmul.f32 %v18843_v37, %v22441_v9  ;;  %v23871_v9 = vld [vmem:[#allocation36_spill] sm:$0xff] }
 0xb3f   : > { %v12359_v14 = vpop.xlane.xlu1 %12358  ;;  %18854 = vrcp.f32 %v12362_v34  ;;  %17676 = vmatprep.subr.bf16.mxu1 %v17675_v48  ;;  %14069 = vrot.lane.b32.xlu0 %v23869_v12, %s19137_s0  ;;  %v12459_v13 = vmul.f32 %v18845_v5, %v22438_v52  ;;  %v23872_v52 = vld [vmem:[#allocation101_spill] sm:$0xff] }
 0xb40   : > { %18856 = vrcp.f32 %v12359_v14 }
 0xb41   : > { %v18847_v15 = vpop.eup %18846  ;;  %16913 = vmatprep.mubr.msk.f32.mxu0 %vm2534_vm3, %v12459_v13  ;;  %v17691_v13 = vpack.c.bf16 %v18355_v18, %v18354_v24  ;;  %v23887_v24 = vld [vmem:[#allocation44_spill] sm:$0xff] }
 0xb42   : > { %v18849_v41 = vpop.eup %18848  ;;  %16914 = vmatmul.mubr.msk.f32.vlgmr.msra.gmra.mrb[130].mxu0 %vm2534_vm3, %v12460_v10  ;;  %v12368_v60 = vpop.xlane.xlu0 %12367  ;;  %14083 = vrot.lane.b32.xlu1 %v23871_v9, %s19137_s0  ;;  %v12462_v25 = vmul.f32 %v18847_v15, %v22452_v33  ;;  %v23878_v10 = vld [vmem:[#allocation107_spill] sm:$0xff] }
 0xb43   : > { %17674 = vmatpush3.bf16.msra.mxu0 %v22629_v44  ;;  %13945 = vrot.lane.b32.xlu0 %v23872_v52, %s19136_s18  ;;  %v12371_v45 = vpop.xlane.xlu1 %12370  ;;  %v12461_v40 = vmul.f32 %v18849_v41, %v22448_v51  ;;  %v23874_v44 = vld [vmem:[#allocation105_spill] sm:$0xff]  ;;  %v18365_v52 = vunpack.i.h.bf16 %v22583_v62 }
 0xb44   : > { %17680 = vmatprep.subr.bf16.mxu0 %v17679_v0  ;;  %18858 = vrcp.f32 %v12371_v45 }
 0xb45   : > { %v18851_v43 = vpop.eup %18850  ;;  %16920 = vmatprep.mubr.msk.f32.mxu1 %vm2534_vm3, %v12461_v40  ;;  %18860 = vrcp.f32 %v12368_v60  ;;  %v23880_v60 = vld [vmem:[#allocation24_spill] sm:$0xff]  ;;  %v17695_v40 = vpack.c.bf16 %v18360_v1, %v18359_v36  ;;  %v17699_v62 = vpack.c.bf16 %v18365_v52, %v18364_v23 }
 0xb46   : > { %v18853_v54 = vpop.eup %18852  ;;  %16921 = vmatmul.mubr.msk.f32.vlgmr.msra.gmra.mrb[162].mxu1 %vm2534_vm3, %v12462_v25  ;;  %v12365_v33 = vpop.xlane.xlu0 %12364  ;;  %13959 = vrot.lane.b32.xlu1 %v23874_v44, %s19136_s18  ;;  %v12464_v51 = vmul.f32 %v18851_v43, %v22461_v2  ;;  %v23876_v2 = vld [vmem:[#allocation39_spill] sm:$0xff]  ;;  %v23885_v44 = vld [vmem:[#allocation25_spill] sm:$0xff] }
 0xb47   : > { %17678 = vmatpush3.bf16.msra.mxu1 %v17675_v48  ;;  %18862 = vrcp.f32 %v12365_v33  ;;  %14073 = vrot.lane.b32.xlu0 %v23875_v55, %s19137_s0  ;;  %v12463_v37 = vmul.f32 %v18853_v54, %v22458_v56  ;;  %v17687_v48 = vpack.c.bf16 %v18350_v57, %v18349_v38  ;;  %v23877_v56 = vld [vmem:[#allocation108_spill] sm:$0xff]  ;;  %v23884_v38 = vld [vmem:[#allocation29_spill] sm:$0xff]  ;;  %v18369_v55 = vunpack.i.l.bf16 %v22593_v27 }
 0xb48   : > { %17684 = vmatprep.subr.bf16.mxu1 %v17683_v16 }
 0xb49   : > { %v18855_v5 = vpop.eup %18854  ;;  %16927 = vmatprep.mubr.msk.f32.mxu0 %vm2534_vm3, %v12463_v37 }
 0xb4a   : > { %v18857_v29 = vpop.eup %18856  ;;  %16928 = vmatmul.mubr.msk.f32.vlgmr.msra.gmra.mrb[132].mxu0 %vm2534_vm3, %v12464_v51  ;;  %v12374_v35 = vpop.xlane.xlu0 %12373  ;;  %14087 = vrot.lane.b32.xlu1 %v23876_v2, %s19137_s0  ;;  %v12466_v34 = vmul.f32 %v18855_v5, %v22470_v11  ;;  %v23879_v11 = vld [vmem:[#allocation57_spill] sm:$0xff]  ;;  %v18370_v51 = vunpack.i.h.bf16 %v22593_v27  ;;  %v23886_v5 = vld [vmem:[#allocation114_spill] sm:$0xff]  ;;  %v18375_v27 = vunpack.i.h.bf16 %v22601_v28 }
 0xb4b   : > { %17682 = vmatpush3.bf16.msra.mxu0 %v17679_v0  ;;  %18864 = vrcp.f32 %v12374_v35  ;;  %13949 = vrot.lane.b32.xlu0 %v23877_v56, %s19136_s18  ;;  %v12465_v50 = vmul.f32 %v18857_v29, %v22467_v30 }
 0xb4c   : > { %17688 = vmatprep.subr.bf16.mxu0 %v17687_v48  ;;  %v17703_v56 = vpack.c.bf16 %v18370_v51, %v18369_v55 }
 0xb4d   : > { %16934 = vmatprep.mubr.msk.f32.mxu1 %vm2534_vm3, %v12465_v50  ;;  %v23888_v50 = vld [vmem:[#allocation37_spill] sm:$0xff] }
 0xb4e   : > { %v18859_v19 = vpop.eup %18858  ;;  %16935 = vmatmul.mubr.msk.f32.vlgmr.msra.gmra.mrb[164].mxu1 %vm2534_vm3, %v12466_v34  ;;  %v12380_v14 = vpop.xlane.xlu0 %12379  ;;  %13963 = vrot.lane.b32.xlu1 %v23878_v10, %s19136_s18  ;;  %v18374_v34 = vunpack.i.l.bf16 %v22601_v28 }
 0xb4f   : > { %v12386_v12 = vpop.xlane.xlu1 %12385  ;;  %17686 = vmatpush3.bf16.msra.mxu1 %v17683_v16  ;;  %14077 = vrot.lane.b32.xlu0 %v23879_v11, %s19137_s0  ;;  %v12469_v15 = vmul.f32 %v18859_v19, %v22481_v32  ;;  %v18861_v41 = vpop.eup %18860  ;;  %18866 = vrcp.f32 %v12380_v14  ;;  %v23881_v32 = vld [vmem:[#allocation23_spill] sm:$0xff]  ;;  %v23889_v14 = vld [vmem:[#allocation104_spill] sm:$0xff] }
 0xb50   : > { %17692 = vmatprep.subr.bf16.mxu1 %v17691_v13  ;;  %v12468_v25 = vmul.f32 %v18861_v41, %v22478_v46  ;;  %v23883_v46 = vld [vmem:[#allocation58_spill] sm:$0xff] }
 0xb51   : > { %v18863_v30 = vpop.eup %18862  ;;  %16948 = vmatprep.mubr.msk.f32.mxu1 %vm2534_vm3, %v12469_v15  ;;  %v23890_v41 = vld [vmem:[#allocation22_spill] sm:$0xff] }
 0xb52   : > { %v12377_v59 = vpop.xlane.xlu0 %12376  ;;  %14091 = vrot.lane.b32.xlu1 %v23880_v60, %s19137_s0  ;;  %v12467_v0 = vmul.f32 %v18863_v30, %v22485_v63  ;;  %v23882_v63 = vld [vmem:[#allocation109_spill] sm:$0xff] }
 0xb53   : > { %v12392_v9 = vpop.xlane.xlu1 %12391  ;;  %18868 = vrcp.f32 %v12377_v59  ;;  %13953 = vrot.lane.b32.xlu0 %v23881_v32, %s19136_s18 }
 0xb54   : > { %16941 = vmatprep.mubr.msk.f32.mxu0 %vm2534_vm3, %v12467_v0  ;;  %18870 = vrcp.f32 %v12386_v12  ;;  %v23891_v0 = vld [vmem:[#allocation33_spill] sm:$0xff] }
 0xb55   : > { %v18865_v45 = vpop.eup %18864  ;;  %16942 = vmatmul.mubr.msk.f32.vlgmr.msra.gmra.mrb[134].mxu0 %vm2534_vm3, %v12468_v25 }
 0xb56   : > { %17690 = vmatpush3.bf16.msra.mxu0 %v17687_v48  ;;  %v12383_v43 = vpop.xlane.xlu0 %12382  ;;  %13967 = vrot.lane.b32.xlu1 %v23882_v63, %s19136_s18  ;;  %v12470_v57 = vmul.f32 %v18865_v45, %v22493_v3 }
 0xb57   : > { %v12398_v58 = vpop.xlane.xlu1 %12397  ;;  %18872 = vrcp.f32 %v12383_v43  ;;  %17696 = vmatprep.subr.bf16.mxu0 %v17695_v40  ;;  %14081 = vrot.lane.b32.xlu0 %v23883_v46, %s19137_s0 }
 0xb58   : > { %16949 = vmatmul.mubr.msk.f32.vlgmr.msra.gmra.mrb[166].mxu1 %vm2534_vm3, %v12470_v57  ;;  %18874 = vrcp.f32 %v12392_v9 }
 0xb59   : > { %17694 = vmatpush3.bf16.msra.mxu1 %v17691_v13  ;;  %v18867_v3 = vpop.eup %18866  ;;  %v17707_v13 = vpack.c.bf16 %v18375_v27, %v18374_v34  ;;  %v23897_v34 = vld [vmem:[#allocation77_spill] sm:$0xff] }
 0xb5a   : > { %17700 = vmatprep.subr.bf16.mxu1 %v17699_v62  ;;  %v12389_v54 = vpop.xlane.xlu0 %12388  ;;  %14095 = vrot.lane.b32.xlu1 %v23884_v38, %s19137_s0  ;;  %v12472_v35 = vmul.f32 %v18867_v3, %v22499_v61 }
 0xb5b   : > { %v12404_v33 = vpop.xlane.xlu1 %12403  ;;  %18876 = vrcp.f32 %v12389_v54  ;;  %13957 = vrot.lane.b32.xlu0 %v23885_v44, %s19136_s18  ;;  %v23894_v44 = vld [vmem:[#allocation111_spill] sm:$0xff] }
 0xb5c   : > { %18878 = vrcp.f32 %v12398_v58 }
 0xb5d   : > { %v18869_v16 = vpop.eup %18868 }
 0xb5e   : > { %v12395_v37 = vpop.xlane.xlu0 %12394  ;;  %13971 = vrot.lane.b32.xlu1 %v23886_v5, %s19136_s18  ;;  %v12471_v18 = vmul.f32 %v18869_v16, %v22509_v7  ;;  %v18871_v2 = vpop.eup %18870  ;;  %v23895_v5 = vld [vmem:[#allocation74_spill] sm:$0xff] }
 0xb5f   : > { %v12410_v29 = vpop.xlane.xlu1 %12409  ;;  %18880 = vrcp.f32 %v12395_v37  ;;  %14085 = vrot.lane.b32.xlu0 %v23887_v24, %s19137_s0  ;;  %v12474_v10 = vmul.f32 %v18871_v2, %v22502_v4 }
 0xb60   : > { %16955 = vmatprep.mubr.msk.f32.mxu0 %vm2534_vm3, %v12471_v18  ;;  %18882 = vrcp.f32 %v12404_v33  ;;  %v23896_v18 = vld [vmem:[#allocation45_spill] sm:$0xff] }
 0xb61   : > { %v18873_v48 = vpop.eup %18872  ;;  %16956 = vmatmul.mubr.msk.f32.vlgmr.msra.gmra.mrb[136].mxu0 %vm2534_vm3, %v12472_v35 }
 0xb62   : > { %17698 = vmatpush3.bf16.msra.mxu0 %v17695_v40  ;;  %v12401_v7 = vpop.xlane.xlu0 %12400  ;;  %14099 = vrot.lane.b32.xlu1 %v23888_v50, %s19137_s0  ;;  %v12473_v61 = vmul.f32 %v18873_v48, %v22519_v21  ;;  %v18875_v28 = vpop.eup %18874  ;;  %v23892_v40 = vld [vmem:[#allocation80_spill] sm:$0xff] }
 0xb63   : > { %v12416_v19 = vpop.xlane.xlu1 %12415  ;;  %18884 = vrcp.f32 %v12401_v7  ;;  %17704 = vmatprep.subr.bf16.mxu0 %v17703_v56  ;;  %13961 = vrot.lane.b32.xlu0 %v23889_v14, %s19136_s18  ;;  %v12476_v4 = vmul.f32 %v18875_v28, %v22512_v47  ;;  %v23898_v50 = vld [vmem:[#allocation112_spill] sm:$0xff]  ;;  %v23900_v14 = vld [vmem:[#allocation81_spill] sm:$0xff] }
 0xb64   : > { %16962 = vmatprep.mubr.msk.f32.mxu1 %vm2534_vm3, %v12473_v61  ;;  %18886 = vrcp.f32 %v12410_v29  ;;  %v23901_v28 = vld [vmem:[#allocation32_spill] sm:$0xff] }
 0xb65   : > { %v18877_v12 = vpop.eup %18876  ;;  %16963 = vmatmul.mubr.msk.f32.vlgmr.msra.gmra.mrb[168].mxu1 %vm2534_vm3, %v12474_v10 }
 0xb66   : > { %17702 = vmatpush3.bf16.msra.mxu1 %v17699_v62  ;;  %v12407_v11 = vpop.xlane.xlu0 %12406  ;;  %v12475_v21 = vmul.f32 %v18877_v12, %v22529_v39  ;;  %v18879_v30 = vpop.eup %18878 }
 0xb67   : > { %v12422_v15 = vpop.xlane.xlu1 %12421  ;;  %18888 = vrcp.f32 %v12407_v11  ;;  %17708 = vmatprep.subr.bf16.mxu1 %v17707_v13  ;;  %14089 = vrot.lane.b32.xlu0 %v23890_v41, %s19137_s0  ;;  %v12478_v32 = vmul.f32 %v18879_v30, %v22522_v8  ;;  %v23893_v8 = vld [vmem:[#allocation42_spill] sm:$0xff] }
 0xb68   : > { %16969 = vmatprep.mubr.msk.f32.mxu0 %vm2534_vm3, %v12475_v21 }
 0xb69   : > { %v18881_v1 = vpop.eup %18880  ;;  %16970 = vmatmul.mubr.msk.f32.vlgmr.msra.gmra.mrb[138].mxu0 %vm2534_vm3, %v12476_v4  ;;  %v23902_v4 = vld [vmem:[#allocation79_spill] sm:$0xff] }
 0xb6a   : > { %17706 = vmatpush3.bf16.msra.mxu0 %v17703_v56  ;;  %v12413_v36 = vpop.xlane.xlu0 %12412  ;;  %v12477_v60 = vmul.f32 %v18881_v1, %v22539_v53  ;;  %v18883_v47 = vpop.eup %18882  ;;  %v23903_v1 = vld [vmem:[#allocation82_spill] sm:$0xff] }
 0xb6b   : > { %v18383_v59 = vpop.permute.xlu1 %18382  ;;  %18890 = vrcp.f32 %v12413_v36  ;;  %13965 = vrot.lane.b32.xlu0 %v23891_v0, %s19136_s18  ;;  %v12480_v63 = vmul.f32 %v18883_v47, %v22532_v42  ;;  %v23904_v47 = vld [vmem:[#allocation62_spill] sm:$0xff] }
 0xb6c   : > { %v18385_v39 = vunpack.i.h.bf16 %v18383_v59  ;;  %v18384_v9 = vunpack.i.l.bf16 %v18383_v59  ;;  %18892 = vrcp.f32 %v12416_v19  ;;  %16976 = vmatprep.mubr.msk.f32.mxu1 %vm2534_vm3, %v12477_v60 }
 0xb6d   : > { %v18885_v25 = vpop.eup %18884  ;;  %16977 = vmatmul.mubr.msk.f32.vlgmr.msra.gmra.mrb[170].mxu1 %vm2534_vm3, %v12478_v32  ;;  %18894 = vrcp.f32 %v12422_v15 }
 0xb6e   : > { %v17715_v52 = vpack.c.bf16 %v18385_v39, %v18384_v9  ;;  %17710 = vmatpush3.bf16.msra.mxu1 %v17707_v13  ;;  %v12419_v23 = vpop.xlane.xlu0 %12418  ;;  %v12479_v45 = vmul.f32 %v18885_v25, %v22547_v26  ;;  %v18887_v58 = vpop.eup %18886 }
 0xb6f   : > { %v13916_v53 = vpop.permute.xlu1 %13915  ;;  %18896 = vrcp.f32 %v12419_v23  ;;  %14093 = vrot.lane.b32.xlu0 %v23893_v8, %s19137_s0  ;;  %v12482_v42 = vmul.f32 %v18887_v58, %v22541_v31  ;;  %v23906_v58 = vld [vmem:[#allocation87_spill] sm:$0xff] }
 0xb70   : > { %v14265_v43 = vsel %vm1141_vm1, %v23892_v40, %v13916_v53  ;;  %17716 = vmatprep.subr.bf16.mxu1 %v17715_v52  ;;  %16983 = vmatprep.mubr.msk.f32.mxu0 %vm2534_vm3, %v12479_v45 }
 0xb71   : > { %v18889_v57 = vpop.eup %18888  ;;  %16984 = vmatmul.mubr.msk.f32.vlgmr.msra.gmra.mrb[140].mxu0 %vm2534_vm3, %v12480_v63 }
 0xb72   : > { %v18378_v46 = vpop.permute.xlu0 %18377  ;;  %v12481_v26 = vmul.f32 %v18889_v57, %v22555_v17 }
 0xb73   : > { %v14044_v62 = vpop.permute.xlu1 %14043  ;;  %v18380_v54 = vunpack.i.h.bf16 %v18378_v46  ;;  %v18379_v38 = vunpack.i.l.bf16 %v18378_v46  ;;  %13969 = vrot.lane.b32.xlu0 %v23894_v44, %s19136_s18  ;;  %v23907_v46 = vld [vmem:[#allocation90_spill] sm:$0xff] }
 0xb74   : > { %v22787_v33 = vsel %vm2534_vm3, %v14265_v43, %v14044_v62  ;;  %16990 = vmatprep.mubr.msk.f32.mxu1 %vm2534_vm3, %v12481_v26 }
 0xb75   : > { %v18891_v3 = vpop.eup %18890  ;;  %16991 = vmatmul.mubr.msk.f32.vlgmr.msra.gmra.mrb[172].mxu1 %vm2534_vm3, %v12482_v42  ;;  %v17711_v16 = vpack.c.bf16 %v18380_v54, %v18379_v38 }
 0xb76   : > { %v18893_v51 = vpop.eup %18892  ;;  %17718 = vmatpush3.bf16.msra.mxu1 %v17715_v52  ;;  %v13912_v55 = vpop.permute.xlu0 %13911  ;;  %v12483_v37 = vmul.f32 %v18891_v3, %v22563_v20  ;;  %v23905_v52 = vld [vmem:[#allocation86_spill] sm:$0xff] }
 0xb77   : > { %v13920_v17 = vpop.permute.xlu1 %13919  ;;  %14097 = vrot.lane.b32.xlu0 %v23896_v18, %s19137_s0  ;;  %17712 = vmatprep.subr.bf16.mxu0 %v17711_v16  ;;  %v18895_v31 = vpop.eup %18894  ;;  %v12484_v35 = vmul.f32 %v18893_v51, %v22549_v22  ;;  %v23899_v22 = vld [vmem:[#allocation73_spill] sm:$0xff] }
 0xb78   : > { %v14267_v29 = vsel %vm1141_vm1, %v23895_v5, %v13920_v17  ;;  %17714 = vmatpush3.bf16.msra.mxu0 %v17711_v16  ;;  %16997 = vmatprep.mubr.msk.f32.mxu0 %vm2534_vm3, %v12483_v37  ;;  %v12486_v20 = vmul.f32 %v18895_v31, %v22557_v6  ;;  %v23908_v16 = vld [vmem:[#allocation63_spill] sm:$0xff] }
 0xb79   : > { %v18897_v24 = vpop.eup %18896 }
 0xb7a   : > { %v13914_v2 = vpop.permute.xlu0 %13913  ;;  %v12485_v27 = vmul.f32 %v18897_v24, %v22567_v49  ;;  %v14263_v49 = vsel %vm1141_vm1, %v23899_v22, %v13912_v55  ;;  %v23909_v55 = vld [vmem:[#allocation91_spill] sm:$0xff] }
 0xb7b   : > { %v14048_v48 = vpop.permute.xlu1 %14047  ;;  %v14264_v56 = vsel %vm1141_vm1, %v23897_v34, %v13914_v2  ;;  %13973 = vrot.lane.b32.xlu0 %v23898_v50, %s19136_s18  ;;  %16998 = vmatmul.mubr.msk.f32.vlgmr.msra.gmra.mrb[142].mxu0 %vm2534_vm3, %v12484_v35  ;;  %v23910_v35 = vld [vmem:[#allocation84_spill] sm:$0xff] }
 0xb7c   : > { %v22806_v7 = vsel %vm2534_vm3, %v14267_v29, %v14048_v48  ;;  %17004 = vmatprep.mubr.msk.f32.mxu1 %vm2534_vm3, %v12485_v27  ;;  %v23911_v48 = vld [vmem:[#allocation75_spill] sm:$0xff] }
 0xb7d   : > { %17005 = vmatmul.mubr.msk.f32.vlgmr.msra.gmra.mrb[174].mxu1 %vm2534_vm3, %v12486_v20 }
 0xb7e   : > { %v14040_v19 = vpop.permute.xlu0 %14039 }
 0xb7f   : > { %v13924_v6 = vpop.permute.xlu1 %13923  ;;  %v22816_v61 = vsel %vm2534_vm3, %v14263_v49, %v14040_v19  ;;  %14101 = vrot.lane.b32.xlu0 %v23901_v28, %s19137_s0  ;;  %v23912_v19 = vld [vmem:[#allocation88_spill] sm:$0xff] }
 0xb80   : > { %v14269_v10 = vsel %vm1141_vm1, %v23900_v14, %v13924_v6  ;;  %v23913_v14 = vld [vmem:[#allocation65_spill] sm:$0xff] }
 0xb82   : > { %v14042_v12 = vpop.permute.xlu0 %14041 }
 0xb83   : > { %v14052_v13 = vpop.permute.xlu1 %14051  ;;  %v22823_v11 = vsel %vm2534_vm3, %v14264_v56, %v14042_v12 }
 0xb84   : > { %v22826_v15 = vsel %vm2534_vm3, %v14269_v10, %v14052_v13 }
 0xb86   : > { %v13918_v21 = vpop.permute.xlu0 %13917 }
 0xb87   : > { %v13928_v41 = vpop.permute.xlu1 %13927  ;;  %v14266_v30 = vsel %vm1141_vm1, %v23902_v4, %v13918_v21 }
 0xb88   : > { %v14271_v36 = vsel %vm1141_vm1, %v23903_v1, %v13928_v41 }
 0xb8a   : > { %v14046_v59 = vpop.permute.xlu0 %14045 }
 0xb8b   : > { %v14056_v60 = vpop.permute.xlu1 %14055  ;;  %v22833_v39 = vsel %vm2534_vm3, %v14266_v30, %v14046_v59  ;;  %v23914_v30 = vld [vmem:[#allocation89_spill] sm:$0xff] }
 0xb8c   : > { %v22836_v9 = vsel %vm2534_vm3, %v14271_v36, %v14056_v60  ;;  %v23915_v36 = vld [vmem:[#allocation78_spill] sm:$0xff] }
 0xb8e   : > { %v13922_v0 = vpop.permute.xlu0 %13921 }
 0xb8f   : > { %v13932_v32 = vpop.permute.xlu1 %13931  ;;  %v14268_v25 = vsel %vm1141_vm1, %v23904_v47, %v13922_v0 }
 0xb90   : > { %v14273_v23 = vsel %vm1141_vm1, %v23905_v52, %v13932_v32 }
 0xb92   : > { %v14050_v53 = vpop.permute.xlu0 %14049 }
 0xb93   : > { %v14060_v45 = vpop.permute.xlu1 %14059  ;;  %v22843_v40 = vsel %vm2534_vm3, %v14268_v25, %v14050_v53 }
 0xb94   : > { %v22846_v43 = vsel %vm2534_vm3, %v14273_v23, %v14060_v45  ;;  %v23916_v23 = vld [vmem:[#allocation72_spill] sm:$0xff] }
 0xb95   : > { %v23917_v45 = vld [vmem:[#allocation68_spill] sm:$0xff] }
 0xb96   : > { %v13926_v8 = vpop.permute.xlu0 %13925 }
 0xb97   : > { %v13936_v63 = vpop.permute.xlu1 %13935  ;;  %v14270_v57 = vsel %vm1141_vm1, %v23906_v58, %v13926_v8 }
 0xb98   : > { %v14275_v62 = vsel %vm1141_vm1, %v23907_v46, %v13936_v63 }
 0xb9a   : > { %v14054_v26 = vpop.permute.xlu0 %14053 }
 0xb9b   : > { %v14064_v54 = vpop.permute.xlu1 %14063  ;;  %v22853_v38 = vsel %vm2534_vm3, %v14270_v57, %v14054_v26 }
 0xb9c   : > { %v22856_v44 = vsel %vm2534_vm3, %v14275_v62, %v14064_v54  ;;  %v23918_v54 = vld [vmem:[#allocation76_spill] sm:$0xff] }
 0xb9e   : > { %v13930_v42 = vpop.permute.xlu0 %13929 }
 0xb9f   : > { %v13940_v3 = vpop.permute.xlu1 %13939  ;;  %v14272_v51 = vsel %vm1141_vm1, %v23908_v16, %v13930_v42 }
 0xba0   : > { %v14277_v17 = vsel %vm1141_vm1, %v23909_v55, %v13940_v3  ;;  %v23919_v3 = vld [vmem:[#allocation85_spill] sm:$0xff] }
 0xba2   : > { %v14058_v37 = vpop.permute.xlu0 %14057 }
 0xba3   : > { %v14068_v5 = vpop.permute.xlu1 %14067  ;;  %v22863_v29 = vsel %vm2534_vm3, %v14272_v51, %v14058_v37 }
 0xba4   : > { %v22866_v18 = vsel %vm2534_vm3, %v14277_v17, %v14068_v5 }
 0xba6   : > { %v13934_v31 = vpop.permute.xlu0 %13933 }
 0xba7   : > { %v13944_v24 = vpop.permute.xlu1 %13943  ;;  %v14274_v2 = vsel %vm1141_vm1, %v23910_v35, %v13934_v31 }
 0xba8   : > { %v14279_v27 = vsel %vm1141_vm1, %v23911_v48, %v13944_v24  ;;  %v23920_v24 = vld [vmem:[#allocation83_spill] sm:$0xff] }
 0xbaa   : > { %v14062_v20 = vpop.permute.xlu0 %14061 }
 0xbab   : > { %v14072_v34 = vpop.permute.xlu1 %14071  ;;  %v22873_v56 = vsel %vm2534_vm3, %v14274_v2, %v14062_v20  ;;  %v23921_v2 = vld [vmem:[#allocation69_spill] sm:$0xff] }
 0xbac   : > { %v22876_v50 = vsel %vm2534_vm3, %v14279_v27, %v14072_v34 }
 0xbae   : > { %v13938_v22 = vpop.permute.xlu0 %13937 }
 0xbaf   : > { %v13948_v49 = vpop.permute.xlu1 %13947  ;;  %v14276_v6 = vsel %vm1141_vm1, %v23912_v19, %v13938_v22  ;;  %v14361_v19 = vld [vmem:[#allocation10 + $0x8] sm:$0xff] }
 0xbb0   : > { %v14281_v10 = vsel %vm1141_vm1, %v23913_v14, %v13948_v49  ;;  %v14360_v49 = vld [vmem:[#allocation10] sm:$0xff] }
 0xbb2   : > { %v14066_v28 = vpop.permute.xlu0 %14065 }
 0xbb3   : > { %v14076_v12 = vpop.permute.xlu1 %14075  ;;  %v22883_v13 = vsel %vm2534_vm3, %v14276_v6, %v14066_v28  ;;  %v17719_v6 = vpack.c.bf16 %v14361_v19, %v14360_v49  ;;  %v23922_v28 = vld [vmem:[#allocation64_spill] sm:$0xff] }
 0xbb4   : > { %v22886_v21 = vsel %vm2534_vm3, %v14281_v10, %v14076_v12 }
 0xbb5   : > { %17720 = vmatprep.subr.bf16.mxu0 %v17719_v6 }
 0xbb6   : > { %v13942_v41 = vpop.permute.xlu0 %13941  ;;  %17722 = vmatpush3.bf16.msra.mxu0 %v17719_v6 }
 0xbb7   : > { %v13952_v4 = vpop.permute.xlu1 %13951  ;;  %v14278_v1 = vsel %vm1141_vm1, %v23914_v30, %v13942_v41  ;;  %v23923_v41 = vld [vmem:[#allocation70_spill] sm:$0xff] }
 0xbb8   : > { %v14283_v59 = vsel %vm1141_vm1, %v23915_v36, %v13952_v4 }
 0xbba   : > { %v14070_v60 = vpop.permute.xlu0 %14069 }
 0xbbb   : > { %v14080_v0 = vpop.permute.xlu1 %14079  ;;  %v22893_v32 = vsel %vm2534_vm3, %v14278_v1, %v14070_v60  ;;  %v14362_v60 = vld [vmem:[#allocation10 + $0x10] sm:$0xff] }
 0xbbc   : > { %v22896_v47 = vsel %vm2534_vm3, %v14283_v59, %v14080_v0  ;;  %v14363_v0 = vld [vmem:[#allocation10 + $0x18] sm:$0xff] }
 0xbbe   : > { %v13946_v25 = vpop.permute.xlu0 %13945 }
 0xbbf   : > { %v13956_v52 = vpop.permute.xlu1 %13955  ;;  %v14280_v53 = vsel %vm1141_vm1, %v23916_v23, %v13946_v25  ;;  %v17723_v25 = vpack.c.bf16 %v14363_v0, %v14362_v60 }
 0xbc0   : > { %v14285_v8 = vsel %vm1141_vm1, %v23917_v45, %v13956_v52 }
 0xbc1   : > { %17724 = vmatprep.subr.bf16.mxu0 %v17723_v25 }
 0xbc2   : > { %v14074_v63 = vpop.permute.xlu0 %14073  ;;  %17726 = vmatpush3.bf16.msra.mxu0 %v17723_v25 }
 0xbc3   : > { %v14084_v58 = vpop.permute.xlu1 %14083  ;;  %v22903_v57 = vsel %vm2534_vm3, %v14280_v53, %v14074_v63  ;;  %v23924_v53 = vld [vmem:[#allocation67_spill] sm:$0xff] }
 0xbc4   : > { %v22906_v46 = vsel %vm2534_vm3, %v14285_v8, %v14084_v58  ;;  %v23925_v8 = vld [vmem:[#allocation93_spill] sm:$0xff] }
 0xbc6   : > { %v13950_v62 = vpop.permute.xlu0 %13949 }
 0xbc7   : > { %v13960_v26 = vpop.permute.xlu1 %13959  ;;  %v14282_v42 = vsel %vm1141_vm1, %v23918_v54, %v13950_v62  ;;  %v23926_v54 = vld [vmem:[#allocation66_spill] sm:$0xff] }
 0xbc8   : > { %v14287_v16 = vsel %vm1141_vm1, %v23919_v3, %v13960_v26 }
 0xbca   : > { %v14078_v51 = vpop.permute.xlu0 %14077 }
 0xbcb   : > { %v14088_v55 = vpop.permute.xlu1 %14087  ;;  %v22913_v17 = vsel %vm2534_vm3, %v14282_v42, %v14078_v51 }
 0xbcc   : > { %v22916_v37 = vsel %vm2534_vm3, %v14287_v16, %v14088_v55 }
 0xbce   : > { %v13954_v5 = vpop.permute.xlu0 %13953 }
 0xbcf   : > { %v13964_v31 = vpop.permute.xlu1 %13963  ;;  %v14284_v35 = vsel %vm1141_vm1, %v23920_v24, %v13954_v5 }
 0xbd0   : > { %v14289_v48 = vsel %vm1141_vm1, %v23921_v2, %v13964_v31  ;;  %v23927_v31 = vld [vmem:[#allocation71_spill] sm:$0xff] }
 0xbd2   : > { %v14082_v27 = vpop.permute.xlu0 %14081 }
 0xbd3   : > { %v14092_v20 = vpop.permute.xlu1 %14091  ;;  %v22923_v34 = vsel %vm2534_vm3, %v14284_v35, %v14082_v27  ;;  %v23928_v27 = vld [vmem:[#allocation92_spill] sm:$0xff] }
 0xbd4   : > { %v22926_v22 = vsel %vm2534_vm3, %v14289_v48, %v14092_v20 }
 0xbd6   : > { %v13958_v14 = vpop.permute.xlu0 %13957 }
 0xbd7   : > { %v13968_v10 = vpop.permute.xlu1 %13967  ;;  %v14286_v12 = vsel %vm1141_vm1, %v23922_v28, %v13958_v14 }
 0xbd8   : > { %v14291_v4 = vsel %vm1141_vm1, %v23923_v41, %v13968_v10 }
 0xbda   : > { %v14086_v30 = vpop.permute.xlu0 %14085 }
 0xbdb   : > { %v14096_v1 = vpop.permute.xlu1 %14095  ;;  %v22933_v36 = vsel %vm2534_vm3, %v14286_v12, %v14086_v30 }
 0xbdc   : > { %v22936_v59 = vsel %vm2534_vm3, %v14291_v4, %v14096_v1 }
 0xbde   : > { %v13962_v52 = vpop.permute.xlu0 %13961 }
 0xbdf   : > { %v13972_v23 = vpop.permute.xlu1 %13971  ;;  %v14288_v45 = vsel %vm1141_vm1, %v23924_v53, %v13962_v52 }
 0xbe0   : > { %v22942_v63 = vsel %vm1141_vm1, %v23925_v8, %v13972_v23 }
 0xbe2   : > { %v14090_v58 = vpop.permute.xlu0 %14089 }
 0xbe3   : > { %v22945_v62 = vsel %vm2534_vm3, %v14288_v45, %v14090_v58 }
 0xbe6   : > { %v13966_v26 = vpop.permute.xlu0 %13965 }
 0xbe7   : > { %v14290_v42 = vsel %vm1141_vm1, %v23926_v54, %v13966_v26 }
 0xbea   : > { %v14094_v3 = vpop.permute.xlu0 %14093  ;;  %v16901_v16 = vpop.f32.mrb[128].mxu0 }
 0xbeb   : > { %v22950_v51 = vsel %vm2534_vm3, %v14290_v42, %v14094_v3  ;;  %14169 = vrot.lane.b32.xlu0 %v16901_v16, %s19138_s27  ;;  %v12565_v55 = vpop.f32.mrb[129].mxu0 }
 0xbec   : > { %14167 = vrot.lane.b32.xlu1 %v12565_v55, %s19138_s27 }
 0xbee   : > { %v13970_v5 = vpop.permute.xlu0 %13969 }
 0xbef   : > { %v14292_v24 = vsel %vm1141_vm1, %v23927_v31, %v13970_v5 }
 0xbf2   : > { %v14098_v35 = vpop.permute.xlu0 %14097 }
 0xbf3   : > { %v22957_v2 = vsel %vm2534_vm3, %v14292_v24, %v14098_v35 }
 0xbf6   : > { %v13974_v48 = vpop.permute.xlu0 %13973 }
 0xbf7   : > { %v22961_v20 = vsel %vm1141_vm1, %v23928_v27, %v13974_v48  ;;  %v22995_v27 = vpop.permute.xlu1 %14099 }
 0xbfa   : > { %v22993_v48 = vpop.permute.xlu0 %14101 }
 0xc10   : > { %v16908_v49 = vpop.f32.mrb[160].mxu1 }
 0xc11   : > { %14173 = vrot.lane.b32.xlu0 %v16908_v49, %s19138_s27  ;;  %v12652_v19 = vpop.f32.mrb[161].mxu1 }
 0xc12   : > { %14171 = vrot.lane.b32.xlu1 %v12652_v19, %s19138_s27 }
 0xc15   : > { %v16915_v6 = vpop.f32.mrb[130].mxu0 }
 0xc16   : > { %14177 = vrot.lane.b32.xlu0 %v16915_v6, %s19138_s27  ;;  %v12739_v14 = vpop.f32.mrb[131].mxu0 }
 0xc17   : > { %14175 = vrot.lane.b32.xlu1 %v12739_v14, %s19138_s27 }
 0xc19   : > { %v16922_v10 = vpop.f32.mrb[162].mxu1 }
 0xc1a   : > { %14181 = vrot.lane.b32.xlu0 %v16922_v10, %s19138_s27  ;;  %v12826_v28 = vpop.f32.mrb[163].mxu1 }
 0xc1b   : > { %14179 = vrot.lane.b32.xlu1 %v12826_v28, %s19138_s27 }
 0xc1d   : > { %v16929_v12 = vpop.f32.mrb[132].mxu0 }
 0xc1e   : > { %14185 = vrot.lane.b32.xlu0 %v16929_v12, %s19138_s27  ;;  %v12913_v41 = vpop.f32.mrb[133].mxu0 }
 0xc1f   : > { %14183 = vrot.lane.b32.xlu1 %v12913_v41, %s19138_s27 }
 0xc21   : > { %v16936_v4 = vpop.f32.mrb[164].mxu1 }
 0xc22   : > { %14189 = vrot.lane.b32.xlu0 %v16936_v4, %s19138_s27  ;;  %v13000_v30 = vpop.f32.mrb[165].mxu1 }
 0xc23   : > { %14187 = vrot.lane.b32.xlu1 %v13000_v30, %s19138_s27 }
 0xc28   : > { %v16943_v1 = vpop.f32.mrb[134].mxu0 }
 0xc29   : > { %v13087_v60 = vpop.f32.mrb[135].mxu0  ;;  %14193 = vrot.lane.b32.xlu0 %v16943_v1, %s19138_s27 }
 0xc2a   : > { %14191 = vrot.lane.b32.xlu1 %v13087_v60, %s19138_s27 }
 0xc2b   : > { %v16950_v0 = vpop.f32.mrb[166].mxu1 }
 0xc2c   : > { %v13174_v25 = vpop.f32.mrb[167].mxu1 }
 0xc2d   : > { %14197 = vrot.lane.b32.xlu0 %v16950_v0, %s19138_s27 }
 0xc2e   : > { %14195 = vrot.lane.b32.xlu1 %v13174_v25, %s19138_s27 }
 0xc34   : > { %v16957_v52 = vpop.f32.mrb[136].mxu0 }
 0xc35   : > { %v13261_v23 = vpop.f32.mrb[137].mxu0  ;;  %14201 = vrot.lane.b32.xlu0 %v16957_v52, %s19138_s27 }
 0xc36   : > { %14199 = vrot.lane.b32.xlu1 %v13261_v23, %s19138_s27 }
 0xc38   : > { %v16964_v53 = vpop.f32.mrb[168].mxu1 }
 0xc39   : > { %14205 = vrot.lane.b32.xlu0 %v16964_v53, %s19138_s27  ;;  %v13348_v45 = vpop.f32.mrb[169].mxu1 }
 0xc3a   : > { %14203 = vrot.lane.b32.xlu1 %v13348_v45, %s19138_s27 }
 0xc3c   : > { %v16971_v8 = vpop.f32.mrb[138].mxu0 }
 0xc3d   : > { %v13435_v58 = vpop.f32.mrb[139].mxu0  ;;  %14209 = vrot.lane.b32.xlu0 %v16971_v8, %s19138_s27 }
 0xc3e   : > { %14207 = vrot.lane.b32.xlu1 %v13435_v58, %s19138_s27 }
 0xc40   : > { %v16978_v26 = vpop.f32.mrb[170].mxu1 }
 0xc41   : > { %14213 = vrot.lane.b32.xlu0 %v16978_v26, %s19138_s27  ;;  %v13522_v54 = vpop.f32.mrb[171].mxu1 }
 0xc42   : > { %14211 = vrot.lane.b32.xlu1 %v13522_v54, %s19138_s27 }
 0xc44   : > { %v16985_v42 = vpop.f32.mrb[140].mxu0 }
 0xc45   : > { %v13609_v3 = vpop.f32.mrb[141].mxu0  ;;  %14217 = vrot.lane.b32.xlu0 %v16985_v42, %s19138_s27 }
 0xc46   : > { %14215 = vrot.lane.b32.xlu1 %v13609_v3, %s19138_s27 }
 0xc48   : > { %v16992_v16 = vpop.f32.mrb[172].mxu1 }
 0xc49   : > { %14221 = vrot.lane.b32.xlu0 %v16992_v16, %s19138_s27  ;;  %v13696_v55 = vpop.f32.mrb[173].mxu1 }
 0xc4a   : > { %14219 = vrot.lane.b32.xlu1 %v13696_v55, %s19138_s27 }
 0xc4e   : > { %v16999_v5 = vpop.f32.mrb[142].mxu0 }
 0xc4f   : > { %v13783_v31 = vpop.f32.mrb[143].mxu0  ;;  %14225 = vrot.lane.b32.xlu0 %v16999_v5, %s19138_s27 }
 0xc50   : > { %14223 = vrot.lane.b32.xlu1 %v13783_v31, %s19138_s27  ;;  %v17006_v24 = vpop.f32.mrb[174].mxu1 }
 0xc51   : > { %v13870_v35 = vpop.f32.mrb[175].mxu1 }
 0xc53   : > { %14229 = vrot.lane.b32.xlu0 %v17006_v24, %s19138_s27 }
 0xc54   : > { %14227 = vrot.lane.b32.xlu1 %v13870_v35, %s19138_s27 }
 0xc5d   : > { %v14170_v49 = vpop.permute.xlu0 %14169 }
 0xc5e   : > { %v14168_v19 = vpop.permute.xlu1 %14167  ;;  %v14329_v14 = vsel %vm14327_vm4, %v22823_v11, %v14170_v49 }
 0xc5f   : > { %v14328_v6 = vsel %vm14327_vm4, %v22816_v61, %v14168_v19 }
 0xc60   : > { %17015 = vmatprep.mubr.msk.f32.mxu0 %vm487_vm0, %v14328_v6 }
 0xc61   : > { %17016 = vmatmul.mubr.msk.f32.vlgmr.msra.gmra.mrb[144].mxu0 %vm487_vm0, %v14329_v14 }
 0xc83   : > { %v14174_v10 = vpop.permute.xlu0 %14173 }
 0xc84   : > { %v14172_v28 = vpop.permute.xlu1 %14171  ;;  %v14331_v41 = vsel %vm14327_vm4, %v22833_v39, %v14174_v10 }
 0xc85   : > { %v14330_v12 = vsel %vm14327_vm4, %v22787_v33, %v14172_v28  ;;  %v14326_v28 = vsel %vm2534_vm3, %v22961_v20, %v22993_v48 }
 0xc86   : > { %17018 = vmatprep.mubr.msk.f32.mxu0 %vm487_vm0, %v14330_v12 }
 0xc87   : > { %17019 = vmatmul.mubr.msk.f32.gmra.mrb[146].mxu0 %vm487_vm0, %v14331_v41 }
 0xc88   : > { %v14178_v61 = vpop.permute.xlu0 %14177 }
 0xc89   : > { %v14176_v4 = vpop.permute.xlu1 %14175  ;;  %v14333_v30 = vsel %vm14327_vm4, %v22843_v40, %v14178_v61 }
 0xc8a   : > { %v14332_v11 = vsel %vm14327_vm4, %v22806_v7, %v14176_v4 }
 0xc8b   : > { %17021 = vmatprep.mubr.msk.f32.mxu0 %vm487_vm0, %v14332_v11 }
 0xc8c   : > { %v14182_v1 = vpop.permute.xlu0 %14181  ;;  %17022 = vmatmul.mubr.msk.f32.gmra.mrb[148].mxu0 %vm487_vm0, %v14333_v30 }
 0xc8d   : > { %v14180_v33 = vpop.permute.xlu1 %14179  ;;  %v14335_v60 = vsel %vm14327_vm4, %v22853_v38, %v14182_v1 }
 0xc8e   : > { %v14334_v39 = vsel %vm14327_vm4, %v22826_v15, %v14180_v33 }
 0xc8f   : > { %17024 = vmatprep.mubr.msk.f32.mxu0 %vm487_vm0, %v14334_v39 }
 0xc90   : > { %v14186_v0 = vpop.permute.xlu0 %14185  ;;  %17025 = vmatmul.mubr.msk.f32.gmra.mrb[150].mxu0 %vm487_vm0, %v14335_v60 }
 0xc91   : > { %v14184_v7 = vpop.permute.xlu1 %14183  ;;  %v14337_v25 = vsel %vm14327_vm4, %v22863_v29, %v14186_v0 }
 0xc92   : > { %v14336_v40 = vsel %vm14327_vm4, %v22836_v9, %v14184_v7 }
 0xc93   : > { %17027 = vmatprep.mubr.msk.f32.mxu0 %vm487_vm0, %v14336_v40 }
 0xc94   : > { %v14190_v52 = vpop.permute.xlu0 %14189  ;;  %17028 = vmatmul.mubr.msk.f32.gmra.mrb[152].mxu0 %vm487_vm0, %v14337_v25 }
 0xc95   : > { %v14188_v15 = vpop.permute.xlu1 %14187  ;;  %v14339_v23 = vsel %vm14327_vm4, %v22873_v56, %v14190_v52 }
 0xc96   : > { %v14338_v38 = vsel %vm14327_vm4, %v22846_v43, %v14188_v15 }
 0xc97   : > { %17030 = vmatprep.mubr.msk.f32.mxu0 %vm487_vm0, %v14338_v38 }
 0xc98   : > { %17031 = vmatmul.mubr.msk.f32.gmra.mrb[154].mxu0 %vm487_vm0, %v14339_v23 }
 0xc9b   : > { %v14194_v9 = vpop.permute.xlu0 %14193 }
 0xc9c   : > { %v14192_v53 = vpop.permute.xlu1 %14191  ;;  %v14341_v45 = vsel %vm14327_vm4, %v22883_v13, %v14194_v9 }
 0xc9d   : > { %v14340_v29 = vsel %vm14327_vm4, %v22856_v44, %v14192_v53 }
 0xc9e   : > { %17033 = vmatprep.mubr.msk.f32.mxu0 %vm487_vm0, %v14340_v29 }
 0xc9f   : > { %v14198_v8 = vpop.permute.xlu0 %14197  ;;  %17034 = vmatmul.mubr.msk.f32.gmra.mrb[156].mxu0 %vm487_vm0, %v14341_v45 }
 0xca0   : > { %v14196_v43 = vpop.permute.xlu1 %14195  ;;  %v14343_v58 = vsel %vm14327_vm4, %v22893_v32, %v14198_v8 }
 0xca1   : > { %v14342_v56 = vsel %vm14327_vm4, %v22866_v18, %v14196_v43 }
 0xca2   : > { %17036 = vmatprep.mubr.msk.f32.mxu0 %vm487_vm0, %v14342_v56 }
 0xca3   : > { %17037 = vmatmul.mubr.msk.f32.gmra.mrb[158].mxu0 %vm487_vm0, %v14343_v58 }
 0xca7   : > { %v14202_v44 = vpop.permute.xlu0 %14201 }
 0xca8   : > { %v14200_v26 = vpop.permute.xlu1 %14199  ;;  %v14345_v54 = vsel %vm14327_vm4, %v22903_v57, %v14202_v44 }
 0xca9   : > { %v14344_v13 = vsel %vm14327_vm4, %v22876_v50, %v14200_v26 }
 0xcaa   : > { %17039 = vmatprep.mubr.msk.f32.mxu0 %vm487_vm0, %v14344_v13 }
 0xcab   : > { %17040 = vmatmul.mubr.msk.f32.gmra.mrb[160].mxu0 %vm487_vm0, %v14345_v54  ;;  %v14206_v18 = vpop.permute.xlu0 %14205 }
 0xcac   : > { %v14204_v42 = vpop.permute.xlu1 %14203  ;;  %v14347_v3 = vsel %vm14327_vm4, %v22913_v17, %v14206_v18 }
 0xcad   : > { %v14346_v32 = vsel %vm14327_vm4, %v22886_v21, %v14204_v42 }
 0xcae   : > { %17042 = vmatprep.mubr.msk.f32.mxu0 %vm487_vm0, %v14346_v32 }
 0xcaf   : > { %v14210_v16 = vpop.permute.xlu0 %14209  ;;  %17043 = vmatmul.mubr.msk.f32.gmra.mrb[162].mxu0 %vm487_vm0, %v14347_v3 }
 0xcb0   : > { %v14208_v50 = vpop.permute.xlu1 %14207  ;;  %v14349_v55 = vsel %vm14327_vm4, %v22923_v34, %v14210_v16 }
 0xcb1   : > { %v14348_v57 = vsel %vm14327_vm4, %v22896_v47, %v14208_v50 }
 0xcb2   : > { %17045 = vmatprep.mubr.msk.f32.mxu0 %vm487_vm0, %v14348_v57 }
 0xcb3   : > { %17046 = vmatmul.mubr.msk.f32.gmra.mrb[164].mxu0 %vm487_vm0, %v14349_v55  ;;  %v14214_v21 = vpop.permute.xlu0 %14213 }
 0xcb4   : > { %v14212_v5 = vpop.permute.xlu1 %14211  ;;  %v14351_v31 = vsel %vm14327_vm4, %v22933_v36, %v14214_v21 }
 0xcb5   : > { %v14350_v17 = vsel %vm14327_vm4, %v22906_v46, %v14212_v5 }
 0xcb6   : > { %17048 = vmatprep.mubr.msk.f32.mxu0 %vm487_vm0, %v14350_v17 }
 0xcb7   : > { %v14218_v24 = vpop.permute.xlu0 %14217  ;;  %17049 = vmatmul.mubr.msk.f32.gmra.mrb[166].mxu0 %vm487_vm0, %v14351_v31 }
 0xcb8   : > { %v14216_v47 = vpop.permute.xlu1 %14215  ;;  %v14353_v35 = vsel %vm14327_vm4, %v22945_v62, %v14218_v24 }
 0xcb9   : > { %v14352_v34 = vsel %vm14327_vm4, %v22916_v37, %v14216_v47 }
 0xcba   : > { %17051 = vmatprep.mubr.msk.f32.mxu0 %vm487_vm0, %v14352_v34 }
 0xcbb   : > { %17052 = vmatmul.mubr.msk.f32.gmra.mrb[168].mxu0 %vm487_vm0, %v14353_v35  ;;  %v14222_v46 = vpop.permute.xlu0 %14221 }
 0xcbc   : > { %v14220_v49 = vpop.permute.xlu1 %14219  ;;  %v14355_v19 = vsel %vm14327_vm4, %v22950_v51, %v14222_v46  ;;  %v14325_v51 = vsel %vm2534_vm3, %v22942_v63, %v22995_v27 }
 0xcbd   : > { %v14354_v36 = vsel %vm14327_vm4, %v22926_v22, %v14220_v49 }
 0xcbe   : > { %17054 = vmatprep.mubr.msk.f32.mxu0 %vm487_vm0, %v14354_v36 }
 0xcbf   : > { %17055 = vmatmul.mubr.msk.f32.gmra.mrb[170].mxu0 %vm487_vm0, %v14355_v19 }
 0xcc1   : > { %v14226_v37 = vpop.permute.xlu0 %14225 }
 0xcc2   : > { %v14224_v6 = vpop.permute.xlu1 %14223  ;;  %v14357_v14 = vsel %vm14327_vm4, %v22957_v2, %v14226_v37  ;;  %v23100_v2 = vld [vmem:[%s23260_s7] ss:$0 sm:$0xff] }
 0xcc3   : > { %v14356_v62 = vsel %vm14327_vm4, %v22936_v59, %v14224_v6 }
 0xcc4   : > { %17057 = vmatprep.mubr.msk.f32.mxu0 %vm487_vm0, %v14356_v62 }
 0xcc5   : > { %17058 = vmatmul.mubr.msk.f32.gmra.mrb[172].mxu0 %vm487_vm0, %v14357_v14  ;;  %v14230_v22 = vpop.permute.xlu0 %14229 }
 0xcc6   : > { %v14228_v10 = vpop.permute.xlu1 %14227  ;;  %v14359_v12 = vsel %vm14327_vm4, %v14326_v28, %v14230_v22 }
 0xcc7   : > { %v14358_v59 = vsel %vm14327_vm4, %v14325_v51, %v14228_v10 }
 0xcc8   : > { %17060 = vmatprep.mubr.msk.f32.mxu0 %vm487_vm0, %v14358_v59 }
 0xcc9   : > { %17061 = vmatmul.mubr.msk.f32.gmra.mrb[174].mxu0 %vm487_vm0, %v14359_v12 }
 0xd34   : > { %v17017_v41 = vpop.f32.mrb[144].mxu0 }
 0xd35   : > { %v14539_v63 = vadd.f32 %v17017_v41, %v23100_v2  ;;  %v14533_v27 = vpop.f32.mrb[145].mxu0 }
 0xd36   : > { %v14534_v61 = vadd.f32 %v23100_v2, %v14533_v27 }
 0xd37   : > { %14693 = vst.msk [vmem:[%s23105_s10 + $0x8] sm:$0xff] %vm487_vm0, %v14539_v63 }
 0xd38   : > { %14692 = vst.msk [vmem:[%s23105_s10] sm:$0xff] %vm487_vm0, %v14534_v61 }
 0xd5a   : > { %v17020_v20 = vpop.f32.mrb[146].mxu0 }
 0xd5b   : > { %v14549_v48 = vadd.f32 %v17020_v20, %v23100_v2  ;;  %v14543_v4 = vpop.f32.mrb[147].mxu0 }
 0xd5c   : > { %v14544_v11 = vadd.f32 %v23100_v2, %v14543_v4 }
 0xd5d   : > { %14695 = vst.msk [vmem:[%s23105_s10 + $0x18] sm:$0xff] %vm487_vm0, %v14549_v48 }
 0xd5e   : > { %14694 = vst.msk [vmem:[%s23105_s10 + $0x10] sm:$0xff] %vm487_vm0, %v14544_v11 }
 0xd5f   : > { %v17023_v30 = vpop.f32.mrb[148].mxu0 }
 0xd60   : > { %v14559_v1 = vadd.f32 %v17023_v30, %v23100_v2  ;;  %v14553_v33 = vpop.f32.mrb[149].mxu0 }
 0xd61   : > { %v14554_v39 = vadd.f32 %v23100_v2, %v14553_v33 }
 0xd62   : > { %14697 = vst.msk [vmem:[%s23105_s10 + $0x28] sm:$0xff] %vm487_vm0, %v14559_v1 }
 0xd63   : > { %14696 = vst.msk [vmem:[%s23105_s10 + $0x20] sm:$0xff] %vm487_vm0, %v14554_v39  ;;  %v17026_v60 = vpop.f32.mrb[150].mxu0 }
 0xd64   : > { %v14569_v0 = vadd.f32 %v17026_v60, %v23100_v2  ;;  %v14563_v7 = vpop.f32.mrb[151].mxu0 }
 0xd65   : > { %v14564_v40 = vadd.f32 %v23100_v2, %v14563_v7 }
 0xd66   : > { %14699 = vst.msk [vmem:[%s23105_s10 + $0x38] sm:$0xff] %vm487_vm0, %v14569_v0 }
 0xd67   : > { %14698 = vst.msk [vmem:[%s23105_s10 + $0x30] sm:$0xff] %vm487_vm0, %v14564_v40  ;;  %v17029_v25 = vpop.f32.mrb[152].mxu0 }
 0xd68   : > { %v14579_v52 = vadd.f32 %v17029_v25, %v23100_v2  ;;  %v14573_v15 = vpop.f32.mrb[153].mxu0 }
 0xd69   : > { %v14574_v38 = vadd.f32 %v23100_v2, %v14573_v15 }
 0xd6a   : > { %14701 = vst.msk [vmem:[%s23105_s10 + $0x48] sm:$0xff] %vm487_vm0, %v14579_v52 }
 0xd6b   : > { %14700 = vst.msk [vmem:[%s23105_s10 + $0x40] sm:$0xff] %vm487_vm0, %v14574_v38  ;;  %v17032_v23 = vpop.f32.mrb[154].mxu0 }
 0xd6c   : > { %v14589_v9 = vadd.f32 %v17032_v23, %v23100_v2  ;;  %v14583_v53 = vpop.f32.mrb[155].mxu0 }
 0xd6d   : > { %v14584_v29 = vadd.f32 %v23100_v2, %v14583_v53 }
 0xd6e   : > { %14703 = vst.msk [vmem:[%s23105_s10 + $0x58] sm:$0xff] %vm487_vm0, %v14589_v9 }
 0xd6f   : > { %14702 = vst.msk [vmem:[%s23105_s10 + $0x50] sm:$0xff] %vm487_vm0, %v14584_v29 }
 0xd72   : > { %v17035_v45 = vpop.f32.mrb[156].mxu0 }
 0xd73   : > { %v14599_v8 = vadd.f32 %v17035_v45, %v23100_v2  ;;  %v14593_v43 = vpop.f32.mrb[157].mxu0 }
 0xd74   : > { %v14594_v56 = vadd.f32 %v23100_v2, %v14593_v43 }
 0xd75   : > { %14705 = vst.msk [vmem:[%s23105_s10 + $0x68] sm:$0xff] %vm487_vm0, %v14599_v8 }
 0xd76   : > { %14704 = vst.msk [vmem:[%s23105_s10 + $0x60] sm:$0xff] %vm487_vm0, %v14594_v56  ;;  %v17038_v58 = vpop.f32.mrb[158].mxu0 }
 0xd77   : > { %v14609_v44 = vadd.f32 %v17038_v58, %v23100_v2  ;;  %v14603_v26 = vpop.f32.mrb[159].mxu0 }
 0xd78   : > { %v14604_v13 = vadd.f32 %v23100_v2, %v14603_v26 }
 0xd79   : > { %14707 = vst.msk [vmem:[%s23105_s10 + $0x78] sm:$0xff] %vm487_vm0, %v14609_v44 }
 0xd7a   : > { %14706 = vst.msk [vmem:[%s23105_s10 + $0x70] sm:$0xff] %vm487_vm0, %v14604_v13 }
 0xd7e   : > { %v17041_v54 = vpop.f32.mrb[160].mxu0 }
 0xd7f   : > { %v14619_v18 = vadd.f32 %v17041_v54, %v23100_v2  ;;  %v14613_v42 = vpop.f32.mrb[161].mxu0 }
 0xd80   : > { %v14614_v32 = vadd.f32 %v23100_v2, %v14613_v42 }
 0xd81   : > { %14709 = vst.msk [vmem:[%s23105_s10 + $0x88] sm:$0xff] %vm487_vm0, %v14619_v18 }
 0xd82   : > { %14708 = vst.msk [vmem:[%s23105_s10 + $0x80] sm:$0xff] %vm487_vm0, %v14614_v32  ;;  %v17044_v3 = vpop.f32.mrb[162].mxu0 }
 0xd83   : > { %v14629_v16 = vadd.f32 %v17044_v3, %v23100_v2  ;;  %v14623_v50 = vpop.f32.mrb[163].mxu0 }
 0xd84   : > { %v14624_v57 = vadd.f32 %v23100_v2, %v14623_v50 }
 0xd85   : > { %14711 = vst.msk [vmem:[%s23105_s10 + $0x98] sm:$0xff] %vm487_vm0, %v14629_v16 }
 0xd86   : > { %14710 = vst.msk [vmem:[%s23105_s10 + $0x90] sm:$0xff] %vm487_vm0, %v14624_v57  ;;  %v17047_v55 = vpop.f32.mrb[164].mxu0 }
 0xd87   : > { %v14639_v21 = vadd.f32 %v17047_v55, %v23100_v2  ;;  %v14633_v5 = vpop.f32.mrb[165].mxu0 }
 0xd88   : > { %v14634_v17 = vadd.f32 %v23100_v2, %v14633_v5 }
 0xd89   : > { %14713 = vst.msk [vmem:[%s23105_s10 + $0xa8] sm:$0xff] %vm487_vm0, %v14639_v21 }
 0xd8a   : > { %14712 = vst.msk [vmem:[%s23105_s10 + $0xa0] sm:$0xff] %vm487_vm0, %v14634_v17  ;;  %v17050_v31 = vpop.f32.mrb[166].mxu0 }
 0xd8b   : > { %v14649_v24 = vadd.f32 %v17050_v31, %v23100_v2  ;;  %v14643_v47 = vpop.f32.mrb[167].mxu0 }
 0xd8c   : > { %v14644_v34 = vadd.f32 %v23100_v2, %v14643_v47 }
 0xd8d   : > { %14715 = vst.msk [vmem:[%s23105_s10 + $0xb8] sm:$0xff] %vm487_vm0, %v14649_v24 }
 0xd8e   : > { %14714 = vst.msk [vmem:[%s23105_s10 + $0xb0] sm:$0xff] %vm487_vm0, %v14644_v34  ;;  %v17053_v35 = vpop.f32.mrb[168].mxu0 }
 0xd8f   : > { %v14659_v46 = vadd.f32 %v17053_v35, %v23100_v2  ;;  %v14653_v49 = vpop.f32.mrb[169].mxu0 }
 0xd90   : > { %v14654_v36 = vadd.f32 %v23100_v2, %v14653_v49 }
 0xd91   : > { %14717 = vst.msk [vmem:[%s23105_s10 + $0xc8] sm:$0xff] %vm487_vm0, %v14659_v46 }
 0xd92   : > { %14716 = vst.msk [vmem:[%s23105_s10 + $0xc0] sm:$0xff] %vm487_vm0, %v14654_v36  ;;  %v17056_v19 = vpop.f32.mrb[170].mxu0 }
 0xd93   : > { %v14669_v37 = vadd.f32 %v17056_v19, %v23100_v2  ;;  %v14663_v6 = vpop.f32.mrb[171].mxu0 }
 0xd94   : > { %v14664_v62 = vadd.f32 %v23100_v2, %v14663_v6 }
 0xd95   : > { %14719 = vst.msk [vmem:[%s23105_s10 + $0xd8] sm:$0xff] %vm487_vm0, %v14669_v37 }
 0xd96   : > { %14718 = vst.msk [vmem:[%s23105_s10 + $0xd0] sm:$0xff] %vm487_vm0, %v14664_v62 }
 0xd98   : > { %v17059_v14 = vpop.f32.mrb[172].mxu0 }
 0xd99   : > { %v14679_v22 = vadd.f32 %v17059_v14, %v23100_v2  ;;  %v14673_v51 = vpop.f32.mrb[173].mxu0 }
 0xd9a   : > { %v14674_v10 = vadd.f32 %v23100_v2, %v14673_v51 }
 0xd9b   : > { %14721 = vst.msk [vmem:[%s23105_s10 + $0xe8] sm:$0xff] %vm487_vm0, %v14679_v22 }
 0xd9c   : > { %14720 = vst.msk [vmem:[%s23105_s10 + $0xe0] sm:$0xff] %vm487_vm0, %v14674_v10  ;;  %v17062_v28 = vpop.f32.mrb[174].mxu0 }
 0xd9d   : > { %v14689_v59 = vadd.f32 %v17062_v28, %v23100_v2  ;;  %v14683_v12 = vpop.f32.mrb[175].mxu0 }
 0xd9e   : > { %v14684_v41 = vadd.f32 %v23100_v2, %v14683_v12 }
 0xd9f   : > { %14723 = vst.msk [vmem:[%s23105_s10 + $0xf8] sm:$0xff] %vm487_vm0, %v14689_v59 }
 0xda0   : > { %14722 = vst.msk [vmem:[%s23105_s10 + $0xf0] sm:$0xff] %vm487_vm0, %v14684_v41 }
 0xda1   : > { %19055 = shalt.err (!%p19052_p3)
}
 0xda2   : > { %s19056_s25 = scalar_lea.hbm %s23201_s16, 4096  ;;  %s19060_s17 = scalar_lea.hbm %s23261_s8, 8192 }
 0xda3   : > { %p19057_p9 = scmp.ne.s32.totalorder %s23201_s16, %s19056_s25  ;;  %p19061_p7 = scmp.lt.u32.totalorder %s23201_s16, %s23261_s8 }
 0xda4   : > { %p19062_p12 = scmp.lt.u32.totalorder %s19060_s17, %s19056_s25  ;;  %p19064_p2 = scmp.lt.u32.totalorder %s19056_s25, %s23201_s16 }
 0xda5   : > { %p19058_p13 = pnand %p19057_p9, %p19340_p5 }
 0xda6   : > { %p19063_p1 = por %p19062_p12, %p19061_p7 }
 0xda7   : > { %p19059_p11 = pneg %p19058_p13 }
 0xda8   : > { %p19065_p4 = por %p19064_p2, %p19063_p1 }
 0xdaa   : > { %p19066_p0 = pnand %p19065_p4, %p19059_p11 }
 0xdac   : > { %19069 = shalt.err (!%p19066_p0)
}
 0xdad   : > { %s19140_s19 = smov 128  }
 0xdae   : > { %17747 = dma.vmem_to_hbm [thread:$0]  (%p19340_p5), %s23204_s2, 4096, %s23201_s16, %s14725_s9, %s19140_s19, %s19140_s19, %s19136_s18  }
 0xdaf PF: > { %s23929_s13 = sld [smem:[#allocation17_spill]]  ;;  %s23930_s10 = sld [smem:[#allocation18_spill]] }
 0xdb0   : > { %p23932_p6 = scmp.ge.s32.totalorder %s19120_s30, 2 }
 0xdb5   : > { %s14754_s14 = sand.u32 1, %s23929_s13   ;;  %p23931_p8 = scmp.ne.s32.totalorder %s23930_s10, 0 }
 0xdb6   : > { %s14755_s11 = scalar_lea.sflag [#allocation4], %s14754_s14 }
 0xdb7   : > { %p17767_p10 = pnand %p23932_p6, %p23931_p8 }
 0xdb9   : > { %19103 = dma.done.wait (!%p17767_p10), %s14755_s11, 4096  }
 0xdba   : > { %19105 = vsyncadd (!%p17767_p10), %s14755_s11, 4294963200  ;;  %s23933_s23 = sld [smem:[#allocation19_spill]]  ;;  %p25_p3 = scmp.ge.s32.totalorder %s19326_s26, 4  }
 0xdbb   : > { %s23934_s27 = smov %s19112_s28  ;;  %s23935_s28 = smov %s19116_s29 }
 0xdbc   : > { %s23937_s30 = smov %s19326_s26  ;;  %27 = sbr.rel (!%p25_p3) target bundleno = 13 (0xd), region = 122 }
 0xdc0   : > { %s23936_s29 = smov %s23933_s23 }
 0xdc3   :  { %14760 = vsyncpa [#allocation3], 1 }
 0xdc4   :  { %14762 = vsyncpa [#allocation3 + $0x1], 1 }
 0xdc5   :  { %14763 = vsyncpa [#allocation6], 1 }
 0xdc6   :  { %14765 = vsyncpa [#allocation6 + $0x1], 1 }
 0xdc7   :  { %14766 = vsyncpa [#allocation9], 1 }
 0xdc8   :  { %14767 = vsyncpa [#allocation4], 1 }
 0xdc9   :  { %14769 = vsyncpa [#allocation4 + $0x1], 1 }

</bundles_post_ra>
